<compile_context>
chip_gen: v7x
topology: tpu7x:2x2x1
jax: 0.10.0
libtpu: 0.0.40
codegen_flags: <defaults>
</compile_context>

<pallas_src>
import jax
import jax.numpy as jnp
from jax import lax
from jax.experimental import pallas as pl
from jax.experimental.pallas import tpu as pltpu

D_MODEL = 192          # embed_dim_slide == embed_dim_region == dim_feedforward
EMBED_DIM = 192
N_HEADS = 3            # nhead=3 -> head_dim = 64
HEAD_DIM = D_MODEL // N_HEADS
HEAD_PAD = 128         # head dim zero-padded to one full lane group
N_LAYERS = 2
NUM_CLASSES = 2
LN_EPS = 1e-5
Q_TILE = 256           # query-tile size for the blocked attention

# --- row layout of the packed small-parameter slab ([N_SMALL_ROWS, D_MODEL] f32) ---
R_PHI_B = 0
R_LAYER0 = 1
R_PER_LAYER = 7        # out_b, ln1_g, ln1_b, ff1_b, ff2_b, ln2_g, ln2_b
R_ATTA_B = R_LAYER0 + R_PER_LAYER * N_LAYERS   # 15
R_ATTB_B = R_ATTA_B + 1                        # 16
R_ATTC_W = R_ATTB_B + 1                        # 17: gated-pool scoring weight row
R_TAIL_B = R_ATTC_W + 1                        # 18: lane0 = attc bias, lanes 1:1+nc = cls bias
R_CLS_W = R_TAIL_B + 1                         # 19: classifier weight rows (nc rows)
R_RHO_B = R_CLS_W + NUM_CLASSES                # 21
N_SMALL_ROWS = R_RHO_B + 1                     # 22


def _mat_slots(n_layers):
    """Slot layout of the packed [*, D, D] bf16 matrix slab."""
    phi = 0
    ff1 = [1 + 2 * l for l in range(n_layers)]
    ff2 = [2 + 2 * l for l in range(n_layers)]
    rho = 1 + 2 * n_layers
    gate_a, gate_b = rho + 1, rho + 2
    return phi, ff1, ff2, rho, gate_a, gate_b


# ---------------------------------------------------------------------------
# Shared math: runs on plain jnp arrays, used both inside the kernel (after the
# refs are loaded) and as the pure-JAX reference.
# ---------------------------------------------------------------------------
def _hipt_math(x, mats, qkv_w, out_w, qkv_b, small, *, approx_recip):
    f32, bf16 = jnp.float32, jnp.bfloat16
    D, H, HP = D_MODEL, N_HEADS, HEAD_PAD
    n_layers = qkv_w.shape[0]
    M = x.shape[0]
    nc = small.shape[0] - R_CLS_W - 1
    mat_phi, mat_ff1, mat_ff2, mat_rho, mat_ga, mat_gb = _mat_slots(n_layers)

    def recip(v):
        return pl.reciprocal(v, approx=True) if approx_recip else 1.0 / v

    def mm(a_bf, w_bf):
        # bf16 MXU inputs, f32 accumulation
        return jnp.dot(a_bf, w_bf, preferred_element_type=f32)

    def layernorm(h, g, b):
        mu = jnp.mean(h, axis=-1, keepdims=True)
        var = jnp.mean((h - mu) ** 2, axis=-1, keepdims=True)
        return (h - mu) * lax.rsqrt(var + LN_EPS) * g + b

    # global_phi: Linear + ReLU (+ Dropout -> identity in eval)
    h = jnp.maximum(mm(x.astype(bf16), mats[mat_phi]) + small[R_PHI_B], 0.0)

    scale = 1.0 / float(HEAD_DIM) ** 0.5          # PyTorch scales q by 1/sqrt(head_dim)

    # global_transformer: 2 post-norm TransformerEncoderLayers (relu FFN, no mask)
    for l in range(n_layers):
        base = R_LAYER0 + R_PER_LAYER * l
        h_bf = h.astype(bf16)                     # one bf16 copy of h reused (v5e note)

        # fused QKV projection, head-major, 128-lane padded:
        #   columns = [q_h0|q_h1|q_h2|k_h0|k_h1|k_h2|v_h0|v_h1|v_h2], each 128 wide
        qkv = mm(h_bf, qkv_w[l])                  # [M, 3*H*128] f32

        # per-head K/V (bias added, cast once) hoisted out of the query-tile loop;
        # padded lanes of the weights/biases are zero so scores are unaffected.
        kv = []
        for hh in range(H):
            k = qkv[:, (H + hh) * HP:(H + hh + 1) * HP] + qkv_b[l, 1, hh]
            v = qkv[:, (2 * H + hh) * HP:(2 * H + hh + 1) * HP] + qkv_b[l, 2, hh]
            kv.append((k.astype(bf16), v.astype(bf16)))

        # Query-tiled attention: one head's [tq, M] score buffer live at a time;
        # head outputs folded straight into the out-projection accumulation.
        # TODO(synk): for M >> Q_TILE also block the KV axis (online softmax) and add
        #             padding masks; expose the query tiles as a "parallel" grid axis.
        tiles = []
        for qs in range(0, M, Q_TILE):
            qe = min(qs + Q_TILE, M)
            acc = None
            for hh in range(H):
                q = (qkv[qs:qe, hh * HP:(hh + 1) * HP] + qkv_b[l, 0, hh]) * scale
                k_bf, v_bf = kv[hh]
                s = lax.dot_general(q.astype(bf16), k_bf,
                                    (((1,), (1,)), ((), ())),
                                    preferred_element_type=f32)        # [tq, M]
                s_max = jnp.max(s, axis=-1, keepdims=True)
                e = jnp.exp(s - s_max)
                p = e * recip(jnp.sum(e, axis=-1, keepdims=True))
                o = mm(p.astype(bf16), v_bf)                           # [tq, 128]
                c = mm(o.astype(bf16), out_w[l, hh])                   # [tq, D]
                acc = c if acc is None else acc + c
            tiles.append(acc)
        attn = tiles[0] if len(tiles) == 1 else jnp.concatenate(tiles, axis=0)
        attn = attn + small[base + 0]                                  # out_proj bias

        h = layernorm(h + attn, small[base + 1], small[base + 2])
        h_bf = h.astype(bf16)
        ff = jnp.maximum(mm(h_bf, mats[mat_ff1[l]]) + small[base + 3], 0.0)
        ff = mm(ff.astype(bf16), mats[mat_ff2[l]]) + small[base + 4]
        h = layernorm(h + ff, small[base + 5], small[base + 6])

    # Attn_Net_Gated pooling: lane-dense [1, M] logits, MXU contraction over tokens.
    h_bf = h.astype(bf16)
    a = jnp.tanh(mm(h_bf, mats[mat_ga]) + small[R_ATTA_B])
    b = jax.nn.sigmoid(mm(h_bf, mats[mat_gb]) + small[R_ATTB_B])
    ab = a * b                                                         # [M, D] f32

    attc_w = small[R_ATTC_W:R_ATTC_W + 1, :]                           # [1, D]
    att = lax.dot_general(attc_w, ab, (((1,), (1,)), ((), ())),
                          preferred_element_type=f32)                  # [1, M]
    att = att + small[R_TAIL_B:R_TAIL_B + 1, 0:1]
    att_max = jnp.max(att, axis=-1, keepdims=True)
    e = jnp.exp(att - att_max)                                         # [1, M]
    denom = jnp.sum(e, axis=-1, keepdims=True)                         # [1, 1]
    # softmax(att) @ h as one MXU matmul contracting the token axis (exact recip, runs once)
    x_att = jnp.dot(e, h, preferred_element_type=f32) * (1.0 / denom)  # [1, D]

    # global_rho + classifier
    x_wsi = jnp.maximum(mm(x_att.astype(bf16), mats[mat_rho]) + small[R_RHO_B], 0.0)
    cls_w = small[R_CLS_W:R_CLS_W + nc, :]                             # [nc, D]
    logits = lax.dot_general(x_wsi, cls_w, (((1,), (1,)), ((), ())),
                             preferred_element_type=f32)               # [1, nc]
    logits = logits + small[R_TAIL_B:R_TAIL_B + 1, 1:1 + nc]
    return logits


# ---------------------------------------------------------------------------
# Pallas kernel: single invocation, everything resident in VMEM.
# ---------------------------------------------------------------------------
def _hipt_kernel(x_ref, mats_ref, qkvw_ref, outw_ref, qkvb_ref, small_ref, o_ref):
    logits = _hipt_math(
        x_ref[...], mats_ref[...], qkvw_ref[...], outw_ref[...],
        qkvb_ref[...], small_ref[...], approx_recip=True)
    o_ref[...] = logits.astype(o_ref.dtype)


@jax.jit
def local_global_hipt_forward(x, params):
    """x: [M, EMBED_DIM] region-token embeddings (output of the frozen vit_region)."""
    mats, qkv_w, out_w, qkv_b, small = params
    num_classes = small.shape[0] - R_CLS_W - 1
    args = (x.astype(jnp.bfloat16), mats, qkv_w, out_w, qkv_b, small)   # bf16 x: halves the O(M) DMA
    vmem = pltpu.MemorySpace.VMEM
    return pl.pallas_call(
        _hipt_kernel,
        out_shape=jax.ShapeDtypeStruct((1, num_classes), jnp.float32),
        in_specs=[pl.BlockSpec(memory_space=vmem)] * len(args),
        out_specs=pl.BlockSpec(memory_space=vmem),
        compiler_params=pltpu.CompilerParams(vmem_limit_bytes=16 * 1024 * 1024),
    )(*args)


# ---------------------------------------------------------------------------
# Deterministic synthetic parameters (PyTorch-style [in, out] layout), packed
# into the padded / fused layouts the kernel consumes.
# ---------------------------------------------------------------------------
def make_params(key, embed_dim=EMBED_DIM, d_model=D_MODEL,
                num_classes=NUM_CLASSES, n_layers=N_LAYERS):
    ks = iter(jax.random.split(key, 128))
    D, H, hd, HP = d_model, N_HEADS, HEAD_DIM, HEAD_PAD

    def rnd(shape, scale=0.05):
        return scale * jax.random.normal(next(ks), shape, dtype=jnp.float32)

    def gamma():
        return (1.0 + 0.1 * jax.random.normal(next(ks), (D,))).astype(jnp.float32)

    def beta():
        return (0.1 * jax.random.normal(next(ks), (D,))).astype(jnp.float32)

    # ---- raw weights in right-multiply ([in, out]) layout ----
    phi_w, phi_b = rnd((embed_dim, D)), rnd((D,))
    layers = []
    for _ in range(n_layers):
        layers.append(dict(
            wq=rnd((D, D)), wk=rnd((D, D)), wv=rnd((D, D)),
            bq=rnd((D,)), bk=rnd((D,)), bv=rnd((D,)),
            wo=rnd((D, D)), bo=rnd((D,)),
            ln1_g=gamma(), ln1_b=beta(),
            w1=rnd((D, D)), b1=rnd((D,)), w2=rnd((D, D)), b2=rnd((D,)),
            ln2_g=gamma(), ln2_b=beta()))
    gate_a_w, gate_a_b = rnd((D, D)), rnd((D,))
    gate_b_w, gate_b_b = rnd((D, D)), rnd((D,))
    attc_w, attc_b = rnd((D, 1)), rnd((1,))
    rho_w, rho_b = rnd((D, D)), rnd((D,))
    cls_w, cls_b = rnd((D, num_classes)), rnd((num_classes,))

    # ---- pack into padded, head-major, lane-aligned layouts ----
    def pad_head_cols(w):     # [D, D] -> [D, H*HP], head-major, head dim zero-padded
        blocks = [jnp.pad(w[:, h * hd:(h + 1) * hd], ((0, 0), (0, HP - hd)))
                  for h in range(H)]
        return jnp.concatenate(blocks, axis=1)

    def pad_head_bias(b):     # [D] -> [H, HP], zero-padded lanes
        return jnp.stack([jnp.pad(b[h * hd:(h + 1) * hd], (0, HP - hd))
                          for h in range(H)])

    qkv_w = jnp.stack([jnp.concatenate([pad_head_cols(lw['wq']),
                                        pad_head_cols(lw['wk']),
                                        pad_head_cols(lw['wv'])], axis=1)
                       for lw in layers])                              # [L, D, 3*H*HP]
    out_w = jnp.stack([jnp.stack([jnp.pad(lw['wo'][h * hd:(h + 1) * hd, :],
                                          ((0, HP - hd), (0, 0)))
                                  for h in range(H)])
                       for lw in layers])                              # [L, H, HP, D]
    qkv_b = jnp.stack([jnp.stack([pad_head_bias(lw['bq']),
                                  pad_head_bias(lw['bk']),
                                  pad_head_bias(lw['bv'])])
                       for lw in layers])                              # [L, 3, H, HP] f32

    mats = jnp.stack([phi_w]
                     + sum([[lw['w1'], lw['w2']] for lw in layers], [])
                     + [rho_w, gate_a_w, gate_b_w])                    # [2+2L+2... = 8, D, D]

    rows = [phi_b]
    for lw in layers:
        rows += [lw['bo'], lw['ln1_g'], lw['ln1_b'],
                 lw['b1'], lw['b2'], lw['ln2_g'], lw['ln2_b']]
    rows += [gate_a_b, gate_b_b, attc_w[:, 0]]
    tail_row = jnp.zeros((D,), jnp.float32)
    tail_row = tail_row.at[0:1].set(attc_b).at[1:1 + num_classes].set(cls_b)
    rows += [tail_row]
    rows += [cls_w[:, c] for c in range(num_classes)]
    rows += [rho_b]
    small = jnp.stack(rows).astype(jnp.float32)                        # [22, D]
    assert small.shape == (N_SMALL_ROWS, D)

    return (mats.astype(jnp.bfloat16), qkv_w.astype(jnp.bfloat16),
            out_w.astype(jnp.bfloat16), qkv_b.astype(jnp.float32), small)


if __name__ == "__main__":
    key = jax.random.PRNGKey(0)
    k_x, k_p = jax.random.split(key, 2)

    M = 64  # number of region tokens (sequence length) — small test shape
    x = jax.random.normal(k_x, (M, EMBED_DIM), dtype=jnp.float32)
    params = make_params(k_p)

    logits = jax.block_until_ready(local_global_hipt_forward(x, params))

    # pure-JAX reference (identical math, exact reciprocals)
    ref = _hipt_math(x, *params, approx_recip=False)
    assert logits.shape == (1, NUM_CLASSES), logits.shape
    assert jnp.allclose(logits, ref, atol=1e-2, rtol=1e-2), (
        f"mismatch: {logits} vs {ref}")

    print("KERNEL_OK")
</pallas_src>

<mosaic_0001>
module attributes {stable_mosaic.version = 11 : i64} {
  func.func @_hipt_kernel(%arg0: memref<64x192xbf16, #tpu.memory_space<vmem>>, %arg1: memref<8x192x192xbf16, #tpu.memory_space<vmem>>, %arg2: memref<2x192x1152xbf16, #tpu.memory_space<vmem>>, %arg3: memref<2x3x128x192xbf16, #tpu.memory_space<vmem>>, %arg4: memref<2x3x3x128xf32, #tpu.memory_space<vmem>>, %arg5: memref<22x192xf32, #tpu.memory_space<vmem>>, %arg6: memref<1x2xf32, #tpu.memory_space<vmem>>) attributes {dimension_semantics = [], scalar_prefetch = 0 : i64, scratch_operands = 0 : i64, tpu.core_type = #tpu.core_type<tc>} {
    %c0 = arith.constant 0 : index
    %c0_0 = arith.constant 0 : index
    %0 = vector.load %arg0[%c0, %c0_0] : memref<64x192xbf16, #tpu.memory_space<vmem>>, vector<64x192xbf16>
    %c0_1 = arith.constant 0 : index
    %c0_2 = arith.constant 0 : index
    %c0_3 = arith.constant 0 : index
    %1 = vector.load %arg1[%c0_1, %c0_2, %c0_3] : memref<8x192x192xbf16, #tpu.memory_space<vmem>>, vector<8x192x192xbf16>
    %c0_4 = arith.constant 0 : index
    %c0_5 = arith.constant 0 : index
    %c0_6 = arith.constant 0 : index
    %2 = vector.load %arg2[%c0_4, %c0_5, %c0_6] : memref<2x192x1152xbf16, #tpu.memory_space<vmem>>, vector<2x192x1152xbf16>
    %c0_7 = arith.constant 0 : index
    %c0_8 = arith.constant 0 : index
    %c0_9 = arith.constant 0 : index
    %c0_10 = arith.constant 0 : index
    %3 = vector.load %arg3[%c0_7, %c0_8, %c0_9, %c0_10] : memref<2x3x128x192xbf16, #tpu.memory_space<vmem>>, vector<2x3x128x192xbf16>
    %c0_11 = arith.constant 0 : index
    %c0_12 = arith.constant 0 : index
    %c0_13 = arith.constant 0 : index
    %c0_14 = arith.constant 0 : index
    %4 = vector.load %arg4[%c0_11, %c0_12, %c0_13, %c0_14] : memref<2x3x3x128xf32, #tpu.memory_space<vmem>>, vector<2x3x3x128xf32>
    %c0_15 = arith.constant 0 : index
    %c0_16 = arith.constant 0 : index
    %5 = vector.load %arg5[%c0_15, %c0_16] : memref<22x192xf32, #tpu.memory_space<vmem>>, vector<22x192xf32>
    %6 = vector.extract_strided_slice %1 {offsets = [0, 0, 0], sizes = [1, 192, 192], strides = [1, 1, 1]} : vector<8x192x192xbf16> to vector<1x192x192xbf16>
    %7 = vector.shape_cast %6 : vector<1x192x192xbf16> to vector<192x192xbf16>
    %cst = arith.constant dense<0.000000e+00> : vector<64x192xf32>
    %8 = tpu.matmul %0, %7, %cst {dimension_numbers = #tpu.dot_dimension_numbers<[1], [0], [0], [1], [0, 0, 1, 1], [], []>} : vector<64x192xbf16>, vector<192x192xbf16>, vector<64x192xf32> -> vector<64x192xf32>
    %9 = vector.extract_strided_slice %5 {offsets = [0, 0], sizes = [1, 192], strides = [1, 1]} : vector<22x192xf32> to vector<1x192xf32>
    %10 = vector.shape_cast %9 : vector<1x192xf32> to vector<192xf32>
    %11 = vector.shape_cast %10 : vector<192xf32> to vector<1x192xf32>
    %12 = vector.broadcast %11 : vector<1x192xf32> to vector<64x192xf32>
    %13 = arith.addf %8, %12 : vector<64x192xf32>
    %cst_17 = arith.constant 0.000000e+00 : f32
    %14 = vector.broadcast %cst_17 : f32 to vector<64x192xf32>
    %15 = arith.maximumf %13, %14 : vector<64x192xf32>
    %16 = arith.truncf %15 : vector<64x192xf32> to vector<64x192xbf16>
    %17 = vector.extract_strided_slice %2 {offsets = [0, 0, 0], sizes = [1, 192, 1152], strides = [1, 1, 1]} : vector<2x192x1152xbf16> to vector<1x192x1152xbf16>
    %18 = vector.shape_cast %17 : vector<1x192x1152xbf16> to vector<192x1152xbf16>
    %cst_18 = arith.constant dense<0.000000e+00> : vector<64x1152xf32>
    %19 = tpu.matmul %16, %18, %cst_18 {dimension_numbers = #tpu.dot_dimension_numbers<[1], [0], [0], [1], [0, 0, 1, 1], [], []>} : vector<64x192xbf16>, vector<192x1152xbf16>, vector<64x1152xf32> -> vector<64x1152xf32>
    %20 = vector.extract_strided_slice %19 {offsets = [0, 384], sizes = [64, 128], strides = [1, 1]} : vector<64x1152xf32> to vector<64x128xf32>
    %21 = vector.extract_strided_slice %4 {offsets = [0, 1, 0, 0], sizes = [1, 1, 1, 128], strides = [1, 1, 1, 1]} : vector<2x3x3x128xf32> to vector<1x1x1x128xf32>
    %22 = vector.shape_cast %21 : vector<1x1x1x128xf32> to vector<128xf32>
    %23 = vector.shape_cast %22 : vector<128xf32> to vector<1x128xf32>
    %24 = vector.broadcast %23 : vector<1x128xf32> to vector<64x128xf32>
    %25 = arith.addf %20, %24 : vector<64x128xf32>
    %26 = vector.extract_strided_slice %19 {offsets = [0, 768], sizes = [64, 128], strides = [1, 1]} : vector<64x1152xf32> to vector<64x128xf32>
    %27 = vector.extract_strided_slice %4 {offsets = [0, 2, 0, 0], sizes = [1, 1, 1, 128], strides = [1, 1, 1, 1]} : vector<2x3x3x128xf32> to vector<1x1x1x128xf32>
    %28 = vector.shape_cast %27 : vector<1x1x1x128xf32> to vector<128xf32>
    %29 = vector.shape_cast %28 : vector<128xf32> to vector<1x128xf32>
    %30 = vector.broadcast %29 : vector<1x128xf32> to vector<64x128xf32>
    %31 = arith.addf %26, %30 : vector<64x128xf32>
    %32 = arith.truncf %25 : vector<64x128xf32> to vector<64x128xbf16>
    %33 = arith.truncf %31 : vector<64x128xf32> to vector<64x128xbf16>
    %34 = vector.extract_strided_slice %19 {offsets = [0, 512], sizes = [64, 128], strides = [1, 1]} : vector<64x1152xf32> to vector<64x128xf32>
    %35 = vector.extract_strided_slice %4 {offsets = [0, 1, 1, 0], sizes = [1, 1, 1, 128], strides = [1, 1, 1, 1]} : vector<2x3x3x128xf32> to vector<1x1x1x128xf32>
    %36 = vector.shape_cast %35 : vector<1x1x1x128xf32> to vector<128xf32>
    %37 = vector.shape_cast %36 : vector<128xf32> to vector<1x128xf32>
    %38 = vector.broadcast %37 : vector<1x128xf32> to vector<64x128xf32>
    %39 = arith.addf %34, %38 : vector<64x128xf32>
    %40 = vector.extract_strided_slice %19 {offsets = [0, 896], sizes = [64, 128], strides = [1, 1]} : vector<64x1152xf32> to vector<64x128xf32>
    %41 = vector.extract_strided_slice %4 {offsets = [0, 2, 1, 0], sizes = [1, 1, 1, 128], strides = [1, 1, 1, 1]} : vector<2x3x3x128xf32> to vector<1x1x1x128xf32>
    %42 = vector.shape_cast %41 : vector<1x1x1x128xf32> to vector<128xf32>
    %43 = vector.shape_cast %42 : vector<128xf32> to vector<1x128xf32>
    %44 = vector.broadcast %43 : vector<1x128xf32> to vector<64x128xf32>
    %45 = arith.addf %40, %44 : vector<64x128xf32>
    %46 = arith.truncf %39 : vector<64x128xf32> to vector<64x128xbf16>
    %47 = arith.truncf %45 : vector<64x128xf32> to vector<64x128xbf16>
    %48 = vector.extract_strided_slice %19 {offsets = [0, 640], sizes = [64, 128], strides = [1, 1]} : vector<64x1152xf32> to vector<64x128xf32>
    %49 = vector.extract_strided_slice %4 {offsets = [0, 1, 2, 0], sizes = [1, 1, 1, 128], strides = [1, 1, 1, 1]} : vector<2x3x3x128xf32> to vector<1x1x1x128xf32>
    %50 = vector.shape_cast %49 : vector<1x1x1x128xf32> to vector<128xf32>
    %51 = vector.shape_cast %50 : vector<128xf32> to vector<1x128xf32>
    %52 = vector.broadcast %51 : vector<1x128xf32> to vector<64x128xf32>
    %53 = arith.addf %48, %52 : vector<64x128xf32>
    %54 = vector.extract_strided_slice %19 {offsets = [0, 1024], sizes = [64, 128], strides = [1, 1]} : vector<64x1152xf32> to vector<64x128xf32>
    %55 = vector.extract_strided_slice %4 {offsets = [0, 2, 2, 0], sizes = [1, 1, 1, 128], strides = [1, 1, 1, 1]} : vector<2x3x3x128xf32> to vector<1x1x1x128xf32>
    %56 = vector.shape_cast %55 : vector<1x1x1x128xf32> to vector<128xf32>
    %57 = vector.shape_cast %56 : vector<128xf32> to vector<1x128xf32>
    %58 = vector.broadcast %57 : vector<1x128xf32> to vector<64x128xf32>
    %59 = arith.addf %54, %58 : vector<64x128xf32>
    %60 = arith.truncf %53 : vector<64x128xf32> to vector<64x128xbf16>
    %61 = arith.truncf %59 : vector<64x128xf32> to vector<64x128xbf16>
    %62 = vector.extract_strided_slice %19 {offsets = [0, 0], sizes = [64, 128], strides = [1, 1]} : vector<64x1152xf32> to vector<64x128xf32>
    %63 = vector.extract_strided_slice %4 {offsets = [0, 0, 0, 0], sizes = [1, 1, 1, 128], strides = [1, 1, 1, 1]} : vector<2x3x3x128xf32> to vector<1x1x1x128xf32>
    %64 = vector.shape_cast %63 : vector<1x1x1x128xf32> to vector<128xf32>
    %65 = vector.shape_cast %64 : vector<128xf32> to vector<1x128xf32>
    %66 = vector.broadcast %65 : vector<1x128xf32> to vector<64x128xf32>
    %67 = arith.addf %62, %66 : vector<64x128xf32>
    %cst_19 = arith.constant 1.250000e-01 : f32
    %68 = vector.broadcast %cst_19 : f32 to vector<64x128xf32>
    %69 = arith.mulf %67, %68 : vector<64x128xf32>
    %70 = arith.truncf %69 : vector<64x128xf32> to vector<64x128xbf16>
    %cst_20 = arith.constant dense<0.000000e+00> : vector<64x64xf32>
    %71 = tpu.matmul %70, %32, %cst_20 {dimension_numbers = #tpu.dot_dimension_numbers<[1], [1], [0], [0], [0, 0, 1, 0], [], []>} : vector<64x128xbf16>, vector<64x128xbf16>, vector<64x64xf32> -> vector<64x64xf32>
    %cst_21 = arith.constant dense<0xFF800000> : vector<64xf32>
    %72 = vector.multi_reduction <maximumf>, %71, %cst_21 [1] : vector<64x64xf32> to vector<64xf32>
    %73 = vector.shape_cast %72 : vector<64xf32> to vector<64x1xf32>
    %74 = vector.broadcast %73 : vector<64x1xf32> to vector<64x64xf32>
    %75 = arith.subf %71, %74 : vector<64x64xf32>
    %76 = math.exp %75 : vector<64x64xf32>
    %cst_22 = arith.constant dense<0.000000e+00> : vector<64xf32>
    %77 = vector.multi_reduction <add>, %76, %cst_22 [1] : vector<64x64xf32> to vector<64xf32>
    %78 = vector.shape_cast %77 : vector<64xf32> to vector<64x1xf32>
    %79 = tpu.reciprocal %78 {approx = true} : vector<64x1xf32> -> vector<64x1xf32>
    %80 = vector.broadcast %79 : vector<64x1xf32> to vector<64x64xf32>
    %81 = arith.mulf %76, %80 : vector<64x64xf32>
    %82 = arith.truncf %81 : vector<64x64xf32> to vector<64x64xbf16>
    %cst_23 = arith.constant dense<0.000000e+00> : vector<64x128xf32>
    %83 = tpu.matmul %82, %33, %cst_23 {dimension_numbers = #tpu.dot_dimension_numbers<[1], [0], [0], [1], [0, 0, 1, 1], [], []>} : vector<64x64xbf16>, vector<64x128xbf16>, vector<64x128xf32> -> vector<64x128xf32>
    %84 = arith.truncf %83 : vector<64x128xf32> to vector<64x128xbf16>
    %85 = vector.extract_strided_slice %3 {offsets = [0, 0, 0, 0], sizes = [1, 1, 128, 192], strides = [1, 1, 1, 1]} : vector<2x3x128x192xbf16> to vector<1x1x128x192xbf16>
    %86 = vector.shape_cast %85 : vector<1x1x128x192xbf16> to vector<128x192xbf16>
    %cst_24 = arith.constant dense<0.000000e+00> : vector<64x192xf32>
    %87 = tpu.matmul %84, %86, %cst_24 {dimension_numbers = #tpu.dot_dimension_numbers<[1], [0], [0], [1], [0, 0, 1, 1], [], []>} : vector<64x128xbf16>, vector<128x192xbf16>, vector<64x192xf32> -> vector<64x192xf32>
    %88 = vector.extract_strided_slice %19 {offsets = [0, 128], sizes = [64, 128], strides = [1, 1]} : vector<64x1152xf32> to vector<64x128xf32>
    %89 = vector.extract_strided_slice %4 {offsets = [0, 0, 1, 0], sizes = [1, 1, 1, 128], strides = [1, 1, 1, 1]} : vector<2x3x3x128xf32> to vector<1x1x1x128xf32>
    %90 = vector.shape_cast %89 : vector<1x1x1x128xf32> to vector<128xf32>
    %91 = vector.shape_cast %90 : vector<128xf32> to vector<1x128xf32>
    %92 = vector.broadcast %91 : vector<1x128xf32> to vector<64x128xf32>
    %93 = arith.addf %88, %92 : vector<64x128xf32>
    %cst_25 = arith.constant 1.250000e-01 : f32
    %94 = vector.broadcast %cst_25 : f32 to vector<64x128xf32>
    %95 = arith.mulf %93, %94 : vector<64x128xf32>
    %96 = arith.truncf %95 : vector<64x128xf32> to vector<64x128xbf16>
    %cst_26 = arith.constant dense<0.000000e+00> : vector<64x64xf32>
    %97 = tpu.matmul %96, %46, %cst_26 {dimension_numbers = #tpu.dot_dimension_numbers<[1], [1], [0], [0], [0, 0, 1, 0], [], []>} : vector<64x128xbf16>, vector<64x128xbf16>, vector<64x64xf32> -> vector<64x64xf32>
    %cst_27 = arith.constant dense<0xFF800000> : vector<64xf32>
    %98 = vector.multi_reduction <maximumf>, %97, %cst_27 [1] : vector<64x64xf32> to vector<64xf32>
    %99 = vector.shape_cast %98 : vector<64xf32> to vector<64x1xf32>
    %100 = vector.broadcast %99 : vector<64x1xf32> to vector<64x64xf32>
    %101 = arith.subf %97, %100 : vector<64x64xf32>
    %102 = math.exp %101 : vector<64x64xf32>
    %cst_28 = arith.constant dense<0.000000e+00> : vector<64xf32>
    %103 = vector.multi_reduction <add>, %102, %cst_28 [1] : vector<64x64xf32> to vector<64xf32>
    %104 = vector.shape_cast %103 : vector<64xf32> to vector<64x1xf32>
    %105 = tpu.reciprocal %104 {approx = true} : vector<64x1xf32> -> vector<64x1xf32>
    %106 = vector.broadcast %105 : vector<64x1xf32> to vector<64x64xf32>
    %107 = arith.mulf %102, %106 : vector<64x64xf32>
    %108 = arith.truncf %107 : vector<64x64xf32> to vector<64x64xbf16>
    %cst_29 = arith.constant dense<0.000000e+00> : vector<64x128xf32>
    %109 = tpu.matmul %108, %47, %cst_29 {dimension_numbers = #tpu.dot_dimension_numbers<[1], [0], [0], [1], [0, 0, 1, 1], [], []>} : vector<64x64xbf16>, vector<64x128xbf16>, vector<64x128xf32> -> vector<64x128xf32>
    %110 = arith.truncf %109 : vector<64x128xf32> to vector<64x128xbf16>
    %111 = vector.extract_strided_slice %3 {offsets = [0, 1, 0, 0], sizes = [1, 1, 128, 192], strides = [1, 1, 1, 1]} : vector<2x3x128x192xbf16> to vector<1x1x128x192xbf16>
    %112 = vector.shape_cast %111 : vector<1x1x128x192xbf16> to vector<128x192xbf16>
    %cst_30 = arith.constant dense<0.000000e+00> : vector<64x192xf32>
    %113 = tpu.matmul %110, %112, %cst_30 {dimension_numbers = #tpu.dot_dimension_numbers<[1], [0], [0], [1], [0, 0, 1, 1], [], []>} : vector<64x128xbf16>, vector<128x192xbf16>, vector<64x192xf32> -> vector<64x192xf32>
    %114 = arith.addf %87, %113 : vector<64x192xf32>
    %115 = vector.extract_strided_slice %19 {offsets = [0, 256], sizes = [64, 128], strides = [1, 1]} : vector<64x1152xf32> to vector<64x128xf32>
    %116 = vector.extract_strided_slice %4 {offsets = [0, 0, 2, 0], sizes = [1, 1, 1, 128], strides = [1, 1, 1, 1]} : vector<2x3x3x128xf32> to vector<1x1x1x128xf32>
    %117 = vector.shape_cast %116 : vector<1x1x1x128xf32> to vector<128xf32>
    %118 = vector.shape_cast %117 : vector<128xf32> to vector<1x128xf32>
    %119 = vector.broadcast %118 : vector<1x128xf32> to vector<64x128xf32>
    %120 = arith.addf %115, %119 : vector<64x128xf32>
    %cst_31 = arith.constant 1.250000e-01 : f32
    %121 = vector.broadcast %cst_31 : f32 to vector<64x128xf32>
    %122 = arith.mulf %120, %121 : vector<64x128xf32>
    %123 = arith.truncf %122 : vector<64x128xf32> to vector<64x128xbf16>
    %cst_32 = arith.constant dense<0.000000e+00> : vector<64x64xf32>
    %124 = tpu.matmul %123, %60, %cst_32 {dimension_numbers = #tpu.dot_dimension_numbers<[1], [1], [0], [0], [0, 0, 1, 0], [], []>} : vector<64x128xbf16>, vector<64x128xbf16>, vector<64x64xf32> -> vector<64x64xf32>
    %cst_33 = arith.constant dense<0xFF800000> : vector<64xf32>
    %125 = vector.multi_reduction <maximumf>, %124, %cst_33 [1] : vector<64x64xf32> to vector<64xf32>
    %126 = vector.shape_cast %125 : vector<64xf32> to vector<64x1xf32>
    %127 = vector.broadcast %126 : vector<64x1xf32> to vector<64x64xf32>
    %128 = arith.subf %124, %127 : vector<64x64xf32>
    %129 = math.exp %128 : vector<64x64xf32>
    %cst_34 = arith.constant dense<0.000000e+00> : vector<64xf32>
    %130 = vector.multi_reduction <add>, %129, %cst_34 [1] : vector<64x64xf32> to vector<64xf32>
    %131 = vector.shape_cast %130 : vector<64xf32> to vector<64x1xf32>
    %132 = tpu.reciprocal %131 {approx = true} : vector<64x1xf32> -> vector<64x1xf32>
    %133 = vector.broadcast %132 : vector<64x1xf32> to vector<64x64xf32>
    %134 = arith.mulf %129, %133 : vector<64x64xf32>
    %135 = arith.truncf %134 : vector<64x64xf32> to vector<64x64xbf16>
    %cst_35 = arith.constant dense<0.000000e+00> : vector<64x128xf32>
    %136 = tpu.matmul %135, %61, %cst_35 {dimension_numbers = #tpu.dot_dimension_numbers<[1], [0], [0], [1], [0, 0, 1, 1], [], []>} : vector<64x64xbf16>, vector<64x128xbf16>, vector<64x128xf32> -> vector<64x128xf32>
    %137 = arith.truncf %136 : vector<64x128xf32> to vector<64x128xbf16>
    %138 = vector.extract_strided_slice %3 {offsets = [0, 2, 0, 0], sizes = [1, 1, 128, 192], strides = [1, 1, 1, 1]} : vector<2x3x128x192xbf16> to vector<1x1x128x192xbf16>
    %139 = vector.shape_cast %138 : vector<1x1x128x192xbf16> to vector<128x192xbf16>
    %cst_36 = arith.constant dense<0.000000e+00> : vector<64x192xf32>
    %140 = tpu.matmul %137, %139, %cst_36 {dimension_numbers = #tpu.dot_dimension_numbers<[1], [0], [0], [1], [0, 0, 1, 1], [], []>} : vector<64x128xbf16>, vector<128x192xbf16>, vector<64x192xf32> -> vector<64x192xf32>
    %141 = arith.addf %114, %140 : vector<64x192xf32>
    %142 = vector.extract_strided_slice %5 {offsets = [1, 0], sizes = [1, 192], strides = [1, 1]} : vector<22x192xf32> to vector<1x192xf32>
    %143 = vector.shape_cast %142 : vector<1x192xf32> to vector<192xf32>
    %144 = vector.shape_cast %143 : vector<192xf32> to vector<1x192xf32>
    %145 = vector.broadcast %144 : vector<1x192xf32> to vector<64x192xf32>
    %146 = arith.addf %141, %145 : vector<64x192xf32>
    %147 = arith.addf %15, %146 : vector<64x192xf32>
    %148 = vector.extract_strided_slice %5 {offsets = [2, 0], sizes = [1, 192], strides = [1, 1]} : vector<22x192xf32> to vector<1x192xf32>
    %149 = vector.shape_cast %148 : vector<1x192xf32> to vector<192xf32>
    %150 = vector.extract_strided_slice %5 {offsets = [3, 0], sizes = [1, 192], strides = [1, 1]} : vector<22x192xf32> to vector<1x192xf32>
    %151 = vector.shape_cast %150 : vector<1x192xf32> to vector<192xf32>
    %cst_37 = arith.constant dense<0.000000e+00> : vector<64xf32>
    %152 = vector.multi_reduction <add>, %147, %cst_37 [1] : vector<64x192xf32> to vector<64xf32>
    %153 = vector.shape_cast %152 : vector<64xf32> to vector<64x1xf32>
    %cst_38 = arith.constant 1.920000e+02 : f32
    %154 = vector.broadcast %cst_38 : f32 to vector<64x1xf32>
    %155 = arith.divf %153, %154 : vector<64x1xf32>
    %156 = vector.broadcast %155 : vector<64x1xf32> to vector<64x192xf32>
    %157 = arith.subf %147, %156 : vector<64x192xf32>
    %158 = arith.mulf %157, %157 : vector<64x192xf32>
    %cst_39 = arith.constant dense<0.000000e+00> : vector<64xf32>
    %159 = vector.multi_reduction <add>, %158, %cst_39 [1] : vector<64x192xf32> to vector<64xf32>
    %160 = vector.shape_cast %159 : vector<64xf32> to vector<64x1xf32>
    %cst_40 = arith.constant 1.920000e+02 : f32
    %161 = vector.broadcast %cst_40 : f32 to vector<64x1xf32>
    %162 = arith.divf %160, %161 : vector<64x1xf32>
    %163 = vector.broadcast %155 : vector<64x1xf32> to vector<64x192xf32>
    %164 = arith.subf %147, %163 : vector<64x192xf32>
    %cst_41 = arith.constant 9.99999974E-6 : f32
    %165 = vector.broadcast %cst_41 : f32 to vector<64x1xf32>
    %166 = arith.addf %162, %165 : vector<64x1xf32>
    %167 = math.rsqrt %166 : vector<64x1xf32>
    %168 = vector.broadcast %167 : vector<64x1xf32> to vector<64x192xf32>
    %169 = arith.mulf %164, %168 : vector<64x192xf32>
    %170 = vector.shape_cast %149 : vector<192xf32> to vector<1x192xf32>
    %171 = vector.broadcast %170 : vector<1x192xf32> to vector<64x192xf32>
    %172 = arith.mulf %169, %171 : vector<64x192xf32>
    %173 = vector.shape_cast %151 : vector<192xf32> to vector<1x192xf32>
    %174 = vector.broadcast %173 : vector<1x192xf32> to vector<64x192xf32>
    %175 = arith.addf %172, %174 : vector<64x192xf32>
    %176 = arith.truncf %175 : vector<64x192xf32> to vector<64x192xbf16>
    %177 = vector.extract_strided_slice %1 {offsets = [1, 0, 0], sizes = [1, 192, 192], strides = [1, 1, 1]} : vector<8x192x192xbf16> to vector<1x192x192xbf16>
    %178 = vector.shape_cast %177 : vector<1x192x192xbf16> to vector<192x192xbf16>
    %cst_42 = arith.constant dense<0.000000e+00> : vector<64x192xf32>
    %179 = tpu.matmul %176, %178, %cst_42 {dimension_numbers = #tpu.dot_dimension_numbers<[1], [0], [0], [1], [0, 0, 1, 1], [], []>} : vector<64x192xbf16>, vector<192x192xbf16>, vector<64x192xf32> -> vector<64x192xf32>
    %180 = vector.extract_strided_slice %5 {offsets = [4, 0], sizes = [1, 192], strides = [1, 1]} : vector<22x192xf32> to vector<1x192xf32>
    %181 = vector.shape_cast %180 : vector<1x192xf32> to vector<192xf32>
    %182 = vector.shape_cast %181 : vector<192xf32> to vector<1x192xf32>
    %183 = vector.broadcast %182 : vector<1x192xf32> to vector<64x192xf32>
    %184 = arith.addf %179, %183 : vector<64x192xf32>
    %cst_43 = arith.constant 0.000000e+00 : f32
    %185 = vector.broadcast %cst_43 : f32 to vector<64x192xf32>
    %186 = arith.maximumf %184, %185 : vector<64x192xf32>
    %187 = arith.truncf %186 : vector<64x192xf32> to vector<64x192xbf16>
    %188 = vector.extract_strided_slice %1 {offsets = [2, 0, 0], sizes = [1, 192, 192], strides = [1, 1, 1]} : vector<8x192x192xbf16> to vector<1x192x192xbf16>
    %189 = vector.shape_cast %188 : vector<1x192x192xbf16> to vector<192x192xbf16>
    %cst_44 = arith.constant dense<0.000000e+00> : vector<64x192xf32>
    %190 = tpu.matmul %187, %189, %cst_44 {dimension_numbers = #tpu.dot_dimension_numbers<[1], [0], [0], [1], [0, 0, 1, 1], [], []>} : vector<64x192xbf16>, vector<192x192xbf16>, vector<64x192xf32> -> vector<64x192xf32>
    %191 = vector.extract_strided_slice %5 {offsets = [5, 0], sizes = [1, 192], strides = [1, 1]} : vector<22x192xf32> to vector<1x192xf32>
    %192 = vector.shape_cast %191 : vector<1x192xf32> to vector<192xf32>
    %193 = vector.shape_cast %192 : vector<192xf32> to vector<1x192xf32>
    %194 = vector.broadcast %193 : vector<1x192xf32> to vector<64x192xf32>
    %195 = arith.addf %190, %194 : vector<64x192xf32>
    %196 = arith.addf %175, %195 : vector<64x192xf32>
    %197 = vector.extract_strided_slice %5 {offsets = [6, 0], sizes = [1, 192], strides = [1, 1]} : vector<22x192xf32> to vector<1x192xf32>
    %198 = vector.shape_cast %197 : vector<1x192xf32> to vector<192xf32>
    %199 = vector.extract_strided_slice %5 {offsets = [7, 0], sizes = [1, 192], strides = [1, 1]} : vector<22x192xf32> to vector<1x192xf32>
    %200 = vector.shape_cast %199 : vector<1x192xf32> to vector<192xf32>
    %cst_45 = arith.constant dense<0.000000e+00> : vector<64xf32>
    %201 = vector.multi_reduction <add>, %196, %cst_45 [1] : vector<64x192xf32> to vector<64xf32>
    %202 = vector.shape_cast %201 : vector<64xf32> to vector<64x1xf32>
    %cst_46 = arith.constant 1.920000e+02 : f32
    %203 = vector.broadcast %cst_46 : f32 to vector<64x1xf32>
    %204 = arith.divf %202, %203 : vector<64x1xf32>
    %205 = vector.broadcast %204 : vector<64x1xf32> to vector<64x192xf32>
    %206 = arith.subf %196, %205 : vector<64x192xf32>
    %207 = arith.mulf %206, %206 : vector<64x192xf32>
    %cst_47 = arith.constant dense<0.000000e+00> : vector<64xf32>
    %208 = vector.multi_reduction <add>, %207, %cst_47 [1] : vector<64x192xf32> to vector<64xf32>
    %209 = vector.shape_cast %208 : vector<64xf32> to vector<64x1xf32>
    %cst_48 = arith.constant 1.920000e+02 : f32
    %210 = vector.broadcast %cst_48 : f32 to vector<64x1xf32>
    %211 = arith.divf %209, %210 : vector<64x1xf32>
    %212 = vector.broadcast %204 : vector<64x1xf32> to vector<64x192xf32>
    %213 = arith.subf %196, %212 : vector<64x192xf32>
    %cst_49 = arith.constant 9.99999974E-6 : f32
    %214 = vector.broadcast %cst_49 : f32 to vector<64x1xf32>
    %215 = arith.addf %211, %214 : vector<64x1xf32>
    %216 = math.rsqrt %215 : vector<64x1xf32>
    %217 = vector.broadcast %216 : vector<64x1xf32> to vector<64x192xf32>
    %218 = arith.mulf %213, %217 : vector<64x192xf32>
    %219 = vector.shape_cast %198 : vector<192xf32> to vector<1x192xf32>
    %220 = vector.broadcast %219 : vector<1x192xf32> to vector<64x192xf32>
    %221 = arith.mulf %218, %220 : vector<64x192xf32>
    %222 = vector.shape_cast %200 : vector<192xf32> to vector<1x192xf32>
    %223 = vector.broadcast %222 : vector<1x192xf32> to vector<64x192xf32>
    %224 = arith.addf %221, %223 : vector<64x192xf32>
    %225 = arith.truncf %224 : vector<64x192xf32> to vector<64x192xbf16>
    %226 = vector.extract_strided_slice %2 {offsets = [1, 0, 0], sizes = [1, 192, 1152], strides = [1, 1, 1]} : vector<2x192x1152xbf16> to vector<1x192x1152xbf16>
    %227 = vector.shape_cast %226 : vector<1x192x1152xbf16> to vector<192x1152xbf16>
    %cst_50 = arith.constant dense<0.000000e+00> : vector<64x1152xf32>
    %228 = tpu.matmul %225, %227, %cst_50 {dimension_numbers = #tpu.dot_dimension_numbers<[1], [0], [0], [1], [0, 0, 1, 1], [], []>} : vector<64x192xbf16>, vector<192x1152xbf16>, vector<64x1152xf32> -> vector<64x1152xf32>
    %229 = vector.extract_strided_slice %228 {offsets = [0, 384], sizes = [64, 128], strides = [1, 1]} : vector<64x1152xf32> to vector<64x128xf32>
    %230 = vector.extract_strided_slice %4 {offsets = [1, 1, 0, 0], sizes = [1, 1, 1, 128], strides = [1, 1, 1, 1]} : vector<2x3x3x128xf32> to vector<1x1x1x128xf32>
    %231 = vector.shape_cast %230 : vector<1x1x1x128xf32> to vector<128xf32>
    %232 = vector.shape_cast %231 : vector<128xf32> to vector<1x128xf32>
    %233 = vector.broadcast %232 : vector<1x128xf32> to vector<64x128xf32>
    %234 = arith.addf %229, %233 : vector<64x128xf32>
    %235 = vector.extract_strided_slice %228 {offsets = [0, 768], sizes = [64, 128], strides = [1, 1]} : vector<64x1152xf32> to vector<64x128xf32>
    %236 = vector.extract_strided_slice %4 {offsets = [1, 2, 0, 0], sizes = [1, 1, 1, 128], strides = [1, 1, 1, 1]} : vector<2x3x3x128xf32> to vector<1x1x1x128xf32>
    %237 = vector.shape_cast %236 : vector<1x1x1x128xf32> to vector<128xf32>
    %238 = vector.shape_cast %237 : vector<128xf32> to vector<1x128xf32>
    %239 = vector.broadcast %238 : vector<1x128xf32> to vector<64x128xf32>
    %240 = arith.addf %235, %239 : vector<64x128xf32>
    %241 = arith.truncf %234 : vector<64x128xf32> to vector<64x128xbf16>
    %242 = arith.truncf %240 : vector<64x128xf32> to vector<64x128xbf16>
    %243 = vector.extract_strided_slice %228 {offsets = [0, 512], sizes = [64, 128], strides = [1, 1]} : vector<64x1152xf32> to vector<64x128xf32>
    %244 = vector.extract_strided_slice %4 {offsets = [1, 1, 1, 0], sizes = [1, 1, 1, 128], strides = [1, 1, 1, 1]} : vector<2x3x3x128xf32> to vector<1x1x1x128xf32>
    %245 = vector.shape_cast %244 : vector<1x1x1x128xf32> to vector<128xf32>
    %246 = vector.shape_cast %245 : vector<128xf32> to vector<1x128xf32>
    %247 = vector.broadcast %246 : vector<1x128xf32> to vector<64x128xf32>
    %248 = arith.addf %243, %247 : vector<64x128xf32>
    %249 = vector.extract_strided_slice %228 {offsets = [0, 896], sizes = [64, 128], strides = [1, 1]} : vector<64x1152xf32> to vector<64x128xf32>
    %250 = vector.extract_strided_slice %4 {offsets = [1, 2, 1, 0], sizes = [1, 1, 1, 128], strides = [1, 1, 1, 1]} : vector<2x3x3x128xf32> to vector<1x1x1x128xf32>
    %251 = vector.shape_cast %250 : vector<1x1x1x128xf32> to vector<128xf32>
    %252 = vector.shape_cast %251 : vector<128xf32> to vector<1x128xf32>
    %253 = vector.broadcast %252 : vector<1x128xf32> to vector<64x128xf32>
    %254 = arith.addf %249, %253 : vector<64x128xf32>
    %255 = arith.truncf %248 : vector<64x128xf32> to vector<64x128xbf16>
    %256 = arith.truncf %254 : vector<64x128xf32> to vector<64x128xbf16>
    %257 = vector.extract_strided_slice %228 {offsets = [0, 640], sizes = [64, 128], strides = [1, 1]} : vector<64x1152xf32> to vector<64x128xf32>
    %258 = vector.extract_strided_slice %4 {offsets = [1, 1, 2, 0], sizes = [1, 1, 1, 128], strides = [1, 1, 1, 1]} : vector<2x3x3x128xf32> to vector<1x1x1x128xf32>
    %259 = vector.shape_cast %258 : vector<1x1x1x128xf32> to vector<128xf32>
    %260 = vector.shape_cast %259 : vector<128xf32> to vector<1x128xf32>
    %261 = vector.broadcast %260 : vector<1x128xf32> to vector<64x128xf32>
    %262 = arith.addf %257, %261 : vector<64x128xf32>
    %263 = vector.extract_strided_slice %228 {offsets = [0, 1024], sizes = [64, 128], strides = [1, 1]} : vector<64x1152xf32> to vector<64x128xf32>
    %264 = vector.extract_strided_slice %4 {offsets = [1, 2, 2, 0], sizes = [1, 1, 1, 128], strides = [1, 1, 1, 1]} : vector<2x3x3x128xf32> to vector<1x1x1x128xf32>
    %265 = vector.shape_cast %264 : vector<1x1x1x128xf32> to vector<128xf32>
    %266 = vector.shape_cast %265 : vector<128xf32> to vector<1x128xf32>
    %267 = vector.broadcast %266 : vector<1x128xf32> to vector<64x128xf32>
    %268 = arith.addf %263, %267 : vector<64x128xf32>
    %269 = arith.truncf %262 : vector<64x128xf32> to vector<64x128xbf16>
    %270 = arith.truncf %268 : vector<64x128xf32> to vector<64x128xbf16>
    %271 = vector.extract_strided_slice %228 {offsets = [0, 0], sizes = [64, 128], strides = [1, 1]} : vector<64x1152xf32> to vector<64x128xf32>
    %272 = vector.extract_strided_slice %4 {offsets = [1, 0, 0, 0], sizes = [1, 1, 1, 128], strides = [1, 1, 1, 1]} : vector<2x3x3x128xf32> to vector<1x1x1x128xf32>
    %273 = vector.shape_cast %272 : vector<1x1x1x128xf32> to vector<128xf32>
    %274 = vector.shape_cast %273 : vector<128xf32> to vector<1x128xf32>
    %275 = vector.broadcast %274 : vector<1x128xf32> to vector<64x128xf32>
    %276 = arith.addf %271, %275 : vector<64x128xf32>
    %cst_51 = arith.constant 1.250000e-01 : f32
    %277 = vector.broadcast %cst_51 : f32 to vector<64x128xf32>
    %278 = arith.mulf %276, %277 : vector<64x128xf32>
    %279 = arith.truncf %278 : vector<64x128xf32> to vector<64x128xbf16>
    %cst_52 = arith.constant dense<0.000000e+00> : vector<64x64xf32>
    %280 = tpu.matmul %279, %241, %cst_52 {dimension_numbers = #tpu.dot_dimension_numbers<[1], [1], [0], [0], [0, 0, 1, 0], [], []>} : vector<64x128xbf16>, vector<64x128xbf16>, vector<64x64xf32> -> vector<64x64xf32>
    %cst_53 = arith.constant dense<0xFF800000> : vector<64xf32>
    %281 = vector.multi_reduction <maximumf>, %280, %cst_53 [1] : vector<64x64xf32> to vector<64xf32>
    %282 = vector.shape_cast %281 : vector<64xf32> to vector<64x1xf32>
    %283 = vector.broadcast %282 : vector<64x1xf32> to vector<64x64xf32>
    %284 = arith.subf %280, %283 : vector<64x64xf32>
    %285 = math.exp %284 : vector<64x64xf32>
    %cst_54 = arith.constant dense<0.000000e+00> : vector<64xf32>
    %286 = vector.multi_reduction <add>, %285, %cst_54 [1] : vector<64x64xf32> to vector<64xf32>
    %287 = vector.shape_cast %286 : vector<64xf32> to vector<64x1xf32>
    %288 = tpu.reciprocal %287 {approx = true} : vector<64x1xf32> -> vector<64x1xf32>
    %289 = vector.broadcast %288 : vector<64x1xf32> to vector<64x64xf32>
    %290 = arith.mulf %285, %289 : vector<64x64xf32>
    %291 = arith.truncf %290 : vector<64x64xf32> to vector<64x64xbf16>
    %cst_55 = arith.constant dense<0.000000e+00> : vector<64x128xf32>
    %292 = tpu.matmul %291, %242, %cst_55 {dimension_numbers = #tpu.dot_dimension_numbers<[1], [0], [0], [1], [0, 0, 1, 1], [], []>} : vector<64x64xbf16>, vector<64x128xbf16>, vector<64x128xf32> -> vector<64x128xf32>
    %293 = arith.truncf %292 : vector<64x128xf32> to vector<64x128xbf16>
    %294 = vector.extract_strided_slice %3 {offsets = [1, 0, 0, 0], sizes = [1, 1, 128, 192], strides = [1, 1, 1, 1]} : vector<2x3x128x192xbf16> to vector<1x1x128x192xbf16>
    %295 = vector.shape_cast %294 : vector<1x1x128x192xbf16> to vector<128x192xbf16>
    %cst_56 = arith.constant dense<0.000000e+00> : vector<64x192xf32>
    %296 = tpu.matmul %293, %295, %cst_56 {dimension_numbers = #tpu.dot_dimension_numbers<[1], [0], [0], [1], [0, 0, 1, 1], [], []>} : vector<64x128xbf16>, vector<128x192xbf16>, vector<64x192xf32> -> vector<64x192xf32>
    %297 = vector.extract_strided_slice %228 {offsets = [0, 128], sizes = [64, 128], strides = [1, 1]} : vector<64x1152xf32> to vector<64x128xf32>
    %298 = vector.extract_strided_slice %4 {offsets = [1, 0, 1, 0], sizes = [1, 1, 1, 128], strides = [1, 1, 1, 1]} : vector<2x3x3x128xf32> to vector<1x1x1x128xf32>
    %299 = vector.shape_cast %298 : vector<1x1x1x128xf32> to vector<128xf32>
    %300 = vector.shape_cast %299 : vector<128xf32> to vector<1x128xf32>
    %301 = vector.broadcast %300 : vector<1x128xf32> to vector<64x128xf32>
    %302 = arith.addf %297, %301 : vector<64x128xf32>
    %cst_57 = arith.constant 1.250000e-01 : f32
    %303 = vector.broadcast %cst_57 : f32 to vector<64x128xf32>
    %304 = arith.mulf %302, %303 : vector<64x128xf32>
    %305 = arith.truncf %304 : vector<64x128xf32> to vector<64x128xbf16>
    %cst_58 = arith.constant dense<0.000000e+00> : vector<64x64xf32>
    %306 = tpu.matmul %305, %255, %cst_58 {dimension_numbers = #tpu.dot_dimension_numbers<[1], [1], [0], [0], [0, 0, 1, 0], [], []>} : vector<64x128xbf16>, vector<64x128xbf16>, vector<64x64xf32> -> vector<64x64xf32>
    %cst_59 = arith.constant dense<0xFF800000> : vector<64xf32>
    %307 = vector.multi_reduction <maximumf>, %306, %cst_59 [1] : vector<64x64xf32> to vector<64xf32>
    %308 = vector.shape_cast %307 : vector<64xf32> to vector<64x1xf32>
    %309 = vector.broadcast %308 : vector<64x1xf32> to vector<64x64xf32>
    %310 = arith.subf %306, %309 : vector<64x64xf32>
    %311 = math.exp %310 : vector<64x64xf32>
    %cst_60 = arith.constant dense<0.000000e+00> : vector<64xf32>
    %312 = vector.multi_reduction <add>, %311, %cst_60 [1] : vector<64x64xf32> to vector<64xf32>
    %313 = vector.shape_cast %312 : vector<64xf32> to vector<64x1xf32>
    %314 = tpu.reciprocal %313 {approx = true} : vector<64x1xf32> -> vector<64x1xf32>
    %315 = vector.broadcast %314 : vector<64x1xf32> to vector<64x64xf32>
    %316 = arith.mulf %311, %315 : vector<64x64xf32>
    %317 = arith.truncf %316 : vector<64x64xf32> to vector<64x64xbf16>
    %cst_61 = arith.constant dense<0.000000e+00> : vector<64x128xf32>
    %318 = tpu.matmul %317, %256, %cst_61 {dimension_numbers = #tpu.dot_dimension_numbers<[1], [0], [0], [1], [0, 0, 1, 1], [], []>} : vector<64x64xbf16>, vector<64x128xbf16>, vector<64x128xf32> -> vector<64x128xf32>
    %319 = arith.truncf %318 : vector<64x128xf32> to vector<64x128xbf16>
    %320 = vector.extract_strided_slice %3 {offsets = [1, 1, 0, 0], sizes = [1, 1, 128, 192], strides = [1, 1, 1, 1]} : vector<2x3x128x192xbf16> to vector<1x1x128x192xbf16>
    %321 = vector.shape_cast %320 : vector<1x1x128x192xbf16> to vector<128x192xbf16>
    %cst_62 = arith.constant dense<0.000000e+00> : vector<64x192xf32>
    %322 = tpu.matmul %319, %321, %cst_62 {dimension_numbers = #tpu.dot_dimension_numbers<[1], [0], [0], [1], [0, 0, 1, 1], [], []>} : vector<64x128xbf16>, vector<128x192xbf16>, vector<64x192xf32> -> vector<64x192xf32>
    %323 = arith.addf %296, %322 : vector<64x192xf32>
    %324 = vector.extract_strided_slice %228 {offsets = [0, 256], sizes = [64, 128], strides = [1, 1]} : vector<64x1152xf32> to vector<64x128xf32>
    %325 = vector.extract_strided_slice %4 {offsets = [1, 0, 2, 0], sizes = [1, 1, 1, 128], strides = [1, 1, 1, 1]} : vector<2x3x3x128xf32> to vector<1x1x1x128xf32>
    %326 = vector.shape_cast %325 : vector<1x1x1x128xf32> to vector<128xf32>
    %327 = vector.shape_cast %326 : vector<128xf32> to vector<1x128xf32>
    %328 = vector.broadcast %327 : vector<1x128xf32> to vector<64x128xf32>
    %329 = arith.addf %324, %328 : vector<64x128xf32>
    %cst_63 = arith.constant 1.250000e-01 : f32
    %330 = vector.broadcast %cst_63 : f32 to vector<64x128xf32>
    %331 = arith.mulf %329, %330 : vector<64x128xf32>
    %332 = arith.truncf %331 : vector<64x128xf32> to vector<64x128xbf16>
    %cst_64 = arith.constant dense<0.000000e+00> : vector<64x64xf32>
    %333 = tpu.matmul %332, %269, %cst_64 {dimension_numbers = #tpu.dot_dimension_numbers<[1], [1], [0], [0], [0, 0, 1, 0], [], []>} : vector<64x128xbf16>, vector<64x128xbf16>, vector<64x64xf32> -> vector<64x64xf32>
    %cst_65 = arith.constant dense<0xFF800000> : vector<64xf32>
    %334 = vector.multi_reduction <maximumf>, %333, %cst_65 [1] : vector<64x64xf32> to vector<64xf32>
    %335 = vector.shape_cast %334 : vector<64xf32> to vector<64x1xf32>
    %336 = vector.broadcast %335 : vector<64x1xf32> to vector<64x64xf32>
    %337 = arith.subf %333, %336 : vector<64x64xf32>
    %338 = math.exp %337 : vector<64x64xf32>
    %cst_66 = arith.constant dense<0.000000e+00> : vector<64xf32>
    %339 = vector.multi_reduction <add>, %338, %cst_66 [1] : vector<64x64xf32> to vector<64xf32>
    %340 = vector.shape_cast %339 : vector<64xf32> to vector<64x1xf32>
    %341 = tpu.reciprocal %340 {approx = true} : vector<64x1xf32> -> vector<64x1xf32>
    %342 = vector.broadcast %341 : vector<64x1xf32> to vector<64x64xf32>
    %343 = arith.mulf %338, %342 : vector<64x64xf32>
    %344 = arith.truncf %343 : vector<64x64xf32> to vector<64x64xbf16>
    %cst_67 = arith.constant dense<0.000000e+00> : vector<64x128xf32>
    %345 = tpu.matmul %344, %270, %cst_67 {dimension_numbers = #tpu.dot_dimension_numbers<[1], [0], [0], [1], [0, 0, 1, 1], [], []>} : vector<64x64xbf16>, vector<64x128xbf16>, vector<64x128xf32> -> vector<64x128xf32>
    %346 = arith.truncf %345 : vector<64x128xf32> to vector<64x128xbf16>
    %347 = vector.extract_strided_slice %3 {offsets = [1, 2, 0, 0], sizes = [1, 1, 128, 192], strides = [1, 1, 1, 1]} : vector<2x3x128x192xbf16> to vector<1x1x128x192xbf16>
    %348 = vector.shape_cast %347 : vector<1x1x128x192xbf16> to vector<128x192xbf16>
    %cst_68 = arith.constant dense<0.000000e+00> : vector<64x192xf32>
    %349 = tpu.matmul %346, %348, %cst_68 {dimension_numbers = #tpu.dot_dimension_numbers<[1], [0], [0], [1], [0, 0, 1, 1], [], []>} : vector<64x128xbf16>, vector<128x192xbf16>, vector<64x192xf32> -> vector<64x192xf32>
    %350 = arith.addf %323, %349 : vector<64x192xf32>
    %351 = vector.extract_strided_slice %5 {offsets = [8, 0], sizes = [1, 192], strides = [1, 1]} : vector<22x192xf32> to vector<1x192xf32>
    %352 = vector.shape_cast %351 : vector<1x192xf32> to vector<192xf32>
    %353 = vector.shape_cast %352 : vector<192xf32> to vector<1x192xf32>
    %354 = vector.broadcast %353 : vector<1x192xf32> to vector<64x192xf32>
    %355 = arith.addf %350, %354 : vector<64x192xf32>
    %356 = arith.addf %224, %355 : vector<64x192xf32>
    %357 = vector.extract_strided_slice %5 {offsets = [9, 0], sizes = [1, 192], strides = [1, 1]} : vector<22x192xf32> to vector<1x192xf32>
    %358 = vector.shape_cast %357 : vector<1x192xf32> to vector<192xf32>
    %359 = vector.extract_strided_slice %5 {offsets = [10, 0], sizes = [1, 192], strides = [1, 1]} : vector<22x192xf32> to vector<1x192xf32>
    %360 = vector.shape_cast %359 : vector<1x192xf32> to vector<192xf32>
    %cst_69 = arith.constant dense<0.000000e+00> : vector<64xf32>
    %361 = vector.multi_reduction <add>, %356, %cst_69 [1] : vector<64x192xf32> to vector<64xf32>
    %362 = vector.shape_cast %361 : vector<64xf32> to vector<64x1xf32>
    %cst_70 = arith.constant 1.920000e+02 : f32
    %363 = vector.broadcast %cst_70 : f32 to vector<64x1xf32>
    %364 = arith.divf %362, %363 : vector<64x1xf32>
    %365 = vector.broadcast %364 : vector<64x1xf32> to vector<64x192xf32>
    %366 = arith.subf %356, %365 : vector<64x192xf32>
    %367 = arith.mulf %366, %366 : vector<64x192xf32>
    %cst_71 = arith.constant dense<0.000000e+00> : vector<64xf32>
    %368 = vector.multi_reduction <add>, %367, %cst_71 [1] : vector<64x192xf32> to vector<64xf32>
    %369 = vector.shape_cast %368 : vector<64xf32> to vector<64x1xf32>
    %cst_72 = arith.constant 1.920000e+02 : f32
    %370 = vector.broadcast %cst_72 : f32 to vector<64x1xf32>
    %371 = arith.divf %369, %370 : vector<64x1xf32>
    %372 = vector.broadcast %364 : vector<64x1xf32> to vector<64x192xf32>
    %373 = arith.subf %356, %372 : vector<64x192xf32>
    %cst_73 = arith.constant 9.99999974E-6 : f32
    %374 = vector.broadcast %cst_73 : f32 to vector<64x1xf32>
    %375 = arith.addf %371, %374 : vector<64x1xf32>
    %376 = math.rsqrt %375 : vector<64x1xf32>
    %377 = vector.broadcast %376 : vector<64x1xf32> to vector<64x192xf32>
    %378 = arith.mulf %373, %377 : vector<64x192xf32>
    %379 = vector.shape_cast %358 : vector<192xf32> to vector<1x192xf32>
    %380 = vector.broadcast %379 : vector<1x192xf32> to vector<64x192xf32>
    %381 = arith.mulf %378, %380 : vector<64x192xf32>
    %382 = vector.shape_cast %360 : vector<192xf32> to vector<1x192xf32>
    %383 = vector.broadcast %382 : vector<1x192xf32> to vector<64x192xf32>
    %384 = arith.addf %381, %383 : vector<64x192xf32>
    %385 = arith.truncf %384 : vector<64x192xf32> to vector<64x192xbf16>
    %386 = vector.extract_strided_slice %1 {offsets = [3, 0, 0], sizes = [1, 192, 192], strides = [1, 1, 1]} : vector<8x192x192xbf16> to vector<1x192x192xbf16>
    %387 = vector.shape_cast %386 : vector<1x192x192xbf16> to vector<192x192xbf16>
    %cst_74 = arith.constant dense<0.000000e+00> : vector<64x192xf32>
    %388 = tpu.matmul %385, %387, %cst_74 {dimension_numbers = #tpu.dot_dimension_numbers<[1], [0], [0], [1], [0, 0, 1, 1], [], []>} : vector<64x192xbf16>, vector<192x192xbf16>, vector<64x192xf32> -> vector<64x192xf32>
    %389 = vector.extract_strided_slice %5 {offsets = [11, 0], sizes = [1, 192], strides = [1, 1]} : vector<22x192xf32> to vector<1x192xf32>
    %390 = vector.shape_cast %389 : vector<1x192xf32> to vector<192xf32>
    %391 = vector.shape_cast %390 : vector<192xf32> to vector<1x192xf32>
    %392 = vector.broadcast %391 : vector<1x192xf32> to vector<64x192xf32>
    %393 = arith.addf %388, %392 : vector<64x192xf32>
    %cst_75 = arith.constant 0.000000e+00 : f32
    %394 = vector.broadcast %cst_75 : f32 to vector<64x192xf32>
    %395 = arith.maximumf %393, %394 : vector<64x192xf32>
    %396 = arith.truncf %395 : vector<64x192xf32> to vector<64x192xbf16>
    %397 = vector.extract_strided_slice %1 {offsets = [4, 0, 0], sizes = [1, 192, 192], strides = [1, 1, 1]} : vector<8x192x192xbf16> to vector<1x192x192xbf16>
    %398 = vector.shape_cast %397 : vector<1x192x192xbf16> to vector<192x192xbf16>
    %cst_76 = arith.constant dense<0.000000e+00> : vector<64x192xf32>
    %399 = tpu.matmul %396, %398, %cst_76 {dimension_numbers = #tpu.dot_dimension_numbers<[1], [0], [0], [1], [0, 0, 1, 1], [], []>} : vector<64x192xbf16>, vector<192x192xbf16>, vector<64x192xf32> -> vector<64x192xf32>
    %400 = vector.extract_strided_slice %5 {offsets = [12, 0], sizes = [1, 192], strides = [1, 1]} : vector<22x192xf32> to vector<1x192xf32>
    %401 = vector.shape_cast %400 : vector<1x192xf32> to vector<192xf32>
    %402 = vector.shape_cast %401 : vector<192xf32> to vector<1x192xf32>
    %403 = vector.broadcast %402 : vector<1x192xf32> to vector<64x192xf32>
    %404 = arith.addf %399, %403 : vector<64x192xf32>
    %405 = arith.addf %384, %404 : vector<64x192xf32>
    %406 = vector.extract_strided_slice %5 {offsets = [13, 0], sizes = [1, 192], strides = [1, 1]} : vector<22x192xf32> to vector<1x192xf32>
    %407 = vector.shape_cast %406 : vector<1x192xf32> to vector<192xf32>
    %408 = vector.extract_strided_slice %5 {offsets = [14, 0], sizes = [1, 192], strides = [1, 1]} : vector<22x192xf32> to vector<1x192xf32>
    %409 = vector.shape_cast %408 : vector<1x192xf32> to vector<192xf32>
    %cst_77 = arith.constant dense<0.000000e+00> : vector<64xf32>
    %410 = vector.multi_reduction <add>, %405, %cst_77 [1] : vector<64x192xf32> to vector<64xf32>
    %411 = vector.shape_cast %410 : vector<64xf32> to vector<64x1xf32>
    %cst_78 = arith.constant 1.920000e+02 : f32
    %412 = vector.broadcast %cst_78 : f32 to vector<64x1xf32>
    %413 = arith.divf %411, %412 : vector<64x1xf32>
    %414 = vector.broadcast %413 : vector<64x1xf32> to vector<64x192xf32>
    %415 = arith.subf %405, %414 : vector<64x192xf32>
    %416 = arith.mulf %415, %415 : vector<64x192xf32>
    %cst_79 = arith.constant dense<0.000000e+00> : vector<64xf32>
    %417 = vector.multi_reduction <add>, %416, %cst_79 [1] : vector<64x192xf32> to vector<64xf32>
    %418 = vector.shape_cast %417 : vector<64xf32> to vector<64x1xf32>
    %cst_80 = arith.constant 1.920000e+02 : f32
    %419 = vector.broadcast %cst_80 : f32 to vector<64x1xf32>
    %420 = arith.divf %418, %419 : vector<64x1xf32>
    %421 = vector.broadcast %413 : vector<64x1xf32> to vector<64x192xf32>
    %422 = arith.subf %405, %421 : vector<64x192xf32>
    %cst_81 = arith.constant 9.99999974E-6 : f32
    %423 = vector.broadcast %cst_81 : f32 to vector<64x1xf32>
    %424 = arith.addf %420, %423 : vector<64x1xf32>
    %425 = math.rsqrt %424 : vector<64x1xf32>
    %426 = vector.broadcast %425 : vector<64x1xf32> to vector<64x192xf32>
    %427 = arith.mulf %422, %426 : vector<64x192xf32>
    %428 = vector.shape_cast %407 : vector<192xf32> to vector<1x192xf32>
    %429 = vector.broadcast %428 : vector<1x192xf32> to vector<64x192xf32>
    %430 = arith.mulf %427, %429 : vector<64x192xf32>
    %431 = vector.shape_cast %409 : vector<192xf32> to vector<1x192xf32>
    %432 = vector.broadcast %431 : vector<1x192xf32> to vector<64x192xf32>
    %433 = arith.addf %430, %432 : vector<64x192xf32>
    %434 = arith.truncf %433 : vector<64x192xf32> to vector<64x192xbf16>
    %435 = vector.extract_strided_slice %1 {offsets = [6, 0, 0], sizes = [1, 192, 192], strides = [1, 1, 1]} : vector<8x192x192xbf16> to vector<1x192x192xbf16>
    %436 = vector.shape_cast %435 : vector<1x192x192xbf16> to vector<192x192xbf16>
    %cst_82 = arith.constant dense<0.000000e+00> : vector<64x192xf32>
    %437 = tpu.matmul %434, %436, %cst_82 {dimension_numbers = #tpu.dot_dimension_numbers<[1], [0], [0], [1], [0, 0, 1, 1], [], []>} : vector<64x192xbf16>, vector<192x192xbf16>, vector<64x192xf32> -> vector<64x192xf32>
    %438 = vector.extract_strided_slice %5 {offsets = [15, 0], sizes = [1, 192], strides = [1, 1]} : vector<22x192xf32> to vector<1x192xf32>
    %439 = vector.shape_cast %438 : vector<1x192xf32> to vector<192xf32>
    %440 = vector.shape_cast %439 : vector<192xf32> to vector<1x192xf32>
    %441 = vector.broadcast %440 : vector<1x192xf32> to vector<64x192xf32>
    %442 = arith.addf %437, %441 : vector<64x192xf32>
    %443 = math.tanh %442 : vector<64x192xf32>
    %444 = vector.extract_strided_slice %1 {offsets = [7, 0, 0], sizes = [1, 192, 192], strides = [1, 1, 1]} : vector<8x192x192xbf16> to vector<1x192x192xbf16>
    %445 = vector.shape_cast %444 : vector<1x192x192xbf16> to vector<192x192xbf16>
    %cst_83 = arith.constant dense<0.000000e+00> : vector<64x192xf32>
    %446 = tpu.matmul %434, %445, %cst_83 {dimension_numbers = #tpu.dot_dimension_numbers<[1], [0], [0], [1], [0, 0, 1, 1], [], []>} : vector<64x192xbf16>, vector<192x192xbf16>, vector<64x192xf32> -> vector<64x192xf32>
    %447 = vector.extract_strided_slice %5 {offsets = [16, 0], sizes = [1, 192], strides = [1, 1]} : vector<22x192xf32> to vector<1x192xf32>
    %448 = vector.shape_cast %447 : vector<1x192xf32> to vector<192xf32>
    %449 = vector.shape_cast %448 : vector<192xf32> to vector<1x192xf32>
    %450 = vector.broadcast %449 : vector<1x192xf32> to vector<64x192xf32>
    %451 = arith.addf %446, %450 : vector<64x192xf32>
    %452 = arith.negf %451 : vector<64x192xf32>
    %453 = math.exp %452 : vector<64x192xf32>
    %cst_84 = arith.constant 1.000000e+00 : f32
    %454 = vector.broadcast %cst_84 : f32 to vector<64x192xf32>
    %455 = arith.addf %454, %453 : vector<64x192xf32>
    %456 = arith.divf %454, %455 : vector<64x192xf32>
    %457 = arith.mulf %443, %456 : vector<64x192xf32>
    %458 = vector.extract_strided_slice %5 {offsets = [17, 0], sizes = [1, 192], strides = [1, 1]} : vector<22x192xf32> to vector<1x192xf32>
    %cst_85 = arith.constant dense<0.000000e+00> : vector<1x64xf32>
    %459 = tpu.matmul %458, %457, %cst_85 {dimension_numbers = #tpu.dot_dimension_numbers<[1], [1], [0], [0], [0, 0, 1, 0], [], []>} : vector<1x192xf32>, vector<64x192xf32>, vector<1x64xf32> -> vector<1x64xf32>
    %460 = vector.extract_strided_slice %5 {offsets = [18, 0], sizes = [1, 1], strides = [1, 1]} : vector<22x192xf32> to vector<1x1xf32>
    %461 = vector.broadcast %460 : vector<1x1xf32> to vector<1x64xf32>
    %462 = arith.addf %459, %461 : vector<1x64xf32>
    %cst_86 = arith.constant dense<0xFF800000> : vector<1xf32>
    %463 = vector.multi_reduction <maximumf>, %462, %cst_86 [1] : vector<1x64xf32> to vector<1xf32>
    %464 = vector.shape_cast %463 : vector<1xf32> to vector<1x1xf32>
    %465 = vector.broadcast %464 : vector<1x1xf32> to vector<1x64xf32>
    %466 = arith.subf %462, %465 : vector<1x64xf32>
    %467 = math.exp %466 : vector<1x64xf32>
    %cst_87 = arith.constant dense<0.000000e+00> : vector<1xf32>
    %468 = vector.multi_reduction <add>, %467, %cst_87 [1] : vector<1x64xf32> to vector<1xf32>
    %469 = vector.shape_cast %468 : vector<1xf32> to vector<1x1xf32>
    %cst_88 = arith.constant dense<0.000000e+00> : vector<1x192xf32>
    %470 = tpu.matmul %467, %433, %cst_88 {dimension_numbers = #tpu.dot_dimension_numbers<[1], [0], [0], [1], [0, 0, 1, 1], [], []>} : vector<1x64xf32>, vector<64x192xf32>, vector<1x192xf32> -> vector<1x192xf32>
    %cst_89 = arith.constant 1.000000e+00 : f32
    %471 = vector.broadcast %cst_89 : f32 to vector<1x1xf32>
    %472 = arith.divf %471, %469 : vector<1x1xf32>
    %473 = vector.broadcast %472 : vector<1x1xf32> to vector<1x192xf32>
    %474 = arith.mulf %470, %473 : vector<1x192xf32>
    %475 = arith.truncf %474 : vector<1x192xf32> to vector<1x192xbf16>
    %476 = vector.extract_strided_slice %1 {offsets = [5, 0, 0], sizes = [1, 192, 192], strides = [1, 1, 1]} : vector<8x192x192xbf16> to vector<1x192x192xbf16>
    %477 = vector.shape_cast %476 : vector<1x192x192xbf16> to vector<192x192xbf16>
    %cst_90 = arith.constant dense<0.000000e+00> : vector<1x192xf32>
    %478 = tpu.matmul %475, %477, %cst_90 {dimension_numbers = #tpu.dot_dimension_numbers<[1], [0], [0], [1], [0, 0, 1, 1], [], []>} : vector<1x192xbf16>, vector<192x192xbf16>, vector<1x192xf32> -> vector<1x192xf32>
    %479 = vector.extract_strided_slice %5 {offsets = [21, 0], sizes = [1, 192], strides = [1, 1]} : vector<22x192xf32> to vector<1x192xf32>
    %480 = vector.shape_cast %479 : vector<1x192xf32> to vector<192xf32>
    %481 = vector.shape_cast %480 : vector<192xf32> to vector<1x192xf32>
    %482 = arith.addf %478, %481 : vector<1x192xf32>
    %cst_91 = arith.constant 0.000000e+00 : f32
    %483 = vector.broadcast %cst_91 : f32 to vector<1x192xf32>
    %484 = arith.maximumf %482, %483 : vector<1x192xf32>
    %485 = vector.extract_strided_slice %5 {offsets = [19, 0], sizes = [2, 192], strides = [1, 1]} : vector<22x192xf32> to vector<2x192xf32>
    %cst_92 = arith.constant dense<0.000000e+00> : vector<1x2xf32>
    %486 = tpu.matmul %484, %485, %cst_92 {dimension_numbers = #tpu.dot_dimension_numbers<[1], [1], [0], [0], [0, 0, 1, 0], [], []>} : vector<1x192xf32>, vector<2x192xf32>, vector<1x2xf32> -> vector<1x2xf32>
    %487 = vector.extract_strided_slice %5 {offsets = [18, 1], sizes = [1, 2], strides = [1, 1]} : vector<22x192xf32> to vector<1x2xf32>
    %488 = arith.addf %486, %487 : vector<1x2xf32>
    %c0_93 = arith.constant 0 : index
    %c0_94 = arith.constant 0 : index
    %489 = vector.load %arg6[%c0_93, %c0_94] : memref<1x2xf32, #tpu.memory_space<vmem>>, vector<1x2xf32>
    tpu.vector_store %arg6[%c0_93, %c0_94], %488 {strides = array<i32>} : memref<1x2xf32, #tpu.memory_space<vmem>>, vector<1x2xf32>,
    return
  }
}

</mosaic_0001>

<bundles_post_ra>
// kernel: local_global_hipt_forward.1
= control target key start
LH: loop header
LB: loop body
LE: loop exit
PB: predicated region body
PF: predicated region fallthrough
CT: control target
= control target key end

     0   :  { %11 = vsyncpa [#allocation3], 0  ;;  %s14027_s0 = inlined_call_operand.vmem [shape: bf16[64,192], index: 0, kind: input, shape index: {}]   ;;  %s14028_s1 = inlined_call_operand.vmem [shape: bf16[8,192,192], index: 1, kind: input, shape index: {}]   ;;  %s14029_s2 = inlined_call_operand.hbm [shape: bf16[2,192,1152], index: 2, kind: input, shape index: {}]   ;;  %s14030_s3 = inlined_call_operand.vmem [shape: bf16[2,3,128,192], index: 3, kind: input, shape index: {}]   ;;  %s14031_s4 = inlined_call_operand.vmem [shape: f32[2,3,3,128], index: 4, kind: input, shape index: {}]   ;;  %s14032_s5 = inlined_call_operand.vmem [shape: f32[22,192], index: 5, kind: input, shape index: {}]   ;;  %s14033_s6 = inlined_call_operand.hbm [shape: f32[1,2], index: 6, kind: output, shape index: {}]  }
   0x1   :  { %12 = vsyncpa [#allocation4], 0  ;;  %s10432_s21 = smov [#allocation2]   ;;  %s10384_s25 = scalar_lea.hbm %s14029_s2, 27648 }
   0x2   :  { %s22_s22 = sshll.u32 %s10432_s21, 4  ;;  %p10385_p0 = scmp.ne.s32.totalorder %s14029_s2, %s10384_s25  ;;  %s23_s22 = int_to_ptr.vmem [resolvable:$true] %s22_s22 }
   0x3   :  { %p10388_p1 = scmp.lt.u32.totalorder %s10384_s25, %s14029_s2 }
   0x5   :  { %p10390_p2 = pnand %p10388_p1, %p10385_p0 }
   0x7   :  { %10393 = shalt.err (!%p10390_p2)
}
   0x8   :  { %s10394_s30 = scalar_lea.vmem %s23_s22, 27648  ;;  %p10399_p4 = scmp.lt.s32.totalorder %s23_s22, %s23_s22 }
   0x9   :  { %p10395_p3 = scmp.ne.s32.totalorder %s23_s22, %s10394_s30  ;;  %p10400_p5 = scmp.lt.s32.totalorder %s10394_s30, %s10394_s30 }
   0xb   :  { %p10401_p6 = por %p10400_p5, %p10399_p4 }
   0xd   :  { %p10402_p7 = pnand %p10401_p6, %p10395_p3 }
   0xf   :  { %10405 = shalt.err (!%p10402_p7)
}
  0x10   :  { %s10433_s7 = smov 576   ;;  %s10434_s8 = smov 36  }
  0x11   :  { %28 = dma.hbm_to_vmem [thread:$0]  %s14029_s2, 27648, %s23_s22, [#allocation3], %s10433_s7, %s10433_s7, %s10434_s8  }
  0x12   :  { %10428 = dma.done.wait [#allocation3], 27648  }
  0x13   :  { %10429 = vsyncadd [#allocation3], 4294939648  ;;  %v9266_v0 = vld [vmem:[%s14028_s1 + $0x4] ss:$8 sps:$4 sm:$0xff]   ;;  %v9268_v1 = vld [vmem:[%s14028_s1] ss:$8 sps:$4 sm:$0xff]  }
  0x14   :  { %764 = vmatprep.subr.bf16.mxu0 %v9266_v0  ;;  %v9269_v2 = vld [vmem:[%s14028_s1 + $0x14] ss:$8 sps:$4 sm:$0xff]   ;;  %v9271_v3 = vld [vmem:[%s14028_s1 + $0x10] ss:$8 sps:$4 sm:$0xff]   ;;  %v9272_v4 = vld [vmem:[%s14028_s1 + $0x24] ss:$8 sps:$4 sm:$0xff]  }
  0x15   :  { %765 = vmatpush1.bf16.msra.mxu0 %v9268_v1  ;;  %v9274_v5 = vld [vmem:[%s14028_s1 + $0x20] ss:$8 sps:$4 sm:$0xff]   ;;  %v9275_v6 = vld [vmem:[%s14028_s1 + $0x34] ss:$8 sps:$4 sm:$0xff]   ;;  %v9277_v7 = vld [vmem:[%s14028_s1 + $0x30] ss:$8 sps:$4 sm:$0xff]  }
  0x16   :  { %766 = vmatprep.subr.bf16.mxu0 %v9269_v2  ;;  %v9278_v8 = vld [vmem:[%s14028_s1 + $0x44] ss:$8 sps:$4 sm:$0xff]   ;;  %v9280_v9 = vld [vmem:[%s14028_s1 + $0x40] ss:$8 sps:$4 sm:$0xff]   ;;  %v9281_v10 = vld [vmem:[%s14028_s1 + $0x54] ss:$8 sps:$4 sm:$0xff]  }
  0x17   :  { %vm751_vm0 = vcmask 523264   ;;  %v9304_v11 = vld [vmem:[%s14027_s0 + $0x4] ss:$8 sps:$4 sm:$0xff]   ;;  %v9283_v12 = vld [vmem:[%s14028_s1 + $0x50] ss:$8 sps:$4 sm:$0xff]   ;;  %vm7878_vm2 = vcmask 516096  }
  0x18   :  { %8269 = vmatprep.mubr.msk.bf16.mxu0 %vm751_vm0, %v9304_v11  ;;  %v9284_v13 = vld [vmem:[%s14028_s1 + $0x64] ss:$8 sps:$4 sm:$0xff]   ;;  %v9286_v15 = vld [vmem:[%s14028_s1 + $0x60] ss:$8 sps:$4 sm:$0xff]   ;;  %v9287_v16 = vld [vmem:[%s14028_s1 + $0x74] ss:$8 sps:$4 sm:$0xff]  }
  0x19   :  { %767 = vmatpush1.bf16.msra.mxu0 %v9271_v3  ;;  %v9314_v14 = vld [vmem:[#allocation2 + $0x4] ss:$36 sps:$4 sm:$0xff]   ;;  %v9320_v18 = vld [vmem:[#allocation2 + $0x4c] ss:$36 sps:$4 sm:$0xff]   ;;  %v9326_v21 = vld [vmem:[#allocation2 + $0x94] ss:$36 sps:$4 sm:$0xff]  }
  0x1a   :  { %768 = vmatprep.subr.bf16.mxu0 %v9272_v4  ;;  %v9319_v17 = vld [vmem:[#allocation2] ss:$36 sps:$4 sm:$0xff]   ;;  %1425 = vmatprep.subr.bf16.mxu1 %v9314_v14  ;;  %v9289_v19 = vld [vmem:[%s14028_s1 + $0x70] ss:$8 sps:$4 sm:$0xff]   ;;  %v9325_v20 = vld [vmem:[#allocation2 + $0x48] ss:$36 sps:$4 sm:$0xff]  }
  0x1b   :  { %1426 = vmatpush1.bf16.msra.mxu1 %v9319_v17  ;;  %v9290_v22 = vld [vmem:[%s14028_s1 + $0x84] ss:$8 sps:$4 sm:$0xff]   ;;  %v9331_v23 = vld [vmem:[#allocation2 + $0x90] ss:$36 sps:$4 sm:$0xff]   ;;  %v9332_v24 = vld [vmem:[#allocation2 + $0xdc] ss:$36 sps:$4 sm:$0xff]  }
  0x1c   :  { %1427 = vmatprep.subr.bf16.mxu1 %v9320_v18  ;;  %v9292_v25 = vld [vmem:[%s14028_s1 + $0x80] ss:$8 sps:$4 sm:$0xff]   ;;  %v9293_v26 = vld [vmem:[%s14028_s1 + $0x94] ss:$8 sps:$4 sm:$0xff]   ;;  %v9295_v29 = vld [vmem:[%s14028_s1 + $0x90] ss:$8 sps:$4 sm:$0xff]  }
  0x1d   :  { %769 = vmatpush1.bf16.msra.mxu0 %v9274_v5  ;;  %v9337_v27 = vld [vmem:[#allocation2 + $0xd8] ss:$36 sps:$4 sm:$0xff]   ;;  %v9338_v28 = vld [vmem:[#allocation2 + $0x124] ss:$36 sps:$4 sm:$0xff]   ;;  %v9344_v32 = vld [vmem:[#allocation2 + $0x16c] ss:$36 sps:$4 sm:$0xff]  }
  0x1e   :  { %770 = vmatprep.subr.bf16.mxu0 %v9275_v6  ;;  %v9296_v30 = vld [vmem:[%s14028_s1 + $0xa4] ss:$8 sps:$4 sm:$0xff]   ;;  %v9298_v33 = vld [vmem:[%s14028_s1 + $0xa0] ss:$8 sps:$4 sm:$0xff]   ;;  %v9299_v34 = vld [vmem:[%s14028_s1 + $0xb4] ss:$8 sps:$4 sm:$0xff]  }
  0x1f   :  { %1428 = vmatpush1.bf16.msra.mxu1 %v9325_v20  ;;  %v9343_v31 = vld [vmem:[#allocation2 + $0x120] ss:$36 sps:$4 sm:$0xff]   ;;  %v9349_v35 = vld [vmem:[#allocation2 + $0x168] ss:$36 sps:$4 sm:$0xff]   ;;  %v9350_v36 = vld [vmem:[#allocation2 + $0x1b4] ss:$36 sps:$4 sm:$0xff]  }
  0x20   :  { %1429 = vmatprep.subr.bf16.mxu1 %v9326_v21  ;;  %v9301_v37 = vld [vmem:[%s14028_s1 + $0xb0] ss:$8 sps:$4 sm:$0xff]   ;;  %v9302_v38 = vld [vmem:[%s14027_s0] ss:$8 sps:$4 sm:$0xff]   ;;  %v9305_v40 = vld [vmem:[%s14027_s0 + $0x14] ss:$8 sps:$4 sm:$0xff]  }
  0x21   :  { %771 = vmatpush1.bf16.msra.mxu0 %v9277_v7  ;;  %v9318_v39 = vld [vmem:[#allocation2 + $0xc] ss:$36 sps:$4 sm:$0xff]   ;;  %v9356_v42 = vld [vmem:[#allocation2 + $0x1fc] ss:$36 sps:$4 sm:$0xff]   ;;  %v9324_v44 = vld [vmem:[#allocation2 + $0x54] ss:$36 sps:$4 sm:$0xff]  }
  0x22   :  { %772 = vmatprep.subr.bf16.mxu0 %v9278_v8  ;;  %v9355_v41 = vld [vmem:[#allocation2 + $0x1b0] ss:$36 sps:$4 sm:$0xff]   ;;  %v9316_v43 = vld [vmem:[#allocation2 + $0x8] ss:$36 sps:$4 sm:$0xff]   ;;  %v9361_v45 = vld [vmem:[#allocation2 + $0x1f8] ss:$36 sps:$4 sm:$0xff]  }
  0x23   :  { %1430 = vmatpush1.bf16.msra.mxu1 %v9331_v23  ;;  %v9362_v46 = vld [vmem:[#allocation2 + $0x244] ss:$36 sps:$4 sm:$0xff]   ;;  %v9322_v47 = vld [vmem:[#allocation2 + $0x50] ss:$36 sps:$4 sm:$0xff]   ;;  %v9330_v48 = vld [vmem:[#allocation2 + $0x9c] ss:$36 sps:$4 sm:$0xff]  }
  0x24   :  { %1431 = vmatprep.subr.bf16.mxu1 %v9332_v24  ;;  %v9367_v49 = vld [vmem:[#allocation2 + $0x240] ss:$36 sps:$4 sm:$0xff]   ;;  %v9307_v50 = vld [vmem:[%s14027_s0 + $0x10] ss:$8 sps:$4 sm:$0xff]   ;;  %v9373_v55 = vld [vmem:[#allocation2 + $0x288] ss:$36 sps:$4 sm:$0xff]  }
  0x25   :  { %773 = vmatpush1.bf16.msra.mxu0 %v9280_v9  ;;  %v9368_v51 = vld [vmem:[#allocation2 + $0x28c] ss:$36 sps:$4 sm:$0xff]   ;;  %v9328_v53 = vld [vmem:[#allocation2 + $0x98] ss:$36 sps:$4 sm:$0xff]   ;;  %v9336_v54 = vld [vmem:[#allocation2 + $0xe4] ss:$36 sps:$4 sm:$0xff]  }
  0x26   :  { %774 = vmatprep.subr.bf16.mxu0 %v9281_v10  ;;  %v9308_v52 = vld [vmem:[%s14027_s0 + $0x24] ss:$8 sps:$4 sm:$0xff]   ;;  %v9310_v58 = vld [vmem:[%s14027_s0 + $0x20] ss:$8 sps:$4 sm:$0xff]   ;;  %v9311_v59 = vld [vmem:[%s14027_s0 + $0x34] ss:$8 sps:$4 sm:$0xff]  }
  0x27   :  { %1432 = vmatpush1.bf16.msra.mxu1 %v9337_v27  ;;  %v9334_v56 = vld [vmem:[#allocation2 + $0xe0] ss:$36 sps:$4 sm:$0xff]   ;;  %v9342_v57 = vld [vmem:[#allocation2 + $0x12c] ss:$36 sps:$4 sm:$0xff]   ;;  %v9348_v61 = vld [vmem:[#allocation2 + $0x174] ss:$36 sps:$4 sm:$0xff]  }
  0x28   :  { %1433 = vmatprep.subr.bf16.mxu1 %v9338_v28  ;;  %v9340_v60 = vld [vmem:[#allocation2 + $0x128] ss:$36 sps:$4 sm:$0xff]   ;;  %v9346_v62 = vld [vmem:[#allocation2 + $0x170] ss:$36 sps:$4 sm:$0xff]   ;;  %v9354_v63 = vld [vmem:[#allocation2 + $0x1bc] ss:$36 sps:$4 sm:$0xff]  }
  0x29   :  { %775 = vmatpush1.bf16.msra.mxu0 %v9283_v12  ;;  %v9313_v0 = vld [vmem:[%s14027_s0 + $0x30] ss:$8 sps:$4 sm:$0xff]   ;;  %v9360_v2 = vld [vmem:[#allocation2 + $0x204] ss:$36 sps:$4 sm:$0xff]   ;;  %v9378_v9 = vld [vmem:[#allocation2 + $0x2dc] ss:$36 sps:$4 sm:$0xff]  }
  0x2a   :  { %776 = vmatprep.subr.bf16.mxu0 %v9284_v13  ;;  %v9352_v1 = vld [vmem:[#allocation2 + $0x1b8] ss:$36 sps:$4 sm:$0xff]   ;;  %v9358_v3 = vld [vmem:[#allocation2 + $0x200] ss:$36 sps:$4 sm:$0xff]   ;;  %v9366_v4 = vld [vmem:[#allocation2 + $0x24c] ss:$36 sps:$4 sm:$0xff]  }
  0x2b   :  { %1434 = vmatpush1.bf16.msra.mxu1 %v9343_v31  ;;  %v9364_v5 = vld [vmem:[#allocation2 + $0x248] ss:$36 sps:$4 sm:$0xff]   ;;  %v9372_v6 = vld [vmem:[#allocation2 + $0x294] ss:$36 sps:$4 sm:$0xff]   ;;  %v9380_v12 = vld [vmem:[#allocation2 + $0x31c] ss:$36 sps:$4 sm:$0xff]  }
  0x2c   :  { %1435 = vmatprep.subr.bf16.mxu1 %v9344_v32  ;;  %v9370_v7 = vld [vmem:[#allocation2 + $0x290] ss:$36 sps:$4 sm:$0xff]   ;;  %v9376_v10 = vld [vmem:[#allocation2 + $0x2d8] ss:$36 sps:$4 sm:$0xff]   ;;  %v9384_v13 = vld [vmem:[#allocation2 + $0x324] ss:$36 sps:$4 sm:$0xff]  }
  0x2d   :  { %777 = vmatpush1.bf16.msra.mxu0 %v9286_v15  ;;  %v9374_v8 = vld [vmem:[#allocation2 + $0x2d4] ss:$36 sps:$4 sm:$0xff]   ;;  %v9382_v14 = vld [vmem:[#allocation2 + $0x320] ss:$36 sps:$4 sm:$0xff]   ;;  %v14050_v18 = vmov 0   ;;  %vm13897_vm1 = vmpackc.low %vm751_vm0, %vm751_vm0  ;;  %s10438_s2 = smov [#allocation5]  }
  0x2e   :  { %778 = vmatprep.subr.bf16.mxu0 %v9287_v16  ;;  %v9379_v11 = vld [vmem:[#allocation2 + $0x2d0] ss:$36 sps:$4 sm:$0xff]   ;;  %v9385_v15 = vld [vmem:[#allocation2 + $0x318] ss:$36 sps:$4 sm:$0xff]   ;;  %9265 = vset.pattern.permute.xlu0 %v14050_v18  ;;  %v581_v23 = vld [vmem:[%s14032_s5] sm:$0xff]  ;;  %s8228_s19 = sshll.u32 %s10438_s2, 4  ;;  %s8229_s19 = int_to_ptr.vmem [resolvable:$true] %s8228_s19 }
  0x2f   :  { %1436 = vmatpush1.bf16.msra.mxu1 %v9349_v35  ;;  %v9388_v16 = vld [vmem:[#allocation2 + $0x14] ss:$36 sps:$4 sm:$0xff]   ;;  %v9391_v17 = vld [vmem:[#allocation2 + $0x1c] ss:$36 sps:$4 sm:$0xff]   ;;  %vm8220_vm3 = vcmask 8192   ;;  %s10410_s20 = scalar_lea.vmem %s8229_s19, 32  ;;  %p10411_p9 = scmp.lt.s32.totalorder %s8229_s19, %s8229_s19 }
  0x30   :  { %1437 = vmatprep.subr.bf16.mxu1 %v9350_v36 }
  0x31   :  { %779 = vmatpush1.bf16.msra.mxu0 %v9289_v19  ;;  %v587_v19 = vlaneseq }
  0x32   :  { %780 = vmatprep.subr.bf16.mxu0 %v9290_v22  ;;  %v582_v22 = vld [vmem:[%s14032_s5 + $0x8] sm:$0xff] }
  0x33   :  { %1438 = vmatpush1.bf16.msra.mxu1 %v9355_v41  ;;  %v10587_v20 = vshrl.u32 %v587_v19, 7  ;;  %v9389_v41 = vld [vmem:[#allocation2 + $0x18] ss:$36 sps:$4 sm:$0xff]  }
  0x34   :  { %1439 = vmatprep.subr.bf16.mxu1 %v9356_v42 }
  0x35   :  { %781 = vmatpush1.bf16.msra.mxu0 %v9292_v25  ;;  %v10590_v21 = vsub.s32 0, %v10587_v20 }
  0x36   :  { %782 = vmatprep.subr.bf16.mxu0 %v9293_v26 }
  0x37   :  { %1440 = vmatpush1.bf16.msra.mxu1 %v9361_v45  ;;  %v10599_v24 = vrot.slane %v582_v22, %v10590_v21  ;;  %v10602_v25 = vrot.slane %v581_v23, %v10590_v21  ;;  %v9394_v45 = vld [vmem:[#allocation2 + $0x5c] ss:$36 sps:$4 sm:$0xff]  }
  0x38   :  { %1441 = vmatprep.subr.bf16.mxu1 %v9362_v46  ;;  %v9397_v46 = vld [vmem:[#allocation2 + $0x64] ss:$36 sps:$4 sm:$0xff]  }
  0x39   :  { %783 = vmatpush1.bf16.msra.mxu0 %v9295_v29 }
  0x3a   :  { %784 = vmatprep.subr.bf16.mxu0 %v9296_v30 }
  0x3b   :  { %1442 = vmatpush1.bf16.msra.mxu1 %v9367_v49 }
  0x3c   :  { %1443 = vmatprep.subr.bf16.mxu1 %v9368_v51 }
  0x3d   :  { %785 = vmatpush1.bf16.msra.mxu0 %v9298_v33 }
  0x3e   :  { %786 = vmatprep.subr.bf16.mxu0 %v9299_v34 }
  0x3f   :  { %1444 = vmatpush1.bf16.msra.mxu1 %v9373_v55  ;;  %v9395_v55 = vld [vmem:[#allocation2 + $0x60] ss:$36 sps:$4 sm:$0xff]  }
  0x40   :  { %1445 = vmatprep.subr.bf16.mxu1 %v9374_v8 }
  0x41   :  { %787 = vmatpush1.bf16.msra.mxu0 %v9301_v37 }
  0x42   :  { %1498 = vmatprep.subr.bf16.mxu0 %v9318_v39 }
  0x43   :  { %1446 = vmatpush1.bf16.msra.mxu1 %v9379_v11 }
  0x44   :  { %797 = vmatmul.mubr.bf16.vlgmr.msra.gmra.mrb[0].mxu0 %v9302_v38  ;;  %1447 = vmatprep.subr.bf16.mxu1 %v9380_v12  ;;  %v9404_v12 = vld [vmem:[#allocation2 + $0xe8] ss:$36 sps:$4 sm:$0xff]  }
  0x45   :  { %8270 = vmatprep.mubr.msk.bf16.mxu0 %vm751_vm0, %v9305_v40  ;;  %1499 = vmatpush1.bf16.msra.mxu0 %v9316_v43  ;;  %v9386_v40 = vld [vmem:[#allocation2 + $0x10] ss:$36 sps:$4 sm:$0xff]  }
  0x46   :  { %1500 = vmatprep.subr.bf16.mxu0 %v9324_v44 }
  0x47   :  { %1448 = vmatpush1.bf16.msra.mxu1 %v9385_v15  ;;  %v9412_v15 = vld [vmem:[#allocation2 + $0x134] ss:$36 sps:$4 sm:$0xff]  }
  0x48   :  { %1571 = vmatprep.subr.bf16.mxu1 %v9388_v16  ;;  %v9415_v16 = vld [vmem:[#allocation2 + $0x13c] ss:$36 sps:$4 sm:$0xff]  }
  0x49   :  { %1501 = vmatpush1.bf16.msra.mxu0 %v9322_v47 }
  0x4a   :  { %1502 = vmatprep.subr.bf16.mxu0 %v9330_v48 }
  0x4c   :  { %807 = vmatmul.mubr.bf16.gmra.mrb[4].mxu0 %v9307_v50 }
  0x4d   :  { %8271 = vmatprep.mubr.msk.bf16.mxu0 %vm751_vm0, %v9308_v52  ;;  %1503 = vmatpush1.bf16.msra.mxu0 %v9328_v53 }
  0x4e   :  { %1504 = vmatprep.subr.bf16.mxu0 %v9336_v54  ;;  %v9392_v54 = vld [vmem:[#allocation2 + $0x58] ss:$36 sps:$4 sm:$0xff]  }
  0x51   :  { %1505 = vmatpush1.bf16.msra.mxu0 %v9334_v56 }
  0x52   :  { %1506 = vmatprep.subr.bf16.mxu0 %v9342_v57  ;;  %v9400_v57 = vld [vmem:[#allocation2 + $0xa4] ss:$36 sps:$4 sm:$0xff]  }
  0x54   :  { %817 = vmatmul.mubr.bf16.gmra.mrb[8].mxu0 %v9310_v58  ;;  %v9403_v58 = vld [vmem:[#allocation2 + $0xac] ss:$36 sps:$4 sm:$0xff]  }
  0x55   :  { %8272 = vmatprep.mubr.msk.bf16.mxu0 %vm751_vm0, %v9311_v59  ;;  %1507 = vmatpush1.bf16.msra.mxu0 %v9340_v60 }
  0x56   :  { %1508 = vmatprep.subr.bf16.mxu0 %v9348_v61 }
  0x59   :  { %1509 = vmatpush1.bf16.msra.mxu0 %v9346_v62 }
  0x5a   :  { %1510 = vmatprep.subr.bf16.mxu0 %v9354_v63  ;;  %v9398_v63 = vld [vmem:[#allocation2 + $0xa0] ss:$36 sps:$4 sm:$0xff]  }
  0x5c   :  { %827 = vmatmul.mubr.bf16.gmra.mrb[12].mxu0 %v9313_v0  ;;  %v9401_v0 = vld [vmem:[#allocation2 + $0xa8] ss:$36 sps:$4 sm:$0xff]  }
  0x5d   :  { %1511 = vmatpush1.bf16.msra.mxu0 %v9352_v1 }
  0x5e   :  { %1512 = vmatprep.subr.bf16.mxu0 %v9360_v2 }
  0x61   :  { %1513 = vmatpush1.bf16.msra.mxu0 %v9358_v3  ;;  %v9406_v3 = vld [vmem:[#allocation2 + $0xec] ss:$36 sps:$4 sm:$0xff]  }
  0x62   :  { %1514 = vmatprep.subr.bf16.mxu0 %v9366_v4  ;;  %v9409_v4 = vld [vmem:[#allocation2 + $0xf4] ss:$36 sps:$4 sm:$0xff]  }
  0x65   :  { %1515 = vmatpush1.bf16.msra.mxu0 %v9364_v5 }
  0x66   :  { %1516 = vmatprep.subr.bf16.mxu0 %v9372_v6 }
  0x69   :  { %1517 = vmatpush1.bf16.msra.mxu0 %v9370_v7 }
  0x6a   :  { %1518 = vmatprep.subr.bf16.mxu0 %v9378_v9 }
  0x6d   :  { %1519 = vmatpush1.bf16.msra.mxu0 %v9376_v10 }
  0x6e   :  { %1520 = vmatprep.subr.bf16.mxu0 %v9384_v13  ;;  %v9407_v13 = vld [vmem:[#allocation2 + $0xf0] ss:$36 sps:$4 sm:$0xff]  }
  0x71   :  { %1521 = vmatpush1.bf16.msra.mxu0 %v9382_v14 }
  0x72   :  { %1644 = vmatprep.subr.bf16.mxu0 %v9391_v17 }
 0x117   :  { %v798_v26 = vpop.f32.mrb[0].mxu0 }
 0x118   :  { %v800_v27 = vpop.f32.mrb[1].mxu0  ;;  %v10608_v30 = vadd.f32 %v798_v26, %v10602_v25  ;;  %v9410_v26 = vld [vmem:[#allocation2 + $0x130] ss:$36 sps:$4 sm:$0xff]  }
 0x119   :  { %v10605_v28 = vadd.f32 %v800_v27, %v10599_v24  ;;  %v802_v29 = vpop.f32.mrb[2].mxu0  ;;  %v9413_v27 = vld [vmem:[#allocation2 + $0x138] ss:$36 sps:$4 sm:$0xff]  }
 0x11a   :  { %v10611_v31 = vadd.f32 %v802_v29, %v10602_v25  ;;  %v804_v32 = vpop.f32.mrb[3].mxu0  ;;  %v14048_v37 = vmax.f32 %v10608_v30, 0.0 }
 0x11b   :  { %v10614_v33 = vadd.f32 %v804_v32, %v10599_v24  ;;  %v14049_v35 = vmax.f32 %v10605_v28, 0.0 }
 0x11c   :  { %v14046_v34 = vmax.f32 %v10611_v31, 0.0 }
 0x11d   :  { %v14047_v36 = vmax.f32 %v10614_v33, 0.0 }
 0x11e   :  { %v10630_v42 = vpack.c.bf16 %v14046_v34, %v14048_v37 }
 0x11f   :  { %v10624_v38 = vpack.c.bf16 %v14047_v36, %v14049_v35  ;;  %v808_v39 = vpop.f32.mrb[4].mxu0 }
 0x120   :  { %v10633_v43 = vadd.f32 %v808_v39, %v10602_v25  ;;  %v810_v44 = vpop.f32.mrb[5].mxu0  ;;  %v9418_v39 = vld [vmem:[#allocation2 + $0x17c] ss:$36 sps:$4 sm:$0xff]  }
 0x121   :  { %v10636_v47 = vadd.f32 %v810_v44, %v10599_v24  ;;  %v812_v48 = vpop.f32.mrb[6].mxu0  ;;  %8381 = vmatprep.mubr.msk.bf16.mxu1 %vm751_vm0, %v10624_v38  ;;  %8385 = vmatprep.mubr.msk.bf16.mxu0 %vm751_vm0, %v10624_v38 }
 0x122   :  { %v14044_v49 = vmax.f32 %v10633_v43, 0.0  ;;  %v10644_v50 = vadd.f32 %v812_v48, %v10602_v25  ;;  %v814_v51 = vpop.f32.mrb[7].mxu0  ;;  %1458 = vmatmul.mubr.bf16.vlgmr.msra.gmra.mrb[0].mxu1 %v10630_v42  ;;  %1531 = vmatmul.mubr.bf16.vlgmr.msra.gmra.mrb[16].mxu0 %v10630_v42 }
 0x123   :  { %v14045_v52 = vmax.f32 %v10636_v47, 0.0  ;;  %v10650_v53 = vadd.f32 %v814_v51, %v10599_v24  ;;  %1572 = vmatpush1.bf16.msra.mxu1 %v9386_v40  ;;  %1645 = vmatpush1.bf16.msra.mxu0 %v9389_v41  ;;  %v9421_v40 = vld [vmem:[#allocation2 + $0x184] ss:$36 sps:$4 sm:$0xff]  }
 0x124   :  { %v14042_v56 = vmax.f32 %v10644_v50, 0.0  ;;  %1573 = vmatprep.subr.bf16.mxu1 %v9394_v45  ;;  %1646 = vmatprep.subr.bf16.mxu0 %v9397_v46 }
 0x125   :  { %v14043_v59 = vmax.f32 %v10650_v53, 0.0 }
 0x126   :  { %v10658_v60 = vpack.c.bf16 %v14042_v56, %v14044_v49 }
 0x127   :  { %v10664_v61 = vpack.c.bf16 %v14043_v59, %v14045_v52  ;;  %1574 = vmatpush1.bf16.msra.mxu1 %v9392_v54  ;;  %1647 = vmatpush1.bf16.msra.mxu0 %v9395_v55  ;;  %v818_v62 = vpop.f32.mrb[8].mxu0  ;;  %v9416_v55 = vld [vmem:[#allocation2 + $0x178] ss:$36 sps:$4 sm:$0xff]  }
 0x128   :  { %v10667_v1 = vadd.f32 %v818_v62, %v10602_v25  ;;  %v820_v2 = vpop.f32.mrb[9].mxu0  ;;  %1575 = vmatprep.subr.bf16.mxu1 %v9400_v57  ;;  %1648 = vmatprep.subr.bf16.mxu0 %v9403_v58  ;;  %v9419_v57 = vld [vmem:[#allocation2 + $0x180] ss:$36 sps:$4 sm:$0xff]   ;;  %v9427_v62 = vld [vmem:[#allocation2 + $0x1cc] ss:$36 sps:$4 sm:$0xff]  }
 0x129   :  { %v10670_v5 = vadd.f32 %v820_v2, %v10599_v24  ;;  %v822_v6 = vpop.f32.mrb[10].mxu0  ;;  %8382 = vmatprep.mubr.msk.bf16.mxu1 %vm751_vm0, %v10664_v61  ;;  %8386 = vmatprep.mubr.msk.bf16.mxu0 %vm751_vm0, %v10664_v61  ;;  %v9422_v2 = vld [vmem:[#allocation2 + $0x1c0] ss:$36 sps:$4 sm:$0xff]  }
 0x12a   :  { %v14040_v7 = vmax.f32 %v10667_v1, 0.0  ;;  %v10678_v8 = vadd.f32 %v822_v6, %v10602_v25  ;;  %v824_v9 = vpop.f32.mrb[11].mxu0  ;;  %1468 = vmatmul.mubr.bf16.gmra.mrb[4].mxu1 %v10658_v60  ;;  %1541 = vmatmul.mubr.bf16.gmra.mrb[20].mxu0 %v10658_v60  ;;  %v9433_v6 = vld [vmem:[#allocation2 + $0x214] ss:$36 sps:$4 sm:$0xff]  }
 0x12b   :  { %v14041_v10 = vmax.f32 %v10670_v5, 0.0  ;;  %v10684_v11 = vadd.f32 %v824_v9, %v10599_v24  ;;  %1576 = vmatpush1.bf16.msra.mxu1 %v9398_v63  ;;  %1649 = vmatpush1.bf16.msra.mxu0 %v9401_v0  ;;  %v9428_v9 = vld [vmem:[#allocation2 + $0x208] ss:$36 sps:$4 sm:$0xff]  }
 0x12c   :  { %v14038_v14 = vmax.f32 %v10678_v8, 0.0  ;;  %1577 = vmatprep.subr.bf16.mxu1 %v9406_v3  ;;  %1650 = vmatprep.subr.bf16.mxu0 %v9409_v4  ;;  %v9425_v3 = vld [vmem:[#allocation2 + $0x1c8] ss:$36 sps:$4 sm:$0xff]  }
 0x12d   :  { %v14039_v17 = vmax.f32 %v10684_v11, 0.0  ;;  %v9430_v4 = vld [vmem:[#allocation2 + $0x20c] ss:$36 sps:$4 sm:$0xff]  }
 0x12e   :  { %v10692_v19 = vpack.c.bf16 %v14038_v14, %v14040_v7 }
 0x12f   :  { %v10698_v22 = vpack.c.bf16 %v14039_v17, %v14041_v10  ;;  %1578 = vmatpush1.bf16.msra.mxu1 %v9404_v12  ;;  %1651 = vmatpush1.bf16.msra.mxu0 %v9407_v13  ;;  %v828_v23 = vpop.f32.mrb[12].mxu0  ;;  %v9431_v12 = vld [vmem:[#allocation2 + $0x210] ss:$36 sps:$4 sm:$0xff]  }
 0x130   :  { %v10701_v29 = vadd.f32 %v828_v23, %v10602_v25  ;;  %v830_v32 = vpop.f32.mrb[13].mxu0  ;;  %1579 = vmatprep.subr.bf16.mxu1 %v9412_v15  ;;  %1652 = vmatprep.subr.bf16.mxu0 %v9415_v16  ;;  %v9436_v13 = vld [vmem:[#allocation2 + $0x254] ss:$36 sps:$4 sm:$0xff]   ;;  %v9439_v15 = vld [vmem:[#allocation2 + $0x25c] ss:$36 sps:$4 sm:$0xff]  }
 0x131   :  { %v10704_v41 = vadd.f32 %v830_v32, %v10599_v24  ;;  %v832_v44 = vpop.f32.mrb[14].mxu0  ;;  %8383 = vmatprep.mubr.msk.bf16.mxu1 %vm751_vm0, %v10698_v22  ;;  %8387 = vmatprep.mubr.msk.bf16.mxu0 %vm751_vm0, %v10698_v22  ;;  %v9434_v16 = vld [vmem:[#allocation2 + $0x250] ss:$36 sps:$4 sm:$0xff]   ;;  %v9437_v23 = vld [vmem:[#allocation2 + $0x258] ss:$36 sps:$4 sm:$0xff]  }
 0x132   :  { %v14036_v45 = vmax.f32 %v10701_v29, 0.0  ;;  %v10712_v46 = vadd.f32 %v832_v44, %v10602_v25  ;;  %v834_v48 = vpop.f32.mrb[15].mxu0  ;;  %1478 = vmatmul.mubr.bf16.gmra.mrb[8].mxu1 %v10692_v19  ;;  %1551 = vmatmul.mubr.bf16.gmra.mrb[24].mxu0 %v10692_v19  ;;  %v9424_v25 = vld [vmem:[#allocation2 + $0x1c4] ss:$36 sps:$4 sm:$0xff]   ;;  %v9440_v32 = vld [vmem:[#allocation2 + $0x298] ss:$36 sps:$4 sm:$0xff]  }
 0x133   :  { %v14037_v51 = vmax.f32 %v10704_v41, 0.0  ;;  %v10718_v54 = vadd.f32 %v834_v48, %v10599_v24  ;;  %1580 = vmatpush1.bf16.msra.mxu1 %v9410_v26  ;;  %1653 = vmatpush1.bf16.msra.mxu0 %v9413_v27  ;;  %v9442_v26 = vld [vmem:[#allocation2 + $0x29c] ss:$36 sps:$4 sm:$0xff]   ;;  %v9445_v27 = vld [vmem:[#allocation2 + $0x2a4] ss:$36 sps:$4 sm:$0xff]  }
 0x134   :  { %v14034_v58 = vmax.f32 %v10712_v46, 0.0  ;;  %1581 = vmatprep.subr.bf16.mxu1 %v9418_v39  ;;  %1654 = vmatprep.subr.bf16.mxu0 %v9421_v40  ;;  %v9443_v39 = vld [vmem:[#allocation2 + $0x2a0] ss:$36 sps:$4 sm:$0xff]   ;;  %v9451_v44 = vld [vmem:[#allocation2 + $0x2ec] ss:$36 sps:$4 sm:$0xff]  }
 0x135   :  { %v14035_v63 = vmax.f32 %v10718_v54, 0.0  ;;  %v9448_v40 = vld [vmem:[#allocation2 + $0x2e4] ss:$36 sps:$4 sm:$0xff]  }
 0x136   :  { %v10726_v0 = vpack.c.bf16 %v14034_v58, %v14036_v45  ;;  %v9446_v48 = vld [vmem:[#allocation2 + $0x2e0] ss:$36 sps:$4 sm:$0xff]  }
 0x137   :  { %v10732_v24 = vpack.c.bf16 %v14035_v63, %v14037_v51  ;;  %1582 = vmatpush1.bf16.msra.mxu1 %v9416_v55  ;;  %1655 = vmatpush1.bf16.msra.mxu0 %v9419_v57  ;;  %v9449_v55 = vld [vmem:[#allocation2 + $0x2e8] ss:$36 sps:$4 sm:$0xff]  }
 0x138   :  { %1583 = vmatprep.subr.bf16.mxu1 %v9424_v25  ;;  %1656 = vmatprep.subr.bf16.mxu0 %v9427_v62  ;;  %v9454_v57 = vld [vmem:[#allocation2 + $0x32c] ss:$36 sps:$4 sm:$0xff]   ;;  %v9457_v25 = vld [vmem:[#allocation2 + $0x334] ss:$36 sps:$4 sm:$0xff]  }
 0x139   :  { %8384 = vmatprep.mubr.msk.bf16.mxu1 %vm751_vm0, %v10732_v24  ;;  %8388 = vmatprep.mubr.msk.bf16.mxu0 %vm751_vm0, %v10732_v24  ;;  %v9452_v62 = vld [vmem:[#allocation2 + $0x328] ss:$36 sps:$4 sm:$0xff]  }
 0x13a   :  { %1488 = vmatmul.mubr.bf16.gmra.mrb[12].mxu1 %v10726_v0  ;;  %1561 = vmatmul.mubr.bf16.gmra.mrb[28].mxu0 %v10726_v0 }
 0x13b   :  { %1584 = vmatpush1.bf16.msra.mxu1 %v9422_v2  ;;  %1657 = vmatpush1.bf16.msra.mxu0 %v9425_v3  ;;  %v9455_v2 = vld [vmem:[#allocation2 + $0x330] ss:$36 sps:$4 sm:$0xff]   ;;  %v9458_v3 = vld [vmem:[#allocation2 + $0x20] ss:$36 sps:$4 sm:$0xff]  }
 0x13c   :  { %8389 = vmatprep.mubr.msk.bf16.mxu1 %vm751_vm0, %v10624_v38  ;;  %8393 = vmatprep.mubr.msk.bf16.mxu0 %vm751_vm0, %v10624_v38 }
 0x13d   :  { %1585 = vmatprep.subr.bf16.mxu1 %v9430_v4  ;;  %1658 = vmatprep.subr.bf16.mxu0 %v9433_v6  ;;  %v9459_v4 = vld [vmem:[#allocation2 + $0x68] ss:$36 sps:$4 sm:$0xff]   ;;  %v9460_v6 = vld [vmem:[#allocation2 + $0xb0] ss:$36 sps:$4 sm:$0xff]  }
 0x13f   :  { %1586 = vmatpush1.bf16.msra.mxu1 %v9428_v9  ;;  %1659 = vmatpush1.bf16.msra.mxu0 %v9431_v12  ;;  %v9461_v9 = vld [vmem:[#allocation2 + $0xf8] ss:$36 sps:$4 sm:$0xff]   ;;  %v9462_v12 = vld [vmem:[#allocation2 + $0x140] ss:$36 sps:$4 sm:$0xff]  }
 0x140   :  { %1587 = vmatprep.subr.bf16.mxu1 %v9436_v13  ;;  %1660 = vmatprep.subr.bf16.mxu0 %v9439_v15  ;;  %v9463_v13 = vld [vmem:[#allocation2 + $0x188] ss:$36 sps:$4 sm:$0xff]   ;;  %v9464_v15 = vld [vmem:[#allocation2 + $0x1d0] ss:$36 sps:$4 sm:$0xff]  }
 0x143   :  { %1588 = vmatpush1.bf16.msra.mxu1 %v9434_v16  ;;  %1661 = vmatpush1.bf16.msra.mxu0 %v9437_v23  ;;  %v9465_v16 = vld [vmem:[#allocation2 + $0x218] ss:$36 sps:$4 sm:$0xff]   ;;  %v9466_v23 = vld [vmem:[#allocation2 + $0x260] ss:$36 sps:$4 sm:$0xff]  }
 0x144   :  { %1589 = vmatprep.subr.bf16.mxu1 %v9442_v26  ;;  %1662 = vmatprep.subr.bf16.mxu0 %v9445_v27  ;;  %v9467_v26 = vld [vmem:[#allocation2 + $0x2a8] ss:$36 sps:$4 sm:$0xff]   ;;  %v9468_v27 = vld [vmem:[#allocation2 + $0x2f0] ss:$36 sps:$4 sm:$0xff]  }
 0x147   :  { %1590 = vmatpush1.bf16.msra.mxu1 %v9440_v32  ;;  %1663 = vmatpush1.bf16.msra.mxu0 %v9443_v39  ;;  %v9469_v32 = vld [vmem:[#allocation2 + $0x338] ss:$36 sps:$4 sm:$0xff]  }
 0x148   :  { %1591 = vmatprep.subr.bf16.mxu1 %v9448_v40  ;;  %1664 = vmatprep.subr.bf16.mxu0 %v9451_v44 }
 0x14b   :  { %1592 = vmatpush1.bf16.msra.mxu1 %v9446_v48  ;;  %1665 = vmatpush1.bf16.msra.mxu0 %v9449_v55 }
 0x14c   :  { %1593 = vmatprep.subr.bf16.mxu1 %v9454_v57  ;;  %1666 = vmatprep.subr.bf16.mxu0 %v9457_v25 }
 0x14f   :  { %1594 = vmatpush1.bf16.msra.mxu1 %v9452_v62  ;;  %1667 = vmatpush1.bf16.msra.mxu0 %v9455_v2 }
 0x150   :  { %1717 = vmatprep.subr.bf16.mxu1 %v14050_v18 }
 0x152   :  { %1604 = vmatmul.mubr.bf16.vlgmr.msra.gmra.mrb[16].mxu1 %v10630_v42  ;;  %1677 = vmatmul.mubr.bf16.vlgmr.msra.gmra.mrb[32].mxu0 %v10630_v42 }
 0x153   :  { %8390 = vmatprep.mubr.msk.bf16.mxu1 %vm751_vm0, %v10664_v61  ;;  %8394 = vmatprep.mubr.msk.bf16.mxu0 %vm751_vm0, %v10664_v61 }
 0x154   :  { %1718 = vmatpush1.bf16.msra.mxu1 %v9458_v3 }
 0x155   :  { %1719 = vmatprep.subr.bf16.mxu1 %v14050_v18 }
 0x158   :  { %1720 = vmatpush1.bf16.msra.mxu1 %v9459_v4 }
 0x159   :  { %1721 = vmatprep.subr.bf16.mxu1 %v14050_v18 }
 0x15a   :  { %1614 = vmatmul.mubr.bf16.gmra.mrb[20].mxu1 %v10658_v60  ;;  %1687 = vmatmul.mubr.bf16.gmra.mrb[36].mxu0 %v10658_v60 }
 0x15b   :  { %8391 = vmatprep.mubr.msk.bf16.mxu1 %vm751_vm0, %v10698_v22  ;;  %8395 = vmatprep.mubr.msk.bf16.mxu0 %vm751_vm0, %v10698_v22 }
 0x15c   :  { %1722 = vmatpush1.bf16.msra.mxu1 %v9460_v6 }
 0x15d   :  { %1723 = vmatprep.subr.bf16.mxu1 %v14050_v18 }
 0x160   :  { %1724 = vmatpush1.bf16.msra.mxu1 %v9461_v9 }
 0x161   :  { %1725 = vmatprep.subr.bf16.mxu1 %v14050_v18 }
 0x162   :  { %1624 = vmatmul.mubr.bf16.gmra.mrb[24].mxu1 %v10692_v19  ;;  %1697 = vmatmul.mubr.bf16.gmra.mrb[40].mxu0 %v10692_v19 }
 0x163   :  { %8392 = vmatprep.mubr.msk.bf16.mxu1 %vm751_vm0, %v10732_v24  ;;  %8396 = vmatprep.mubr.msk.bf16.mxu0 %vm751_vm0, %v10732_v24 }
 0x164   :  { %1726 = vmatpush1.bf16.msra.mxu1 %v9462_v12 }
 0x165   :  { %1727 = vmatprep.subr.bf16.mxu1 %v14050_v18 }
 0x168   :  { %1728 = vmatpush1.bf16.msra.mxu1 %v9463_v13 }
 0x169   :  { %1729 = vmatprep.subr.bf16.mxu1 %v14050_v18 }
 0x16a   :  { %1634 = vmatmul.mubr.bf16.gmra.mrb[28].mxu1 %v10726_v0  ;;  %1707 = vmatmul.mubr.bf16.gmra.mrb[44].mxu0 %v10726_v0 }
 0x16b   :  { %8397 = vmatprep.mubr.msk.bf16.mxu1 %vm751_vm0, %v10624_v38  ;;  %v10789_v38 = vsub.s32 2, %v10587_v20 }
 0x16c   :  { %1730 = vmatpush1.bf16.msra.mxu1 %v9464_v15 }
 0x16d   :  { %1731 = vmatprep.subr.bf16.mxu1 %v14050_v18 }
 0x170   :  { %1732 = vmatpush1.bf16.msra.mxu1 %v9465_v16 }
 0x171   :  { %1733 = vmatprep.subr.bf16.mxu1 %v14050_v18 }
 0x174   :  { %1734 = vmatpush1.bf16.msra.mxu1 %v9466_v23 }
 0x175   :  { %1735 = vmatprep.subr.bf16.mxu1 %v14050_v18 }
 0x178   :  { %1736 = vmatpush1.bf16.msra.mxu1 %v9467_v26 }
 0x179   :  { %1737 = vmatprep.subr.bf16.mxu1 %v14050_v18 }
 0x17c   :  { %1738 = vmatpush1.bf16.msra.mxu1 %v9468_v27 }
 0x17d   :  { %1739 = vmatprep.subr.bf16.mxu1 %v14050_v18 }
 0x180   :  { %1740 = vmatpush1.bf16.msra.mxu1 %v9469_v32 }
 0x183   :  { %1750 = vmatmul.mubr.bf16.vlgmr.msra.gmra.mrb[32].mxu1 %v10630_v42  ;;  %v575_v42 = vld [vmem:[%s14031_s4] sm:$0x7] }
 0x184   :  { %8398 = vmatprep.mubr.msk.bf16.mxu1 %vm751_vm0, %v10664_v61  ;;  %v10795_v61 = vsub.s32 1, %v10587_v20 }
 0x186   :  { %14064 = vst [vmem:[#allocation8_spill] sm:$0xff] %v10795_v61 }
 0x18b   :  { %1758 = vmatmul.mubr.bf16.gmra.mrb[36].mxu1 %v10658_v60  ;;  %v10798_v60 = vrot.slane %v575_v42, %v10590_v21 }
 0x18c   :  { %8399 = vmatprep.mubr.msk.bf16.mxu1 %vm751_vm0, %v10698_v22  ;;  %v10806_v22 = vld [vmem:[%s14031_s4 + $0x4] sm:$0x7] }
 0x18d   :  { %v10813_v40 = vrot.slane %v10806_v22, %v10590_v21 }
 0x193   :  { %1766 = vmatmul.mubr.bf16.gmra.mrb[40].mxu1 %v10692_v19  ;;  %v10801_v19 = vrot.slane %v575_v42, %v10789_v38 }
 0x194   :  { %8400 = vmatprep.mubr.msk.bf16.mxu1 %vm751_vm0, %v10732_v24 }
 0x19b   :  { %1774 = vmatmul.mubr.bf16.gmra.mrb[44].mxu1 %v10726_v0  ;;  %v10809_v0 = vrot.slane %v575_v42, %v10795_v61 }
 0x1f5   :  { %v1459_v24 = vpop.f32.mrb[0].mxu1  ;;  %v1532_v39 = vpop.f32.mrb[16].mxu0 }
 0x1f6   :  { %v1882_v44 = vadd.f32 %v10798_v60, %v1459_v24  ;;  %v2712_v48 = vadd.f32 %v10801_v19, %v1532_v39  ;;  %v1461_v55 = vpop.f32.mrb[1].mxu1  ;;  %v1534_v57 = vpop.f32.mrb[17].mxu0 }
 0x1f7   :  { %v2144_v25 = vadd.f32 %v10809_v0, %v1461_v55  ;;  %v1463_v62 = vpop.f32.mrb[2].mxu1  ;;  %v1536_v2 = vpop.f32.mrb[18].mxu0  ;;  %v1786_v12 = vadd.f32 %v10813_v40, %v1534_v57 }
 0x1f8   :  { %v1883_v3 = vadd.f32 %v10798_v60, %v1463_v62  ;;  %v2713_v4 = vadd.f32 %v10801_v19, %v1536_v2  ;;  %v1465_v6 = vpop.f32.mrb[3].mxu1  ;;  %v1538_v9 = vpop.f32.mrb[19].mxu0  ;;  %v1890_v16 = vmul.f32 0.125, %v1882_v44  ;;  %v10823_v23 = vmul.f32 0.125, %v2712_v48 }
 0x1f9   :  { %v2145_v13 = vadd.f32 %v10809_v0, %v1465_v6  ;;  %v1787_v15 = vadd.f32 %v10813_v40, %v1538_v9  ;;  %v2152_v32 = vmul.f32 0.125, %v2144_v25 }
 0x1fa   :  { %v1891_v26 = vmul.f32 0.125, %v1883_v3  ;;  %v10825_v27 = vmul.f32 0.125, %v2713_v4 }
 0x1fb   :  { %v2153_v42 = vmul.f32 0.125, %v2145_v13  ;;  %v1806_v24 = vpack.c.bf16 %v1787_v15, %v1786_v12 }
 0x1fc   :  { %v1898_v39 = vpack.c.bf16 %v1891_v26, %v1890_v16 }
 0x1fd   :  { %v2160_v62 = vpack.c.bf16 %v2153_v42, %v2152_v32  ;;  %v1542_v2 = vpop.f32.mrb[20].mxu0  ;;  %8966 = vmatprep.subr.bf16.mxu1 %v1806_v24  ;;  %v1469_v57 = vpop.f32.mrb[4].mxu1 }
 0x1fe   :  { %v2714_v6 = vadd.f32 %v10801_v19, %v1542_v2  ;;  %v1544_v9 = vpop.f32.mrb[21].mxu0  ;;  %8967 = vmatpush3.bf16.xpose.msra.mxu1 %v1806_v24  ;;  %8974 = vmatprep.mubr.bf16.mxu1 %v1898_v39  ;;  %v1884_v44 = vadd.f32 %v10798_v60, %v1469_v57  ;;  %v1471_v48 = vpop.f32.mrb[5].mxu1 }
 0x1ff   :  { %v1788_v25 = vadd.f32 %v10813_v40, %v1544_v9  ;;  %v1546_v3 = vpop.f32.mrb[22].mxu0  ;;  %9006 = vmatprep.mubr.bf16.mxu0 %v2160_v62  ;;  %v2146_v4 = vadd.f32 %v10809_v0, %v1471_v48  ;;  %v1473_v12 = vpop.f32.mrb[6].mxu1 }
 0x200   :  { %v10833_v13 = vmul.f32 0.125, %v2714_v6  ;;  %v2715_v15 = vadd.f32 %v10801_v19, %v1546_v3  ;;  %v1548_v16 = vpop.f32.mrb[23].mxu0  ;;  %v10836_v26 = vmul.f32 0.125, %v1884_v44  ;;  %v1885_v32 = vadd.f32 %v10798_v60, %v1473_v12  ;;  %v1475_v42 = vpop.f32.mrb[7].mxu1 }
 0x201   :  { %v1789_v24 = vadd.f32 %v10813_v40, %v1548_v16  ;;  %v10840_v39 = vmul.f32 0.125, %v2146_v4  ;;  %v2147_v2 = vadd.f32 %v10809_v0, %v1475_v42 }
 0x202   :  { %v10843_v62 = vmul.f32 0.125, %v2715_v15  ;;  %v10845_v57 = vmul.f32 0.125, %v1885_v32 }
 0x203   :  { %v1807_v6 = vpack.c.bf16 %v1789_v24, %v1788_v25  ;;  %v10847_v9 = vmul.f32 0.125, %v2147_v2 }
 0x204   :  { %v1899_v48 = vpack.c.bf16 %v10845_v57, %v10836_v26 }
 0x205   :  { %v1552_v3 = vpop.f32.mrb[24].mxu0  ;;  %8968 = vmatprep.subr.bf16.mxu1 %v1807_v6  ;;  %v1479_v12 = vpop.f32.mrb[8].mxu1 }
 0x206   :  { %v2716_v15 = vadd.f32 %v10801_v19, %v1552_v3  ;;  %v1554_v16 = vpop.f32.mrb[25].mxu0  ;;  %8969 = vmatpush3.bf16.xpose.msra.mxu1 %v1807_v6  ;;  %v1886_v25 = vadd.f32 %v10798_v60, %v1479_v12  ;;  %v1481_v32 = vpop.f32.mrb[9].mxu1 }
 0x207   :  { %v1790_v42 = vadd.f32 %v10813_v40, %v1554_v16  ;;  %v1556_v24 = vpop.f32.mrb[26].mxu0  ;;  %v2148_v2 = vadd.f32 %v10809_v0, %v1481_v32  ;;  %v1483_v58 = vpop.f32.mrb[10].mxu1 }
 0x208   :  { %v10859_v26 = vmul.f32 0.125, %v2716_v15  ;;  %v2717_v57 = vadd.f32 %v10801_v19, %v1556_v24  ;;  %v1558_v63 = vpop.f32.mrb[27].mxu0  ;;  %v1894_v45 = vmul.f32 0.125, %v1886_v25  ;;  %v1887_v51 = vadd.f32 %v10798_v60, %v1483_v58  ;;  %v1485_v3 = vpop.f32.mrb[11].mxu1 }
 0x209   :  { %v1791_v6 = vadd.f32 %v10813_v40, %v1558_v63  ;;  %v10864_v14 = vmul.f32 0.125, %v2148_v2  ;;  %v2149_v12 = vadd.f32 %v10809_v0, %v1485_v3 }
 0x20a   :  { %v10867_v16 = vmul.f32 0.125, %v2717_v57  ;;  %v1895_v17 = vmul.f32 0.125, %v1887_v51 }
 0x20b   :  { %v1808_v32 = vpack.c.bf16 %v1791_v6, %v1790_v42  ;;  %v10869_v7 = vmul.f32 0.125, %v2149_v12 }
 0x20c   :  { %v1900_v24 = vpack.c.bf16 %v1895_v17, %v1894_v45 }
 0x20d   :  { %v1562_v25 = vpop.f32.mrb[28].mxu0  ;;  %8970 = vmatprep.subr.bf16.mxu1 %v1808_v32  ;;  %v1489_v63 = vpop.f32.mrb[12].mxu1 }
 0x20e   :  { %v2718_v2 = vadd.f32 %v10801_v19, %v1562_v25  ;;  %v1564_v10 = vpop.f32.mrb[29].mxu0  ;;  %8971 = vmatpush3.bf16.xpose.msra.mxu1 %v1808_v32  ;;  %v1888_v57 = vadd.f32 %v10798_v60, %v1489_v63  ;;  %v1491_v51 = vpop.f32.mrb[13].mxu1 }
 0x20f   :  { %v1792_v42 = vadd.f32 %v10813_v40, %v1564_v10  ;;  %v1566_v3 = vpop.f32.mrb[30].mxu0  ;;  %v2150_v6 = vadd.f32 %v10809_v0, %v1491_v51  ;;  %v1493_v12 = vpop.f32.mrb[14].mxu1 }
 0x210   :  { %v10879_v17 = vmul.f32 0.125, %v2718_v2  ;;  %v2719_v45 = vadd.f32 %v10801_v19, %v1566_v3  ;;  %v1568_v56 = vpop.f32.mrb[31].mxu0  ;;  %v1896_v59 = vmul.f32 0.125, %v1888_v57  ;;  %v1889_v49 = vadd.f32 %v10798_v60, %v1493_v12  ;;  %v1495_v25 = vpop.f32.mrb[15].mxu1 }
 0x211   :  { %v1793_v32 = vadd.f32 %v10813_v40, %v1568_v56  ;;  %v10884_v52 = vmul.f32 0.125, %v2150_v6  ;;  %v2151_v63 = vadd.f32 %v10809_v0, %v1495_v25  ;;  %v10898_v56 = vld [vmem:[%s14031_s4 + $0x8] sm:$0x7]  ;;  %v10906_v0 = vrot.slane %v10806_v22, %v10795_v61 }
 0x212   :  { %v10887_v10 = vmul.f32 0.125, %v2719_v45  ;;  %v1897_v34 = vmul.f32 0.125, %v1889_v49  ;;  %v10902_v49 = vrot.slane %v10806_v22, %v10789_v38 }
 0x213   :  { %v1809_v51 = vpack.c.bf16 %v1793_v32, %v1792_v42  ;;  %v10889_v36 = vmul.f32 0.125, %v2151_v63 }
 0x214   :  { %v1901_v2 = vpack.c.bf16 %v1897_v34, %v1896_v59  ;;  %v10910_v34 = vrot.slane %v10898_v56, %v10590_v21 }
 0x215   :  { %8972 = vmatprep.subr.bf16.mxu1 %v1809_v51 }
 0x216   :  { %8973 = vmatpush3.bf16.xpose.msra.mxu1 %v1809_v51 }
 0x21d   :  { %8975 = vmatmul.mubr.bf16.vlgmr.msra.gmra.mrb[48].mxu1 %v1899_v48  ;;  %v10914_v48 = vrot.slane %v10898_v56, %v10795_v61 }
 0x21e   :  { %8978 = vmatprep.mubr.bf16.mxu1 %v1900_v24 }
 0x225   :  { %v1605_v59 = vpop.f32.mrb[16].mxu1  ;;  %v1678_v40 = vpop.f32.mrb[32].mxu0  ;;  %8979 = vmatmul.mubr.bf16.gmra.mrb[52].mxu1 %v1901_v2 }
 0x226   :  { %v1607_v24 = vpop.f32.mrb[17].mxu1  ;;  %v1680_v57 = vpop.f32.mrb[33].mxu0  ;;  %v1818_v22 = vadd.f32 %v10906_v0, %v1605_v59  ;;  %v1798_v12 = vadd.f32 %v10910_v34, %v1678_v40 }
 0x227   :  { %v1850_v42 = vadd.f32 %v10902_v49, %v1607_v24  ;;  %v1609_v3 = vpop.f32.mrb[18].mxu1  ;;  %v1682_v6 = vpop.f32.mrb[34].mxu0  ;;  %v1830_v51 = vadd.f32 %v10914_v48, %v1680_v57 }
 0x228   :  { %v1819_v45 = vadd.f32 %v10906_v0, %v1609_v3  ;;  %v1799_v25 = vadd.f32 %v10910_v34, %v1682_v6  ;;  %v1611_v32 = vpop.f32.mrb[19].mxu1  ;;  %v1684_v63 = vpop.f32.mrb[35].mxu0 }
 0x229   :  { %v1851_v2 = vadd.f32 %v10902_v49, %v1611_v32  ;;  %v1831_v37 = vadd.f32 %v10914_v48, %v1684_v63 }
 0x22a   :  { %v1838_v35 = vpack.c.bf16 %v1819_v45, %v1818_v22  ;;  %v1810_v24 = vpack.c.bf16 %v1799_v25, %v1798_v12 }
 0x22b   :  { %v10924_v18 = vpack.c.bf16 %v1851_v2, %v1850_v42  ;;  %v10926_v19 = vpack.c.bf16 %v1831_v37, %v1830_v51 }
 0x22c   :  { %8982 = vmatprep.subr.bf16.mxu1 %v1810_v24  ;;  %8998 = vmatprep.subr.bf16.mxu0 %v1838_v35 }
 0x22d   :  { %v1615_v59 = vpop.f32.mrb[20].mxu1  ;;  %v1688_v40 = vpop.f32.mrb[36].mxu0  ;;  %8983 = vmatpush3.bf16.msra.mxu1 %v1810_v24  ;;  %8999 = vmatpush3.bf16.xpose.msra.mxu0 %v1838_v35 }
 0x22e   :  { %v1617_v3 = vpop.f32.mrb[21].mxu1  ;;  %v1690_v6 = vpop.f32.mrb[37].mxu0  ;;  %v1820_v22 = vadd.f32 %v10906_v0, %v1615_v59  ;;  %v1800_v42 = vadd.f32 %v10910_v34, %v1688_v40 }
 0x22f   :  { %v1852_v57 = vadd.f32 %v10902_v49, %v1617_v3  ;;  %v1832_v32 = vadd.f32 %v10914_v48, %v1690_v6  ;;  %v1619_v15 = vpop.f32.mrb[22].mxu1  ;;  %v1692_v63 = vpop.f32.mrb[38].mxu0 }
 0x230   :  { %v1821_v37 = vadd.f32 %v10906_v0, %v1619_v15  ;;  %v1801_v12 = vadd.f32 %v10910_v34, %v1692_v63  ;;  %v1621_v45 = vpop.f32.mrb[23].mxu1  ;;  %v1694_v25 = vpop.f32.mrb[39].mxu0 }
 0x231   :  { %v1853_v35 = vadd.f32 %v10902_v49, %v1621_v45  ;;  %v1833_v51 = vadd.f32 %v10914_v48, %v1694_v25 }
 0x232   :  { %v1839_v2 = vpack.c.bf16 %v1821_v37, %v1820_v22  ;;  %v1811_v24 = vpack.c.bf16 %v1801_v12, %v1800_v42 }
 0x233   :  { %v1871_v3 = vpack.c.bf16 %v1853_v35, %v1852_v57  ;;  %v10936_v6 = vpack.c.bf16 %v1833_v51, %v1832_v32 }
 0x234   :  { %8984 = vmatprep.subr.bf16.mxu1 %v1811_v24  ;;  %9000 = vmatprep.subr.bf16.mxu0 %v1839_v2 }
 0x235   :  { %v1625_v59 = vpop.f32.mrb[24].mxu1  ;;  %v1698_v44 = vpop.f32.mrb[40].mxu0  ;;  %8985 = vmatpush3.bf16.msra.mxu1 %v1811_v24  ;;  %9001 = vmatpush3.bf16.xpose.msra.mxu0 %v1839_v2 }
 0x236   :  { %v1627_v15 = vpop.f32.mrb[25].mxu1  ;;  %v1700_v40 = vpop.f32.mrb[41].mxu0  ;;  %v1822_v22 = vadd.f32 %v10906_v0, %v1625_v59  ;;  %v1802_v57 = vadd.f32 %v10910_v34, %v1698_v44 }
 0x237   :  { %v1854_v63 = vadd.f32 %v10902_v49, %v1627_v15  ;;  %v1834_v55 = vadd.f32 %v10914_v48, %v1700_v40  ;;  %v1629_v45 = vpop.f32.mrb[26].mxu1  ;;  %v1702_v60 = vpop.f32.mrb[42].mxu0 }
 0x238   :  { %v1823_v32 = vadd.f32 %v10906_v0, %v1629_v45  ;;  %v1803_v42 = vadd.f32 %v10910_v34, %v1702_v60  ;;  %v1631_v37 = vpop.f32.mrb[27].mxu1  ;;  %v1704_v12 = vpop.f32.mrb[43].mxu0 }
 0x239   :  { %v1855_v25 = vadd.f32 %v10902_v49, %v1631_v37  ;;  %v1835_v35 = vadd.f32 %v10914_v48, %v1704_v12 }
 0x23a   :  { %v1840_v51 = vpack.c.bf16 %v1823_v32, %v1822_v22  ;;  %v1812_v2 = vpack.c.bf16 %v1803_v42, %v1802_v57 }
 0x23b   :  { %v1872_v24 = vpack.c.bf16 %v1855_v25, %v1854_v63  ;;  %v10946_v15 = vpack.c.bf16 %v1835_v35, %v1834_v55 }
 0x23c   :  { %8986 = vmatprep.subr.bf16.mxu1 %v1812_v2  ;;  %9002 = vmatprep.subr.bf16.mxu0 %v1840_v51 }
 0x23d   :  { %v1635_v59 = vpop.f32.mrb[28].mxu1  ;;  %v1708_v40 = vpop.f32.mrb[44].mxu0  ;;  %8987 = vmatpush3.bf16.msra.mxu1 %v1812_v2  ;;  %9003 = vmatpush3.bf16.xpose.msra.mxu0 %v1840_v51 }
 0x23e   :  { %v1637_v44 = vpop.f32.mrb[29].mxu1  ;;  %v1710_v45 = vpop.f32.mrb[45].mxu0  ;;  %v1824_v22 = vadd.f32 %v10906_v0, %v1635_v59  ;;  %v1804_v63 = vadd.f32 %v10910_v34, %v1708_v40 }
 0x23f   :  { %v1856_v60 = vadd.f32 %v10902_v49, %v1637_v44  ;;  %v1836_v58 = vadd.f32 %v10914_v48, %v1710_v45  ;;  %v1639_v37 = vpop.f32.mrb[30].mxu1  ;;  %v1712_v4 = vpop.f32.mrb[46].mxu0 }
 0x240   :  { %v1825_v55 = vadd.f32 %v10906_v0, %v1639_v37  ;;  %v1805_v57 = vadd.f32 %v10910_v34, %v1712_v4  ;;  %v1641_v32 = vpop.f32.mrb[31].mxu1  ;;  %v1714_v42 = vpop.f32.mrb[47].mxu0  ;;  %v14065_v4 = vpack.c.bf16 %v10847_v9, %v10840_v39  ;;  %v1861_v0 = vrot.slane %v10898_v56, %v10789_v38 }
 0x241   :  { %v1857_v12 = vadd.f32 %v10902_v49, %v1641_v32  ;;  %v1837_v25 = vadd.f32 %v10914_v48, %v1714_v42  ;;  %v14066_v49 = vpack.c.bf16 %v10869_v7, %v10864_v14  ;;  %v14068_v34 = vpack.c.bf16 %v10825_v27, %v10823_v23 }
 0x242   :  { %v1841_v35 = vpack.c.bf16 %v1825_v55, %v1824_v22  ;;  %v1813_v51 = vpack.c.bf16 %v1805_v57, %v1804_v63  ;;  %v14070_v32 = vpack.c.bf16 %v10867_v16, %v10859_v26 }
 0x243   :  { %v1873_v2 = vpack.c.bf16 %v1857_v12, %v1856_v60  ;;  %v10956_v44 = vpack.c.bf16 %v1837_v25, %v1836_v58  ;;  %v14067_v58 = vpack.c.bf16 %v10889_v36, %v10884_v52 }
 0x244   :  { %8988 = vmatprep.subr.bf16.mxu1 %v1813_v51  ;;  %9004 = vmatprep.subr.bf16.mxu0 %v1841_v35 }
 0x245   :  { %8989 = vmatpush3.bf16.msra.mxu1 %v1813_v51  ;;  %9005 = vmatpush3.bf16.xpose.msra.mxu0 %v1841_v35 }
 0x246   :  { %9014 = vmatprep.subr.bf16.mxu1 %v10926_v19  ;;  %9030 = vmatprep.subr.bf16.mxu0 %v10924_v18 }
 0x24c   :  { %9007 = vmatmul.mubr.bf16.vlgmr.msra.gmra.mrb[48].mxu0 %v14065_v4 }
 0x24d   :  { %9010 = vmatprep.mubr.bf16.mxu0 %v14066_v49  ;;  %9031 = vmatpush3.bf16.xpose.msra.mxu0 %v10924_v18  ;;  %v14071_v49 = vpack.c.bf16 %v10887_v10, %v10879_v17 }
 0x24e   :  { %9032 = vmatprep.subr.bf16.mxu0 %v1871_v3 }
 0x254   :  { %9011 = vmatmul.mubr.bf16.gmra.mrb[52].mxu0 %v14067_v58 }
 0x255   :  { %9033 = vmatpush3.bf16.xpose.msra.mxu0 %v1871_v3  ;;  %9038 = vmatprep.mubr.bf16.mxu0 %v14068_v34 }
 0x256   :  { %v1751_v39 = vpop.f32.mrb[32].mxu1  ;;  %9034 = vmatprep.subr.bf16.mxu0 %v1872_v24 }
 0x257   :  { %v1753_v9 = vpop.f32.mrb[33].mxu1  ;;  %v1862_v14 = vadd.f32 %v1861_v0, %v1751_v39 }
 0x258   :  { %v1754_v7 = vpop.f32.mrb[34].mxu1 }
 0x259   :  { %v1863_v48 = vadd.f32 %v1861_v0, %v1754_v7  ;;  %v1756_v18 = vpop.f32.mrb[35].mxu1 }
 0x25b   :  { %v1874_v59 = vpack.c.bf16 %v1863_v48, %v1862_v14 }
 0x25d   :  { %9035 = vmatpush3.bf16.xpose.msra.mxu0 %v1872_v24  ;;  %v14069_v24 = vpack.c.bf16 %v10843_v62, %v10833_v13 }
 0x25e   :  { %v1759_v40 = vpop.f32.mrb[36].mxu1  ;;  %9036 = vmatprep.subr.bf16.mxu0 %v1873_v2 }
 0x25f   :  { %v1761_v36 = vpop.f32.mrb[37].mxu1  ;;  %v1864_v45 = vadd.f32 %v1861_v0, %v1759_v40 }
 0x260   :  { %v1762_v52 = vpop.f32.mrb[38].mxu1 }
 0x261   :  { %v1865_v56 = vadd.f32 %v1861_v0, %v1762_v52  ;;  %v1764_v3 = vpop.f32.mrb[39].mxu1 }
 0x263   :  { %v1875_v60 = vpack.c.bf16 %v1865_v56, %v1864_v45 }
 0x265   :  { %9037 = vmatpush3.bf16.xpose.msra.mxu0 %v1873_v2 }
 0x266   :  { %v1767_v23 = vpop.f32.mrb[40].mxu1  ;;  %9046 = vmatprep.subr.bf16.mxu0 %v1874_v59 }
 0x267   :  { %v1769_v27 = vpop.f32.mrb[41].mxu1  ;;  %v1866_v22 = vadd.f32 %v1861_v0, %v1767_v23 }
 0x268   :  { %v1770_v37 = vpop.f32.mrb[42].mxu1 }
 0x269   :  { %v1867_v63 = vadd.f32 %v1861_v0, %v1770_v37  ;;  %v1772_v55 = vpop.f32.mrb[43].mxu1 }
 0x26b   :  { %v1876_v57 = vpack.c.bf16 %v1867_v63, %v1866_v22 }
 0x26c   :  { %9039 = vmatmul.mubr.bf16.vlgmr.msra.gmra.mrb[56].mxu0 %v14069_v24 }
 0x26d   :  { %9042 = vmatprep.mubr.bf16.mxu0 %v14070_v32  ;;  %9047 = vmatpush3.bf16.msra.mxu0 %v1874_v59 }
 0x26e   :  { %v1775_v42 = vpop.f32.mrb[44].mxu1  ;;  %9048 = vmatprep.subr.bf16.mxu0 %v1875_v60 }
 0x26f   :  { %v1777_v12 = vpop.f32.mrb[45].mxu1  ;;  %v1868_v35 = vadd.f32 %v1861_v0, %v1775_v42 }
 0x270   :  { %v1778_v25 = vpop.f32.mrb[46].mxu1 }
 0x271   :  { %v1869_v51 = vadd.f32 %v1861_v0, %v1778_v25  ;;  %v1780_v2 = vpop.f32.mrb[47].mxu1  ;;  %9049 = vmatpush3.bf16.msra.mxu0 %v1875_v60 }
 0x272   :  { %9050 = vmatprep.subr.bf16.mxu0 %v1876_v57 }
 0x273   :  { %v1877_v4 = vpack.c.bf16 %v1869_v51, %v1868_v35 }
 0x274   :  { %9043 = vmatmul.mubr.bf16.gmra.mrb[60].mxu0 %v14071_v49 }
 0x275   :  { %9051 = vmatpush3.bf16.msra.mxu0 %v1876_v57 }
 0x276   :  { %9052 = vmatprep.subr.bf16.mxu0 %v1877_v4 }
 0x279   :  { %9053 = vmatpush3.bf16.msra.mxu0 %v1877_v4 }
 0x2f0   :  { %v10984_v13 = vpop.f32.mrb[48].mxu1 }
 0x2f1   :  { %v10986_v62 = vpop.f32.mrb[49].mxu1  ;;  %v1973_v26 = vsel %vm751_vm0, %v10984_v13, -inf }
 0x2f2   :  { %1974 = vmax.xlane.f32.xlu1 %v1973_v26  ;;  %v10990_v16 = vpop.f32.mrb[50].mxu1  ;;  %v1967_v58 = vsel %vm751_vm0, %v10986_v62, -inf }
 0x2f3   :  { %1968 = vmax.xlane.f32.xlu0 %v1967_v58  ;;  %v10994_v0 = vpop.f32.mrb[51].mxu1  ;;  %v1976_v17 = vsel %vm751_vm0, %v10990_v16, -inf }
 0x2f4   :  { %v1970_v10 = vsel %vm751_vm0, %v10994_v0, -inf }
 0x2f6   :  { %1977 = vmax.xlane.f32.xlu1 %v1976_v17 }
 0x2f7   :  { %1971 = vmax.xlane.f32.xlu0 %v1970_v10 }
 0x2f8   :  { %v11000_v34 = vpop.f32.mrb[52].mxu1 }
 0x2f9   :  { %v11002_v39 = vpop.f32.mrb[53].mxu1  ;;  %v1985_v18 = vsel %vm751_vm0, %v11000_v34, -inf }
 0x2fa   :  { %v11004_v9 = vpop.f32.mrb[54].mxu1  ;;  %v1979_v7 = vsel %vm751_vm0, %v11002_v39, -inf }
 0x2fb   :  { %1980 = vmax.xlane.f32.xlu0 %v1979_v7  ;;  %v11008_v14 = vpop.f32.mrb[55].mxu1  ;;  %v1988_v59 = vsel %vm751_vm0, %v11004_v9, -inf }
 0x2fc   :  { %v1982_v48 = vsel %vm751_vm0, %v11008_v14, -inf }
 0x2fd   :  { %1983 = vmax.xlane.f32.xlu1 %v1982_v48 }
 0x2ff   :  { %1986 = vmax.xlane.f32.xlu0 %v1985_v18 }
 0x301   :  { %1989 = vmax.xlane.f32.xlu1 %v1988_v59 }
 0x31f   :  { %v11016_v40 = vpop.f32.mrb[48].mxu0 }
 0x320   :  { %v11018_v36 = vpop.f32.mrb[49].mxu0  ;;  %v2235_v60 = vsel %vm751_vm0, %v11016_v40, -inf }
 0x321   :  { %v11020_v52 = vpop.f32.mrb[50].mxu0  ;;  %v2229_v45 = vsel %vm751_vm0, %v11018_v36, -inf }
 0x322   :  { %v11024_v56 = vpop.f32.mrb[51].mxu0  ;;  %2230 = vmax.xlane.f32.xlu0 %v2229_v45  ;;  %v2238_v27 = vsel %vm751_vm0, %v11020_v52, -inf }
 0x323   :  { %v2232_v3 = vsel %vm751_vm0, %v11024_v56, -inf }
 0x324   :  { %2233 = vmax.xlane.f32.xlu1 %v2232_v3 }
 0x326   :  { %2236 = vmax.xlane.f32.xlu0 %v2235_v60 }
 0x327   :  { %v11030_v23 = vpop.f32.mrb[52].mxu0 }
 0x328   :  { %v11034_v37 = vpop.f32.mrb[53].mxu0  ;;  %2239 = vmax.xlane.f32.xlu1 %v2238_v27  ;;  %v2247_v24 = vsel %vm751_vm0, %v11030_v23, -inf }
 0x329   :  { %v11036_v22 = vpop.f32.mrb[54].mxu0  ;;  %v2241_v63 = vsel %vm751_vm0, %v11034_v37, -inf }
 0x32a   :  { %v11040_v55 = vpop.f32.mrb[55].mxu0  ;;  %2242 = vmax.xlane.f32.xlu0 %v2241_v63  ;;  %v2250_v32 = vsel %vm751_vm0, %v11036_v22, -inf }
 0x32b   :  { %v2244_v57 = vsel %vm751_vm0, %v11040_v55, -inf }
 0x32c   :  { %2245 = vmax.xlane.f32.xlu1 %v2244_v57 }
 0x32e   :  { %2248 = vmax.xlane.f32.xlu0 %v2247_v24 }
 0x330   :  { %2251 = vmax.xlane.f32.xlu1 %v2250_v32 }
 0x33f   :  { %v11048_v42 = vpop.f32.mrb[56].mxu0 }
 0x340   :  { %v11050_v12 = vpop.f32.mrb[57].mxu0  ;;  %v2803_v25 = vsel %vm751_vm0, %v11048_v42, -inf }
 0x341   :  { %v11054_v35 = vpop.f32.mrb[58].mxu0  ;;  %2804 = vmax.xlane.f32.xlu0 %v2803_v25  ;;  %v2797_v4 = vsel %vm751_vm0, %v11050_v12, -inf }
 0x342   :  { %v11056_v51 = vpop.f32.mrb[59].mxu0  ;;  %v2806_v2 = vsel %vm751_vm0, %v11054_v35, -inf }
 0x343   :  { %2807 = vmax.xlane.f32.xlu1 %v2806_v2  ;;  %v2800_v49 = vsel %vm751_vm0, %v11056_v51, -inf }
 0x345   :  { %2798 = vmax.xlane.f32.xlu0 %v2797_v4 }
 0x347   :  { %v11064_v26 = vpop.f32.mrb[60].mxu0  ;;  %2801 = vmax.xlane.f32.xlu1 %v2800_v49 }
 0x348   :  { %v11066_v58 = vpop.f32.mrb[61].mxu0 }
 0x349   :  { %v11068_v17 = vpop.f32.mrb[62].mxu0 }
 0x34a   :  { %v11070_v10 = vpop.f32.mrb[63].mxu0 }
 0x37f   :  { %v1975_v7 = vpop.xlane.xlu1 %1974 }
 0x380   :  { %v1993_v48 = vsub.f32 %v10984_v13, %v1975_v7  ;;  %v1969_v18 = vpop.xlane.xlu0 %1968 }
 0x381   :  { %v1991_v59 = vsub.f32 %v10986_v62, %v1969_v18 }
 0x382   :  { %v2003_v45 = vmul.f32 1.442695, %v1993_v48 }
 0x383   :  { %v1999_v3 = vmul.f32 1.442695, %v1991_v59  ;;  %v1978_v60 = vpop.xlane.xlu1 %1977 }
 0x384   :  { %10022 = vpow2.f32 %v2003_v45  ;;  %v1994_v27 = vsub.f32 %v10990_v16, %v1978_v60  ;;  %v1972_v63 = vpop.xlane.xlu0 %1971 }
 0x385   :  { %v1992_v57 = vsub.f32 %v10994_v0, %v1972_v63  ;;  %10024 = vpow2.f32 %v1999_v3 }
 0x386   :  { %v2005_v24 = vmul.f32 1.442695, %v1994_v27 }
 0x387   :  { %v2001_v32 = vmul.f32 1.442695, %v1992_v57 }
 0x388   :  { %10026 = vpow2.f32 %v2005_v24  ;;  %v1981_v25 = vpop.xlane.xlu0 %1980 }
 0x389   :  { %10028 = vpow2.f32 %v2001_v32  ;;  %v1995_v13 = vsub.f32 %v11002_v39, %v1981_v25 }
 0x38a   :  { %v1984_v2 = vpop.xlane.xlu1 %1983 }
 0x38b   :  { %v1996_v62 = vsub.f32 %v11008_v14, %v1984_v2  ;;  %v2007_v16 = vmul.f32 1.442695, %v1995_v13 }
 0x38c   :  { %v1987_v4 = vpop.xlane.xlu0 %1986 }
 0x38d   :  { %v1997_v49 = vsub.f32 %v11000_v34, %v1987_v4  ;;  %v2009_v39 = vmul.f32 1.442695, %v1996_v62 }
 0x38e   :  { %v11079_v7 = vpop.eup %10022  ;;  %v1990_v48 = vpop.xlane.xlu1 %1989 }
 0x38f   :  { %v2011_v18 = vmul.f32 1.442695, %v1997_v49  ;;  %v1998_v0 = vsub.f32 %v11004_v9, %v1990_v48  ;;  %v2021_v59 = vsel %vm751_vm0, %v11079_v7, 0.0  ;;  %v11084_v45 = vpop.eup %10024 }
 0x390   :  { %2022 = vadd.xlane.f32.xlu0 %v2021_v59  ;;  %v2015_v34 = vsel %vm751_vm0, %v11084_v45, 0.0 }
 0x391   :  { %10030 = vpow2.f32 %v2011_v18  ;;  %v2013_v3 = vmul.f32 1.442695, %v1998_v0 }
 0x392   :  { %v11086_v60 = vpop.eup %10026  ;;  %10032 = vpow2.f32 %v2007_v16 }
 0x393   :  { %10034 = vpow2.f32 %v2013_v3  ;;  %v2024_v14 = vsel %vm751_vm0, %v11086_v60, 0.0  ;;  %v11092_v9 = vpop.eup %10028 }
 0x394   :  { %2016 = vadd.xlane.f32.xlu0 %v2015_v34  ;;  %2025 = vadd.xlane.f32.xlu1 %v2024_v14  ;;  %10036 = vpow2.f32 %v2009_v39  ;;  %v2018_v27 = vsel %vm751_vm0, %v11092_v9, 0.0 }
 0x398   :  { %2019 = vadd.xlane.f32.xlu1 %v2018_v27 }
 0x39b   :  { %v11096_v63 = vpop.eup %10030 }
 0x39c   :  { %v11098_v57 = vpop.eup %10032  ;;  %v2033_v24 = vsel %vm751_vm0, %v11096_v63, 0.0 }
 0x39d   :  { %v11102_v32 = vpop.eup %10034  ;;  %2034 = vadd.xlane.f32.xlu0 %v2033_v24  ;;  %v2027_v2 = vsel %vm751_vm0, %v11098_v57, 0.0 }
 0x39e   :  { %v2036_v25 = vsel %vm751_vm0, %v11102_v32, 0.0  ;;  %v11106_v13 = vpop.eup %10036 }
 0x39f   :  { %2037 = vadd.xlane.f32.xlu1 %v2036_v25  ;;  %v2030_v4 = vsel %vm751_vm0, %v11106_v13, 0.0 }
 0x3a1   :  { %2028 = vadd.xlane.f32.xlu0 %v2027_v2 }
 0x3a3   :  { %2031 = vadd.xlane.f32.xlu1 %v2030_v4 }
 0x3af   :  { %v2231_v62 = vpop.xlane.xlu0 %2230 }
 0x3b0   :  { %v2253_v49 = vsub.f32 %v11018_v36, %v2231_v62 }
 0x3b1   :  { %v2234_v16 = vpop.xlane.xlu1 %2233 }
 0x3b2   :  { %v2254_v18 = vsub.f32 %v11024_v56, %v2234_v16  ;;  %v2261_v59 = vmul.f32 1.442695, %v2253_v49 }
 0x3b3   :  { %v2237_v48 = vpop.xlane.xlu0 %2236 }
 0x3b4   :  { %v2255_v0 = vsub.f32 %v11016_v40, %v2237_v48  ;;  %v2263_v14 = vmul.f32 1.442695, %v2254_v18 }
 0x3b5   :  { %v2240_v39 = vpop.xlane.xlu1 %2239 }
 0x3b6   :  { %v2265_v3 = vmul.f32 1.442695, %v2255_v0  ;;  %v2256_v34 = vsub.f32 %v11020_v52, %v2240_v39 }
 0x3b7   :  { %v2243_v24 = vpop.xlane.xlu0 %2242 }
 0x3b8   :  { %10038 = vpow2.f32 %v2265_v3  ;;  %v2267_v27 = vmul.f32 1.442695, %v2256_v34  ;;  %v2257_v36 = vsub.f32 %v11034_v37, %v2243_v24  ;;  %v2812_v34 = vsel %vm751_vm0, %v11070_v10, -inf }
 0x3b9   :  { %10040 = vpow2.f32 %v2261_v59  ;;  %v2246_v25 = vpop.xlane.xlu1 %2245 }
 0x3ba   :  { %10042 = vpow2.f32 %v2267_v27  ;;  %v2258_v56 = vsub.f32 %v11040_v55, %v2246_v25  ;;  %v2269_v62 = vmul.f32 1.442695, %v2257_v36  ;;  %v2815_v27 = vsel %vm751_vm0, %v11064_v26, -inf }
 0x3bb   :  { %10044 = vpow2.f32 %v2263_v14  ;;  %v2249_v2 = vpop.xlane.xlu0 %2248 }
 0x3bc   :  { %v2259_v49 = vsub.f32 %v11030_v23, %v2249_v2  ;;  %v2271_v18 = vmul.f32 1.442695, %v2258_v56  ;;  %10046 = vpow2.f32 %v2269_v62  ;;  %v2818_v2 = vsel %vm751_vm0, %v11068_v17, -inf }
 0x3bd   :  { %v2252_v4 = vpop.xlane.xlu1 %2251 }
 0x3be   :  { %v2260_v0 = vsub.f32 %v11036_v22, %v2252_v4  ;;  %v2273_v59 = vmul.f32 1.442695, %v2259_v49  ;;  %10048 = vpow2.f32 %v2271_v18  ;;  %v2809_v22 = vsel %vm751_vm0, %v11066_v58, -inf }
 0x3c0   :  { %v2275_v39 = vmul.f32 1.442695, %v2260_v0  ;;  %10050 = vpow2.f32 %v2273_v59 }
 0x3c2   :  { %v11118_v40 = vpop.eup %10038  ;;  %10052 = vpow2.f32 %v2275_v39 }
 0x3c3   :  { %v11121_v52 = vpop.eup %10040  ;;  %v2283_v16 = vsel %vm751_vm0, %v11118_v40, 0.0 }
 0x3c4   :  { %v11125_v48 = vpop.eup %10042  ;;  %2284 = vadd.xlane.f32.xlu0 %v2283_v16  ;;  %v2277_v23 = vsel %vm751_vm0, %v11121_v52, 0.0 }
 0x3c5   :  { %v2286_v37 = vsel %vm751_vm0, %v11125_v48, 0.0  ;;  %v11130_v55 = vpop.eup %10044 }
 0x3c6   :  { %2287 = vadd.xlane.f32.xlu1 %v2286_v37  ;;  %v2280_v3 = vsel %vm751_vm0, %v11130_v55, 0.0  ;;  %v11142_v24 = vpop.eup %10046 }
 0x3c7   :  { %v2289_v16 = vsel %vm751_vm0, %v11142_v24, 0.0 }
 0x3c8   :  { %2278 = vadd.xlane.f32.xlu0 %v2277_v23  ;;  %v11147_v56 = vpop.eup %10048 }
 0x3c9   :  { %v2292_v23 = vsel %vm751_vm0, %v11147_v56, 0.0 }
 0x3ca   :  { %2281 = vadd.xlane.f32.xlu1 %v2280_v3  ;;  %v11153_v18 = vpop.eup %10050 }
 0x3cb   :  { %v2295_v3 = vsel %vm751_vm0, %v11153_v18, 0.0 }
 0x3cc   :  { %2810 = vmax.xlane.f32.xlu0 %v2809_v22  ;;  %v11158_v39 = vpop.eup %10052 }
 0x3cd   :  { %v2298_v22 = vsel %vm751_vm0, %v11158_v39, 0.0 }
 0x3ce   :  { %v2805_v14 = vpop.xlane.xlu0 %2804  ;;  %2813 = vmax.xlane.f32.xlu1 %v2812_v34 }
 0x3cf   :  { %v2823_v25 = vsub.f32 %v11048_v42, %v2805_v14 }
 0x3d0   :  { %2816 = vmax.xlane.f32.xlu0 %v2815_v27  ;;  %v2808_v36 = vpop.xlane.xlu1 %2807 }
 0x3d1   :  { %v2824_v62 = vsub.f32 %v11054_v35, %v2808_v36  ;;  %v2833_v0 = vmul.f32 1.442695, %v2823_v25 }
 0x3d2   :  { %v2799_v4 = vpop.xlane.xlu0 %2798  ;;  %2819 = vmax.xlane.f32.xlu1 %v2818_v2 }
 0x3d3   :  { %v2821_v49 = vsub.f32 %v11050_v12, %v2799_v4  ;;  %v2835_v35 = vmul.f32 1.442695, %v2824_v62 }
 0x3d4   :  { %2290 = vadd.xlane.f32.xlu0 %v2289_v16  ;;  %v2802_v42 = vpop.xlane.xlu1 %2801 }
 0x3d5   :  { %v2829_v37 = vmul.f32 1.442695, %v2821_v49  ;;  %v2822_v59 = vsub.f32 %v11056_v51, %v2802_v42 }
 0x3d6   :  { %2293 = vadd.xlane.f32.xlu1 %v2292_v23 }
 0x3d7   :  { %10054 = vpow2.f32 %v2829_v37  ;;  %v2831_v12 = vmul.f32 1.442695, %v2822_v59 }
 0x3d8   :  { %10056 = vpow2.f32 %v2833_v0  ;;  %2296 = vadd.xlane.f32.xlu0 %v2295_v3 }
 0x3d9   :  { %10058 = vpow2.f32 %v2831_v12 }
 0x3da   :  { %2299 = vadd.xlane.f32.xlu1 %v2298_v22  ;;  %10060 = vpow2.f32 %v2835_v35 }
 0x3e1   :  { %v11164_v51 = vpop.eup %10054 }
 0x3e2   :  { %v11166_v34 = vpop.eup %10056  ;;  %v2845_v14 = vsel %vm751_vm0, %v11164_v51, 0.0 }
 0x3e3   :  { %v11170_v27 = vpop.eup %10058  ;;  %2846 = vadd.xlane.f32.xlu0 %v2845_v14  ;;  %v2851_v2 = vsel %vm751_vm0, %v11166_v34, 0.0 }
 0x3e4   :  { %v2848_v25 = vsel %vm751_vm0, %v11170_v27, 0.0  ;;  %v11174_v36 = vpop.eup %10060 }
 0x3e5   :  { %2849 = vadd.xlane.f32.xlu1 %v2848_v25  ;;  %v2854_v4 = vsel %vm751_vm0, %v11174_v36, 0.0 }
 0x3e7   :  { %2852 = vadd.xlane.f32.xlu0 %v2851_v2 }
 0x3e9   :  { %2855 = vadd.xlane.f32.xlu1 %v2854_v4 }
 0x41d   :  { %v2023_v62 = vpop.xlane.xlu0 %2022 }
 0x421   :  { %v2017_v49 = vpop.xlane.xlu0 %2016  ;;  %v2026_v16 = vpop.xlane.xlu1 %2025 }
 0x422   :  { %10062 = vrcp.f32 %v2026_v16 }
 0x423   :  { %10064 = vrcp.f32 %v2017_v49 }
 0x424   :  { %10066 = vrcp.f32 %v2023_v62 }
 0x425   :  { %v2020_v0 = vpop.xlane.xlu1 %2019 }
 0x426   :  { %10068 = vrcp.f32 %v2020_v0 }
 0x42a   :  { %v2035_v42 = vpop.xlane.xlu0 %2034 }
 0x42c   :  { %v2038_v37 = vpop.xlane.xlu1 %2037  ;;  %v10063_v59 = vpop.eup %10062 }
 0x42d   :  { %v10065_v23 = vpop.eup %10064  ;;  %10070 = vrcp.f32 %v2038_v37  ;;  %v2050_v22 = vmul.f32 %v10063_v59, %v11086_v60 }
 0x42e   :  { %v2029_v35 = vpop.xlane.xlu0 %2028  ;;  %v10067_v12 = vpop.eup %10066  ;;  %v2047_v25 = vmul.f32 %v10065_v23, %v11084_v45 }
 0x42f   :  { %10072 = vrcp.f32 %v2029_v35  ;;  %v2049_v4 = vmul.f32 %v10067_v12, %v11079_v7 }
 0x430   :  { %v10069_v3 = vpop.eup %10068  ;;  %10074 = vrcp.f32 %v2035_v42  ;;  %v2032_v14 = vpop.xlane.xlu1 %2031 }
 0x431   :  { %10076 = vrcp.f32 %v2032_v14  ;;  %v2048_v2 = vmul.f32 %v10069_v3, %v11092_v9  ;;  %v2056_v49 = vpack.c.bf16 %v2050_v22, %v2049_v4 }
 0x433   :  { %v2055_v62 = vpack.c.bf16 %v2048_v2, %v2047_v25 }
 0x435   :  { %8990 = vmatprep.mubr.msk.bf16.mxu1 %vm751_vm0, %v2055_v62 }
 0x436   :  { %8991 = vmatmul.mubr.msk.bf16.vlgmr.msra.gmra.mrb[56].mxu1 %vm751_vm0, %v2056_v49 }
 0x437   :  { %9015 = vmatpush3.bf16.msra.mxu1 %v10926_v19  ;;  %v10071_v16 = vpop.eup %10070 }
 0x438   :  { %9016 = vmatprep.subr.bf16.mxu1 %v10936_v6  ;;  %v2054_v45 = vmul.f32 %v10071_v16, %v11102_v32 }
 0x439   :  { %v10073_v60 = vpop.eup %10072 }
 0x43a   :  { %v10075_v0 = vpop.eup %10074  ;;  %v2051_v7 = vmul.f32 %v10073_v60, %v11098_v57 }
 0x43b   :  { %v10077_v42 = vpop.eup %10076  ;;  %9017 = vmatpush3.bf16.msra.mxu1 %v10936_v6  ;;  %v2053_v37 = vmul.f32 %v10075_v0, %v11096_v63 }
 0x43c   :  { %9018 = vmatprep.subr.bf16.mxu1 %v10946_v15  ;;  %v2052_v9 = vmul.f32 %v10077_v42, %v11106_v13 }
 0x43d   :  { %v2058_v19 = vpack.c.bf16 %v2054_v45, %v2053_v37 }
 0x43e   :  { %v2057_v59 = vpack.c.bf16 %v2052_v9, %v2051_v7 }
 0x43f   :  { %9019 = vmatpush3.bf16.msra.mxu1 %v10946_v15 }
 0x440   :  { %9020 = vmatprep.subr.bf16.mxu1 %v10956_v44  ;;  %8994 = vmatprep.mubr.msk.bf16.mxu1 %vm751_vm0, %v2057_v59 }
 0x441   :  { %8995 = vmatmul.mubr.msk.bf16.gmra.mrb[60].mxu1 %vm751_vm0, %v2058_v19 }
 0x443   :  { %9021 = vmatpush3.bf16.msra.mxu1 %v10956_v44 }
 0x451   :  { %v2285_v6 = vpop.xlane.xlu0 %2284 }
 0x453   :  { %v2288_v32 = vpop.xlane.xlu1 %2287 }
 0x454   :  { %10078 = vrcp.f32 %v2288_v32 }
 0x455   :  { %v2279_v57 = vpop.xlane.xlu0 %2278 }
 0x456   :  { %10080 = vrcp.f32 %v2279_v57 }
 0x457   :  { %10082 = vrcp.f32 %v2285_v6  ;;  %v2282_v13 = vpop.xlane.xlu1 %2281 }
 0x458   :  { %10084 = vrcp.f32 %v2282_v13 }
 0x459   :  { %v2811_v63 = vpop.xlane.xlu0 %2810 }
 0x45a   :  { %v2825_v15 = vsub.f32 %v11066_v58, %v2811_v63 }
 0x45b   :  { %v2814_v23 = vpop.xlane.xlu1 %2813 }
 0x45c   :  { %v2837_v35 = vmul.f32 1.442695, %v2825_v15  ;;  %v2826_v12 = vsub.f32 %v11070_v10, %v2814_v23 }
 0x45d   :  { %v2817_v3 = vpop.xlane.xlu0 %2816 }
 0x45e   :  { %10086 = vpow2.f32 %v2837_v35  ;;  %v2839_v22 = vmul.f32 1.442695, %v2826_v12  ;;  %v2827_v44 = vsub.f32 %v11064_v26, %v2817_v3  ;;  %v10079_v14 = vpop.eup %10078 }
 0x45f   :  { %v2820_v25 = vpop.xlane.xlu1 %2819  ;;  %v2312_v58 = vmul.f32 %v10079_v14, %v11125_v48 }
 0x460   :  { %v10081_v2 = vpop.eup %10080  ;;  %10088 = vpow2.f32 %v2839_v22  ;;  %v2841_v4 = vmul.f32 1.442695, %v2827_v44  ;;  %v2828_v62 = vsub.f32 %v11068_v17, %v2820_v25 }
 0x461   :  { %v10083_v49 = vpop.eup %10082  ;;  %v2291_v16 = vpop.xlane.xlu0 %2290  ;;  %v2309_v42 = vmul.f32 %v10081_v2, %v11121_v52 }
 0x462   :  { %v10085_v60 = vpop.eup %10084  ;;  %10090 = vpow2.f32 %v2841_v4  ;;  %v2843_v0 = vmul.f32 1.442695, %v2828_v62  ;;  %v2311_v45 = vmul.f32 %v10083_v49, %v11118_v40 }
 0x463   :  { %10092 = vrcp.f32 %v2291_v16  ;;  %v2294_v10 = vpop.xlane.xlu1 %2293  ;;  %v2310_v26 = vmul.f32 %v10085_v60, %v11130_v55 }
 0x464   :  { %10094 = vpow2.f32 %v2843_v0  ;;  %v2318_v17 = vpack.c.bf16 %v2312_v58, %v2311_v45  ;;  %v9481_v45 = vld [vmem:[%s14030_s3 + $0xb4] ss:$8 sps:$4 sm:$0xff]  }
 0x465   :  { %10096 = vrcp.f32 %v2294_v10  ;;  %v2297_v7 = vpop.xlane.xlu0 %2296  ;;  %v2317_v9 = vpack.c.bf16 %v2310_v26, %v2309_v42  ;;  %v9470_v42 = vld [vmem:[%s14030_s3 + $0x80] ss:$8 sps:$4 sm:$0xff]  }
 0x466   :  { %10098 = vrcp.f32 %v2297_v7  ;;  %v9476_v26 = vld [vmem:[%s14030_s3 + $0xa0] ss:$8 sps:$4 sm:$0xff]   ;;  %v9479_v7 = vld [vmem:[%s14030_s3 + $0xb0] ss:$8 sps:$4 sm:$0xff]  }
 0x467   :  { %9022 = vmatprep.mubr.msk.bf16.mxu1 %vm751_vm0, %v2317_v9  ;;  %v2300_v37 = vpop.xlane.xlu1 %2299  ;;  %v9484_v9 = vld [vmem:[%s14030_s3 + $0xc4] ss:$8 sps:$4 sm:$0xff]  }
 0x468   :  { %v11208_v48 = vpop.eup %10086  ;;  %10100 = vrcp.f32 %v2300_v37  ;;  %9023 = vmatmul.mubr.msk.bf16.vlgmr.msra.gmra.mrb[64].mxu1 %vm751_vm0, %v2318_v17  ;;  %v9482_v17 = vld [vmem:[%s14030_s3 + $0xc0] ss:$8 sps:$4 sm:$0xff]   ;;  %v9487_v37 = vld [vmem:[%s14030_s3 + $0xd4] ss:$8 sps:$4 sm:$0xff]  }
 0x469   :  { %v2857_v52 = vsel %vm751_vm0, %v11208_v48, 0.0 }
 0x46a   :  { %v11213_v55 = vpop.eup %10088  ;;  %2858 = vadd.xlane.f32.xlu0 %v2857_v52  ;;  %v9485_v52 = vld [vmem:[%s14030_s3 + $0xd0] ss:$8 sps:$4 sm:$0xff]  }
 0x46b   :  { %v2860_v40 = vsel %vm751_vm0, %v11213_v55, 0.0 }
 0x46c   :  { %v11217_v59 = vpop.eup %10090  ;;  %2861 = vadd.xlane.f32.xlu1 %v2860_v40  ;;  %v9490_v40 = vld [vmem:[%s14030_s3 + $0xe4] ss:$8 sps:$4 sm:$0xff]  }
 0x46d   :  { %v10093_v19 = vpop.eup %10092  ;;  %v2863_v6 = vsel %vm751_vm0, %v11217_v59, 0.0 }
 0x46e   :  { %v11221_v32 = vpop.eup %10094  ;;  %2864 = vadd.xlane.f32.xlu0 %v2863_v6  ;;  %v2313_v23 = vmul.f32 %v10093_v19, %v11142_v24  ;;  %v14072_v24 = vmov 0   ;;  %v9488_v19 = vld [vmem:[%s14030_s3 + $0xe0] ss:$8 sps:$4 sm:$0xff]   ;;  %v9493_v6 = vld [vmem:[%s14030_s3 + $0xf4] ss:$8 sps:$4 sm:$0xff]  }
 0x46f   :  { %v10097_v57 = vpop.eup %10096  ;;  %v2866_v13 = vsel %vm751_vm0, %v11221_v32, 0.0 }
 0x470   :  { %v10099_v63 = vpop.eup %10098  ;;  %v2847_v15 = vpop.xlane.xlu0 %2846  ;;  %2867 = vadd.xlane.f32.xlu1 %v2866_v13  ;;  %v2314_v35 = vmul.f32 %v10097_v57, %v11147_v56  ;;  %v9491_v57 = vld [vmem:[%s14030_s3 + $0xf0] ss:$8 sps:$4 sm:$0xff]   ;;  %v9496_v13 = vld [vmem:[%s14030_s3 + $0x4] ss:$8 sps:$4 sm:$0xff]  }
 0x471   :  { %10102 = vrcp.f32 %v2847_v15  ;;  %v2315_v44 = vmul.f32 %v10099_v63, %v11153_v18 }
 0x472   :  { %v10101_v12 = vpop.eup %10100  ;;  %v2850_v3 = vpop.xlane.xlu1 %2849  ;;  %v2319_v22 = vpack.c.bf16 %v2314_v35, %v2313_v23 }
 0x473   :  { %10104 = vrcp.f32 %v2850_v3  ;;  %v2316_v14 = vmul.f32 %v10101_v12, %v11158_v39 }
 0x474   :  { %9026 = vmatprep.mubr.msk.bf16.mxu1 %vm751_vm0, %v2319_v22  ;;  %v2853_v25 = vpop.xlane.xlu0 %2852 }
 0x475   :  { %10106 = vrcp.f32 %v2853_v25  ;;  %v2320_v2 = vpack.c.bf16 %v2316_v14, %v2315_v44 }
 0x476   :  { %v2856_v4 = vpop.xlane.xlu1 %2855 }
 0x477   :  { %10108 = vrcp.f32 %v2856_v4  ;;  %9027 = vmatmul.mubr.msk.bf16.gmra.mrb[68].mxu1 %vm751_vm0, %v2320_v2 }
 0x478   :  { %2514 = vmatprep.mubr.bf16.mxu1 %v14072_v24 }
 0x47b   :  { %v10103_v56 = vpop.eup %10102 }
 0x47c   :  { %v2877_v49 = vmul.f32 %v10103_v56, %v11164_v51  ;;  %v9472_v51 = vld [vmem:[%s14030_s3 + $0x84] ss:$8 sps:$4 sm:$0xff]  }
 0x47d   :  { %v10105_v62 = vpop.eup %10104  ;;  %2482 = vmatprep.subr.bf16.mxu1 %v9472_v51 }
 0x47e   :  { %v2878_v16 = vmul.f32 %v10105_v62, %v11170_v27  ;;  %v9475_v27 = vld [vmem:[%s14030_s3 + $0x94] ss:$8 sps:$4 sm:$0xff]   ;;  %2483 = vmatpush1.bf16.msra.mxu1 %v9470_v42 }
 0x47f   :  { %v10107_v18 = vpop.eup %10106  ;;  %2484 = vmatprep.subr.bf16.mxu1 %v9475_v27 }
 0x480   :  { %v2885_v60 = vpack.c.bf16 %v2878_v16, %v2877_v49  ;;  %v2879_v58 = vmul.f32 %v10107_v18, %v11166_v34  ;;  %v9473_v34 = vld [vmem:[%s14030_s3 + $0x90] ss:$8 sps:$4 sm:$0xff]  }
 0x481   :  { %v10109_v39 = vpop.eup %10108 }
 0x482   :  { %v2880_v0 = vmul.f32 %v10109_v39, %v11174_v36  ;;  %9054 = vmatprep.mubr.msk.bf16.mxu0 %vm751_vm0, %v2885_v60  ;;  %v9478_v36 = vld [vmem:[%s14030_s3 + $0xa4] ss:$8 sps:$4 sm:$0xff]   ;;  %2485 = vmatpush1.bf16.msra.mxu1 %v9473_v34 }
 0x483   :  { %2486 = vmatprep.subr.bf16.mxu1 %v9478_v36 }
 0x484   :  { %v2886_v10 = vpack.c.bf16 %v2880_v0, %v2879_v58 }
 0x486   :  { %9055 = vmatmul.mubr.msk.bf16.vlgmr.msra.gmra.mrb[64].mxu0 %vm751_vm0, %v2886_v10  ;;  %2487 = vmatpush1.bf16.msra.mxu1 %v9476_v26  ;;  %v9494_v26 = vld [vmem:[%s14030_s3] ss:$8 sps:$4 sm:$0xff]  }
 0x487   :  { %2488 = vmatprep.subr.bf16.mxu1 %v9481_v45 }
 0x48a   :  { %2489 = vmatpush1.bf16.msra.mxu1 %v9479_v7  ;;  %v9499_v7 = vld [vmem:[%s14030_s3 + $0x14] ss:$8 sps:$4 sm:$0xff]  }
 0x48b   :  { %2490 = vmatprep.subr.bf16.mxu1 %v9484_v9  ;;  %v9497_v9 = vld [vmem:[%s14030_s3 + $0x10] ss:$8 sps:$4 sm:$0xff]  }
 0x48e   :  { %2491 = vmatpush1.bf16.msra.mxu1 %v9482_v17  ;;  %v9502_v17 = vld [vmem:[%s14030_s3 + $0x24] ss:$8 sps:$4 sm:$0xff]  }
 0x48f   :  { %2492 = vmatprep.subr.bf16.mxu1 %v9487_v37  ;;  %v9500_v37 = vld [vmem:[%s14030_s3 + $0x20] ss:$8 sps:$4 sm:$0xff]  }
 0x492   :  { %2493 = vmatpush1.bf16.msra.mxu1 %v9485_v52  ;;  %v9505_v52 = vld [vmem:[%s14030_s3 + $0x34] ss:$8 sps:$4 sm:$0xff]  }
 0x493   :  { %2494 = vmatprep.subr.bf16.mxu1 %v9490_v40 }
 0x496   :  { %2495 = vmatpush1.bf16.msra.mxu1 %v9488_v19  ;;  %v9503_v19 = vld [vmem:[%s14030_s3 + $0x30] ss:$8 sps:$4 sm:$0xff]  }
 0x497   :  { %2496 = vmatprep.subr.bf16.mxu1 %v9493_v6 }
 0x49a   :  { %2497 = vmatpush1.bf16.msra.mxu1 %v9491_v57  ;;  %v9508_v57 = vld [vmem:[%s14030_s3 + $0x44] ss:$8 sps:$4 sm:$0xff]  }
 0x49b   :  { %2635 = vmatprep.subr.bf16.mxu1 %v9496_v13 }
 0x4f7   :  { %v2859_v63 = vpop.xlane.xlu0 %2858 }
 0x4f8   :  { %10110 = vrcp.f32 %v2859_v63 }
 0x4f9   :  { %v2862_v15 = vpop.xlane.xlu1 %2861 }
 0x4fa   :  { %10112 = vrcp.f32 %v2862_v15 }
 0x4fb   :  { %v2865_v23 = vpop.xlane.xlu0 %2864 }
 0x4fc   :  { %10114 = vrcp.f32 %v2865_v23 }
 0x4fd   :  { %v2868_v35 = vpop.xlane.xlu1 %2867 }
 0x4fe   :  { %10116 = vrcp.f32 %v2868_v35  ;;  %v9506_v35 = vld [vmem:[%s14030_s3 + $0x40] ss:$8 sps:$4 sm:$0xff]  }
 0x502   :  { %v10111_v12 = vpop.eup %10110 }
 0x503   :  { %v2881_v22 = vmul.f32 %v10111_v12, %v11208_v48  ;;  %v9511_v12 = vld [vmem:[%s14030_s3 + $0x54] ss:$8 sps:$4 sm:$0xff]  }
 0x504   :  { %v10113_v3 = vpop.eup %10112 }
 0x505   :  { %v2882_v44 = vmul.f32 %v10113_v3, %v11213_v55  ;;  %v9509_v3 = vld [vmem:[%s14030_s3 + $0x50] ss:$8 sps:$4 sm:$0xff]  }
 0x506   :  { %v10115_v14 = vpop.eup %10114 }
 0x507   :  { %v2887_v25 = vpack.c.bf16 %v2882_v44, %v2881_v22  ;;  %v2883_v56 = vmul.f32 %v10115_v14, %v11217_v59  ;;  %v9514_v22 = vld [vmem:[%s14030_s3 + $0x64] ss:$8 sps:$4 sm:$0xff]   ;;  %v9512_v44 = vld [vmem:[%s14030_s3 + $0x60] ss:$8 sps:$4 sm:$0xff]   ;;  %v9517_v14 = vld [vmem:[%s14030_s3 + $0x74] ss:$8 sps:$4 sm:$0xff]  }
 0x508   :  { %v10117_v2 = vpop.eup %10116 }
 0x509   :  { %9058 = vmatprep.mubr.msk.bf16.mxu0 %vm751_vm0, %v2887_v25  ;;  %v11292_v4 = vpop.f32.mrb[56].mxu1  ;;  %v2884_v62 = vmul.f32 %v10117_v2, %v11221_v32 }
 0x50a   :  { %v11296_v49 = vpop.f32.mrb[57].mxu1 }
 0x50b   :  { %v11298_v16 = vpop.f32.mrb[58].mxu1  ;;  %v2888_v18 = vpack.c.bf16 %v2884_v62, %v2883_v56  ;;  %v9515_v56 = vld [vmem:[%s14030_s3 + $0x70] ss:$8 sps:$4 sm:$0xff]  }
 0x50c   :  { %v2137_v48 = vpack.c.bf16 %v11298_v16, %v11292_v4  ;;  %v11302_v55 = vpop.f32.mrb[59].mxu1  ;;  %v9535_v4 = vld [vmem:[%s14030_s3 + $0x154] ss:$8 sps:$4 sm:$0xff]   ;;  %v9533_v16 = vld [vmem:[%s14030_s3 + $0x150] ss:$8 sps:$4 sm:$0xff]  }
 0x50d   :  { %v2136_v60 = vpack.c.bf16 %v11302_v55, %v11296_v49  ;;  %9059 = vmatmul.mubr.msk.bf16.gmra.mrb[68].mxu0 %vm751_vm0, %v2888_v18  ;;  %v9520_v18 = vld [vmem:[%s14030_s3 + $0x104] ss:$8 sps:$4 sm:$0xff]   ;;  %v9529_v49 = vld [vmem:[%s14030_s3 + $0x134] ss:$8 sps:$4 sm:$0xff]   ;;  %v9527_v55 = vld [vmem:[%s14030_s3 + $0x130] ss:$8 sps:$4 sm:$0xff]  }
 0x514   :  { %v11307_v39 = vpop.f32.mrb[60].mxu1 }
 0x515   :  { %v11309_v59 = vpop.f32.mrb[61].mxu1 }
 0x516   :  { %v11311_v32 = vpop.f32.mrb[62].mxu1 }
 0x517   :  { %v2139_v58 = vpack.c.bf16 %v11311_v32, %v11307_v39  ;;  %v11315_v0 = vpop.f32.mrb[63].mxu1 }
 0x518   :  { %v2138_v10 = vpack.c.bf16 %v11315_v0, %v11309_v59  ;;  %v9541_v59 = vld [vmem:[%s14030_s3 + $0x174] ss:$8 sps:$4 sm:$0xff]   ;;  %v9539_v0 = vld [vmem:[%s14030_s3 + $0x170] ss:$8 sps:$4 sm:$0xff]  }
 0x53b   :  { %v9024_v42 = vpop.f32.mrb[64].mxu1 }
 0x53c   :  { %v2367_v51 = vpop.f32.mrb[65].mxu1 }
 0x53d   :  { %v9025_v27 = vpop.f32.mrb[66].mxu1 }
 0x53e   :  { %v2399_v34 = vpack.c.bf16 %v9025_v27, %v9024_v42  ;;  %v2370_v36 = vpop.f32.mrb[67].mxu1 }
 0x53f   :  { %v2398_v45 = vpack.c.bf16 %v2370_v36, %v2367_v51  ;;  %v9523_v36 = vld [vmem:[%s14030_s3 + $0x114] ss:$8 sps:$4 sm:$0xff]  }
 0x541   :  { %2515 = vmatmul.mubr.bf16.vlgmr.msra.gmra.mrb[72].mxu1 %v2398_v45  ;;  %v9526_v45 = vld [vmem:[%s14030_s3 + $0x124] ss:$8 sps:$4 sm:$0xff]  }
 0x542   :  { %2636 = vmatpush1.bf16.msra.mxu1 %v9494_v26  ;;  %2524 = vmatprep.mubr.bf16.mxu1 %v14072_v24  ;;  %v9521_v26 = vld [vmem:[%s14030_s3 + $0x110] ss:$8 sps:$4 sm:$0xff]  }
 0x543   :  { %2637 = vmatprep.subr.bf16.mxu1 %v9499_v7  ;;  %v9524_v7 = vld [vmem:[%s14030_s3 + $0x120] ss:$8 sps:$4 sm:$0xff]  }
 0x546   :  { %2638 = vmatpush1.bf16.msra.mxu1 %v9497_v9  ;;  %v9530_v9 = vld [vmem:[%s14030_s3 + $0x140] ss:$8 sps:$4 sm:$0xff]  }
 0x547   :  { %2639 = vmatprep.subr.bf16.mxu1 %v9502_v17  ;;  %v9536_v17 = vld [vmem:[%s14030_s3 + $0x160] ss:$8 sps:$4 sm:$0xff]  }
 0x549   :  { %2525 = vmatmul.mubr.bf16.gmra.mrb[76].mxu1 %v2399_v34  ;;  %v9518_v34 = vld [vmem:[%s14030_s3 + $0x100] ss:$8 sps:$4 sm:$0xff]  }
 0x54a   :  { %v9028_v40 = vpop.f32.mrb[68].mxu1  ;;  %2640 = vmatpush1.bf16.msra.mxu1 %v9500_v37  ;;  %2534 = vmatprep.mubr.bf16.mxu1 %v14072_v24 }
 0x54b   :  { %v2383_v6 = vpop.f32.mrb[69].mxu1  ;;  %2641 = vmatprep.subr.bf16.mxu1 %v9505_v52 }
 0x54c   :  { %v9029_v13 = vpop.f32.mrb[70].mxu1 }
 0x54d   :  { %v2401_v63 = vpack.c.bf16 %v9029_v13, %v9028_v40  ;;  %v2386_v15 = vpop.f32.mrb[71].mxu1  ;;  %v11438_v40 = vld [vmem:[%s14032_s5] sm:$0xff] }
 0x54e   :  { %v2400_v23 = vpack.c.bf16 %v2386_v15, %v2383_v6  ;;  %2642 = vmatpush1.bf16.msra.mxu1 %v9503_v19  ;;  %v3142_v19 = vrot.slane %v11438_v40, %v10795_v61  ;;  %v11445_v6 = vld [vmem:[%s14032_s5 + $0x8] sm:$0xff] }
 0x54f   :  { %2643 = vmatprep.subr.bf16.mxu1 %v9508_v57  ;;  %v11449_v57 = vrot.slane %v11445_v6, %v10795_v61 }
 0x551   :  { %2535 = vmatmul.mubr.bf16.gmra.mrb[80].mxu1 %v2400_v23 }
 0x552   :  { %2644 = vmatpush1.bf16.msra.mxu1 %v9506_v35  ;;  %2544 = vmatprep.mubr.bf16.mxu1 %v14072_v24 }
 0x553   :  { %2645 = vmatprep.subr.bf16.mxu1 %v9511_v12 }
 0x556   :  { %2646 = vmatpush1.bf16.msra.mxu1 %v9509_v3 }
 0x557   :  { %2647 = vmatprep.subr.bf16.mxu1 %v9514_v22  ;;  %v14073_v22 = vmax.f32 %v10605_v28, 0.0 }
 0x559   :  { %2545 = vmatmul.mubr.bf16.gmra.mrb[84].mxu1 %v2401_v63  ;;  %v9056_v25 = vpop.f32.mrb[64].mxu0 }
 0x55a   :  { %2648 = vmatpush1.bf16.msra.mxu1 %v9512_v44  ;;  %v2935_v2 = vpop.f32.mrb[65].mxu0  ;;  %2667 = vmatprep.mubr.bf16.mxu1 %v14072_v24 }
 0x55b   :  { %v9057_v62 = vpop.f32.mrb[66].mxu0  ;;  %2649 = vmatprep.subr.bf16.mxu1 %v9517_v14 }
 0x55c   :  { %v2967_v42 = vpack.c.bf16 %v9057_v62, %v9056_v25  ;;  %v2938_v51 = vpop.f32.mrb[67].mxu0  ;;  %v14074_v25 = vmax.f32 %v10608_v30, 0.0 }
 0x55d   :  { %v2966_v27 = vpack.c.bf16 %v2938_v51, %v2935_v2 }
 0x55e   :  { %2650 = vmatpush1.bf16.msra.mxu1 %v9515_v56  ;;  %v14075_v56 = vmax.f32 %v10614_v33, 0.0 }
 0x55f   :  { %3050 = vmatprep.subr.bf16.mxu1 %v9520_v18 }
 0x561   :  { %2668 = vmatmul.mubr.bf16.vlgmr.msra.gmra.mrb[72].mxu1 %v2136_v60  ;;  %v9532_v60 = vld [vmem:[%s14030_s3 + $0x144] ss:$8 sps:$4 sm:$0xff]  }
 0x562   :  { %3051 = vmatpush1.bf16.msra.mxu1 %v9518_v34  ;;  %2677 = vmatprep.mubr.bf16.mxu1 %v14072_v24 }
 0x563   :  { %3052 = vmatprep.subr.bf16.mxu1 %v9523_v36 }
 0x566   :  { %3053 = vmatpush1.bf16.msra.mxu1 %v9521_v26 }
 0x567   :  { %3054 = vmatprep.subr.bf16.mxu1 %v9526_v45 }
 0x569   :  { %2678 = vmatmul.mubr.bf16.gmra.mrb[76].mxu1 %v2137_v48  ;;  %v9538_v48 = vld [vmem:[%s14030_s3 + $0x164] ss:$8 sps:$4 sm:$0xff]  }
 0x56a   :  { %3055 = vmatpush1.bf16.msra.mxu1 %v9524_v7  ;;  %2687 = vmatprep.mubr.bf16.mxu1 %v14072_v24 }
 0x56b   :  { %3056 = vmatprep.subr.bf16.mxu1 %v9529_v49 }
 0x56e   :  { %3057 = vmatpush1.bf16.msra.mxu1 %v9527_v55 }
 0x56f   :  { %3058 = vmatprep.subr.bf16.mxu1 %v9532_v60 }
 0x571   :  { %2688 = vmatmul.mubr.bf16.gmra.mrb[80].mxu1 %v2138_v10 }
 0x572   :  { %3059 = vmatpush1.bf16.msra.mxu1 %v9530_v9  ;;  %2697 = vmatprep.mubr.bf16.mxu1 %v14072_v24  ;;  %v14078_v9 = vmax.f32 %v10633_v43, 0.0 }
 0x573   :  { %3060 = vmatprep.subr.bf16.mxu1 %v9535_v4 }
 0x576   :  { %3061 = vmatpush1.bf16.msra.mxu1 %v9533_v16  ;;  %v14079_v16 = vmax.f32 %v10650_v53, 0.0 }
 0x577   :  { %3062 = vmatprep.subr.bf16.mxu1 %v9538_v48 }
 0x579   :  { %2698 = vmatmul.mubr.bf16.gmra.mrb[84].mxu1 %v2139_v58 }
 0x57a   :  { %3063 = vmatpush1.bf16.msra.mxu1 %v9536_v17  ;;  %3082 = vmatprep.mubr.bf16.mxu1 %v14072_v24 }
 0x57b   :  { %3064 = vmatprep.subr.bf16.mxu1 %v9541_v59  ;;  %v14080_v59 = vmax.f32 %v10644_v50, 0.0  ;;  %v14081_v50 = vmax.f32 %v10670_v5, 0.0 }
 0x57e   :  { %3065 = vmatpush1.bf16.msra.mxu1 %v9539_v0 }
 0x581   :  { %3083 = vmatmul.mubr.bf16.vlgmr.msra.gmra.mrb[72].mxu1 %v2966_v27 }
 0x582   :  { %3092 = vmatprep.mubr.bf16.mxu1 %v14072_v24 }
 0x589   :  { %3093 = vmatmul.mubr.bf16.gmra.mrb[76].mxu1 %v2967_v42  ;;  %v14076_v42 = vmax.f32 %v10611_v31, 0.0  ;;  %v14077_v31 = vmax.f32 %v10636_v47, 0.0 }
 0x58a   :  { %3102 = vmatprep.mubr.bf16.mxu1 %v14072_v24 }
 0x5e0   :  { %v9060_v10 = vpop.f32.mrb[68].mxu0 }
 0x5e1   :  { %v2951_v37 = vpop.f32.mrb[69].mxu0 }
 0x5e2   :  { %v9061_v52 = vpop.f32.mrb[70].mxu0 }
 0x5e3   :  { %v2969_v39 = vpack.c.bf16 %v9061_v52, %v9060_v10  ;;  %v2954_v32 = vpop.f32.mrb[71].mxu0 }
 0x5e4   :  { %v2968_v58 = vpack.c.bf16 %v2954_v32, %v2951_v37 }
 0x5e6   :  { %3103 = vmatmul.mubr.bf16.gmra.mrb[80].mxu1 %v2968_v58 }
 0x5e7   :  { %3112 = vmatprep.mubr.bf16.mxu1 %v14072_v24 }
 0x5ee   :  { %3113 = vmatmul.mubr.bf16.gmra.mrb[84].mxu1 %v2969_v39 }
 0x654   :  { %v3084_v13 = vpop.f32.mrb[72].mxu1 }
 0x655   :  { %v3147_v63 = vadd.f32 %v3142_v19, %v3084_v13  ;;  %v3086_v15 = vpop.f32.mrb[73].mxu1 }
 0x656   :  { %v3148_v23 = vadd.f32 %v11449_v57, %v3086_v15  ;;  %v3088_v35 = vpop.f32.mrb[74].mxu1 }
 0x657   :  { %v3149_v12 = vadd.f32 %v3142_v19, %v3088_v35  ;;  %v3090_v3 = vpop.f32.mrb[75].mxu1  ;;  %v11459_v2 = vadd.f32 %v3147_v63, %v14074_v25 }
 0x658   :  { %v11454_v44 = vadd.f32 %v3148_v23, %v14073_v22  ;;  %v3150_v14 = vadd.f32 %v11449_v57, %v3090_v3  ;;  %v14082_v23 = vmax.f32 %v10667_v1, 0.0 }
 0x659   :  { %v11469_v51 = vadd.f32 %v3149_v12, %v14076_v42  ;;  %v14083_v12 = vmax.f32 %v10684_v11, 0.0 }
 0x65a   :  { %v11463_v62 = vadd.f32 %v3150_v14, %v14075_v56  ;;  %v3179_v18 = vsel %vm751_vm0, %v11454_v44, 0.0  ;;  %v14084_v14 = vmax.f32 %v10678_v8, 0.0  ;;  %v14085_v8 = vmax.f32 %v10704_v41, 0.0 }
 0x65b   :  { %v3180_v28 = vadd.f32 %v3179_v18, %v11459_v2 }
 0x65c   :  { %v3094_v27 = vpop.f32.mrb[76].mxu1  ;;  %v3183_v34 = vsel %vm751_vm0, %v11463_v62, 0.0 }
 0x65d   :  { %v3151_v30 = vadd.f32 %v3142_v19, %v3094_v27  ;;  %3181 = vadd.xlane.f32.xlu0 %v3180_v28  ;;  %v3096_v36 = vpop.f32.mrb[77].mxu1  ;;  %v3184_v33 = vadd.f32 %v3183_v34, %v11469_v51 }
 0x65e   :  { %v3152_v26 = vadd.f32 %v11449_v57, %v3096_v36  ;;  %v3098_v45 = vpop.f32.mrb[78].mxu1 }
 0x65f   :  { %v3153_v7 = vadd.f32 %v3142_v19, %v3098_v45  ;;  %3185 = vadd.xlane.f32.xlu1 %v3184_v33  ;;  %v3100_v49 = vpop.f32.mrb[79].mxu1  ;;  %v11483_v4 = vadd.f32 %v3151_v30, %v14078_v9  ;;  %v9544_v9 = vld [vmem:[%s14028_s1 + $0xc4] ss:$8 sps:$4 sm:$0xff]  }
 0x660   :  { %v11478_v55 = vadd.f32 %v3152_v26, %v14077_v31  ;;  %v3154_v60 = vadd.f32 %v11449_v57, %v3100_v49  ;;  %v14086_v26 = vmax.f32 %v10701_v29, 0.0  ;;  %3520 = vmatprep.subr.bf16.mxu0 %v9544_v9  ;;  %v9571_v9 = vld [vmem:[%s14028_s1 + $0x154] ss:$8 sps:$4 sm:$0xff]  }
 0x661   :  { %v11493_v0 = vadd.f32 %v3153_v7, %v14080_v59  ;;  %v14087_v7 = vmax.f32 %v10718_v54, 0.0  ;;  %v9542_v54 = vld [vmem:[%s14028_s1 + $0xc0] ss:$8 sps:$4 sm:$0xff]  }
 0x662   :  { %v11487_v48 = vadd.f32 %v3154_v60, %v14079_v16  ;;  %v3187_v17 = vsel %vm751_vm0, %v11478_v55, 0.0  ;;  %3521 = vmatpush1.bf16.msra.mxu0 %v9542_v54  ;;  %v9545_v16 = vld [vmem:[%s14028_s1 + $0xd0] ss:$8 sps:$4 sm:$0xff]   ;;  %v9566_v54 = vld [vmem:[%s14028_s1 + $0x140] ss:$8 sps:$4 sm:$0xff]  }
 0x663   :  { %v3188_v47 = vadd.f32 %v3187_v17, %v11483_v4  ;;  %v9550_v17 = vld [vmem:[%s14028_s1 + $0xe4] ss:$8 sps:$4 sm:$0xff]  }
 0x664   :  { %v3191_v10 = vsel %vm751_vm0, %v11487_v48, 0.0 }
 0x665   :  { %3189 = vadd.xlane.f32.xlu0 %v3188_v47  ;;  %v3192_v43 = vadd.f32 %v3191_v10, %v11493_v0  ;;  %v9548_v47 = vld [vmem:[%s14028_s1 + $0xe0] ss:$8 sps:$4 sm:$0xff]  }
 0x667   :  { %3193 = vadd.xlane.f32.xlu1 %v3192_v43  ;;  %v9553_v43 = vld [vmem:[%s14028_s1 + $0xf4] ss:$8 sps:$4 sm:$0xff]  }
 0x6b9   :  { %v3104_v37 = vpop.f32.mrb[80].mxu1 }
 0x6ba   :  { %v3155_v53 = vadd.f32 %v3142_v19, %v3104_v37  ;;  %v3106_v52 = vpop.f32.mrb[81].mxu1 }
 0x6bb   :  { %v3156_v39 = vadd.f32 %v11449_v57, %v3106_v52  ;;  %v3108_v32 = vpop.f32.mrb[82].mxu1 }
 0x6bc   :  { %v3157_v58 = vadd.f32 %v3142_v19, %v3108_v32  ;;  %v3110_v13 = vpop.f32.mrb[83].mxu1  ;;  %v11507_v35 = vadd.f32 %v3155_v53, %v14082_v23  ;;  %v9551_v32 = vld [vmem:[%s14028_s1 + $0xf0] ss:$8 sps:$4 sm:$0xff]  }
 0x6bd   :  { %v11502_v63 = vadd.f32 %v3156_v39, %v14081_v50  ;;  %v3158_v15 = vadd.f32 %v11449_v57, %v3110_v13 }
 0x6be   :  { %v11517_v25 = vadd.f32 %v3157_v58, %v14084_v14 }
 0x6bf   :  { %v11511_v3 = vadd.f32 %v3158_v15, %v14083_v12  ;;  %v3195_v22 = vsel %vm751_vm0, %v11502_v63, 0.0 }
 0x6c0   :  { %v3196_v5 = vadd.f32 %v3195_v22, %v11507_v35  ;;  %v9554_v22 = vld [vmem:[%s14028_s1 + $0x100] ss:$8 sps:$4 sm:$0xff]  }
 0x6c1   :  { %v3114_v56 = vpop.f32.mrb[84].mxu1  ;;  %v3199_v18 = vsel %vm751_vm0, %v11511_v3, 0.0 }
 0x6c2   :  { %v3159_v1 = vadd.f32 %v3142_v19, %v3114_v56  ;;  %3197 = vadd.xlane.f32.xlu0 %v3196_v5  ;;  %v3116_v42 = vpop.f32.mrb[85].mxu1  ;;  %v3200_v11 = vadd.f32 %v3199_v18, %v11517_v25  ;;  %v9559_v56 = vld [vmem:[%s14028_s1 + $0x114] ss:$8 sps:$4 sm:$0xff]  }
 0x6c3   :  { %v3160_v28 = vadd.f32 %v11449_v57, %v3116_v42  ;;  %v3118_v27 = vpop.f32.mrb[86].mxu1 }
 0x6c4   :  { %v3161_v34 = vadd.f32 %v3142_v19, %v3118_v27  ;;  %3201 = vadd.xlane.f32.xlu1 %v3200_v11  ;;  %v3120_v30 = vpop.f32.mrb[87].mxu1  ;;  %v11531_v45 = vadd.f32 %v3159_v1, %v14086_v26  ;;  %v14088_v19 = vmax.f32 %v10712_v46, 0.0  ;;  %v9547_v46 = vld [vmem:[%s14028_s1 + $0xd4] ss:$8 sps:$4 sm:$0xff]   ;;  %v9557_v27 = vld [vmem:[%s14028_s1 + $0x110] ss:$8 sps:$4 sm:$0xff]  }
 0x6c5   :  { %v11526_v36 = vadd.f32 %v3160_v28, %v14085_v8  ;;  %v3162_v33 = vadd.f32 %v11449_v57, %v3120_v30  ;;  %3522 = vmatprep.subr.bf16.mxu0 %v9547_v46  ;;  %v9569_v46 = vld [vmem:[%s14028_s1 + $0x150] ss:$8 sps:$4 sm:$0xff]  }
 0x6c6   :  { %v11541_v60 = vadd.f32 %v3161_v34, %v14088_v19  ;;  %3523 = vmatpush1.bf16.msra.mxu0 %v9545_v16  ;;  %v9560_v19 = vld [vmem:[%s14028_s1 + $0x120] ss:$8 sps:$4 sm:$0xff]   ;;  %v9574_v16 = vld [vmem:[%s14028_s1 + $0x164] ss:$8 sps:$4 sm:$0xff]  }
 0x6c7   :  { %v11535_v49 = vadd.f32 %v3162_v33, %v14087_v7  ;;  %v3203_v31 = vsel %vm751_vm0, %v11526_v36, 0.0  ;;  %3524 = vmatprep.subr.bf16.mxu0 %v9550_v17  ;;  %v9572_v17 = vld [vmem:[%s14028_s1 + $0x160] ss:$8 sps:$4 sm:$0xff]  }
 0x6c8   :  { %v3204_v41 = vadd.f32 %v3203_v31, %v11531_v45  ;;  %v9562_v31 = vld [vmem:[%s14028_s1 + $0x124] ss:$8 sps:$4 sm:$0xff]  }
 0x6c9   :  { %v3207_v57 = vsel %vm751_vm0, %v11535_v49, 0.0 }
 0x6ca   :  { %3205 = vadd.xlane.f32.xlu0 %v3204_v41  ;;  %v3208_v29 = vadd.f32 %v3207_v57, %v11541_v60  ;;  %3525 = vmatpush1.bf16.msra.mxu0 %v9548_v47  ;;  %v9565_v41 = vld [vmem:[%s14028_s1 + $0x134] ss:$8 sps:$4 sm:$0xff]   ;;  %v9563_v57 = vld [vmem:[%s14028_s1 + $0x130] ss:$8 sps:$4 sm:$0xff]  }
 0x6cb   :  { %3526 = vmatprep.subr.bf16.mxu0 %v9553_v43  ;;  %v9575_v47 = vld [vmem:[%s14028_s1 + $0x170] ss:$8 sps:$4 sm:$0xff]  }
 0x6cc   :  { %3209 = vadd.xlane.f32.xlu1 %v3208_v29  ;;  %v9568_v29 = vld [vmem:[%s14028_s1 + $0x144] ss:$8 sps:$4 sm:$0xff]  }
 0x6ce   :  { %3527 = vmatpush1.bf16.msra.mxu0 %v9551_v32 }
 0x6ea   :  { %v3182_v59 = vpop.xlane.xlu0 %3181 }
 0x6eb   :  { %v3212_v10 = vmul.f32 0.0052083335, %v3182_v59  ;;  %v9577_v59 = vld [vmem:[%s14028_s1 + $0x174] ss:$8 sps:$4 sm:$0xff]  }
 0x6ec   :  { %v3186_v37 = vpop.xlane.xlu1 %3185 }
 0x6ed   :  { %v11569_v53 = vsub.f32 %v11459_v2, %v3212_v10  ;;  %v11572_v52 = vsub.f32 %v11454_v44, %v3212_v10  ;;  %v3213_v39 = vmul.f32 0.0052083335, %v3186_v37  ;;  %v9556_v44 = vld [vmem:[%s14028_s1 + $0x104] ss:$8 sps:$4 sm:$0xff]  }
 0x6ee   :  { %3528 = vmatprep.subr.bf16.mxu0 %v9556_v44 }
 0x6ef   :  { %v11578_v58 = vsub.f32 %v11469_v51, %v3213_v39  ;;  %v11581_v13 = vsub.f32 %v11463_v62, %v3213_v39  ;;  %v3236_v50 = vmul.f32 %v11569_v53, %v11569_v53  ;;  %v3237_v2 = vmul.f32 %v11572_v52, %v11572_v52  ;;  %3529 = vmatpush1.bf16.msra.mxu0 %v9554_v22 }
 0x6f0   :  { %3530 = vmatprep.subr.bf16.mxu0 %v9559_v56 }
 0x6f1   :  { %v3252_v15 = vsel %vm751_vm0, %v3237_v2, 0.0  ;;  %v3238_v51 = vmul.f32 %v11578_v58, %v11578_v58  ;;  %v3239_v62 = vmul.f32 %v11581_v13, %v11581_v13 }
 0x6f2   :  { %v3190_v23 = vpop.xlane.xlu0 %3189  ;;  %v3253_v12 = vadd.f32 %v3252_v15, %v3236_v50 }
 0x6f3   :  { %v3214_v14 = vmul.f32 0.0052083335, %v3190_v23  ;;  %v3256_v5 = vsel %vm751_vm0, %v3239_v62, 0.0  ;;  %3531 = vmatpush1.bf16.msra.mxu0 %v9557_v27 }
 0x6f4   :  { %3254 = vadd.xlane.f32.xlu0 %v3253_v12  ;;  %v3194_v18 = vpop.xlane.xlu1 %3193  ;;  %v3257_v1 = vadd.f32 %v3256_v5, %v3238_v51  ;;  %3532 = vmatprep.subr.bf16.mxu0 %v9562_v31 }
 0x6f5   :  { %v11603_v42 = vsub.f32 %v11483_v4, %v3214_v14  ;;  %v11606_v11 = vsub.f32 %v11478_v55, %v3214_v14  ;;  %v3215_v28 = vmul.f32 0.0052083335, %v3194_v18 }
 0x6f6   :  { %3258 = vadd.xlane.f32.xlu1 %v3257_v1 }
 0x6f7   :  { %v11612_v34 = vsub.f32 %v11493_v0, %v3215_v28  ;;  %v11615_v30 = vsub.f32 %v11487_v48, %v3215_v28  ;;  %v3240_v4 = vmul.f32 %v11603_v42, %v11603_v42  ;;  %v3241_v55 = vmul.f32 %v11606_v11, %v11606_v11  ;;  %3533 = vmatpush1.bf16.msra.mxu0 %v9560_v19 }
 0x6f8   :  { %3534 = vmatprep.subr.bf16.mxu0 %v9565_v41  ;;  %v9578_v41 = vld [vmem:[%s14028_s1 + $0x180] ss:$8 sps:$4 sm:$0xff]  }
 0x6f9   :  { %v3260_v8 = vsel %vm751_vm0, %v3241_v55, 0.0  ;;  %v3242_v33 = vmul.f32 %v11612_v34, %v11612_v34  ;;  %v3243_v26 = vmul.f32 %v11615_v30, %v11615_v30 }
 0x6fa   :  { %v3261_v0 = vadd.f32 %v3260_v8, %v3240_v4 }
 0x6fb   :  { %v3264_v48 = vsel %vm751_vm0, %v3243_v26, 0.0  ;;  %3535 = vmatpush1.bf16.msra.mxu0 %v9563_v57  ;;  %v9580_v57 = vld [vmem:[%s14028_s1 + $0x184] ss:$8 sps:$4 sm:$0xff]  }
 0x6fc   :  { %3262 = vadd.xlane.f32.xlu0 %v3261_v0  ;;  %v3265_v7 = vadd.f32 %v3264_v48, %v3242_v33  ;;  %3536 = vmatprep.subr.bf16.mxu0 %v9568_v29 }
 0x6fd   :  { %3757 = vmatprep.subr.bf16.mxu1 %v9580_v57 }
 0x6fe   :  { %3266 = vadd.xlane.f32.xlu1 %v3265_v7  ;;  %3758 = vmatpush1.bf16.msra.mxu1 %v9578_v41 }
 0x6ff   :  { %3537 = vmatpush1.bf16.msra.mxu0 %v9566_v54  ;;  %v9583_v54 = vld [vmem:[%s14028_s1 + $0x194] ss:$8 sps:$4 sm:$0xff]  }
 0x700   :  { %3538 = vmatprep.subr.bf16.mxu0 %v9571_v9  ;;  %3759 = vmatprep.subr.bf16.mxu1 %v9583_v54 }
 0x703   :  { %3539 = vmatpush1.bf16.msra.mxu0 %v9569_v46 }
 0x704   :  { %3540 = vmatprep.subr.bf16.mxu0 %v9574_v16 }
 0x707   :  { %3541 = vmatpush1.bf16.msra.mxu0 %v9572_v17  ;;  %v9581_v17 = vld [vmem:[%s14028_s1 + $0x190] ss:$8 sps:$4 sm:$0xff]  }
 0x708   :  { %3542 = vmatprep.subr.bf16.mxu0 %v9577_v59  ;;  %v9586_v59 = vld [vmem:[%s14028_s1 + $0x1a4] ss:$8 sps:$4 sm:$0xff]   ;;  %3760 = vmatpush1.bf16.msra.mxu1 %v9581_v17  ;;  %v9601_v17 = vld [vmem:[%s14028_s1 + $0x1f4] ss:$8 sps:$4 sm:$0xff]  }
 0x709   :  { %3761 = vmatprep.subr.bf16.mxu1 %v9586_v59  ;;  %v9599_v59 = vld [vmem:[%s14028_s1 + $0x1f0] ss:$8 sps:$4 sm:$0xff]  }
 0x70b   :  { %3543 = vmatpush1.bf16.msra.mxu0 %v9575_v47 }
 0x74f   :  { %v3198_v10 = vpop.xlane.xlu0 %3197 }
 0x750   :  { %v3216_v43 = vmul.f32 0.0052083335, %v3198_v10  ;;  %v11723_v10 = vsub.s32 3, %v10587_v20 }
 0x751   :  { %v3202_v37 = vpop.xlane.xlu1 %3201 }
 0x752   :  { %v11664_v39 = vsub.f32 %v11507_v35, %v3216_v43  ;;  %v11667_v32 = vsub.f32 %v11502_v63, %v3216_v43  ;;  %v3217_v50 = vmul.f32 0.0052083335, %v3202_v37  ;;  %14089 = vst [vmem:[#allocation9_spill] sm:$0xff] %v11723_v10  ;;  %v11727_v43 = vrot.slane %v11438_v40, %v10789_v38 }
 0x753   :  { %v11731_v37 = vrot.slane %v11445_v6, %v10789_v38 }
 0x754   :  { %v11670_v2 = vsub.f32 %v11517_v25, %v3217_v50  ;;  %v11673_v44 = vsub.f32 %v11511_v3, %v3217_v50  ;;  %v3244_v15 = vmul.f32 %v11664_v39, %v11664_v39  ;;  %v3245_v51 = vmul.f32 %v11667_v32, %v11667_v32 }
 0x756   :  { %v3268_v62 = vsel %vm751_vm0, %v3245_v51, 0.0  ;;  %v3246_v35 = vmul.f32 %v11670_v2, %v11670_v2  ;;  %v3247_v63 = vmul.f32 %v11673_v44, %v11673_v44 }
 0x757   :  { %v3206_v23 = vpop.xlane.xlu0 %3205  ;;  %v3269_v25 = vadd.f32 %v3268_v62, %v3244_v15  ;;  %v9584_v15 = vld [vmem:[%s14028_s1 + $0x1a0] ss:$8 sps:$4 sm:$0xff]  }
 0x758   :  { %v3218_v12 = vmul.f32 0.0052083335, %v3206_v23  ;;  %v3272_v3 = vsel %vm751_vm0, %v3247_v63, 0.0  ;;  %v11743_v23 = vrot.slane %v11445_v6, %v11723_v10  ;;  %3762 = vmatpush1.bf16.msra.mxu1 %v9584_v15  ;;  %v9607_v15 = vld [vmem:[%s14028_s1 + $0x214] ss:$8 sps:$4 sm:$0xff]  }
 0x759   :  { %3270 = vadd.xlane.f32.xlu0 %v3269_v25  ;;  %v3210_v22 = vpop.xlane.xlu1 %3209  ;;  %v3273_v14 = vadd.f32 %v3272_v3, %v3246_v35  ;;  %v9589_v35 = vld [vmem:[%s14028_s1 + $0x1b4] ss:$8 sps:$4 sm:$0xff]   ;;  %v11747_v25 = vrot.slane %v11438_v40, %v11723_v10 }
 0x75a   :  { %v11686_v5 = vsub.f32 %v11531_v45, %v3218_v12  ;;  %v11689_v56 = vsub.f32 %v11526_v36, %v3218_v12  ;;  %v3219_v18 = vmul.f32 0.0052083335, %v3210_v22  ;;  %v9587_v22 = vld [vmem:[%s14028_s1 + $0x1b0] ss:$8 sps:$4 sm:$0xff]   ;;  %3763 = vmatprep.subr.bf16.mxu1 %v9589_v35 }
 0x75b   :  { %3274 = vadd.xlane.f32.xlu1 %v3273_v14 }
 0x75c   :  { %v11692_v1 = vsub.f32 %v11541_v60, %v3219_v18  ;;  %v11695_v28 = vsub.f32 %v11535_v49, %v3219_v18  ;;  %v3248_v27 = vmul.f32 %v11686_v5, %v11686_v5  ;;  %v3249_v4 = vmul.f32 %v11689_v56, %v11689_v56  ;;  %3764 = vmatpush1.bf16.msra.mxu1 %v9587_v22 }
 0x75e   :  { %v3276_v45 = vsel %vm751_vm0, %v3249_v4, 0.0  ;;  %v3250_v36 = vmul.f32 %v11692_v1, %v11692_v1  ;;  %v3251_v55 = vmul.f32 %v11695_v28, %v11695_v28 }
 0x75f   :  { %v3277_v8 = vadd.f32 %v3276_v45, %v3248_v27  ;;  %v9592_v27 = vld [vmem:[%s14028_s1 + $0x1c4] ss:$8 sps:$4 sm:$0xff]  }
 0x760   :  { %v3280_v60 = vsel %vm751_vm0, %v3251_v55, 0.0  ;;  %v9590_v55 = vld [vmem:[%s14028_s1 + $0x1c0] ss:$8 sps:$4 sm:$0xff]   ;;  %3765 = vmatprep.subr.bf16.mxu1 %v9592_v27 }
 0x761   :  { %3278 = vadd.xlane.f32.xlu0 %v3277_v8  ;;  %v3281_v49 = vadd.f32 %v3280_v60, %v3250_v36  ;;  %3766 = vmatpush1.bf16.msra.mxu1 %v9590_v55  ;;  %v9608_v55 = vld [vmem:[%s14028_s1 + $0x220] ss:$8 sps:$4 sm:$0xff]  }
 0x763   :  { %3282 = vadd.xlane.f32.xlu1 %v3281_v49 }
 0x781   :  { %v3255_v33 = vpop.xlane.xlu0 %3254 }
 0x782   :  { %v3284_v26 = vmul.f32 0.0052083335, %v3255_v33 }
 0x783   :  { %v3259_v0 = vpop.xlane.xlu1 %3258 }
 0x784   :  { %v3292_v48 = vadd.f32 1e-05, %v3284_v26  ;;  %v3285_v7 = vmul.f32 0.0052083335, %v3259_v0  ;;  %v9595_v26 = vld [vmem:[%s14028_s1 + $0x1d4] ss:$8 sps:$4 sm:$0xff]  }
 0x785   :  { %3767 = vmatprep.subr.bf16.mxu1 %v9595_v26 }
 0x786   :  { %10118 = vrsqrt.f32 %v3292_v48  ;;  %v3293_v31 = vadd.f32 1e-05, %v3285_v7 }
 0x788   :  { %10120 = vrsqrt.f32 %v3293_v31 }
 0x789   :  { %v3263_v19 = vpop.xlane.xlu0 %3262 }
 0x78a   :  { %v3286_v29 = vmul.f32 0.0052083335, %v3263_v19 }
 0x78b   :  { %v3267_v9 = vpop.xlane.xlu1 %3266 }
 0x78c   :  { %v3294_v46 = vadd.f32 1e-05, %v3286_v29  ;;  %v3287_v16 = vmul.f32 0.0052083335, %v3267_v9  ;;  %v9596_v9 = vld [vmem:[%s14028_s1 + $0x1e0] ss:$8 sps:$4 sm:$0xff]  }
 0x78e   :  { %10122 = vrsqrt.f32 %v3294_v46  ;;  %v3295_v47 = vadd.f32 1e-05, %v3287_v16 }
 0x790   :  { %v10119_v50 = vpop.eup %10118  ;;  %10124 = vrsqrt.f32 %v3295_v47  ;;  %v9604_v47 = vld [vmem:[%s14028_s1 + $0x204] ss:$8 sps:$4 sm:$0xff]  }
 0x791   :  { %v3308_v51 = vmul.f32 %v10119_v50, %v11569_v53  ;;  %v3309_v62 = vmul.f32 %v10119_v50, %v11572_v52  ;;  %v9602_v50 = vld [vmem:[%s14028_s1 + $0x200] ss:$8 sps:$4 sm:$0xff]  }
 0x792   :  { %v10121_v63 = vpop.eup %10120 }
 0x793   :  { %v3332_v12 = vmul.f32 %v11727_v43, %v3308_v51  ;;  %v3310_v53 = vmul.f32 %v10121_v63, %v11578_v58  ;;  %v3311_v52 = vmul.f32 %v10121_v63, %v11581_v13  ;;  %v3333_v3 = vmul.f32 %v11731_v37, %v3309_v62  ;;  %v9605_v51 = vld [vmem:[%s14028_s1 + $0x210] ss:$8 sps:$4 sm:$0xff]  }
 0x795   :  { %v3334_v14 = vmul.f32 %v11727_v43, %v3310_v53  ;;  %v3335_v18 = vmul.f32 %v11731_v37, %v3311_v52  ;;  %v11762_v58 = vadd.f32 %v11743_v23, %v3333_v3  ;;  %v11768_v4 = vadd.f32 %v11747_v25, %v3332_v12 }
 0x797   :  { %v11765_v13 = vadd.f32 %v11743_v23, %v3335_v18  ;;  %v11771_v45 = vadd.f32 %v11747_v25, %v3334_v14 }
 0x798   :  { %v10123_v36 = vpop.eup %10122 }
 0x799   :  { %v3373_v8 = vpack.c.bf16 %v11765_v13, %v11762_v58  ;;  %v3372_v60 = vpack.c.bf16 %v11771_v45, %v11768_v4  ;;  %v3313_v49 = vmul.f32 %v10123_v36, %v11606_v11  ;;  %v3312_v33 = vmul.f32 %v10123_v36, %v11603_v42  ;;  %v9593_v42 = vld [vmem:[%s14028_s1 + $0x1d0] ss:$8 sps:$4 sm:$0xff]   ;;  %v9610_v36 = vld [vmem:[%s14028_s1 + $0x224] ss:$8 sps:$4 sm:$0xff]  }
 0x79a   :  { %v10125_v0 = vpop.eup %10124  ;;  %3768 = vmatpush1.bf16.msra.mxu1 %v9593_v42 }
 0x79b   :  { %8485 = vmatprep.mubr.msk.bf16.mxu0 %vm751_vm0, %v3373_v8  ;;  %v3315_v48 = vmul.f32 %v10125_v0, %v11615_v30  ;;  %v3337_v7 = vmul.f32 %v11731_v37, %v3313_v49  ;;  %v3314_v31 = vmul.f32 %v10125_v0, %v11612_v34  ;;  %v3336_v19 = vmul.f32 %v11727_v43, %v3312_v33  ;;  %v9598_v30 = vld [vmem:[%s14028_s1 + $0x1e4] ss:$8 sps:$4 sm:$0xff]   ;;  %v9613_v49 = vld [vmem:[%s14028_s1 + $0x234] ss:$8 sps:$4 sm:$0xff]   ;;  %v9611_v0 = vld [vmem:[%s14028_s1 + $0x230] ss:$8 sps:$4 sm:$0xff]  }
 0x79c   :  { %3553 = vmatmul.mubr.bf16.vlgmr.msra.gmra.mrb[72].mxu0 %v3372_v60  ;;  %3769 = vmatprep.subr.bf16.mxu1 %v9598_v30 }
 0x79d   :  { %v3339_v11 = vmul.f32 %v11731_v37, %v3315_v48  ;;  %v3338_v41 = vmul.f32 %v11727_v43, %v3314_v31  ;;  %v11799_v57 = vadd.f32 %v11743_v23, %v3337_v7  ;;  %v11805_v29 = vadd.f32 %v11747_v25, %v3336_v19 }
 0x79e   :  { %3770 = vmatpush1.bf16.msra.mxu1 %v9596_v9 }
 0x79f   :  { %v11802_v34 = vadd.f32 %v11743_v23, %v3339_v11  ;;  %v11808_v54 = vadd.f32 %v11747_v25, %v3338_v41  ;;  %3771 = vmatprep.subr.bf16.mxu1 %v9601_v17 }
 0x7a1   :  { %v3375_v46 = vpack.c.bf16 %v11802_v34, %v11799_v57  ;;  %v3374_v16 = vpack.c.bf16 %v11808_v54, %v11805_v29 }
 0x7a2   :  { %3772 = vmatpush1.bf16.msra.mxu1 %v9599_v59 }
 0x7a3   :  { %8486 = vmatprep.mubr.msk.bf16.mxu0 %vm751_vm0, %v3375_v46  ;;  %3773 = vmatprep.subr.bf16.mxu1 %v9604_v47 }
 0x7a4   :  { %3563 = vmatmul.mubr.bf16.gmra.mrb[76].mxu0 %v3374_v16 }
 0x7a6   :  { %3774 = vmatpush1.bf16.msra.mxu1 %v9602_v50 }
 0x7a7   :  { %3775 = vmatprep.subr.bf16.mxu1 %v9607_v15 }
 0x7aa   :  { %3776 = vmatpush1.bf16.msra.mxu1 %v9605_v51 }
 0x7ab   :  { %3777 = vmatprep.subr.bf16.mxu1 %v9610_v36 }
 0x7ae   :  { %3778 = vmatpush1.bf16.msra.mxu1 %v9608_v55 }
 0x7af   :  { %3779 = vmatprep.subr.bf16.mxu1 %v9613_v49 }
 0x7b2   :  { %3780 = vmatpush1.bf16.msra.mxu1 %v9611_v0 }
 0x7e6   :  { %v3271_v62 = vpop.xlane.xlu0 %3270 }
 0x7e7   :  { %v3288_v35 = vmul.f32 0.0052083335, %v3271_v62 }
 0x7e8   :  { %v3275_v63 = vpop.xlane.xlu1 %3274 }
 0x7e9   :  { %v3296_v12 = vadd.f32 1e-05, %v3288_v35  ;;  %v3289_v53 = vmul.f32 0.0052083335, %v3275_v63 }
 0x7eb   :  { %10126 = vrsqrt.f32 %v3296_v12  ;;  %v3297_v52 = vadd.f32 1e-05, %v3289_v53 }
 0x7ed   :  { %10128 = vrsqrt.f32 %v3297_v52 }
 0x7ee   :  { %v3279_v3 = vpop.xlane.xlu0 %3278 }
 0x7ef   :  { %v3290_v22 = vmul.f32 0.0052083335, %v3279_v3 }
 0x7f0   :  { %v3283_v14 = vpop.xlane.xlu1 %3282 }
 0x7f1   :  { %v3298_v18 = vadd.f32 1e-05, %v3290_v22  ;;  %v3291_v27 = vmul.f32 0.0052083335, %v3283_v14 }
 0x7f3   :  { %10130 = vrsqrt.f32 %v3298_v18  ;;  %v3299_v8 = vadd.f32 1e-05, %v3291_v27 }
 0x7f5   :  { %v10127_v60 = vpop.eup %10126  ;;  %10132 = vrsqrt.f32 %v3299_v8 }
 0x7f6   :  { %v3317_v33 = vmul.f32 %v10127_v60, %v11667_v32  ;;  %v3316_v26 = vmul.f32 %v10127_v60, %v11664_v39 }
 0x7f7   :  { %v10129_v48 = vpop.eup %10128 }
 0x7f8   :  { %v3319_v7 = vmul.f32 %v10129_v48, %v11673_v44  ;;  %v3341_v31 = vmul.f32 %v11731_v37, %v3317_v33  ;;  %v3318_v19 = vmul.f32 %v10129_v48, %v11670_v2  ;;  %v3340_v42 = vmul.f32 %v11727_v43, %v3316_v26 }
 0x7fa   :  { %v3343_v11 = vmul.f32 %v11731_v37, %v3319_v7  ;;  %v3342_v32 = vmul.f32 %v11727_v43, %v3318_v19  ;;  %v11857_v39 = vadd.f32 %v11743_v23, %v3341_v31  ;;  %v11863_v30 = vadd.f32 %v11747_v25, %v3340_v42 }
 0x7fc   :  { %v11860_v41 = vadd.f32 %v11743_v23, %v3343_v11  ;;  %v11866_v44 = vadd.f32 %v11747_v25, %v3342_v32 }
 0x7fd   :  { %v10131_v2 = vpop.eup %10130 }
 0x7fe   :  { %v3377_v9 = vpack.c.bf16 %v11860_v41, %v11857_v39  ;;  %v3376_v46 = vpack.c.bf16 %v11866_v44, %v11863_v30  ;;  %v3321_v16 = vmul.f32 %v10131_v2, %v11689_v56  ;;  %v3320_v17 = vmul.f32 %v10131_v2, %v11686_v5 }
 0x7ff   :  { %v10133_v59 = vpop.eup %10132 }
 0x800   :  { %8487 = vmatprep.mubr.msk.bf16.mxu0 %vm751_vm0, %v3377_v9  ;;  %v3323_v47 = vmul.f32 %v10133_v59, %v11695_v28  ;;  %v3345_v50 = vmul.f32 %v11731_v37, %v3321_v16  ;;  %v3322_v15 = vmul.f32 %v10133_v59, %v11692_v1  ;;  %v3344_v51 = vmul.f32 %v11727_v43, %v3320_v17 }
 0x801   :  { %3573 = vmatmul.mubr.bf16.gmra.mrb[80].mxu0 %v3376_v46 }
 0x802   :  { %v3347_v62 = vmul.f32 %v11731_v37, %v3323_v47  ;;  %v3346_v35 = vmul.f32 %v11727_v43, %v3322_v15  ;;  %v11882_v56 = vadd.f32 %v11743_v23, %v3345_v50  ;;  %v11888_v63 = vadd.f32 %v11747_v25, %v3344_v51 }
 0x803   :  { %v11899_v43 = vsub.s32 4, %v10587_v20 }
 0x804   :  { %v11885_v5 = vadd.f32 %v11743_v23, %v3347_v62  ;;  %v11891_v28 = vadd.f32 %v11747_v25, %v3346_v35 }
 0x805   :  { %14090 = vst [vmem:[#allocation10_spill] sm:$0xff] %v11899_v43  ;;  %v3383_v23 = vrot.slane %v11438_v40, %v11899_v43  ;;  %v3387_v12 = vrot.slane %v11445_v6, %v11899_v43 }
 0x806   :  { %v3379_v1 = vpack.c.bf16 %v11885_v5, %v11882_v56  ;;  %v3378_v37 = vpack.c.bf16 %v11891_v28, %v11888_v63 }
 0x808   :  { %8488 = vmatprep.mubr.msk.bf16.mxu0 %vm751_vm0, %v3379_v1 }
 0x809   :  { %3583 = vmatmul.mubr.bf16.gmra.mrb[84].mxu0 %v3378_v37 }
 0x86f   :  { %v3554_v25 = vpop.f32.mrb[72].mxu0 }
 0x870   :  { %v3555_v53 = vadd.f32 %v3554_v25, %v3383_v23  ;;  %v3556_v52 = vpop.f32.mrb[73].mxu0 }
 0x871   :  { %v3557_v3 = vadd.f32 %v3556_v52, %v3387_v12  ;;  %v3558_v22 = vpop.f32.mrb[74].mxu0 }
 0x872   :  { %v3559_v14 = vadd.f32 %v3558_v22, %v3383_v23  ;;  %v3560_v18 = vpop.f32.mrb[75].mxu0  ;;  %v3593_v36 = vmax.f32 %v3555_v53, 0.0 }
 0x873   :  { %v3561_v27 = vadd.f32 %v3560_v18, %v3387_v12  ;;  %v3594_v8 = vmax.f32 %v3557_v3, 0.0 }
 0x874   :  { %v3595_v55 = vmax.f32 %v3559_v14, 0.0 }
 0x875   :  { %v3596_v60 = vmax.f32 %v3561_v27, 0.0 }
 0x876   :  { %v3609_v49 = vpack.c.bf16 %v3595_v55, %v3593_v36 }
 0x877   :  { %v3610_v33 = vpack.c.bf16 %v3596_v60, %v3594_v8  ;;  %v3564_v26 = vpop.f32.mrb[76].mxu0 }
 0x878   :  { %v3565_v0 = vadd.f32 %v3564_v26, %v3383_v23  ;;  %v3566_v48 = vpop.f32.mrb[77].mxu0 }
 0x879   :  { %v3567_v7 = vadd.f32 %v3566_v48, %v3387_v12  ;;  %v3568_v31 = vpop.f32.mrb[78].mxu0  ;;  %8513 = vmatprep.mubr.msk.bf16.mxu1 %vm751_vm0, %v3610_v33 }
 0x87a   :  { %v3569_v19 = vadd.f32 %v3568_v31, %v3383_v23  ;;  %v3570_v42 = vpop.f32.mrb[79].mxu0  ;;  %3790 = vmatmul.mubr.bf16.vlgmr.msra.gmra.mrb[88].mxu1 %v3609_v49  ;;  %v3597_v32 = vmax.f32 %v3565_v0, 0.0 }
 0x87b   :  { %v3571_v11 = vadd.f32 %v3570_v42, %v3387_v12  ;;  %v3598_v9 = vmax.f32 %v3567_v7, 0.0 }
 0x87c   :  { %v3599_v2 = vmax.f32 %v3569_v19, 0.0  ;;  %v11910_v19 = vsub.s32 5, %v10587_v20 }
 0x87d   :  { %v3600_v46 = vmax.f32 %v3571_v11, 0.0 }
 0x87e   :  { %v3611_v16 = vpack.c.bf16 %v3599_v2, %v3597_v32  ;;  %14091 = vst [vmem:[#allocation11_spill] sm:$0xff] %v11910_v19  ;;  %v3620_v42 = vrot.slane %v11438_v40, %v11910_v19 }
 0x87f   :  { %v3612_v17 = vpack.c.bf16 %v3600_v46, %v3598_v9 }
 0x881   :  { %8514 = vmatprep.mubr.msk.bf16.mxu1 %vm751_vm0, %v3612_v17 }
 0x882   :  { %3800 = vmatmul.mubr.bf16.gmra.mrb[92].mxu1 %v3611_v16 }
 0x8d4   :  { %v3574_v59 = vpop.f32.mrb[80].mxu0 }
 0x8d5   :  { %v3575_v47 = vadd.f32 %v3574_v59, %v3383_v23  ;;  %v3576_v50 = vpop.f32.mrb[81].mxu0 }
 0x8d6   :  { %v3577_v15 = vadd.f32 %v3576_v50, %v3387_v12  ;;  %v3578_v51 = vpop.f32.mrb[82].mxu0 }
 0x8d7   :  { %v3579_v62 = vadd.f32 %v3578_v51, %v3383_v23  ;;  %v3580_v35 = vpop.f32.mrb[83].mxu0  ;;  %v3601_v37 = vmax.f32 %v3575_v47, 0.0 }
 0x8d8   :  { %v3581_v1 = vadd.f32 %v3580_v35, %v3387_v12  ;;  %v3602_v53 = vmax.f32 %v3577_v15, 0.0 }
 0x8d9   :  { %v3603_v25 = vmax.f32 %v3579_v62, 0.0 }
 0x8da   :  { %v3604_v52 = vmax.f32 %v3581_v1, 0.0 }
 0x8db   :  { %v3613_v3 = vpack.c.bf16 %v3603_v25, %v3601_v37 }
 0x8dc   :  { %v3614_v22 = vpack.c.bf16 %v3604_v52, %v3602_v53  ;;  %v3584_v14 = vpop.f32.mrb[84].mxu0 }
 0x8dd   :  { %v3585_v18 = vadd.f32 %v3584_v14, %v3383_v23  ;;  %v3586_v27 = vpop.f32.mrb[85].mxu0 }
 0x8de   :  { %v3587_v36 = vadd.f32 %v3586_v27, %v3387_v12  ;;  %v3588_v55 = vpop.f32.mrb[86].mxu0  ;;  %8515 = vmatprep.mubr.msk.bf16.mxu1 %vm751_vm0, %v3614_v22 }
 0x8df   :  { %v3589_v8 = vadd.f32 %v3588_v55, %v3383_v23  ;;  %v3590_v60 = vpop.f32.mrb[87].mxu0  ;;  %3810 = vmatmul.mubr.bf16.gmra.mrb[96].mxu1 %v3613_v3  ;;  %v3605_v33 = vmax.f32 %v3585_v18, 0.0  ;;  %v11916_v23 = vrot.slane %v11445_v6, %v11910_v19 }
 0x8e0   :  { %v3591_v49 = vadd.f32 %v3590_v60, %v3387_v12  ;;  %v3606_v0 = vmax.f32 %v3587_v36, 0.0 }
 0x8e1   :  { %v3607_v26 = vmax.f32 %v3589_v8, 0.0 }
 0x8e2   :  { %v3608_v48 = vmax.f32 %v3591_v49, 0.0 }
 0x8e3   :  { %v3615_v7 = vpack.c.bf16 %v3607_v26, %v3605_v33 }
 0x8e4   :  { %v3616_v31 = vpack.c.bf16 %v3608_v48, %v3606_v0 }
 0x8e6   :  { %8516 = vmatprep.mubr.msk.bf16.mxu1 %vm751_vm0, %v3616_v31 }
 0x8e7   :  { %3820 = vmatmul.mubr.bf16.gmra.mrb[100].mxu1 %v3615_v7 }
 0x94d   :  { %v3791_v12 = vpop.f32.mrb[88].mxu1 }
 0x94e   :  { %v3792_v11 = vadd.f32 %v3791_v12, %v3620_v42  ;;  %v3793_v32 = vpop.f32.mrb[89].mxu1 }
 0x94f   :  { %v3794_v2 = vadd.f32 %v3793_v32, %v11916_v23  ;;  %v3795_v9 = vpop.f32.mrb[90].mxu1 }
 0x950   :  { %v3796_v46 = vadd.f32 %v3795_v9, %v3620_v42  ;;  %v3797_v16 = vpop.f32.mrb[91].mxu1  ;;  %v11924_v47 = vadd.f32 %v3792_v11, %v11768_v4 }
 0x951   :  { %v11920_v17 = vadd.f32 %v3794_v2, %v11762_v58  ;;  %v3798_v59 = vadd.f32 %v3797_v16, %v11916_v23 }
 0x952   :  { %v11932_v50 = vadd.f32 %v3796_v46, %v11771_v45 }
 0x953   :  { %v11927_v40 = vadd.f32 %v3798_v59, %v11765_v13  ;;  %v3846_v6 = vsel %vm751_vm0, %v11920_v17, 0.0 }
 0x954   :  { %v3847_v15 = vadd.f32 %v3846_v6, %v11924_v47 }
 0x955   :  { %v3801_v51 = vpop.f32.mrb[92].mxu1  ;;  %v3850_v58 = vsel %vm751_vm0, %v11927_v40, 0.0 }
 0x956   :  { %v3802_v62 = vadd.f32 %v3801_v51, %v3620_v42  ;;  %3848 = vadd.xlane.f32.xlu0 %v3847_v15  ;;  %v3803_v35 = vpop.f32.mrb[93].mxu1  ;;  %v3851_v4 = vadd.f32 %v3850_v58, %v11932_v50  ;;  %v9616_v58 = vld [vmem:[#allocation2 + $0x364] ss:$36 sps:$4 sm:$0xff]  }
 0x957   :  { %v3804_v13 = vadd.f32 %v3803_v35, %v11916_v23  ;;  %v3805_v1 = vpop.f32.mrb[94].mxu1  ;;  %v9622_v35 = vld [vmem:[#allocation2 + $0x3ac] ss:$36 sps:$4 sm:$0xff]   ;;  %4610 = vmatprep.subr.bf16.mxu0 %v9616_v58 }
 0x958   :  { %v3806_v37 = vadd.f32 %v3805_v1, %v3620_v42  ;;  %3852 = vadd.xlane.f32.xlu1 %v3851_v4  ;;  %v3807_v25 = vpop.f32.mrb[95].mxu1  ;;  %v11944_v52 = vadd.f32 %v3802_v62, %v11805_v29  ;;  %v9617_v62 = vld [vmem:[#allocation2 + $0x368] ss:$36 sps:$4 sm:$0xff]   ;;  %v9625_v4 = vld [vmem:[#allocation2 + $0x3b4] ss:$36 sps:$4 sm:$0xff]  }
 0x959   :  { %v11940_v45 = vadd.f32 %v3804_v13, %v11799_v57  ;;  %v3808_v53 = vadd.f32 %v3807_v25, %v11916_v23  ;;  %v9623_v13 = vld [vmem:[#allocation2 + $0x3b0] ss:$36 sps:$4 sm:$0xff]  }
 0x95a   :  { %v11952_v14 = vadd.f32 %v3806_v37, %v11808_v54  ;;  %v9628_v1 = vld [vmem:[#allocation2 + $0x3f4] ss:$36 sps:$4 sm:$0xff]   ;;  %v9631_v37 = vld [vmem:[#allocation2 + $0x3fc] ss:$36 sps:$4 sm:$0xff]  }
 0x95b   :  { %v11947_v3 = vadd.f32 %v3808_v53, %v11802_v34  ;;  %v3854_v22 = vsel %vm751_vm0, %v11940_v45, 0.0  ;;  %v9626_v53 = vld [vmem:[#allocation2 + $0x3f0] ss:$36 sps:$4 sm:$0xff]  }
 0x95c   :  { %v3855_v18 = vadd.f32 %v3854_v22, %v11944_v52 }
 0x95d   :  { %v3858_v57 = vsel %vm751_vm0, %v11947_v3, 0.0 }
 0x95e   :  { %3856 = vadd.xlane.f32.xlu0 %v3855_v18  ;;  %v3859_v27 = vadd.f32 %v3858_v57, %v11952_v14  ;;  %v9629_v18 = vld [vmem:[#allocation2 + $0x3f8] ss:$36 sps:$4 sm:$0xff]  }
 0x960   :  { %3860 = vadd.xlane.f32.xlu1 %v3859_v27  ;;  %v9634_v27 = vld [vmem:[#allocation2 + $0x43c] ss:$36 sps:$4 sm:$0xff]  }
 0x9b2   :  { %v3811_v29 = vpop.f32.mrb[96].mxu1 }
 0x9b3   :  { %v3812_v36 = vadd.f32 %v3811_v29, %v3620_v42  ;;  %v3813_v55 = vpop.f32.mrb[97].mxu1  ;;  %v9637_v29 = vld [vmem:[#allocation2 + $0x444] ss:$36 sps:$4 sm:$0xff]  }
 0x9b4   :  { %v3814_v34 = vadd.f32 %v3813_v55, %v11916_v23  ;;  %v3815_v8 = vpop.f32.mrb[98].mxu1 }
 0x9b5   :  { %v3816_v60 = vadd.f32 %v3815_v8, %v3620_v42  ;;  %v3817_v49 = vpop.f32.mrb[99].mxu1  ;;  %v11964_v26 = vadd.f32 %v3812_v36, %v11863_v30  ;;  %v9632_v8 = vld [vmem:[#allocation2 + $0x438] ss:$36 sps:$4 sm:$0xff]  }
 0x9b6   :  { %v11960_v54 = vadd.f32 %v3814_v34, %v11857_v39  ;;  %v3818_v33 = vadd.f32 %v3817_v49, %v11916_v23 }
 0x9b7   :  { %v11972_v7 = vadd.f32 %v3816_v60, %v11866_v44 }
 0x9b8   :  { %v11967_v0 = vadd.f32 %v3818_v33, %v11860_v41  ;;  %v3862_v48 = vsel %vm751_vm0, %v11960_v54, 0.0 }
 0x9b9   :  { %v3863_v31 = vadd.f32 %v3862_v48, %v11964_v26 }
 0x9ba   :  { %v3821_v12 = vpop.f32.mrb[100].mxu1  ;;  %v3866_v39 = vsel %vm751_vm0, %v11967_v0, 0.0 }
 0x9bb   :  { %v3822_v11 = vadd.f32 %v3821_v12, %v3620_v42  ;;  %3864 = vadd.xlane.f32.xlu0 %v3863_v31  ;;  %v3823_v32 = vpop.f32.mrb[101].mxu1  ;;  %v3867_v30 = vadd.f32 %v3866_v39, %v11972_v7  ;;  %v9640_v31 = vld [vmem:[#allocation2 + $0x484] ss:$36 sps:$4 sm:$0xff]  }
 0x9bc   :  { %v3824_v41 = vadd.f32 %v3823_v32, %v11916_v23  ;;  %v3825_v2 = vpop.f32.mrb[102].mxu1  ;;  %v9638_v32 = vld [vmem:[#allocation2 + $0x480] ss:$36 sps:$4 sm:$0xff]  }
 0x9bd   :  { %v3826_v9 = vadd.f32 %v3825_v2, %v3620_v42  ;;  %3868 = vadd.xlane.f32.xlu1 %v3867_v30  ;;  %v3827_v46 = vpop.f32.mrb[103].mxu1  ;;  %v11984_v59 = vadd.f32 %v3822_v11, %v11888_v63  ;;  %v9614_v63 = vld [vmem:[#allocation2 + $0x360] ss:$36 sps:$4 sm:$0xff]   ;;  %v9641_v2 = vld [vmem:[#allocation2 + $0x488] ss:$36 sps:$4 sm:$0xff]  }
 0x9be   :  { %v11980_v44 = vadd.f32 %v3824_v41, %v11882_v56  ;;  %v3828_v16 = vadd.f32 %v3827_v46, %v11916_v23  ;;  %4611 = vmatpush1.bf16.msra.mxu0 %v9614_v63  ;;  %v9644_v63 = vld [vmem:[#allocation2 + $0x4c8] ss:$36 sps:$4 sm:$0xff]  }
 0x9bf   :  { %v11992_v51 = vadd.f32 %v3826_v9, %v11891_v28  ;;  %v9620_v28 = vld [vmem:[#allocation2 + $0x3a8] ss:$36 sps:$4 sm:$0xff]   ;;  %4612 = vmatprep.subr.bf16.mxu0 %v9622_v35  ;;  %v9647_v35 = vld [vmem:[#allocation2 + $0x4d0] ss:$36 sps:$4 sm:$0xff]  }
 0x9c0   :  { %v11987_v6 = vadd.f32 %v3828_v16, %v11885_v5  ;;  %v3870_v15 = vsel %vm751_vm0, %v11980_v44, 0.0  ;;  %v9619_v5 = vld [vmem:[#allocation2 + $0x36c] ss:$36 sps:$4 sm:$0xff]  }
 0x9c1   :  { %v3871_v42 = vadd.f32 %v3870_v15, %v11984_v59  ;;  %4683 = vmatprep.subr.bf16.mxu1 %v9619_v5  ;;  %v9646_v16 = vld [vmem:[#allocation2 + $0x4cc] ss:$36 sps:$4 sm:$0xff]   ;;  %v9649_v15 = vld [vmem:[#allocation2 + $0x4d4] ss:$36 sps:$4 sm:$0xff]  }
 0x9c2   :  { %v3874_v56 = vsel %vm751_vm0, %v11987_v6, 0.0  ;;  %4684 = vmatpush1.bf16.msra.mxu1 %v9617_v62  ;;  %4613 = vmatpush1.bf16.msra.mxu0 %v9620_v28 }
 0x9c3   :  { %3872 = vadd.xlane.f32.xlu0 %v3871_v42  ;;  %v3875_v23 = vadd.f32 %v3874_v56, %v11992_v51  ;;  %4685 = vmatprep.subr.bf16.mxu1 %v9625_v4 }
 0x9c4   :  { %4614 = vmatprep.subr.bf16.mxu0 %v9628_v1  ;;  %v9652_v1 = vld [vmem:[#allocation2 + $0x514] ss:$36 sps:$4 sm:$0xff]  }
 0x9c5   :  { %3876 = vadd.xlane.f32.xlu1 %v3875_v23 }
 0x9c6   :  { %4686 = vmatpush1.bf16.msra.mxu1 %v9623_v13  ;;  %4615 = vmatpush1.bf16.msra.mxu0 %v9626_v53  ;;  %v9653_v53 = vld [vmem:[#allocation2 + $0x518] ss:$36 sps:$4 sm:$0xff]  }
 0x9c7   :  { %4687 = vmatprep.subr.bf16.mxu1 %v9631_v37  ;;  %4616 = vmatprep.subr.bf16.mxu0 %v9634_v27  ;;  %v9655_v37 = vld [vmem:[#allocation2 + $0x51c] ss:$36 sps:$4 sm:$0xff]  }
 0x9c8   :  { %v9659_v27 = vld [vmem:[#allocation2 + $0x560] ss:$36 sps:$4 sm:$0xff]  }
 0x9ca   :  { %4688 = vmatpush1.bf16.msra.mxu1 %v9629_v18  ;;  %4617 = vmatpush1.bf16.msra.mxu0 %v9632_v8  ;;  %v9661_v18 = vld [vmem:[#allocation2 + $0x564] ss:$36 sps:$4 sm:$0xff]  }
 0x9cb   :  { %4689 = vmatprep.subr.bf16.mxu1 %v9637_v29  ;;  %4618 = vmatprep.subr.bf16.mxu0 %v9640_v31  ;;  %v9664_v29 = vld [vmem:[#allocation2 + $0x5a4] ss:$36 sps:$4 sm:$0xff]  }
 0x9cc   :  { %v9662_v8 = vld [vmem:[#allocation2 + $0x5a0] ss:$36 sps:$4 sm:$0xff]   ;;  %v9668_v31 = vld [vmem:[#allocation2 + $0x5e8] ss:$36 sps:$4 sm:$0xff]  }
 0x9ce   :  { %4619 = vmatpush1.bf16.msra.mxu0 %v9638_v32  ;;  %v9685_v32 = vld [vmem:[#allocation2 + $0x684] ss:$36 sps:$4 sm:$0xff]  }
 0x9cf   :  { %4620 = vmatprep.subr.bf16.mxu0 %v9646_v16 }
 0x9d2   :  { %4621 = vmatpush1.bf16.msra.mxu0 %v9644_v63 }
 0x9d3   :  { %4622 = vmatprep.subr.bf16.mxu0 %v9652_v1 }
 0x9e3   :  { %v3849_v25 = vpop.xlane.xlu0 %3848 }
 0x9e4   :  { %v3878_v22 = vmul.f32 0.0052083335, %v3849_v25  ;;  %v9650_v25 = vld [vmem:[#allocation2 + $0x510] ss:$36 sps:$4 sm:$0xff]  }
 0x9e5   :  { %v3853_v57 = vpop.xlane.xlu1 %3852  ;;  %4623 = vmatpush1.bf16.msra.mxu0 %v9650_v25 }
 0x9e6   :  { %v11999_v36 = vsub.f32 %v11924_v47, %v3878_v22  ;;  %v12002_v55 = vsub.f32 %v11920_v17, %v3878_v22  ;;  %v3879_v34 = vmul.f32 0.0052083335, %v3853_v57  ;;  %v9635_v47 = vld [vmem:[#allocation2 + $0x440] ss:$36 sps:$4 sm:$0xff]   ;;  %v9643_v17 = vld [vmem:[#allocation2 + $0x48c] ss:$36 sps:$4 sm:$0xff]  }
 0x9e7   :  { %4690 = vmatpush1.bf16.msra.mxu1 %v9635_v47  ;;  %v9658_v22 = vld [vmem:[#allocation2 + $0x55c] ss:$36 sps:$4 sm:$0xff]   ;;  %v9673_v47 = vld [vmem:[#allocation2 + $0x5f4] ss:$36 sps:$4 sm:$0xff]  }
 0x9e8   :  { %v12005_v60 = vsub.f32 %v11932_v50, %v3879_v34  ;;  %v12008_v49 = vsub.f32 %v11927_v40, %v3879_v34  ;;  %v3902_v33 = vmul.f32 %v11999_v36, %v11999_v36  ;;  %v3903_v48 = vmul.f32 %v12002_v55, %v12002_v55  ;;  %4691 = vmatprep.subr.bf16.mxu1 %v9643_v17  ;;  %v9656_v57 = vld [vmem:[#allocation2 + $0x558] ss:$36 sps:$4 sm:$0xff]   ;;  %v9667_v34 = vld [vmem:[#allocation2 + $0x5ac] ss:$36 sps:$4 sm:$0xff]  }
 0x9e9   :  { %4624 = vmatprep.subr.bf16.mxu0 %v9658_v22  ;;  %v9671_v17 = vld [vmem:[#allocation2 + $0x5f0] ss:$36 sps:$4 sm:$0xff]  }
 0x9ea   :  { %v3918_v12 = vsel %vm751_vm0, %v3903_v48, 0.0  ;;  %v3904_v50 = vmul.f32 %v12005_v60, %v12005_v60  ;;  %v3905_v40 = vmul.f32 %v12008_v49, %v12008_v49  ;;  %4625 = vmatpush1.bf16.msra.mxu0 %v9656_v57  ;;  %v9670_v48 = vld [vmem:[#allocation2 + $0x5ec] ss:$36 sps:$4 sm:$0xff]  }
 0x9eb   :  { %v3857_v39 = vpop.xlane.xlu0 %3856  ;;  %v3919_v11 = vadd.f32 %v3918_v12, %v3902_v33  ;;  %4692 = vmatpush1.bf16.msra.mxu1 %v9641_v2  ;;  %v9665_v33 = vld [vmem:[#allocation2 + $0x5a8] ss:$36 sps:$4 sm:$0xff]   ;;  %4626 = vmatprep.subr.bf16.mxu0 %v9664_v29  ;;  %v9676_v12 = vld [vmem:[#allocation2 + $0x634] ss:$36 sps:$4 sm:$0xff]  }
 0x9ec   :  { %v3880_v30 = vmul.f32 0.0052083335, %v3857_v39  ;;  %v3922_v41 = vsel %vm751_vm0, %v3905_v40, 0.0  ;;  %4693 = vmatprep.subr.bf16.mxu1 %v9649_v15  ;;  %v9674_v40 = vld [vmem:[#allocation2 + $0x630] ss:$36 sps:$4 sm:$0xff]  }
 0x9ed   :  { %3920 = vadd.xlane.f32.xlu0 %v3919_v11  ;;  %v3861_v9 = vpop.xlane.xlu1 %3860  ;;  %v3923_v46 = vadd.f32 %v3922_v41, %v3904_v50  ;;  %v9679_v50 = vld [vmem:[#allocation2 + $0x63c] ss:$36 sps:$4 sm:$0xff]   ;;  %v9688_v2 = vld [vmem:[#allocation2 + $0x374] ss:$36 sps:$4 sm:$0xff]  }
 0x9ee   :  { %v12021_v42 = vsub.f32 %v11944_v52, %v3880_v30  ;;  %v12024_v56 = vsub.f32 %v11940_v45, %v3880_v30  ;;  %v3881_v23 = vmul.f32 0.0052083335, %v3861_v9  ;;  %4627 = vmatpush1.bf16.msra.mxu0 %v9662_v8  ;;  %v9677_v39 = vld [vmem:[#allocation2 + $0x638] ss:$36 sps:$4 sm:$0xff]   ;;  %v9683_v41 = vld [vmem:[#allocation2 + $0x680] ss:$36 sps:$4 sm:$0xff]  }
 0x9ef   :  { %3924 = vadd.xlane.f32.xlu1 %v3923_v46  ;;  %4694 = vmatpush1.bf16.msra.mxu1 %v9647_v35  ;;  %v9682_v11 = vld [vmem:[#allocation2 + $0x67c] ss:$36 sps:$4 sm:$0xff]  }
 0x9f0   :  { %v12027_v58 = vsub.f32 %v11952_v14, %v3881_v23  ;;  %v12030_v62 = vsub.f32 %v11947_v3, %v3881_v23  ;;  %v3906_v5 = vmul.f32 %v12021_v42, %v12021_v42  ;;  %v3907_v52 = vmul.f32 %v12024_v56, %v12024_v56  ;;  %4695 = vmatprep.subr.bf16.mxu1 %v9655_v37  ;;  %v9680_v30 = vld [vmem:[#allocation2 + $0x678] ss:$36 sps:$4 sm:$0xff]  }
 0x9f1   :  { %4628 = vmatprep.subr.bf16.mxu0 %v9670_v48  ;;  %v9691_v9 = vld [vmem:[#allocation2 + $0x37c] ss:$36 sps:$4 sm:$0xff]  }
 0x9f2   :  { %v3926_v45 = vsel %vm751_vm0, %v3907_v52, 0.0  ;;  %v3908_v4 = vmul.f32 %v12027_v58, %v12027_v58  ;;  %v3909_v14 = vmul.f32 %v12030_v62, %v12030_v62  ;;  %4629 = vmatpush1.bf16.msra.mxu0 %v9668_v31 }
 0x9f3   :  { %v3927_v3 = vadd.f32 %v3926_v45, %v3906_v5  ;;  %4696 = vmatpush1.bf16.msra.mxu1 %v9653_v53  ;;  %4630 = vmatprep.subr.bf16.mxu0 %v9676_v12 }
 0x9f4   :  { %v3930_v28 = vsel %vm751_vm0, %v3909_v14, 0.0  ;;  %4697 = vmatprep.subr.bf16.mxu1 %v9661_v18 }
 0x9f5   :  { %3928 = vadd.xlane.f32.xlu0 %v3927_v3  ;;  %v3931_v13 = vadd.f32 %v3930_v28, %v3908_v4 }
 0x9f6   :  { %4631 = vmatpush1.bf16.msra.mxu0 %v9674_v40  ;;  %v12087_v40 = vsub.s32 6, %v10587_v20 }
 0x9f7   :  { %3932 = vadd.xlane.f32.xlu1 %v3931_v13  ;;  %4698 = vmatpush1.bf16.msra.mxu1 %v9659_v27 }
 0x9f8   :  { %4699 = vmatprep.subr.bf16.mxu1 %v9667_v34  ;;  %4632 = vmatprep.subr.bf16.mxu0 %v9682_v11  ;;  %14092 = vst [vmem:[#allocation12_spill] sm:$0xff] %v12087_v40 }
 0x9fa   :  { %4633 = vmatpush1.bf16.msra.mxu0 %v9680_v30 }
 0x9fb   :  { %4700 = vmatpush1.bf16.msra.mxu1 %v9665_v33  ;;  %4756 = vmatprep.subr.bf16.mxu0 %v9688_v2  ;;  %v10380_v2 = vld [vmem:[%s14032_s5] sm:$0xff] }
 0x9fc   :  { %4701 = vmatprep.subr.bf16.mxu1 %v9673_v47 }
 0x9ff   :  { %4702 = vmatpush1.bf16.msra.mxu1 %v9671_v17 }
 0xa00   :  { %4703 = vmatprep.subr.bf16.mxu1 %v9679_v50 }
 0xa03   :  { %4704 = vmatpush1.bf16.msra.mxu1 %v9677_v39 }
 0xa04   :  { %4705 = vmatprep.subr.bf16.mxu1 %v9685_v32 }
 0xa07   :  { %4706 = vmatpush1.bf16.msra.mxu1 %v9683_v41  ;;  %v12090_v41 = vsub.s32 7, %v10587_v20 }
 0xa08   :  { %4829 = vmatprep.subr.bf16.mxu1 %v9691_v9  ;;  %v12096_v9 = vrot.slane %v10380_v2, %v12087_v40 }
 0xa09   :  { %14093 = vst [vmem:[#allocation13_spill] sm:$0xff] %v12090_v41 }
 0xa48   :  { %v3865_v46 = vpop.xlane.xlu0 %3864 }
 0xa49   :  { %v3882_v16 = vmul.f32 0.0052083335, %v3865_v46  ;;  %v10381_v46 = vld [vmem:[%s14032_s5 + $0x8] sm:$0xff] }
 0xa4a   :  { %v3869_v15 = vpop.xlane.xlu1 %3868 }
 0xa4b   :  { %v12043_v23 = vsub.f32 %v11964_v26, %v3882_v16  ;;  %v12046_v63 = vsub.f32 %v11960_v54, %v3882_v16  ;;  %v3883_v5 = vmul.f32 0.0052083335, %v3869_v15  ;;  %v12102_v16 = vrot.slane %v10381_v46, %v12087_v40 }
 0xa4d   :  { %v12049_v52 = vsub.f32 %v11972_v7, %v3883_v5  ;;  %v12052_v35 = vsub.f32 %v11967_v0, %v3883_v5  ;;  %v3910_v45 = vmul.f32 %v12043_v23, %v12043_v23  ;;  %v3911_v4 = vmul.f32 %v12046_v63, %v12046_v63 }
 0xa4f   :  { %v3934_v14 = vsel %vm751_vm0, %v3911_v4, 0.0  ;;  %v3912_v26 = vmul.f32 %v12049_v52, %v12049_v52  ;;  %v3913_v54 = vmul.f32 %v12052_v35, %v12052_v35  ;;  %v12107_v4 = vrot.slane %v10381_v46, %v12090_v41  ;;  %v9706_v46 = vld [vmem:[#allocation2 + $0x44c] ss:$36 sps:$4 sm:$0xff]  }
 0xa50   :  { %v3873_v3 = vpop.xlane.xlu0 %3872  ;;  %v3935_v7 = vadd.f32 %v3934_v14, %v3910_v45  ;;  %v12110_v14 = vrot.slane %v10380_v2, %v12090_v41  ;;  %v9701_v2 = vld [vmem:[#allocation2 + $0x408] ss:$36 sps:$4 sm:$0xff]  }
 0xa51   :  { %v3884_v28 = vmul.f32 0.0052083335, %v3873_v3  ;;  %v3938_v0 = vsel %vm751_vm0, %v3913_v54, 0.0 }
 0xa52   :  { %3936 = vadd.xlane.f32.xlu0 %v3935_v7  ;;  %v3877_v13 = vpop.xlane.xlu1 %3876  ;;  %v3939_v1 = vadd.f32 %v3938_v0, %v3912_v26 }
 0xa53   :  { %v12065_v37 = vsub.f32 %v11984_v59, %v3884_v28  ;;  %v12068_v25 = vsub.f32 %v11980_v44, %v3884_v28  ;;  %v3885_v53 = vmul.f32 0.0052083335, %v3877_v13 }
 0xa54   :  { %3940 = vadd.xlane.f32.xlu1 %v3939_v1 }
 0xa55   :  { %v12071_v22 = vsub.f32 %v11992_v51, %v3885_v53  ;;  %v12074_v18 = vsub.f32 %v11987_v6, %v3885_v53  ;;  %v3914_v57 = vmul.f32 %v12065_v37, %v12065_v37  ;;  %v3915_v27 = vmul.f32 %v12068_v25, %v12068_v25 }
 0xa57   :  { %v3942_v59 = vsel %vm751_vm0, %v3915_v27, 0.0  ;;  %v3916_v44 = vmul.f32 %v12071_v22, %v12071_v22  ;;  %v3917_v29 = vmul.f32 %v12074_v18, %v12074_v18 }
 0xa58   :  { %v3943_v34 = vadd.f32 %v3942_v59, %v3914_v57 }
 0xa59   :  { %v3946_v51 = vsel %vm751_vm0, %v3917_v29, 0.0  ;;  %v9689_v29 = vld [vmem:[#allocation2 + $0x378] ss:$36 sps:$4 sm:$0xff]  }
 0xa5a   :  { %3944 = vadd.xlane.f32.xlu0 %v3943_v34  ;;  %v3947_v6 = vadd.f32 %v3946_v51, %v3916_v44  ;;  %v9686_v44 = vld [vmem:[#allocation2 + $0x370] ss:$36 sps:$4 sm:$0xff]  }
 0xa5c   :  { %3948 = vadd.xlane.f32.xlu1 %v3947_v6 }
 0xa7a   :  { %v3921_v8 = vpop.xlane.xlu0 %3920 }
 0xa7b   :  { %v3950_v33 = vmul.f32 0.0052083335, %v3921_v8  ;;  %v9697_v8 = vld [vmem:[#allocation2 + $0x3c4] ss:$36 sps:$4 sm:$0xff]  }
 0xa7c   :  { %v3925_v48 = vpop.xlane.xlu1 %3924 }
 0xa7d   :  { %v3958_v47 = vadd.f32 1e-05, %v3950_v33  ;;  %v3951_v31 = vmul.f32 0.0052083335, %v3925_v48 }
 0xa7f   :  { %10134 = vrsqrt.f32 %v3958_v47  ;;  %v3959_v17 = vadd.f32 1e-05, %v3951_v31  ;;  %v9695_v47 = vld [vmem:[#allocation2 + $0x3c0] ss:$36 sps:$4 sm:$0xff]  }
 0xa81   :  { %10136 = vrsqrt.f32 %v3959_v17 }
 0xa82   :  { %v3929_v12 = vpop.xlane.xlu0 %3928 }
 0xa83   :  { %v3952_v50 = vmul.f32 0.0052083335, %v3929_v12 }
 0xa84   :  { %v3933_v39 = vpop.xlane.xlu1 %3932 }
 0xa85   :  { %v3960_v11 = vadd.f32 1e-05, %v3952_v50  ;;  %v3953_v32 = vmul.f32 0.0052083335, %v3933_v39  ;;  %v9700_v50 = vld [vmem:[#allocation2 + $0x404] ss:$36 sps:$4 sm:$0xff]  }
 0xa87   :  { %10138 = vrsqrt.f32 %v3960_v11  ;;  %v3961_v30 = vadd.f32 1e-05, %v3953_v32  ;;  %v9703_v32 = vld [vmem:[#allocation2 + $0x40c] ss:$36 sps:$4 sm:$0xff]  }
 0xa89   :  { %v10135_v15 = vpop.eup %10134  ;;  %10140 = vrsqrt.f32 %v3961_v30  ;;  %v9698_v30 = vld [vmem:[#allocation2 + $0x400] ss:$36 sps:$4 sm:$0xff]  }
 0xa8a   :  { %v3974_v5 = vmul.f32 %v10135_v15, %v11999_v36  ;;  %v3975_v20 = vmul.f32 %v10135_v15, %v12002_v55  ;;  %v9709_v15 = vld [vmem:[#allocation2 + $0x454] ss:$36 sps:$4 sm:$0xff]  }
 0xa8b   :  { %v10137_v45 = vpop.eup %10136 }
 0xa8c   :  { %v3998_v26 = vmul.f32 %v12096_v9, %v3974_v5  ;;  %v3999_v54 = vmul.f32 %v12102_v16, %v3975_v20  ;;  %v3976_v3 = vmul.f32 %v10137_v45, %v12005_v60  ;;  %v3977_v7 = vmul.f32 %v10137_v45, %v12008_v49  ;;  %v9704_v5 = vld [vmem:[#allocation2 + $0x448] ss:$36 sps:$4 sm:$0xff]   ;;  %v9707_v20 = vld [vmem:[#allocation2 + $0x450] ss:$36 sps:$4 sm:$0xff]  }
 0xa8d   :  { %v9712_v45 = vld [vmem:[#allocation2 + $0x494] ss:$36 sps:$4 sm:$0xff]  }
 0xa8e   :  { %v4000_v28 = vmul.f32 %v12096_v9, %v3976_v3  ;;  %v4001_v36 = vmul.f32 %v12102_v16, %v3977_v7  ;;  %v12119_v55 = vadd.f32 %v12107_v4, %v3999_v54  ;;  %v12125_v13 = vadd.f32 %v12110_v14, %v3998_v26  ;;  %v9715_v26 = vld [vmem:[#allocation2 + $0x49c] ss:$36 sps:$4 sm:$0xff]   ;;  %v9710_v54 = vld [vmem:[#allocation2 + $0x490] ss:$36 sps:$4 sm:$0xff]  }
 0xa8f   :  { %v9713_v3 = vld [vmem:[#allocation2 + $0x498] ss:$36 sps:$4 sm:$0xff]  }
 0xa90   :  { %v12122_v0 = vadd.f32 %v12107_v4, %v4001_v36  ;;  %v12128_v1 = vadd.f32 %v12110_v14, %v4000_v28  ;;  %v9718_v7 = vld [vmem:[#allocation2 + $0x4dc] ss:$36 sps:$4 sm:$0xff]   ;;  %v9721_v28 = vld [vmem:[#allocation2 + $0x4e4] ss:$36 sps:$4 sm:$0xff]  }
 0xa91   :  { %v10139_v53 = vpop.eup %10138  ;;  %v9716_v36 = vld [vmem:[#allocation2 + $0x4d8] ss:$36 sps:$4 sm:$0xff]  }
 0xa92   :  { %v3978_v60 = vmul.f32 %v10139_v53, %v12021_v42  ;;  %v3979_v49 = vmul.f32 %v10139_v53, %v12024_v56  ;;  %v12134_v57 = vpack.c.bf16 %v12122_v0, %v12119_v55  ;;  %v12138_v27 = vpack.c.bf16 %v12128_v1, %v12125_v13  ;;  %v9694_v56 = vld [vmem:[#allocation2 + $0x3bc] ss:$36 sps:$4 sm:$0xff]  }
 0xa93   :  { %v10141_v59 = vpop.eup %10140  ;;  %v9719_v53 = vld [vmem:[#allocation2 + $0x4e0] ss:$36 sps:$4 sm:$0xff]  }
 0xa94   :  { %v4002_v34 = vmul.f32 %v12096_v9, %v3978_v60  ;;  %v4003_v51 = vmul.f32 %v12102_v16, %v3979_v49  ;;  %v3980_v6 = vmul.f32 %v10141_v59, %v12027_v58  ;;  %v3981_v42 = vmul.f32 %v10141_v59, %v12030_v62  ;;  %8625 = vmatprep.mubr.msk.bf16.mxu0 %vm751_vm0, %v12134_v57  ;;  %v9692_v62 = vld [vmem:[#allocation2 + $0x3b8] ss:$36 sps:$4 sm:$0xff]   ;;  %v9724_v60 = vld [vmem:[#allocation2 + $0x524] ss:$36 sps:$4 sm:$0xff]   ;;  %v9727_v49 = vld [vmem:[#allocation2 + $0x52c] ss:$36 sps:$4 sm:$0xff]  }
 0xa95   :  { %8629 = vmatprep.mubr.msk.bf16.mxu1 %vm751_vm0, %v12134_v57  ;;  %4643 = vmatmul.mubr.bf16.vlgmr.msra.gmra.mrb[88].mxu0 %v12138_v27  ;;  %v9722_v59 = vld [vmem:[#allocation2 + $0x520] ss:$36 sps:$4 sm:$0xff]  }
 0xa96   :  { %v4004_v33 = vmul.f32 %v12096_v9, %v3980_v6  ;;  %v4005_v48 = vmul.f32 %v12102_v16, %v3981_v42  ;;  %4716 = vmatmul.mubr.bf16.vlgmr.msra.gmra.mrb[104].mxu1 %v12138_v27  ;;  %v12153_v58 = vadd.f32 %v12107_v4, %v4003_v51  ;;  %4757 = vmatpush1.bf16.msra.mxu0 %v9686_v44  ;;  %v9725_v44 = vld [vmem:[#allocation2 + $0x528] ss:$36 sps:$4 sm:$0xff]   ;;  %v9731_v6 = vld [vmem:[#allocation2 + $0x570] ss:$36 sps:$4 sm:$0xff]  }
 0xa97   :  { %4830 = vmatpush1.bf16.msra.mxu1 %v9689_v29  ;;  %v12159_v17 = vadd.f32 %v12110_v14, %v4002_v34  ;;  %4758 = vmatprep.subr.bf16.mxu0 %v9694_v56  ;;  %v9730_v29 = vld [vmem:[#allocation2 + $0x56c] ss:$36 sps:$4 sm:$0xff]   ;;  %v9733_v34 = vld [vmem:[#allocation2 + $0x574] ss:$36 sps:$4 sm:$0xff]   ;;  %v9739_v56 = vld [vmem:[#allocation2 + $0x5bc] ss:$36 sps:$4 sm:$0xff]  }
 0xa98   :  { %v12156_v31 = vadd.f32 %v12107_v4, %v4005_v48  ;;  %v12162_v12 = vadd.f32 %v12110_v14, %v4004_v33  ;;  %4831 = vmatprep.subr.bf16.mxu1 %v9697_v8  ;;  %v9728_v51 = vld [vmem:[#allocation2 + $0x568] ss:$36 sps:$4 sm:$0xff]   ;;  %v9736_v42 = vld [vmem:[#allocation2 + $0x5b4] ss:$36 sps:$4 sm:$0xff]   ;;  %v9742_v48 = vld [vmem:[#allocation2 + $0x5fc] ss:$36 sps:$4 sm:$0xff]  }
 0xa99   :  { %v9734_v8 = vld [vmem:[#allocation2 + $0x5b0] ss:$36 sps:$4 sm:$0xff]   ;;  %v9737_v33 = vld [vmem:[#allocation2 + $0x5b8] ss:$36 sps:$4 sm:$0xff]  }
 0xa9a   :  { %v12166_v39 = vpack.c.bf16 %v12156_v31, %v12153_v58  ;;  %v12170_v11 = vpack.c.bf16 %v12162_v12, %v12159_v17  ;;  %4759 = vmatpush1.bf16.msra.mxu0 %v9692_v62  ;;  %v9745_v62 = vld [vmem:[#allocation2 + $0x604] ss:$36 sps:$4 sm:$0xff]  }
 0xa9b   :  { %4832 = vmatpush1.bf16.msra.mxu1 %v9695_v47  ;;  %4760 = vmatprep.subr.bf16.mxu0 %v9700_v50  ;;  %v9740_v47 = vld [vmem:[#allocation2 + $0x5f8] ss:$36 sps:$4 sm:$0xff]   ;;  %v9743_v50 = vld [vmem:[#allocation2 + $0x600] ss:$36 sps:$4 sm:$0xff]  }
 0xa9c   :  { %8626 = vmatprep.mubr.msk.bf16.mxu0 %vm751_vm0, %v12166_v39  ;;  %8630 = vmatprep.mubr.msk.bf16.mxu1 %vm751_vm0, %v12166_v39 }
 0xa9d   :  { %4653 = vmatmul.mubr.bf16.gmra.mrb[92].mxu0 %v12170_v11  ;;  %4833 = vmatprep.subr.bf16.mxu1 %v9703_v32  ;;  %v9748_v32 = vld [vmem:[#allocation2 + $0x644] ss:$36 sps:$4 sm:$0xff]  }
 0xa9e   :  { %4726 = vmatmul.mubr.bf16.gmra.mrb[108].mxu1 %v12170_v11  ;;  %4761 = vmatpush1.bf16.msra.mxu0 %v9698_v30  ;;  %v9751_v30 = vld [vmem:[#allocation2 + $0x64c] ss:$36 sps:$4 sm:$0xff]  }
 0xa9f   :  { %4834 = vmatpush1.bf16.msra.mxu1 %v9701_v2  ;;  %4762 = vmatprep.subr.bf16.mxu0 %v9706_v46  ;;  %v9746_v2 = vld [vmem:[#allocation2 + $0x640] ss:$36 sps:$4 sm:$0xff]   ;;  %v9749_v46 = vld [vmem:[#allocation2 + $0x648] ss:$36 sps:$4 sm:$0xff]  }
 0xaa0   :  { %4835 = vmatprep.subr.bf16.mxu1 %v9709_v15  ;;  %v9754_v15 = vld [vmem:[#allocation2 + $0x68c] ss:$36 sps:$4 sm:$0xff]  }
 0xaa2   :  { %4763 = vmatpush1.bf16.msra.mxu0 %v9704_v5  ;;  %v9757_v5 = vld [vmem:[#allocation2 + $0x694] ss:$36 sps:$4 sm:$0xff]  }
 0xaa3   :  { %4836 = vmatpush1.bf16.msra.mxu1 %v9707_v20  ;;  %4764 = vmatprep.subr.bf16.mxu0 %v9712_v45  ;;  %v9752_v20 = vld [vmem:[#allocation2 + $0x688] ss:$36 sps:$4 sm:$0xff]   ;;  %v9755_v45 = vld [vmem:[#allocation2 + $0x690] ss:$36 sps:$4 sm:$0xff]  }
 0xaa4   :  { %4837 = vmatprep.subr.bf16.mxu1 %v9715_v26 }
 0xaa6   :  { %4765 = vmatpush1.bf16.msra.mxu0 %v9710_v54 }
 0xaa7   :  { %4838 = vmatpush1.bf16.msra.mxu1 %v9713_v3  ;;  %4766 = vmatprep.subr.bf16.mxu0 %v9718_v7 }
 0xaa8   :  { %4839 = vmatprep.subr.bf16.mxu1 %v9721_v28 }
 0xaaa   :  { %4767 = vmatpush1.bf16.msra.mxu0 %v9716_v36 }
 0xaab   :  { %4840 = vmatpush1.bf16.msra.mxu1 %v9719_v53  ;;  %4768 = vmatprep.subr.bf16.mxu0 %v9724_v60 }
 0xaac   :  { %4841 = vmatprep.subr.bf16.mxu1 %v9727_v49 }
 0xaae   :  { %4769 = vmatpush1.bf16.msra.mxu0 %v9722_v59 }
 0xaaf   :  { %4842 = vmatpush1.bf16.msra.mxu1 %v9725_v44  ;;  %4770 = vmatprep.subr.bf16.mxu0 %v9730_v29 }
 0xab0   :  { %4843 = vmatprep.subr.bf16.mxu1 %v9733_v34 }
 0xab2   :  { %4771 = vmatpush1.bf16.msra.mxu0 %v9728_v51 }
 0xab3   :  { %4844 = vmatpush1.bf16.msra.mxu1 %v9731_v6  ;;  %4772 = vmatprep.subr.bf16.mxu0 %v9736_v42 }
 0xab4   :  { %4845 = vmatprep.subr.bf16.mxu1 %v9739_v56 }
 0xab6   :  { %4773 = vmatpush1.bf16.msra.mxu0 %v9734_v8 }
 0xab7   :  { %4846 = vmatpush1.bf16.msra.mxu1 %v9737_v33  ;;  %4774 = vmatprep.subr.bf16.mxu0 %v9742_v48 }
 0xab8   :  { %4847 = vmatprep.subr.bf16.mxu1 %v9745_v62 }
 0xaba   :  { %4775 = vmatpush1.bf16.msra.mxu0 %v9740_v47 }
 0xabb   :  { %4848 = vmatpush1.bf16.msra.mxu1 %v9743_v50  ;;  %4776 = vmatprep.subr.bf16.mxu0 %v9748_v32 }
 0xabc   :  { %4849 = vmatprep.subr.bf16.mxu1 %v9751_v30 }
 0xabe   :  { %4777 = vmatpush1.bf16.msra.mxu0 %v9746_v2 }
 0xabf   :  { %4850 = vmatpush1.bf16.msra.mxu1 %v9749_v46  ;;  %4778 = vmatprep.subr.bf16.mxu0 %v9754_v15 }
 0xac0   :  { %4851 = vmatprep.subr.bf16.mxu1 %v9757_v5 }
 0xac2   :  { %4779 = vmatpush1.bf16.msra.mxu0 %v9752_v20 }
 0xac3   :  { %4852 = vmatpush1.bf16.msra.mxu1 %v9755_v45  ;;  %4902 = vmatprep.subr.bf16.mxu0 %v14072_v24 }
 0xadf   :  { %v3937_v26 = vpop.xlane.xlu0 %3936 }
 0xae0   :  { %v3954_v54 = vmul.f32 0.0052083335, %v3937_v26 }
 0xae1   :  { %v3941_v3 = vpop.xlane.xlu1 %3940 }
 0xae2   :  { %v3962_v7 = vadd.f32 1e-05, %v3954_v54  ;;  %v3955_v28 = vmul.f32 0.0052083335, %v3941_v3 }
 0xae4   :  { %10142 = vrsqrt.f32 %v3962_v7  ;;  %v3963_v36 = vadd.f32 1e-05, %v3955_v28  ;;  %v9761_v28 = vld [vmem:[#allocation2 + $0x458] ss:$36 sps:$4 sm:$0xff]  }
 0xae6   :  { %10144 = vrsqrt.f32 %v3963_v36  ;;  %v9762_v36 = vld [vmem:[#allocation2 + $0x4a0] ss:$36 sps:$4 sm:$0xff]  }
 0xae7   :  { %v3945_v53 = vpop.xlane.xlu0 %3944 }
 0xae8   :  { %v3956_v60 = vmul.f32 0.0052083335, %v3945_v53  ;;  %v9763_v53 = vld [vmem:[#allocation2 + $0x4e8] ss:$36 sps:$4 sm:$0xff]  }
 0xae9   :  { %v3949_v49 = vpop.xlane.xlu1 %3948 }
 0xaea   :  { %v3964_v59 = vadd.f32 1e-05, %v3956_v60  ;;  %v3957_v44 = vmul.f32 0.0052083335, %v3949_v49  ;;  %v9764_v60 = vld [vmem:[#allocation2 + $0x530] ss:$36 sps:$4 sm:$0xff]  }
 0xaeb   :  { %v9765_v49 = vld [vmem:[#allocation2 + $0x578] ss:$36 sps:$4 sm:$0xff]  }
 0xaec   :  { %10146 = vrsqrt.f32 %v3964_v59  ;;  %v3965_v29 = vadd.f32 1e-05, %v3957_v44  ;;  %v9766_v59 = vld [vmem:[#allocation2 + $0x5c0] ss:$36 sps:$4 sm:$0xff]   ;;  %v9767_v44 = vld [vmem:[#allocation2 + $0x608] ss:$36 sps:$4 sm:$0xff]  }
 0xaee   :  { %v10143_v34 = vpop.eup %10142  ;;  %10148 = vrsqrt.f32 %v3965_v29  ;;  %v9768_v29 = vld [vmem:[#allocation2 + $0x650] ss:$36 sps:$4 sm:$0xff]  }
 0xaef   :  { %v3982_v51 = vmul.f32 %v10143_v34, %v12043_v23  ;;  %v3983_v6 = vmul.f32 %v10143_v34, %v12046_v63  ;;  %v9769_v34 = vld [vmem:[#allocation2 + $0x698] ss:$36 sps:$4 sm:$0xff]  }
 0xaf0   :  { %v10145_v42 = vpop.eup %10144 }
 0xaf1   :  { %v4006_v56 = vmul.f32 %v12096_v9, %v3982_v51  ;;  %v4007_v8 = vmul.f32 %v12102_v16, %v3983_v6  ;;  %v3984_v33 = vmul.f32 %v10145_v42, %v12049_v52  ;;  %v3985_v48 = vmul.f32 %v10145_v42, %v12052_v35  ;;  %v12309_v51 = vld [vmem:[%s14031_s4 + $0x10] sm:$0x7] }
 0xaf3   :  { %v4008_v62 = vmul.f32 %v12096_v9, %v3984_v33  ;;  %v4009_v47 = vmul.f32 %v12102_v16, %v3985_v48  ;;  %v12188_v50 = vadd.f32 %v12107_v4, %v4007_v8  ;;  %v12194_v63 = vadd.f32 %v12110_v14, %v4006_v56 }
 0xaf4   :  { %v12314_v33 = vrot.slane %v12309_v51, %v10590_v21 }
 0xaf5   :  { %v12191_v23 = vadd.f32 %v12107_v4, %v4009_v47  ;;  %v12197_v32 = vadd.f32 %v12110_v14, %v4008_v62 }
 0xaf6   :  { %v10147_v30 = vpop.eup %10146 }
 0xaf7   :  { %v3986_v52 = vmul.f32 %v10147_v30, %v12065_v37  ;;  %v3987_v35 = vmul.f32 %v10147_v30, %v12068_v25  ;;  %v12203_v2 = vpack.c.bf16 %v12191_v23, %v12188_v50  ;;  %v12207_v46 = vpack.c.bf16 %v12197_v32, %v12194_v63 }
 0xaf8   :  { %v10149_v15 = vpop.eup %10148 }
 0xaf9   :  { %v4010_v5 = vmul.f32 %v12096_v9, %v3986_v52  ;;  %v4011_v20 = vmul.f32 %v12102_v16, %v3987_v35  ;;  %v3988_v45 = vmul.f32 %v10149_v15, %v12071_v22  ;;  %v3989_v26 = vmul.f32 %v10149_v15, %v12074_v18  ;;  %8627 = vmatprep.mubr.msk.bf16.mxu0 %vm751_vm0, %v12203_v2 }
 0xafa   :  { %8631 = vmatprep.mubr.msk.bf16.mxu1 %vm751_vm0, %v12203_v2  ;;  %4663 = vmatmul.mubr.bf16.gmra.mrb[96].mxu0 %v12207_v46 }
 0xafb   :  { %v4012_v37 = vmul.f32 %v12096_v9, %v3988_v45  ;;  %v4013_v25 = vmul.f32 %v12102_v16, %v3989_v26  ;;  %4736 = vmatmul.mubr.bf16.gmra.mrb[112].mxu1 %v12207_v46  ;;  %v12222_v54 = vadd.f32 %v12107_v4, %v4011_v20  ;;  %v12228_v18 = vadd.f32 %v12110_v14, %v4010_v5  ;;  %v9758_v16 = vld [vmem:[#allocation2 + $0x380] ss:$36 sps:$4 sm:$0xff]  }
 0xafd   :  { %v12225_v22 = vadd.f32 %v12107_v4, %v4013_v25  ;;  %v12231_v3 = vadd.f32 %v12110_v14, %v4012_v37  ;;  %v9759_v4 = vld [vmem:[#allocation2 + $0x3c8] ss:$36 sps:$4 sm:$0xff]   ;;  %v9760_v14 = vld [vmem:[#allocation2 + $0x410] ss:$36 sps:$4 sm:$0xff]  }
 0xaff   :  { %v12235_v7 = vpack.c.bf16 %v12225_v22, %v12222_v54  ;;  %v12239_v9 = vpack.c.bf16 %v12231_v3, %v12228_v18 }
 0xb01   :  { %8628 = vmatprep.mubr.msk.bf16.mxu0 %vm751_vm0, %v12235_v7  ;;  %8632 = vmatprep.mubr.msk.bf16.mxu1 %vm751_vm0, %v12235_v7 }
 0xb02   :  { %4673 = vmatmul.mubr.bf16.gmra.mrb[100].mxu0 %v12239_v9 }
 0xb03   :  { %4746 = vmatmul.mubr.bf16.gmra.mrb[116].mxu1 %v12239_v9  ;;  %8633 = vmatprep.mubr.msk.bf16.mxu0 %vm751_vm0, %v12134_v57 }
 0xb04   :  { %8637 = vmatprep.mubr.msk.bf16.mxu1 %vm751_vm0, %v12134_v57 }
 0xb0a   :  { %4789 = vmatmul.mubr.bf16.vlgmr.msra.gmra.mrb[104].mxu0 %v12138_v27 }
 0xb0b   :  { %4862 = vmatmul.mubr.bf16.vlgmr.msra.gmra.mrb[120].mxu1 %v12138_v27  ;;  %4903 = vmatpush1.bf16.msra.mxu0 %v9758_v16 }
 0xb0c   :  { %8634 = vmatprep.mubr.msk.bf16.mxu0 %vm751_vm0, %v12166_v39  ;;  %8638 = vmatprep.mubr.msk.bf16.mxu1 %vm751_vm0, %v12166_v39 }
 0xb0d   :  { %4904 = vmatprep.subr.bf16.mxu0 %v14072_v24 }
 0xb0f   :  { %4905 = vmatpush1.bf16.msra.mxu0 %v9759_v4 }
 0xb10   :  { %4906 = vmatprep.subr.bf16.mxu0 %v14072_v24 }
 0xb12   :  { %4799 = vmatmul.mubr.bf16.gmra.mrb[108].mxu0 %v12170_v11 }
 0xb13   :  { %4872 = vmatmul.mubr.bf16.gmra.mrb[124].mxu1 %v12170_v11  ;;  %4907 = vmatpush1.bf16.msra.mxu0 %v9760_v14 }
 0xb14   :  { %8635 = vmatprep.mubr.msk.bf16.mxu0 %vm751_vm0, %v12203_v2  ;;  %8639 = vmatprep.mubr.msk.bf16.mxu1 %vm751_vm0, %v12203_v2 }
 0xb15   :  { %4908 = vmatprep.subr.bf16.mxu0 %v14072_v24 }
 0xb17   :  { %4909 = vmatpush1.bf16.msra.mxu0 %v9761_v28 }
 0xb18   :  { %4910 = vmatprep.subr.bf16.mxu0 %v14072_v24 }
 0xb1a   :  { %4809 = vmatmul.mubr.bf16.gmra.mrb[112].mxu0 %v12207_v46 }
 0xb1b   :  { %4882 = vmatmul.mubr.bf16.gmra.mrb[128].mxu1 %v12207_v46  ;;  %4911 = vmatpush1.bf16.msra.mxu0 %v9762_v36 }
 0xb1c   :  { %8636 = vmatprep.mubr.msk.bf16.mxu0 %vm751_vm0, %v12235_v7  ;;  %8640 = vmatprep.mubr.msk.bf16.mxu1 %vm751_vm0, %v12235_v7 }
 0xb1d   :  { %4912 = vmatprep.subr.bf16.mxu0 %v14072_v24 }
 0xb1f   :  { %4913 = vmatpush1.bf16.msra.mxu0 %v9763_v53 }
 0xb20   :  { %4914 = vmatprep.subr.bf16.mxu0 %v14072_v24 }
 0xb22   :  { %4819 = vmatmul.mubr.bf16.gmra.mrb[116].mxu0 %v12239_v9 }
 0xb23   :  { %4892 = vmatmul.mubr.bf16.gmra.mrb[132].mxu1 %v12239_v9  ;;  %4915 = vmatpush1.bf16.msra.mxu0 %v9764_v60 }
 0xb24   :  { %8641 = vmatprep.mubr.msk.bf16.mxu0 %vm751_vm0, %v12134_v57  ;;  %4916 = vmatprep.subr.bf16.mxu0 %v14072_v24  ;;  %v578_v57 = vld [vmem:[%s14031_s4 + $0xc] sm:$0x7] }
 0xb27   :  { %4917 = vmatpush1.bf16.msra.mxu0 %v9765_v49 }
 0xb28   :  { %4918 = vmatprep.subr.bf16.mxu0 %v14072_v24 }
 0xb2b   :  { %4919 = vmatpush1.bf16.msra.mxu0 %v9766_v59 }
 0xb2c   :  { %4920 = vmatprep.subr.bf16.mxu0 %v14072_v24 }
 0xb2f   :  { %4921 = vmatpush1.bf16.msra.mxu0 %v9767_v44 }
 0xb30   :  { %4922 = vmatprep.subr.bf16.mxu0 %v14072_v24 }
 0xb33   :  { %4923 = vmatpush1.bf16.msra.mxu0 %v9768_v29 }
 0xb34   :  { %4924 = vmatprep.subr.bf16.mxu0 %v14072_v24 }
 0xb37   :  { %4925 = vmatpush1.bf16.msra.mxu0 %v9769_v34 }
 0xb3a   :  { %4935 = vmatmul.mubr.bf16.vlgmr.msra.gmra.mrb[120].mxu0 %v12138_v27  ;;  %v12298_v27 = vrot.slane %v578_v57, %v10590_v21 }
 0xb3b   :  { %8642 = vmatprep.mubr.msk.bf16.mxu0 %vm751_vm0, %v12166_v39  ;;  %v12301_v39 = vrot.slane %v578_v57, %v10789_v38 }
 0xb42   :  { %4943 = vmatmul.mubr.bf16.gmra.mrb[124].mxu0 %v12170_v11  ;;  %v12304_v11 = vrot.slane %v578_v57, %v10795_v61 }
 0xb43   :  { %8643 = vmatprep.mubr.msk.bf16.mxu0 %vm751_vm0, %v12203_v2 }
 0xb4a   :  { %4951 = vmatmul.mubr.bf16.gmra.mrb[128].mxu0 %v12207_v46 }
 0xb4b   :  { %8644 = vmatprep.mubr.msk.bf16.mxu0 %vm751_vm0, %v12235_v7 }
 0xb52   :  { %4959 = vmatmul.mubr.bf16.gmra.mrb[132].mxu0 %v12239_v9 }
 0xb68   :  { %v4644_v6 = vpop.f32.mrb[88].mxu0 }
 0xb69   :  { %v5067_v42 = vadd.f32 %v12298_v27, %v4644_v6  ;;  %v4717_v56 = vpop.f32.mrb[104].mxu1  ;;  %v4646_v8 = vpop.f32.mrb[89].mxu0 }
 0xb6a   :  { %v5897_v48 = vadd.f32 %v12301_v39, %v4717_v56  ;;  %v5329_v62 = vadd.f32 %v12304_v11, %v4646_v8  ;;  %v4719_v47 = vpop.f32.mrb[105].mxu1  ;;  %v4648_v30 = vpop.f32.mrb[90].mxu0 }
 0xb6b   :  { %v5068_v52 = vadd.f32 %v12298_v27, %v4648_v30  ;;  %v4721_v35 = vpop.f32.mrb[106].mxu1  ;;  %v4650_v2 = vpop.f32.mrb[91].mxu0  ;;  %v5075_v20 = vmul.f32 0.125, %v5067_v42  ;;  %v4971_v45 = vadd.f32 %v12314_v33, %v4719_v47 }
 0xb6c   :  { %v5898_v46 = vadd.f32 %v12301_v39, %v4721_v35  ;;  %v5330_v15 = vadd.f32 %v12304_v11, %v4650_v2  ;;  %v4723_v5 = vpop.f32.mrb[107].mxu1  ;;  %v12323_v25 = vmul.f32 0.125, %v5897_v48  ;;  %v12325_v7 = vmul.f32 0.125, %v5329_v62 }
 0xb6d   :  { %v5076_v26 = vmul.f32 0.125, %v5068_v52  ;;  %v4972_v37 = vadd.f32 %v12314_v33, %v4723_v5 }
 0xb6e   :  { %v12327_v9 = vmul.f32 0.125, %v5898_v46  ;;  %v12329_v16 = vmul.f32 0.125, %v5330_v15 }
 0xb6f   :  { %v5083_v4 = vpack.c.bf16 %v5076_v26, %v5075_v20  ;;  %v4991_v14 = vpack.c.bf16 %v4972_v37, %v4971_v45 }
 0xb70   :  { %v4654_v53 = vpop.f32.mrb[92].mxu0 }
 0xb71   :  { %v5069_v60 = vadd.f32 %v12298_v27, %v4654_v53  ;;  %v4727_v49 = vpop.f32.mrb[108].mxu1  ;;  %9062 = vmatprep.subr.bf16.mxu1 %v4991_v14  ;;  %v4656_v59 = vpop.f32.mrb[93].mxu0  ;;  %9070 = vmatprep.mubr.bf16.mxu1 %v5083_v4 }
 0xb72   :  { %v5899_v44 = vadd.f32 %v12301_v39, %v4727_v49  ;;  %v5331_v29 = vadd.f32 %v12304_v11, %v4656_v59  ;;  %v4729_v34 = vpop.f32.mrb[109].mxu1  ;;  %9063 = vmatpush3.bf16.xpose.msra.mxu1 %v4991_v14  ;;  %v4658_v57 = vpop.f32.mrb[94].mxu0 }
 0xb73   :  { %v5070_v6 = vadd.f32 %v12298_v27, %v4658_v57  ;;  %v4731_v42 = vpop.f32.mrb[110].mxu1  ;;  %v4660_v56 = vpop.f32.mrb[95].mxu0  ;;  %v12341_v47 = vmul.f32 0.125, %v5069_v60  ;;  %v4973_v30 = vadd.f32 %v12314_v33, %v4729_v34 }
 0xb74   :  { %v5900_v8 = vadd.f32 %v12301_v39, %v4731_v42  ;;  %v5332_v48 = vadd.f32 %v12304_v11, %v4660_v56  ;;  %v4733_v62 = vpop.f32.mrb[111].mxu1  ;;  %v12347_v2 = vmul.f32 0.125, %v5899_v44  ;;  %v12349_v46 = vmul.f32 0.125, %v5331_v29 }
 0xb75   :  { %v12344_v52 = vmul.f32 0.125, %v5070_v6  ;;  %v4974_v35 = vadd.f32 %v12314_v33, %v4733_v62 }
 0xb76   :  { %v12351_v15 = vmul.f32 0.125, %v5900_v8  ;;  %v12353_v5 = vmul.f32 0.125, %v5332_v48 }
 0xb77   :  { %v4992_v45 = vpack.c.bf16 %v4974_v35, %v4973_v30 }
 0xb79   :  { %9064 = vmatprep.subr.bf16.mxu1 %v4992_v45 }
 0xb7a   :  { %9065 = vmatpush3.bf16.xpose.msra.mxu1 %v4992_v45 }
 0xbcd   :  { %v4664_v4 = vpop.f32.mrb[96].mxu0 }
 0xbce   :  { %v5071_v14 = vadd.f32 %v12298_v27, %v4664_v4  ;;  %v4737_v53 = vpop.f32.mrb[112].mxu1  ;;  %v4666_v60 = vpop.f32.mrb[97].mxu0 }
 0xbcf   :  { %v5901_v49 = vadd.f32 %v12301_v39, %v4737_v53  ;;  %v5333_v59 = vadd.f32 %v12304_v11, %v4666_v60  ;;  %v4739_v44 = vpop.f32.mrb[113].mxu1  ;;  %v4668_v29 = vpop.f32.mrb[98].mxu0 }
 0xbd0   :  { %v5072_v34 = vadd.f32 %v12298_v27, %v4668_v29  ;;  %v4741_v57 = vpop.f32.mrb[114].mxu1  ;;  %v4670_v6 = vpop.f32.mrb[99].mxu0  ;;  %v12367_v48 = vmul.f32 0.125, %v5071_v14  ;;  %v4975_v62 = vadd.f32 %v12314_v33, %v4739_v44 }
 0xbd1   :  { %v5902_v42 = vadd.f32 %v12301_v39, %v4741_v57  ;;  %v5334_v56 = vadd.f32 %v12304_v11, %v4670_v6  ;;  %v4743_v8 = vpop.f32.mrb[115].mxu1  ;;  %v12373_v45 = vmul.f32 0.125, %v5901_v49  ;;  %v12375_v4 = vmul.f32 0.125, %v5333_v59 }
 0xbd2   :  { %v12370_v30 = vmul.f32 0.125, %v5072_v34  ;;  %v4976_v35 = vadd.f32 %v12314_v33, %v4743_v8 }
 0xbd3   :  { %v12377_v53 = vmul.f32 0.125, %v5902_v42  ;;  %v12379_v60 = vmul.f32 0.125, %v5334_v56 }
 0xbd4   :  { %v4993_v57 = vpack.c.bf16 %v4976_v35, %v4975_v62 }
 0xbd5   :  { %v4674_v34 = vpop.f32.mrb[100].mxu0 }
 0xbd6   :  { %v5073_v49 = vadd.f32 %v12298_v27, %v4674_v34  ;;  %v4747_v6 = vpop.f32.mrb[116].mxu1  ;;  %9066 = vmatprep.subr.bf16.mxu1 %v4993_v57  ;;  %v4676_v59 = vpop.f32.mrb[101].mxu0 }
 0xbd7   :  { %v5903_v42 = vadd.f32 %v12301_v39, %v4747_v6  ;;  %v5335_v56 = vadd.f32 %v12304_v11, %v4676_v59  ;;  %v4749_v8 = vpop.f32.mrb[117].mxu1  ;;  %9067 = vmatpush3.bf16.xpose.msra.mxu1 %v4993_v57  ;;  %v4678_v26 = vpop.f32.mrb[102].mxu0  ;;  %v12402_v57 = vld [vmem:[%s14031_s4 + $0x14] sm:$0x7] }
 0xbd8   :  { %v5074_v62 = vadd.f32 %v12298_v27, %v4678_v26  ;;  %v4751_v35 = vpop.f32.mrb[118].mxu1  ;;  %v4680_v14 = vpop.f32.mrb[103].mxu0  ;;  %v12393_v34 = vmul.f32 0.125, %v5073_v49  ;;  %v4977_v36 = vadd.f32 %v12314_v33, %v4749_v8 }
 0xbd9   :  { %v5904_v28 = vadd.f32 %v12301_v39, %v4751_v35  ;;  %v5336_v44 = vadd.f32 %v12304_v11, %v4680_v14  ;;  %v4753_v37 = vpop.f32.mrb[119].mxu1  ;;  %v12404_v27 = vmul.f32 0.125, %v5903_v42  ;;  %v12406_v26 = vmul.f32 0.125, %v5335_v56 }
 0xbda   :  { %v12396_v29 = vmul.f32 0.125, %v5074_v62  ;;  %v4978_v6 = vadd.f32 %v12314_v33, %v4753_v37  ;;  %v12416_v33 = vrot.slane %v12309_v51, %v10795_v61  ;;  %v12432_v56 = vrot.slane %v12402_v57, %v10795_v61 }
 0xbdb   :  { %v12408_v39 = vmul.f32 0.125, %v5904_v28  ;;  %v12410_v11 = vmul.f32 0.125, %v5336_v44  ;;  %v12424_v28 = vrot.slane %v12402_v57, %v10590_v21  ;;  %v12428_v44 = vrot.slane %v12309_v51, %v10789_v38 }
 0xbdc   :  { %v5086_v14 = vpack.c.bf16 %v12396_v29, %v12393_v34  ;;  %v4994_v49 = vpack.c.bf16 %v4978_v6, %v4977_v36 }
 0xbdd   :  { %v4790_v42 = vpop.f32.mrb[104].mxu0 }
 0xbde   :  { %v4863_v36 = vpop.f32.mrb[120].mxu1  ;;  %9068 = vmatprep.subr.bf16.mxu1 %v4994_v49  ;;  %v4792_v29 = vpop.f32.mrb[105].mxu0  ;;  %v5003_v35 = vadd.f32 %v12416_v33, %v4790_v42 }
 0xbdf   :  { %v4865_v8 = vpop.f32.mrb[121].mxu1  ;;  %9069 = vmatpush3.bf16.xpose.msra.mxu1 %v4994_v49  ;;  %v4794_v62 = vpop.f32.mrb[106].mxu0  ;;  %v4983_v59 = vadd.f32 %v12424_v28, %v4863_v36  ;;  %v5035_v51 = vadd.f32 %v12428_v44, %v4792_v29  ;;  %v14094_v29 = vpack.c.bf16 %v12344_v52, %v12341_v47 }
 0xbe0   :  { %v5004_v34 = vadd.f32 %v12416_v33, %v4794_v62  ;;  %v4867_v6 = vpop.f32.mrb[122].mxu1  ;;  %v4796_v37 = vpop.f32.mrb[107].mxu0  ;;  %v5015_v19 = vadd.f32 %v12432_v56, %v4865_v8  ;;  %v14095_v8 = vpack.c.bf16 %v12370_v30, %v12367_v48 }
 0xbe1   :  { %v4984_v20 = vadd.f32 %v12424_v28, %v4867_v6  ;;  %v5036_v41 = vadd.f32 %v12428_v44, %v4796_v37  ;;  %v4869_v40 = vpop.f32.mrb[123].mxu1 }
 0xbe2   :  { %v5023_v43 = vpack.c.bf16 %v5004_v34, %v5003_v35  ;;  %v5016_v49 = vadd.f32 %v12432_v56, %v4869_v40 }
 0xbe3   :  { %v4995_v10 = vpack.c.bf16 %v4984_v20, %v4983_v59  ;;  %v12442_v42 = vpack.c.bf16 %v5036_v41, %v5035_v51 }
 0xbe4   :  { %v12444_v62 = vpack.c.bf16 %v5016_v49, %v5015_v19  ;;  %9094 = vmatprep.subr.bf16.mxu1 %v5023_v43 }
 0xbe5   :  { %9078 = vmatprep.subr.bf16.mxu0 %v4995_v10  ;;  %v4800_v36 = vpop.f32.mrb[108].mxu0 }
 0xbe6   :  { %v4873_v61 = vpop.f32.mrb[124].mxu1  ;;  %9071 = vmatmul.mubr.bf16.vlgmr.msra.gmra.mrb[136].mxu1 %v14094_v29  ;;  %9079 = vmatpush3.bf16.msra.mxu0 %v4995_v10  ;;  %v4802_v37 = vpop.f32.mrb[109].mxu0  ;;  %v5005_v19 = vadd.f32 %v12416_v33, %v4800_v36 }
 0xbe7   :  { %v4875_v6 = vpop.f32.mrb[125].mxu1  ;;  %9074 = vmatprep.mubr.bf16.mxu1 %v14095_v8  ;;  %9095 = vmatpush3.bf16.xpose.msra.mxu1 %v5023_v43  ;;  %v4804_v40 = vpop.f32.mrb[110].mxu0  ;;  %v4985_v47 = vadd.f32 %v12424_v28, %v4873_v61  ;;  %v5037_v10 = vadd.f32 %v12428_v44, %v4802_v37  ;;  %v14096_v8 = vpack.c.bf16 %v12329_v16, %v12325_v7 }
 0xbe8   :  { %v5017_v41 = vadd.f32 %v12432_v56, %v4875_v6  ;;  %v5006_v20 = vadd.f32 %v12416_v33, %v4804_v40  ;;  %v4877_v59 = vpop.f32.mrb[126].mxu1  ;;  %v4806_v35 = vpop.f32.mrb[111].mxu0 }
 0xbe9   :  { %v4986_v52 = vadd.f32 %v12424_v28, %v4877_v59  ;;  %v5038_v34 = vadd.f32 %v12428_v44, %v4806_v35  ;;  %v4879_v48 = vpop.f32.mrb[127].mxu1 }
 0xbea   :  { %v5024_v30 = vpack.c.bf16 %v5006_v20, %v5005_v19  ;;  %v5018_v43 = vadd.f32 %v12432_v56, %v4879_v48 }
 0xbeb   :  { %v4996_v51 = vpack.c.bf16 %v4986_v52, %v4985_v47  ;;  %v12460_v49 = vpack.c.bf16 %v5038_v34, %v5037_v10 }
 0xbec   :  { %v12462_v36 = vpack.c.bf16 %v5018_v43, %v5017_v41  ;;  %9096 = vmatprep.subr.bf16.mxu1 %v5024_v30 }
 0xbed   :  { %9080 = vmatprep.subr.bf16.mxu0 %v4996_v51  ;;  %v4810_v29 = vpop.f32.mrb[112].mxu0 }
 0xbee   :  { %v4883_v6 = vpop.f32.mrb[128].mxu1  ;;  %9075 = vmatmul.mubr.bf16.gmra.mrb[140].mxu1 %v5086_v14  ;;  %9081 = vmatpush3.bf16.msra.mxu0 %v4996_v51  ;;  %v4812_v61 = vpop.f32.mrb[113].mxu0  ;;  %v5007_v19 = vadd.f32 %v12416_v33, %v4810_v29 }
 0xbef   :  { %v4885_v37 = vpop.f32.mrb[129].mxu1  ;;  %9097 = vmatpush3.bf16.xpose.msra.mxu1 %v5024_v30  ;;  %9102 = vmatprep.mubr.bf16.mxu1 %v14096_v8  ;;  %v4814_v40 = vpop.f32.mrb[114].mxu0  ;;  %v4987_v47 = vadd.f32 %v12424_v28, %v4883_v6  ;;  %v5039_v14 = vadd.f32 %v12428_v44, %v4812_v61 }
 0xbf0   :  { %v5019_v20 = vadd.f32 %v12432_v56, %v4885_v37  ;;  %v5008_v41 = vadd.f32 %v12416_v33, %v4814_v40  ;;  %v4887_v59 = vpop.f32.mrb[130].mxu1  ;;  %v4816_v35 = vpop.f32.mrb[115].mxu0 }
 0xbf1   :  { %v4988_v10 = vadd.f32 %v12424_v28, %v4887_v59  ;;  %v5040_v52 = vadd.f32 %v12428_v44, %v4816_v35  ;;  %v4889_v34 = vpop.f32.mrb[131].mxu1 }
 0xbf2   :  { %v5025_v7 = vpack.c.bf16 %v5008_v41, %v5007_v19  ;;  %v5020_v16 = vadd.f32 %v12432_v56, %v4889_v34 }
 0xbf3   :  { %v4997_v48 = vpack.c.bf16 %v4988_v10, %v4987_v47  ;;  %v5057_v30 = vpack.c.bf16 %v5040_v52, %v5039_v14 }
 0xbf4   :  { %v12475_v43 = vpack.c.bf16 %v5020_v16, %v5019_v20  ;;  %9098 = vmatprep.subr.bf16.mxu1 %v5025_v7 }
 0xbf5   :  { %9082 = vmatprep.subr.bf16.mxu0 %v4997_v48  ;;  %v4820_v51 = vpop.f32.mrb[116].mxu0 }
 0xbf6   :  { %v4893_v29 = vpop.f32.mrb[132].mxu1  ;;  %9083 = vmatpush3.bf16.msra.mxu0 %v4997_v48  ;;  %v4822_v6 = vpop.f32.mrb[117].mxu0  ;;  %v5009_v8 = vadd.f32 %v12416_v33, %v4820_v51 }
 0xbf7   :  { %v4895_v37 = vpop.f32.mrb[133].mxu1  ;;  %9099 = vmatpush3.bf16.xpose.msra.mxu1 %v5025_v7  ;;  %v4824_v61 = vpop.f32.mrb[118].mxu0  ;;  %v4989_v20 = vadd.f32 %v12424_v28, %v4893_v29  ;;  %v5041_v35 = vadd.f32 %v12428_v44, %v4822_v6  ;;  %v14099_v29 = vpack.c.bf16 %v12410_v11, %v12406_v26 }
 0xbf8   :  { %v5021_v40 = vadd.f32 %v12432_v56, %v4895_v37  ;;  %v5010_v19 = vadd.f32 %v12416_v33, %v4824_v61  ;;  %v4897_v41 = vpop.f32.mrb[134].mxu1  ;;  %v4826_v59 = vpop.f32.mrb[119].mxu0  ;;  %v14097_v33 = vpack.c.bf16 %v12353_v5, %v12349_v46  ;;  %v14100_v46 = vpack.c.bf16 %v12327_v9, %v12323_v25 }
 0xbf9   :  { %v4990_v47 = vadd.f32 %v12424_v28, %v4897_v41  ;;  %v5042_v14 = vadd.f32 %v12428_v44, %v4826_v59  ;;  %v4899_v10 = vpop.f32.mrb[135].mxu1  ;;  %v14098_v28 = vpack.c.bf16 %v12379_v60, %v12375_v4  ;;  %v5046_v44 = vrot.slane %v12402_v57, %v10789_v38 }
 0xbfa   :  { %v5026_v52 = vpack.c.bf16 %v5010_v19, %v5009_v8  ;;  %v5022_v34 = vadd.f32 %v12432_v56, %v4899_v10  ;;  %v14102_v10 = vpack.c.bf16 %v12377_v53, %v12373_v45 }
 0xbfb   :  { %v4998_v7 = vpack.c.bf16 %v4990_v47, %v4989_v20  ;;  %v5058_v16 = vpack.c.bf16 %v5042_v14, %v5041_v35  ;;  %v14101_v14 = vpack.c.bf16 %v12351_v15, %v12347_v2 }
 0xbfc   :  { %v12485_v48 = vpack.c.bf16 %v5022_v34, %v5021_v40  ;;  %9100 = vmatprep.subr.bf16.mxu1 %v5026_v52 }
 0xbfd   :  { %9084 = vmatprep.subr.bf16.mxu0 %v4998_v7 }
 0xbfe   :  { %9085 = vmatpush3.bf16.msra.mxu0 %v4998_v7 }
 0xbff   :  { %9101 = vmatpush3.bf16.xpose.msra.mxu1 %v5026_v52  ;;  %9110 = vmatprep.subr.bf16.mxu0 %v12444_v62 }
 0xc00   :  { %9126 = vmatprep.subr.bf16.mxu1 %v12442_v42 }
 0xc06   :  { %9103 = vmatmul.mubr.bf16.vlgmr.msra.gmra.mrb[144].mxu1 %v14097_v33  ;;  %v14103_v33 = vpack.c.bf16 %v12408_v39, %v12404_v27 }
 0xc07   :  { %9106 = vmatprep.mubr.bf16.mxu1 %v14098_v28  ;;  %9127 = vmatpush3.bf16.xpose.msra.mxu1 %v12442_v42 }
 0xc08   :  { %9128 = vmatprep.subr.bf16.mxu1 %v12460_v49 }
 0xc0d   :  { %v4936_v56 = vpop.f32.mrb[120].mxu0 }
 0xc0e   :  { %v4938_v51 = vpop.f32.mrb[121].mxu0  ;;  %9107 = vmatmul.mubr.bf16.gmra.mrb[148].mxu1 %v14099_v29  ;;  %v5047_v5 = vadd.f32 %v5046_v44, %v4936_v56 }
 0xc0f   :  { %v4939_v6 = vpop.f32.mrb[122].mxu0  ;;  %9129 = vmatpush3.bf16.xpose.msra.mxu1 %v12460_v49  ;;  %9134 = vmatprep.mubr.bf16.mxu1 %v14100_v46 }
 0xc10   :  { %v5048_v4 = vadd.f32 %v5046_v44, %v4939_v6  ;;  %v4941_v60 = vpop.f32.mrb[123].mxu0  ;;  %9130 = vmatprep.subr.bf16.mxu1 %v5057_v30 }
 0xc12   :  { %v5059_v42 = vpack.c.bf16 %v5048_v4, %v5047_v5 }
 0xc15   :  { %v4944_v37 = vpop.f32.mrb[124].mxu0 }
 0xc16   :  { %v4946_v57 = vpop.f32.mrb[125].mxu0  ;;  %v5049_v8 = vadd.f32 %v5046_v44, %v4944_v37 }
 0xc17   :  { %v4947_v61 = vpop.f32.mrb[126].mxu0  ;;  %9131 = vmatpush3.bf16.xpose.msra.mxu1 %v5057_v30 }
 0xc18   :  { %v5050_v40 = vadd.f32 %v5046_v44, %v4947_v61  ;;  %v4949_v26 = vpop.f32.mrb[127].mxu0  ;;  %9132 = vmatprep.subr.bf16.mxu1 %v5058_v16 }
 0xc1a   :  { %v5060_v11 = vpack.c.bf16 %v5050_v40, %v5049_v8 }
 0xc1d   :  { %v4952_v19 = vpop.f32.mrb[128].mxu0 }
 0xc1e   :  { %v4954_v49 = vpop.f32.mrb[129].mxu0  ;;  %v5051_v25 = vadd.f32 %v5046_v44, %v4952_v19 }
 0xc1f   :  { %v4955_v41 = vpop.f32.mrb[130].mxu0  ;;  %9133 = vmatpush3.bf16.xpose.msra.mxu1 %v5058_v16 }
 0xc20   :  { %v5052_v9 = vadd.f32 %v5046_v44, %v4955_v41  ;;  %v4957_v59 = vpop.f32.mrb[131].mxu0  ;;  %9142 = vmatprep.subr.bf16.mxu1 %v5059_v42 }
 0xc22   :  { %v5061_v20 = vpack.c.bf16 %v5052_v9, %v5051_v25 }
 0xc25   :  { %v4960_v35 = vpop.f32.mrb[132].mxu0 }
 0xc26   :  { %v4962_v47 = vpop.f32.mrb[133].mxu0  ;;  %9135 = vmatmul.mubr.bf16.vlgmr.msra.gmra.mrb[152].mxu1 %v14101_v14  ;;  %v5053_v52 = vadd.f32 %v5046_v44, %v4960_v35 }
 0xc27   :  { %v4963_v30 = vpop.f32.mrb[134].mxu0  ;;  %9138 = vmatprep.mubr.bf16.mxu1 %v14102_v10  ;;  %9143 = vmatpush3.bf16.msra.mxu1 %v5059_v42 }
 0xc28   :  { %v5054_v34 = vadd.f32 %v5046_v44, %v4963_v30  ;;  %v4965_v7 = vpop.f32.mrb[135].mxu0  ;;  %9144 = vmatprep.subr.bf16.mxu1 %v5060_v11 }
 0xc2a   :  { %v5062_v16 = vpack.c.bf16 %v5054_v34, %v5053_v52 }
 0xc2b   :  { %9145 = vmatpush3.bf16.msra.mxu1 %v5060_v11 }
 0xc2c   :  { %9146 = vmatprep.subr.bf16.mxu1 %v5061_v20 }
 0xc2e   :  { %9139 = vmatmul.mubr.bf16.gmra.mrb[156].mxu1 %v14103_v33 }
 0xc2f   :  { %9147 = vmatpush3.bf16.msra.mxu1 %v5061_v20 }
 0xc30   :  { %9148 = vmatprep.subr.bf16.mxu1 %v5062_v16 }
 0xc33   :  { %9149 = vmatpush3.bf16.msra.mxu1 %v5062_v16 }
 0xcb9   :  { %v12515_v2 = vpop.f32.mrb[136].mxu1 }
 0xcba   :  { %v12517_v15 = vpop.f32.mrb[137].mxu1  ;;  %v5158_v27 = vsel %vm751_vm0, %v12515_v2, -inf }
 0xcbb   :  { %v12519_v45 = vpop.f32.mrb[138].mxu1  ;;  %v5152_v53 = vsel %vm751_vm0, %v12517_v15, -inf }
 0xcbc   :  { %5153 = vmax.xlane.f32.xlu0 %v5152_v53  ;;  %v12523_v28 = vpop.f32.mrb[139].mxu1  ;;  %v5161_v56 = vsel %vm751_vm0, %v12519_v45, -inf }
 0xcbd   :  { %v5155_v44 = vsel %vm751_vm0, %v12523_v28, -inf }
 0xcbe   :  { %5156 = vmax.xlane.f32.xlu1 %v5155_v44 }
 0xcc0   :  { %5159 = vmax.xlane.f32.xlu0 %v5158_v27 }
 0xcc1   :  { %v12529_v39 = vpop.f32.mrb[140].mxu1 }
 0xcc2   :  { %5162 = vmax.xlane.f32.xlu1 %v5161_v56  ;;  %v12533_v51 = vpop.f32.mrb[141].mxu1  ;;  %v5170_v4 = vsel %vm751_vm0, %v12529_v39, -inf }
 0xcc3   :  { %v12535_v29 = vpop.f32.mrb[142].mxu1  ;;  %v5164_v6 = vsel %vm751_vm0, %v12533_v51, -inf }
 0xcc4   :  { %5165 = vmax.xlane.f32.xlu0 %v5164_v6  ;;  %v12539_v46 = vpop.f32.mrb[143].mxu1  ;;  %v5173_v60 = vsel %vm751_vm0, %v12535_v29, -inf }
 0xcc5   :  { %v5167_v5 = vsel %vm751_vm0, %v12539_v46, -inf }
 0xcc6   :  { %5168 = vmax.xlane.f32.xlu1 %v5167_v5 }
 0xcc8   :  { %5171 = vmax.xlane.f32.xlu0 %v5170_v4 }
 0xcca   :  { %5174 = vmax.xlane.f32.xlu1 %v5173_v60 }
 0xcd9   :  { %v12547_v42 = vpop.f32.mrb[144].mxu1 }
 0xcda   :  { %v12549_v37 = vpop.f32.mrb[145].mxu1  ;;  %v5420_v26 = vsel %vm751_vm0, %v12547_v42, -inf }
 0xcdb   :  { %v12551_v57 = vpop.f32.mrb[146].mxu1  ;;  %v5414_v61 = vsel %vm751_vm0, %v12549_v37, -inf }
 0xcdc   :  { %5415 = vmax.xlane.f32.xlu0 %v5414_v61  ;;  %v12555_v8 = vpop.f32.mrb[147].mxu1  ;;  %v5423_v19 = vsel %vm751_vm0, %v12551_v57, -inf }
 0xcdd   :  { %v5417_v40 = vsel %vm751_vm0, %v12555_v8, -inf }
 0xcde   :  { %5418 = vmax.xlane.f32.xlu1 %v5417_v40 }
 0xce0   :  { %5421 = vmax.xlane.f32.xlu0 %v5420_v26 }
 0xce1   :  { %v12561_v11 = vpop.f32.mrb[148].mxu1 }
 0xce2   :  { %5424 = vmax.xlane.f32.xlu1 %v5423_v19  ;;  %v12565_v49 = vpop.f32.mrb[149].mxu1  ;;  %v5432_v20 = vsel %vm751_vm0, %v12561_v11, -inf }
 0xce3   :  { %v12567_v41 = vpop.f32.mrb[150].mxu1  ;;  %v5426_v25 = vsel %vm751_vm0, %v12565_v49, -inf }
 0xce4   :  { %5427 = vmax.xlane.f32.xlu0 %v5426_v25  ;;  %v12571_v9 = vpop.f32.mrb[151].mxu1  ;;  %v5435_v35 = vsel %vm751_vm0, %v12567_v41, -inf }
 0xce5   :  { %v5429_v59 = vsel %vm751_vm0, %v12571_v9, -inf }
 0xce6   :  { %5430 = vmax.xlane.f32.xlu1 %v5429_v59 }
 0xce8   :  { %5433 = vmax.xlane.f32.xlu0 %v5432_v20 }
 0xcea   :  { %5436 = vmax.xlane.f32.xlu1 %v5435_v35 }
 0xcf9   :  { %v12579_v47 = vpop.f32.mrb[152].mxu1 }
 0xcfa   :  { %v12581_v14 = vpop.f32.mrb[153].mxu1  ;;  %v5988_v30 = vsel %vm751_vm0, %v12579_v47, -inf }
 0xcfb   :  { %5989 = vmax.xlane.f32.xlu0 %v5988_v30  ;;  %v12585_v10 = vpop.f32.mrb[154].mxu1  ;;  %v5982_v7 = vsel %vm751_vm0, %v12581_v14, -inf }
 0xcfc   :  { %v12587_v52 = vpop.f32.mrb[155].mxu1  ;;  %v5991_v34 = vsel %vm751_vm0, %v12585_v10, -inf }
 0xcfd   :  { %5992 = vmax.xlane.f32.xlu1 %v5991_v34  ;;  %v5985_v16 = vsel %vm751_vm0, %v12587_v52, -inf }
 0xcff   :  { %5983 = vmax.xlane.f32.xlu0 %v5982_v7 }
 0xd01   :  { %5986 = vmax.xlane.f32.xlu1 %v5985_v16  ;;  %v12595_v33 = vpop.f32.mrb[156].mxu1 }
 0xd02   :  { %v12597_v53 = vpop.f32.mrb[157].mxu1 }
 0xd03   :  { %v12599_v44 = vpop.f32.mrb[158].mxu1  ;;  %v5994_v27 = vsel %vm751_vm0, %v12597_v53, -inf }
 0xd04   :  { %5995 = vmax.xlane.f32.xlu0 %v5994_v27  ;;  %v12603_v56 = vpop.f32.mrb[159].mxu1 }
 0xd05   :  { %v5997_v6 = vsel %vm751_vm0, %v12603_v56, -inf }
 0xd06   :  { %5998 = vmax.xlane.f32.xlu1 %v5997_v6 }
 0xd49   :  { %v5154_v5 = vpop.xlane.xlu0 %5153 }
 0xd4a   :  { %v5176_v4 = vsub.f32 %v12517_v15, %v5154_v5 }
 0xd4b   :  { %v5157_v60 = vpop.xlane.xlu1 %5156 }
 0xd4c   :  { %v5177_v40 = vsub.f32 %v12523_v28, %v5157_v60  ;;  %v5184_v19 = vmul.f32 1.442695, %v5176_v4 }
 0xd4d   :  { %v5160_v61 = vpop.xlane.xlu0 %5159 }
 0xd4e   :  { %v5178_v26 = vsub.f32 %v12515_v2, %v5160_v61  ;;  %v5186_v30 = vmul.f32 1.442695, %v5177_v40 }
 0xd4f   :  { %v5163_v25 = vpop.xlane.xlu1 %5162 }
 0xd50   :  { %v5188_v59 = vmul.f32 1.442695, %v5178_v26  ;;  %v5179_v20 = vsub.f32 %v12519_v45, %v5163_v25 }
 0xd51   :  { %v5166_v35 = vpop.xlane.xlu0 %5165 }
 0xd52   :  { %10150 = vpow2.f32 %v5188_v59  ;;  %v5190_v34 = vmul.f32 1.442695, %v5179_v20  ;;  %v5180_v7 = vsub.f32 %v12533_v51, %v5166_v35 }
 0xd53   :  { %10152 = vpow2.f32 %v5184_v19  ;;  %v5169_v16 = vpop.xlane.xlu1 %5168 }
 0xd54   :  { %10154 = vpow2.f32 %v5190_v34  ;;  %v5181_v28 = vsub.f32 %v12539_v46, %v5169_v16  ;;  %v5192_v27 = vmul.f32 1.442695, %v5180_v7 }
 0xd55   :  { %v5172_v15 = vpop.xlane.xlu0 %5171  ;;  %10156 = vpow2.f32 %v5186_v30 }
 0xd56   :  { %v5182_v2 = vsub.f32 %v12529_v39, %v5172_v15  ;;  %v5194_v4 = vmul.f32 1.442695, %v5181_v28 }
 0xd57   :  { %v5175_v6 = vpop.xlane.xlu1 %5174 }
 0xd58   :  { %v5196_v5 = vmul.f32 1.442695, %v5182_v2  ;;  %v5183_v45 = vsub.f32 %v12535_v29, %v5175_v6 }
 0xd5a   :  { %10158 = vpow2.f32 %v5196_v5  ;;  %v5198_v60 = vmul.f32 1.442695, %v5183_v45  ;;  %v6000_v45 = vsel %vm751_vm0, %v12595_v33, -inf }
 0xd5b   :  { %10160 = vpow2.f32 %v5192_v27 }
 0xd5c   :  { %v12615_v61 = vpop.eup %10150  ;;  %10162 = vpow2.f32 %v5198_v60 }
 0xd5d   :  { %v12617_v51 = vpop.eup %10152  ;;  %v5206_v40 = vsel %vm751_vm0, %v12615_v61, 0.0  ;;  %10164 = vpow2.f32 %v5194_v4 }
 0xd5e   :  { %v12621_v46 = vpop.eup %10154  ;;  %5207 = vadd.xlane.f32.xlu0 %v5206_v40  ;;  %v5200_v26 = vsel %vm751_vm0, %v12617_v51, 0.0 }
 0xd5f   :  { %v5209_v39 = vsel %vm751_vm0, %v12621_v46, 0.0  ;;  %v12625_v29 = vpop.eup %10156 }
 0xd60   :  { %5210 = vadd.xlane.f32.xlu1 %v5209_v39  ;;  %v5203_v19 = vsel %vm751_vm0, %v12625_v29, 0.0 }
 0xd62   :  { %5201 = vadd.xlane.f32.xlu0 %v5200_v26 }
 0xd64   :  { %v12631_v25 = vpop.eup %10158  ;;  %5204 = vadd.xlane.f32.xlu1 %v5203_v19 }
 0xd65   :  { %v12633_v59 = vpop.eup %10160  ;;  %v5218_v20 = vsel %vm751_vm0, %v12631_v25, 0.0 }
 0xd66   :  { %v12637_v35 = vpop.eup %10162  ;;  %5219 = vadd.xlane.f32.xlu0 %v5218_v20  ;;  %v5212_v16 = vsel %vm751_vm0, %v12633_v59, 0.0 }
 0xd67   :  { %v5221_v30 = vsel %vm751_vm0, %v12637_v35, 0.0  ;;  %v12641_v34 = vpop.eup %10164 }
 0xd68   :  { %5222 = vadd.xlane.f32.xlu1 %v5221_v30  ;;  %v5215_v2 = vsel %vm751_vm0, %v12641_v34, 0.0 }
 0xd69   :  { %v5416_v7 = vpop.xlane.xlu0 %5415 }
 0xd6a   :  { %v5438_v15 = vsub.f32 %v12549_v37, %v5416_v7  ;;  %5213 = vadd.xlane.f32.xlu0 %v5212_v16  ;;  %v6003_v37 = vsel %vm751_vm0, %v12599_v44, -inf }
 0xd6b   :  { %v5419_v28 = vpop.xlane.xlu1 %5418 }
 0xd6c   :  { %v5446_v27 = vmul.f32 1.442695, %v5438_v15  ;;  %v5439_v6 = vsub.f32 %v12555_v8, %v5419_v28  ;;  %5216 = vadd.xlane.f32.xlu1 %v5215_v2 }
 0xd6d   :  { %v5422_v5 = vpop.xlane.xlu0 %5421 }
 0xd6e   :  { %10166 = vpow2.f32 %v5446_v27  ;;  %v5448_v4 = vmul.f32 1.442695, %v5439_v6  ;;  %v5440_v60 = vsub.f32 %v12547_v42, %v5422_v5  ;;  %6001 = vmax.xlane.f32.xlu0 %v6000_v45 }
 0xd6f   :  { %v5425_v40 = vpop.xlane.xlu1 %5424 }
 0xd70   :  { %10168 = vpow2.f32 %v5448_v4  ;;  %v5450_v39 = vmul.f32 1.442695, %v5440_v60  ;;  %v5441_v26 = vsub.f32 %v12551_v57, %v5425_v40  ;;  %6004 = vmax.xlane.f32.xlu1 %v6003_v37 }
 0xd71   :  { %v5428_v8 = vpop.xlane.xlu0 %5427 }
 0xd72   :  { %10170 = vpow2.f32 %v5450_v39  ;;  %v5452_v19 = vmul.f32 1.442695, %v5441_v26  ;;  %v5442_v20 = vsub.f32 %v12565_v49, %v5428_v8 }
 0xd73   :  { %v5431_v30 = vpop.xlane.xlu1 %5430 }
 0xd74   :  { %10172 = vpow2.f32 %v5452_v19  ;;  %v5454_v7 = vmul.f32 1.442695, %v5442_v20  ;;  %v5443_v42 = vsub.f32 %v12571_v9, %v5431_v30 }
 0xd75   :  { %v5434_v16 = vpop.xlane.xlu0 %5433 }
 0xd76   :  { %10174 = vpow2.f32 %v5454_v7  ;;  %v5456_v15 = vmul.f32 1.442695, %v5443_v42  ;;  %v5444_v28 = vsub.f32 %v12561_v11, %v5434_v16 }
 0xd77   :  { %v5437_v2 = vpop.xlane.xlu1 %5436 }
 0xd78   :  { %v12658_v27 = vpop.eup %10166  ;;  %10176 = vpow2.f32 %v5456_v15  ;;  %v5458_v57 = vmul.f32 1.442695, %v5444_v28  ;;  %v5445_v6 = vsub.f32 %v12567_v41, %v5437_v2 }
 0xd79   :  { %v5462_v49 = vsel %vm751_vm0, %v12658_v27, 0.0 }
 0xd7a   :  { %v12663_v5 = vpop.eup %10168  ;;  %10178 = vpow2.f32 %v5458_v57  ;;  %v5460_v45 = vmul.f32 1.442695, %v5445_v6  ;;  %5463 = vadd.xlane.f32.xlu0 %v5462_v49 }
 0xd7b   :  { %v5465_v9 = vsel %vm751_vm0, %v12663_v5, 0.0 }
 0xd7c   :  { %v12667_v4 = vpop.eup %10170  ;;  %10180 = vpow2.f32 %v5460_v45  ;;  %5466 = vadd.xlane.f32.xlu1 %v5465_v9 }
 0xd7d   :  { %v5468_v11 = vsel %vm751_vm0, %v12667_v4, 0.0 }
 0xd7e   :  { %v12671_v60 = vpop.eup %10172  ;;  %5469 = vadd.xlane.f32.xlu0 %v5468_v11 }
 0xd7f   :  { %v5471_v41 = vsel %vm751_vm0, %v12671_v60, 0.0 }
 0xd80   :  { %v12675_v40 = vpop.eup %10174  ;;  %5472 = vadd.xlane.f32.xlu1 %v5471_v41 }
 0xd81   :  { %v5474_v37 = vsel %vm751_vm0, %v12675_v40, 0.0 }
 0xd82   :  { %v12679_v39 = vpop.eup %10176  ;;  %5475 = vadd.xlane.f32.xlu0 %v5474_v37 }
 0xd83   :  { %v5477_v26 = vsel %vm751_vm0, %v12679_v39, 0.0 }
 0xd84   :  { %v12683_v8 = vpop.eup %10178  ;;  %5478 = vadd.xlane.f32.xlu1 %v5477_v26 }
 0xd85   :  { %v5480_v19 = vsel %vm751_vm0, %v12683_v8, 0.0 }
 0xd86   :  { %v12687_v20 = vpop.eup %10180  ;;  %5481 = vadd.xlane.f32.xlu0 %v5480_v19 }
 0xd87   :  { %v5483_v30 = vsel %vm751_vm0, %v12687_v20, 0.0 }
 0xd88   :  { %v5990_v7 = vpop.xlane.xlu0 %5989  ;;  %5484 = vadd.xlane.f32.xlu1 %v5483_v30 }
 0xd89   :  { %v6008_v42 = vsub.f32 %v12579_v47, %v5990_v7 }
 0xd8a   :  { %v5993_v16 = vpop.xlane.xlu1 %5992 }
 0xd8b   :  { %v6009_v28 = vsub.f32 %v12585_v10, %v5993_v16  ;;  %v6018_v57 = vmul.f32 1.442695, %v6008_v42 }
 0xd8c   :  { %v5984_v15 = vpop.xlane.xlu0 %5983 }
 0xd8d   :  { %v6006_v2 = vsub.f32 %v12581_v14, %v5984_v15  ;;  %v6020_v9 = vmul.f32 1.442695, %v6009_v28 }
 0xd8e   :  { %v5987_v6 = vpop.xlane.xlu1 %5986 }
 0xd8f   :  { %v6014_v49 = vmul.f32 1.442695, %v6006_v2  ;;  %v6007_v45 = vsub.f32 %v12587_v52, %v5987_v6 }
 0xd91   :  { %10182 = vpow2.f32 %v6014_v49  ;;  %v6016_v11 = vmul.f32 1.442695, %v6007_v45  ;;  %v5996_v41 = vpop.xlane.xlu0 %5995 }
 0xd92   :  { %10184 = vpow2.f32 %v6018_v57  ;;  %v6010_v37 = vsub.f32 %v12597_v53, %v5996_v41 }
 0xd93   :  { %10186 = vpow2.f32 %v6016_v11  ;;  %v5999_v47 = vpop.xlane.xlu1 %5998 }
 0xd94   :  { %v6022_v26 = vmul.f32 1.442695, %v6010_v37  ;;  %v6011_v19 = vsub.f32 %v12603_v56, %v5999_v47  ;;  %10188 = vpow2.f32 %v6020_v9 }
 0xd96   :  { %v6024_v10 = vmul.f32 1.442695, %v6011_v19  ;;  %10190 = vpow2.f32 %v6022_v26 }
 0xd98   :  { %10192 = vpow2.f32 %v6024_v10 }
 0xd9b   :  { %v12697_v14 = vpop.eup %10182 }
 0xd9c   :  { %v12699_v30 = vpop.eup %10184  ;;  %v6030_v52 = vsel %vm751_vm0, %v12697_v14, 0.0 }
 0xd9d   :  { %v12703_v7 = vpop.eup %10186  ;;  %6031 = vadd.xlane.f32.xlu0 %v6030_v52  ;;  %v6036_v56 = vsel %vm751_vm0, %v12699_v30, 0.0 }
 0xd9e   :  { %v6033_v53 = vsel %vm751_vm0, %v12703_v7, 0.0  ;;  %v12707_v42 = vpop.eup %10188 }
 0xd9f   :  { %6034 = vadd.xlane.f32.xlu1 %v6033_v53  ;;  %v6039_v15 = vsel %vm751_vm0, %v12707_v42, 0.0 }
 0xda0   :  { %v12711_v16 = vpop.eup %10190 }
 0xda1   :  { %6037 = vadd.xlane.f32.xlu0 %v6036_v56  ;;  %v6042_v2 = vsel %vm751_vm0, %v12711_v16, 0.0 }
 0xda2   :  { %v12715_v28 = vpop.eup %10192 }
 0xda3   :  { %6040 = vadd.xlane.f32.xlu1 %v6039_v15  ;;  %v6045_v57 = vsel %vm751_vm0, %v12715_v28, 0.0 }
 0xda5   :  { %6043 = vadd.xlane.f32.xlu0 %v6042_v2 }
 0xda7   :  { %6046 = vadd.xlane.f32.xlu1 %v6045_v57 }
 0xdeb   :  { %v5208_v6 = vpop.xlane.xlu0 %5207 }
 0xded   :  { %v5211_v49 = vpop.xlane.xlu1 %5210 }
 0xdee   :  { %10194 = vrcp.f32 %v5211_v49 }
 0xdef   :  { %v5202_v45 = vpop.xlane.xlu0 %5201 }
 0xdf0   :  { %10196 = vrcp.f32 %v5202_v45 }
 0xdf1   :  { %10198 = vrcp.f32 %v5208_v6  ;;  %v5205_v9 = vpop.xlane.xlu1 %5204 }
 0xdf2   :  { %10200 = vrcp.f32 %v5205_v9 }
 0xdf3   :  { %v5220_v11 = vpop.xlane.xlu0 %5219 }
 0xdf5   :  { %v5223_v41 = vpop.xlane.xlu1 %5222 }
 0xdf6   :  { %10202 = vrcp.f32 %v5223_v41 }
 0xdf7   :  { %v5214_v37 = vpop.xlane.xlu0 %5213 }
 0xdf8   :  { %10204 = vrcp.f32 %v5214_v37  ;;  %v10195_v47 = vpop.eup %10194 }
 0xdf9   :  { %10206 = vrcp.f32 %v5220_v11  ;;  %v5217_v26 = vpop.xlane.xlu1 %5216  ;;  %v5235_v56 = vmul.f32 %v10195_v47, %v12621_v46 }
 0xdfa   :  { %v10197_v19 = vpop.eup %10196  ;;  %10208 = vrcp.f32 %v5217_v26 }
 0xdfb   :  { %v10199_v10 = vpop.eup %10198  ;;  %v6002_v52 = vpop.xlane.xlu0 %6001  ;;  %v5232_v57 = vmul.f32 %v10197_v19, %v12617_v51 }
 0xdfc   :  { %v10201_v53 = vpop.eup %10200  ;;  %v6012_v15 = vsub.f32 %v12595_v33, %v6002_v52  ;;  %v5234_v49 = vmul.f32 %v10199_v10, %v12615_v61 }
 0xdfd   :  { %v6005_v2 = vpop.xlane.xlu1 %6004  ;;  %v5233_v6 = vmul.f32 %v10201_v53, %v12625_v29 }
 0xdfe   :  { %v6026_v45 = vmul.f32 1.442695, %v6012_v15  ;;  %v6013_v9 = vsub.f32 %v12599_v44, %v6005_v2  ;;  %v5241_v41 = vpack.c.bf16 %v5235_v56, %v5234_v49 }
 0xdff   :  { %v5240_v11 = vpack.c.bf16 %v5233_v6, %v5232_v57 }
 0xe00   :  { %10210 = vpow2.f32 %v6026_v45  ;;  %v6028_v37 = vmul.f32 1.442695, %v6013_v9  ;;  %v10203_v26 = vpop.eup %10202 }
 0xe01   :  { %9086 = vmatprep.mubr.msk.bf16.mxu0 %vm751_vm0, %v5240_v11  ;;  %v5239_v61 = vmul.f32 %v10203_v26, %v12637_v35 }
 0xe02   :  { %v10205_v46 = vpop.eup %10204  ;;  %10212 = vpow2.f32 %v6028_v37  ;;  %9087 = vmatmul.mubr.msk.bf16.vlgmr.msra.gmra.mrb[136].mxu0 %vm751_vm0, %v5241_v41 }
 0xe03   :  { %v10207_v33 = vpop.eup %10206  ;;  %9111 = vmatpush3.bf16.msra.mxu0 %v12444_v62  ;;  %v5236_v44 = vmul.f32 %v10205_v46, %v12633_v59 }
 0xe04   :  { %v10209_v51 = vpop.eup %10208  ;;  %9112 = vmatprep.subr.bf16.mxu0 %v12462_v36  ;;  %v5238_v47 = vmul.f32 %v10207_v33, %v12631_v25 }
 0xe05   :  { %v5237_v29 = vmul.f32 %v10209_v51, %v12641_v34 }
 0xe06   :  { %v5243_v52 = vpack.c.bf16 %v5239_v61, %v5238_v47 }
 0xe07   :  { %9113 = vmatpush3.bf16.msra.mxu0 %v12462_v36  ;;  %v5464_v19 = vpop.xlane.xlu0 %5463  ;;  %v5242_v10 = vpack.c.bf16 %v5237_v29, %v5236_v44 }
 0xe08   :  { %10214 = vrcp.f32 %v5464_v19  ;;  %9114 = vmatprep.subr.bf16.mxu0 %v12475_v43 }
 0xe09   :  { %9090 = vmatprep.mubr.msk.bf16.mxu0 %vm751_vm0, %v5242_v10  ;;  %v5467_v62 = vpop.xlane.xlu1 %5466 }
 0xe0a   :  { %v12738_v53 = vpop.eup %10210  ;;  %10216 = vrcp.f32 %v5467_v62  ;;  %9091 = vmatmul.mubr.msk.bf16.gmra.mrb[140].mxu0 %vm751_vm0, %v5243_v52 }
 0xe0b   :  { %9115 = vmatpush3.bf16.msra.mxu0 %v12475_v43  ;;  %v5470_v59 = vpop.xlane.xlu0 %5469  ;;  %v6048_v36 = vsel %vm751_vm0, %v12738_v53, 0.0 }
 0xe0c   :  { %v12744_v25 = vpop.eup %10212  ;;  %10218 = vrcp.f32 %v5470_v59  ;;  %9116 = vmatprep.subr.bf16.mxu0 %v12485_v48  ;;  %6049 = vadd.xlane.f32.xlu0 %v6048_v36 }
 0xe0d   :  { %v5473_v35 = vpop.xlane.xlu1 %5472  ;;  %v6051_v34 = vsel %vm751_vm0, %v12744_v25, 0.0 }
 0xe0e   :  { %10220 = vrcp.f32 %v5473_v35  ;;  %6052 = vadd.xlane.f32.xlu1 %v6051_v34 }
 0xe0f   :  { %9117 = vmatpush3.bf16.msra.mxu0 %v12485_v48  ;;  %v5476_v56 = vpop.xlane.xlu0 %5475 }
 0xe10   :  { %10222 = vrcp.f32 %v5476_v56 }
 0xe11   :  { %v5479_v43 = vpop.xlane.xlu1 %5478 }
 0xe12   :  { %v10215_v15 = vpop.eup %10214  ;;  %10224 = vrcp.f32 %v5479_v43 }
 0xe13   :  { %v5482_v2 = vpop.xlane.xlu0 %5481  ;;  %v5494_v49 = vmul.f32 %v10215_v15, %v12658_v27 }
 0xe14   :  { %v10217_v57 = vpop.eup %10216  ;;  %10226 = vrcp.f32 %v5482_v2 }
 0xe15   :  { %v5485_v6 = vpop.xlane.xlu1 %5484  ;;  %v5495_v45 = vmul.f32 %v10217_v57, %v12663_v5 }
 0xe16   :  { %v10219_v9 = vpop.eup %10218  ;;  %10228 = vrcp.f32 %v5485_v6 }
 0xe17   :  { %v5502_v11 = vpack.c.bf16 %v5495_v45, %v5494_v49  ;;  %v5496_v37 = vmul.f32 %v10219_v9, %v12667_v4  ;;  %v9776_v45 = vld [vmem:[%s14030_s3 + $0x220] ss:$8 sps:$4 sm:$0xff]   ;;  %v9779_v9 = vld [vmem:[%s14030_s3 + $0x230] ss:$8 sps:$4 sm:$0xff]  }
 0xe18   :  { %v10221_v41 = vpop.eup %10220 }
 0xe19   :  { %v5497_v48 = vmul.f32 %v10221_v41, %v12671_v60  ;;  %9118 = vmatprep.mubr.msk.bf16.mxu0 %vm751_vm0, %v5502_v11  ;;  %v9781_v11 = vld [vmem:[%s14030_s3 + $0x234] ss:$8 sps:$4 sm:$0xff]   ;;  %v9784_v41 = vld [vmem:[%s14030_s3 + $0x244] ss:$8 sps:$4 sm:$0xff]  }
 0xe1a   :  { %v10223_v26 = vpop.eup %10222 }
 0xe1b   :  { %v5503_v46 = vpack.c.bf16 %v5497_v48, %v5496_v37  ;;  %v5498_v51 = vmul.f32 %v10223_v26, %v12675_v40  ;;  %v9782_v37 = vld [vmem:[%s14030_s3 + $0x240] ss:$8 sps:$4 sm:$0xff]   ;;  %v9787_v48 = vld [vmem:[%s14030_s3 + $0x254] ss:$8 sps:$4 sm:$0xff]   ;;  %v9785_v26 = vld [vmem:[%s14030_s3 + $0x250] ss:$8 sps:$4 sm:$0xff]  }
 0xe1c   :  { %v10225_v33 = vpop.eup %10224 }
 0xe1d   :  { %9119 = vmatmul.mubr.msk.bf16.vlgmr.msra.gmra.mrb[144].mxu0 %vm751_vm0, %v5503_v46  ;;  %v5499_v27 = vmul.f32 %v10225_v33, %v12679_v39  ;;  %v9790_v46 = vld [vmem:[%s14030_s3 + $0x264] ss:$8 sps:$4 sm:$0xff]   ;;  %v9788_v33 = vld [vmem:[%s14030_s3 + $0x260] ss:$8 sps:$4 sm:$0xff]  }
 0xe1e   :  { %v10227_v5 = vpop.eup %10226 }
 0xe1f   :  { %v5504_v61 = vpack.c.bf16 %v5499_v27, %v5498_v51  ;;  %v5500_v4 = vmul.f32 %v10227_v5, %v12683_v8  ;;  %v9793_v51 = vld [vmem:[%s14030_s3 + $0x274] ss:$8 sps:$4 sm:$0xff]   ;;  %v9791_v27 = vld [vmem:[%s14030_s3 + $0x270] ss:$8 sps:$4 sm:$0xff]   ;;  %v9796_v5 = vld [vmem:[%s14030_s3 + $0x184] ss:$8 sps:$4 sm:$0xff]  }
 0xe20   :  { %v10229_v44 = vpop.eup %10228 }
 0xe21   :  { %9122 = vmatprep.mubr.msk.bf16.mxu0 %vm751_vm0, %v5504_v61  ;;  %v5501_v60 = vmul.f32 %v10229_v44, %v12687_v20 }
 0xe23   :  { %v5505_v29 = vpack.c.bf16 %v5501_v60, %v5500_v4 }
 0xe25   :  { %9123 = vmatmul.mubr.msk.bf16.gmra.mrb[148].mxu0 %vm751_vm0, %v5505_v29 }
 0xe26   :  { %5699 = vmatprep.mubr.bf16.mxu0 %v14072_v24 }
 0xe2a   :  { %v6032_v47 = vpop.xlane.xlu0 %6031 }
 0xe2b   :  { %10230 = vrcp.f32 %v6032_v47 }
 0xe2c   :  { %v6035_v19 = vpop.xlane.xlu1 %6034 }
 0xe2d   :  { %10232 = vrcp.f32 %v6035_v19 }
 0xe2e   :  { %v6038_v40 = vpop.xlane.xlu0 %6037 }
 0xe2f   :  { %10234 = vrcp.f32 %v6038_v40 }
 0xe30   :  { %v6041_v39 = vpop.xlane.xlu1 %6040 }
 0xe31   :  { %10236 = vrcp.f32 %v6041_v39 }
 0xe32   :  { %v6044_v10 = vpop.xlane.xlu0 %6043 }
 0xe33   :  { %10238 = vrcp.f32 %v6044_v10 }
 0xe34   :  { %v6047_v52 = vpop.xlane.xlu1 %6046 }
 0xe35   :  { %v10231_v62 = vpop.eup %10230  ;;  %10240 = vrcp.f32 %v6047_v52 }
 0xe36   :  { %v6062_v20 = vmul.f32 %v10231_v62, %v12697_v14 }
 0xe37   :  { %v10233_v8 = vpop.eup %10232 }
 0xe38   :  { %v6063_v59 = vmul.f32 %v10233_v8, %v12703_v7  ;;  %v9770_v7 = vld [vmem:[%s14030_s3 + $0x200] ss:$8 sps:$4 sm:$0xff]  }
 0xe39   :  { %v10235_v36 = vpop.eup %10234 }
 0xe3a   :  { %v6070_v35 = vpack.c.bf16 %v6063_v59, %v6062_v20  ;;  %v6064_v56 = vmul.f32 %v10235_v36, %v12699_v30  ;;  %v9772_v30 = vld [vmem:[%s14030_s3 + $0x204] ss:$8 sps:$4 sm:$0xff]  }
 0xe3b   :  { %v10237_v34 = vpop.eup %10236  ;;  %5667 = vmatprep.subr.bf16.mxu0 %v9772_v30 }
 0xe3c   :  { %v6065_v43 = vmul.f32 %v10237_v34, %v12707_v42  ;;  %9150 = vmatprep.mubr.msk.bf16.mxu1 %vm751_vm0, %v6070_v35  ;;  %5668 = vmatpush1.bf16.msra.mxu0 %v9770_v7  ;;  %v9773_v42 = vld [vmem:[%s14030_s3 + $0x210] ss:$8 sps:$4 sm:$0xff]   ;;  %v9802_v7 = vld [vmem:[%s14030_s3 + $0x1a4] ss:$8 sps:$4 sm:$0xff]  }
 0xe3d   :  { %v10239_v15 = vpop.eup %10238 }
 0xe3e   :  { %v6071_v2 = vpack.c.bf16 %v6065_v43, %v6064_v56  ;;  %v6066_v6 = vmul.f32 %v10239_v15, %v12711_v16  ;;  %v9775_v16 = vld [vmem:[%s14030_s3 + $0x214] ss:$8 sps:$4 sm:$0xff]  }
 0xe3f   :  { %v10241_v57 = vpop.eup %10240  ;;  %5669 = vmatprep.subr.bf16.mxu0 %v9775_v16 }
 0xe40   :  { %9151 = vmatmul.mubr.msk.bf16.vlgmr.msra.gmra.mrb[160].mxu1 %vm751_vm0, %v6071_v2  ;;  %v6067_v14 = vmul.f32 %v10241_v57, %v12715_v28  ;;  %5670 = vmatpush1.bf16.msra.mxu0 %v9773_v42  ;;  %v9778_v28 = vld [vmem:[%s14030_s3 + $0x224] ss:$8 sps:$4 sm:$0xff]   ;;  %v9794_v57 = vld [vmem:[%s14030_s3 + $0x180] ss:$8 sps:$4 sm:$0xff]  }
 0xe41   :  { %5671 = vmatprep.subr.bf16.mxu0 %v9778_v28 }
 0xe42   :  { %v6072_v49 = vpack.c.bf16 %v6067_v14, %v6066_v6  ;;  %v9799_v14 = vld [vmem:[%s14030_s3 + $0x194] ss:$8 sps:$4 sm:$0xff]  }
 0xe44   :  { %9154 = vmatprep.mubr.msk.bf16.mxu1 %vm751_vm0, %v6072_v49  ;;  %5672 = vmatpush1.bf16.msra.mxu0 %v9776_v45  ;;  %v9797_v49 = vld [vmem:[%s14030_s3 + $0x190] ss:$8 sps:$4 sm:$0xff]  }
 0xe45   :  { %5673 = vmatprep.subr.bf16.mxu0 %v9781_v11 }
 0xe48   :  { %5674 = vmatpush1.bf16.msra.mxu0 %v9779_v9  ;;  %v9800_v9 = vld [vmem:[%s14030_s3 + $0x1a0] ss:$8 sps:$4 sm:$0xff]  }
 0xe49   :  { %5675 = vmatprep.subr.bf16.mxu0 %v9784_v41  ;;  %v9805_v41 = vld [vmem:[%s14030_s3 + $0x1b4] ss:$8 sps:$4 sm:$0xff]  }
 0xe4c   :  { %5676 = vmatpush1.bf16.msra.mxu0 %v9782_v37  ;;  %v9803_v37 = vld [vmem:[%s14030_s3 + $0x1b0] ss:$8 sps:$4 sm:$0xff]  }
 0xe4d   :  { %5677 = vmatprep.subr.bf16.mxu0 %v9787_v48  ;;  %v9808_v48 = vld [vmem:[%s14030_s3 + $0x1c4] ss:$8 sps:$4 sm:$0xff]  }
 0xe50   :  { %5678 = vmatpush1.bf16.msra.mxu0 %v9785_v26  ;;  %v9806_v26 = vld [vmem:[%s14030_s3 + $0x1c0] ss:$8 sps:$4 sm:$0xff]  }
 0xe51   :  { %5679 = vmatprep.subr.bf16.mxu0 %v9790_v46  ;;  %v9811_v46 = vld [vmem:[%s14030_s3 + $0x1d4] ss:$8 sps:$4 sm:$0xff]  }
 0xe54   :  { %5680 = vmatpush1.bf16.msra.mxu0 %v9788_v33  ;;  %v9809_v33 = vld [vmem:[%s14030_s3 + $0x1d0] ss:$8 sps:$4 sm:$0xff]  }
 0xe55   :  { %5681 = vmatprep.subr.bf16.mxu0 %v9793_v51  ;;  %v9814_v51 = vld [vmem:[%s14030_s3 + $0x1e4] ss:$8 sps:$4 sm:$0xff]  }
 0xe58   :  { %5682 = vmatpush1.bf16.msra.mxu0 %v9791_v27  ;;  %v9812_v27 = vld [vmem:[%s14030_s3 + $0x1e0] ss:$8 sps:$4 sm:$0xff]  }
 0xe59   :  { %5820 = vmatprep.subr.bf16.mxu0 %v9796_v5  ;;  %v9817_v5 = vld [vmem:[%s14030_s3 + $0x1f4] ss:$8 sps:$4 sm:$0xff]  }
 0xe99   :  { %v6050_v61 = vpop.xlane.xlu0 %6049 }
 0xe9a   :  { %10242 = vrcp.f32 %v6050_v61  ;;  %v9815_v61 = vld [vmem:[%s14030_s3 + $0x1f0] ss:$8 sps:$4 sm:$0xff]  }
 0xe9b   :  { %v6053_v44 = vpop.xlane.xlu1 %6052 }
 0xe9c   :  { %10244 = vrcp.f32 %v6053_v44  ;;  %v9820_v44 = vld [vmem:[%s14030_s3 + $0x284] ss:$8 sps:$4 sm:$0xff]  }
 0xea4   :  { %v10243_v4 = vpop.eup %10242 }
 0xea5   :  { %v6068_v29 = vmul.f32 %v10243_v4, %v12738_v53 }
 0xea6   :  { %v10245_v60 = vpop.eup %10244 }
 0xea7   :  { %v6069_v47 = vmul.f32 %v10245_v60, %v12744_v25  ;;  %v9818_v60 = vld [vmem:[%s14030_s3 + $0x280] ss:$8 sps:$4 sm:$0xff]  }
 0xea9   :  { %v6073_v19 = vpack.c.bf16 %v6069_v47, %v6068_v29  ;;  %v9823_v47 = vld [vmem:[%s14030_s3 + $0x294] ss:$8 sps:$4 sm:$0xff]  }
 0xeab   :  { %9155 = vmatmul.mubr.msk.bf16.gmra.mrb[164].mxu1 %vm751_vm0, %v6073_v19 }
 0xed5   :  { %v12826_v40 = vpop.f32.mrb[136].mxu0 }
 0xed6   :  { %v12828_v39 = vpop.f32.mrb[137].mxu0 }
 0xed7   :  { %v12830_v10 = vpop.f32.mrb[138].mxu0 }
 0xed8   :  { %v5322_v52 = vpack.c.bf16 %v12830_v10, %v12826_v40  ;;  %v12834_v62 = vpop.f32.mrb[139].mxu0  ;;  %v9835_v40 = vld [vmem:[%s14030_s3 + $0x2d4] ss:$8 sps:$4 sm:$0xff]   ;;  %v9833_v10 = vld [vmem:[%s14030_s3 + $0x2d0] ss:$8 sps:$4 sm:$0xff]  }
 0xed9   :  { %v5321_v8 = vpack.c.bf16 %v12834_v62, %v12828_v39  ;;  %v9824_v39 = vld [vmem:[%s14030_s3 + $0x2a0] ss:$8 sps:$4 sm:$0xff]   ;;  %v9829_v62 = vld [vmem:[%s14030_s3 + $0x2b4] ss:$8 sps:$4 sm:$0xff]  }
 0xedd   :  { %v12838_v53 = vpop.f32.mrb[140].mxu0 }
 0xede   :  { %v12840_v25 = vpop.f32.mrb[141].mxu0 }
 0xedf   :  { %v12842_v20 = vpop.f32.mrb[142].mxu0 }
 0xee0   :  { %v5324_v59 = vpack.c.bf16 %v12842_v20, %v12838_v53  ;;  %v12846_v36 = vpop.f32.mrb[143].mxu0 }
 0xee1   :  { %v5323_v35 = vpack.c.bf16 %v12846_v36, %v12840_v25  ;;  %v9841_v25 = vld [vmem:[%s14030_s3 + $0x2f4] ss:$8 sps:$4 sm:$0xff]   ;;  %v9839_v36 = vld [vmem:[%s14030_s3 + $0x2f0] ss:$8 sps:$4 sm:$0xff]  }
 0xef0   :  { %v9120_v34 = vpop.f32.mrb[144].mxu0 }
 0xef1   :  { %v5552_v56 = vpop.f32.mrb[145].mxu0 }
 0xef2   :  { %v9121_v43 = vpop.f32.mrb[146].mxu0 }
 0xef3   :  { %v5584_v15 = vpack.c.bf16 %v9121_v43, %v9120_v34  ;;  %v5555_v2 = vpop.f32.mrb[147].mxu0 }
 0xef4   :  { %v5583_v6 = vpack.c.bf16 %v5555_v2, %v5552_v56  ;;  %v9826_v2 = vld [vmem:[%s14030_s3 + $0x2a4] ss:$8 sps:$4 sm:$0xff]  }
 0xef6   :  { %5700 = vmatmul.mubr.bf16.vlgmr.msra.gmra.mrb[152].mxu0 %v5583_v6  ;;  %v9830_v6 = vld [vmem:[%s14030_s3 + $0x2c0] ss:$8 sps:$4 sm:$0xff]  }
 0xef7   :  { %5821 = vmatpush1.bf16.msra.mxu0 %v9794_v57  ;;  %5709 = vmatprep.mubr.bf16.mxu0 %v14072_v24  ;;  %v9832_v57 = vld [vmem:[%s14030_s3 + $0x2c4] ss:$8 sps:$4 sm:$0xff]  }
 0xef8   :  { %v9124_v30 = vpop.f32.mrb[148].mxu0  ;;  %5822 = vmatprep.subr.bf16.mxu0 %v9799_v14  ;;  %v9836_v14 = vld [vmem:[%s14030_s3 + $0x2e0] ss:$8 sps:$4 sm:$0xff]  }
 0xef9   :  { %v5568_v42 = vpop.f32.mrb[149].mxu0 }
 0xefa   :  { %v9125_v16 = vpop.f32.mrb[150].mxu0 }
 0xefb   :  { %v5586_v28 = vpack.c.bf16 %v9125_v16, %v9124_v30  ;;  %v5571_v45 = vpop.f32.mrb[151].mxu0  ;;  %5823 = vmatpush1.bf16.msra.mxu0 %v9797_v49 }
 0xefc   :  { %v5585_v11 = vpack.c.bf16 %v5571_v45, %v5568_v42  ;;  %5824 = vmatprep.subr.bf16.mxu0 %v9802_v7  ;;  %v12969_v7 = vld [vmem:[%s14032_s5 + $0x10] sm:$0xff]  ;;  %v12974_v42 = vld [vmem:[%s14032_s5 + $0x18] sm:$0xff] }
 0xefd   :  { %v6327_v16 = vrot.slane %v12969_v7, %v10590_v21 }
 0xefe   :  { %5710 = vmatmul.mubr.bf16.gmra.mrb[156].mxu0 %v5584_v15  ;;  %v9821_v15 = vld [vmem:[%s14030_s3 + $0x290] ss:$8 sps:$4 sm:$0xff]  }
 0xeff   :  { %5825 = vmatpush1.bf16.msra.mxu0 %v9800_v9  ;;  %5719 = vmatprep.mubr.bf16.mxu0 %v14072_v24 }
 0xf00   :  { %5826 = vmatprep.subr.bf16.mxu0 %v9805_v41 }
 0xf03   :  { %5827 = vmatpush1.bf16.msra.mxu0 %v9803_v37 }
 0xf04   :  { %5828 = vmatprep.subr.bf16.mxu0 %v9808_v48 }
 0xf06   :  { %5720 = vmatmul.mubr.bf16.gmra.mrb[160].mxu0 %v5585_v11 }
 0xf07   :  { %5829 = vmatpush1.bf16.msra.mxu0 %v9806_v26  ;;  %5729 = vmatprep.mubr.bf16.mxu0 %v14072_v24 }
 0xf08   :  { %5830 = vmatprep.subr.bf16.mxu0 %v9811_v46 }
 0xf0b   :  { %5831 = vmatpush1.bf16.msra.mxu0 %v9809_v33 }
 0xf0c   :  { %5832 = vmatprep.subr.bf16.mxu0 %v9814_v51 }
 0xf0e   :  { %5730 = vmatmul.mubr.bf16.gmra.mrb[164].mxu0 %v5586_v28  ;;  %v12980_v28 = vrot.slane %v12974_v42, %v10590_v21 }
 0xf0f   :  { %5833 = vmatpush1.bf16.msra.mxu0 %v9812_v27  ;;  %5852 = vmatprep.mubr.bf16.mxu0 %v14072_v24 }
 0xf10   :  { %5834 = vmatprep.subr.bf16.mxu0 %v9817_v5 }
 0xf13   :  { %5835 = vmatpush1.bf16.msra.mxu0 %v9815_v61  ;;  %v9152_v4 = vpop.f32.mrb[160].mxu1 }
 0xf14   :  { %v6120_v29 = vpop.f32.mrb[161].mxu1  ;;  %6235 = vmatprep.subr.bf16.mxu0 %v9820_v44 }
 0xf15   :  { %v9153_v19 = vpop.f32.mrb[162].mxu1 }
 0xf16   :  { %v6152_v34 = vpack.c.bf16 %v9153_v19, %v9152_v4  ;;  %5853 = vmatmul.mubr.bf16.vlgmr.msra.gmra.mrb[152].mxu0 %v5321_v8  ;;  %v6123_v56 = vpop.f32.mrb[163].mxu1  ;;  %v9827_v8 = vld [vmem:[%s14030_s3 + $0x2b0] ss:$8 sps:$4 sm:$0xff]  }
 0xf17   :  { %v6151_v43 = vpack.c.bf16 %v6123_v56, %v6120_v29  ;;  %6236 = vmatpush1.bf16.msra.mxu0 %v9818_v60  ;;  %5862 = vmatprep.mubr.bf16.mxu0 %v14072_v24 }
 0xf18   :  { %6237 = vmatprep.subr.bf16.mxu0 %v9823_v47 }
 0xf1b   :  { %6238 = vmatpush1.bf16.msra.mxu0 %v9821_v15 }
 0xf1c   :  { %6239 = vmatprep.subr.bf16.mxu0 %v9826_v2 }
 0xf1e   :  { %5863 = vmatmul.mubr.bf16.gmra.mrb[156].mxu0 %v5322_v52  ;;  %v9838_v52 = vld [vmem:[%s14030_s3 + $0x2e4] ss:$8 sps:$4 sm:$0xff]   ;;  %s10406_s3 = scalar_lea.vmem %s8229_s19, 16 }
 0xf1f   :  { %6240 = vmatpush1.bf16.msra.mxu0 %v9824_v39  ;;  %5872 = vmatprep.mubr.bf16.mxu0 %v14072_v24  ;;  %p10407_p8 = scmp.ne.s32.totalorder %s8229_s19, %s10406_s3  ;;  %p10412_p10 = scmp.lt.s32.totalorder %s10410_s20, %s10406_s3 }
 0xf20   :  { %6241 = vmatprep.subr.bf16.mxu0 %v9829_v62 }
 0xf21   :  { %p10413_p11 = por %p10412_p10, %p10411_p9 }
 0xf23   :  { %6242 = vmatpush1.bf16.msra.mxu0 %v9827_v8  ;;  %p10414_p12 = pnand %p10413_p11, %p10407_p8 }
 0xf24   :  { %6243 = vmatprep.subr.bf16.mxu0 %v9832_v57 }
 0xf26   :  { %5873 = vmatmul.mubr.bf16.gmra.mrb[160].mxu0 %v5323_v35 }
 0xf27   :  { %6244 = vmatpush1.bf16.msra.mxu0 %v9830_v6  ;;  %5882 = vmatprep.mubr.bf16.mxu0 %v14072_v24 }
 0xf28   :  { %6245 = vmatprep.subr.bf16.mxu0 %v9835_v40 }
 0xf2b   :  { %6246 = vmatpush1.bf16.msra.mxu0 %v9833_v10 }
 0xf2c   :  { %6247 = vmatprep.subr.bf16.mxu0 %v9838_v52 }
 0xf2e   :  { %5883 = vmatmul.mubr.bf16.gmra.mrb[164].mxu0 %v5324_v59 }
 0xf2f   :  { %6248 = vmatpush1.bf16.msra.mxu0 %v9836_v14  ;;  %6267 = vmatprep.mubr.bf16.mxu0 %v14072_v24 }
 0xf30   :  { %6249 = vmatprep.subr.bf16.mxu0 %v9841_v25 }
 0xf33   :  { %6250 = vmatpush1.bf16.msra.mxu0 %v9839_v36 }
 0xf36   :  { %6268 = vmatmul.mubr.bf16.vlgmr.msra.gmra.mrb[152].mxu0 %v6151_v43 }
 0xf37   :  { %6277 = vmatprep.mubr.bf16.mxu0 %v14072_v24 }
 0xf3e   :  { %6278 = vmatmul.mubr.bf16.gmra.mrb[156].mxu0 %v6152_v34 }
 0xf3f   :  { %6287 = vmatprep.mubr.bf16.mxu0 %v14072_v24 }
 0xf7e   :  { %v9156_v35 = vpop.f32.mrb[164].mxu1 }
 0xf7f   :  { %v6136_v49 = vpop.f32.mrb[165].mxu1 }
 0xf80   :  { %v9157_v30 = vpop.f32.mrb[166].mxu1 }
 0xf81   :  { %v6154_v53 = vpack.c.bf16 %v9157_v30, %v9156_v35  ;;  %v6139_v20 = vpop.f32.mrb[167].mxu1 }
 0xf82   :  { %v6153_v59 = vpack.c.bf16 %v6139_v20, %v6136_v49 }
 0xf84   :  { %6288 = vmatmul.mubr.bf16.gmra.mrb[160].mxu0 %v6153_v59 }
 0xf85   :  { %6297 = vmatprep.mubr.bf16.mxu0 %v14072_v24 }
 0xf8c   :  { %6298 = vmatmul.mubr.bf16.gmra.mrb[164].mxu0 %v6154_v53 }
0x1009   :  { %v6269_v45 = vpop.f32.mrb[152].mxu0 }
0x100a   :  { %v6332_v24 = vadd.f32 %v6327_v16, %v6269_v45  ;;  %v6271_v9 = vpop.f32.mrb[153].mxu0 }
0x100b   :  { %v6333_v11 = vadd.f32 %v12980_v28, %v6271_v9  ;;  %v6273_v41 = vpop.f32.mrb[154].mxu0 }
0x100c   :  { %v6334_v37 = vadd.f32 %v6327_v16, %v6273_v41  ;;  %v6275_v48 = vpop.f32.mrb[155].mxu0  ;;  %v12988_v33 = vadd.f32 %v6332_v24, %v12125_v13 }
0x100d   :  { %v12984_v26 = vadd.f32 %v6333_v11, %v12119_v55  ;;  %v6335_v46 = vadd.f32 %v12980_v28, %v6275_v48 }
0x100e   :  { %v12996_v5 = vadd.f32 %v6334_v37, %v12128_v1 }
0x100f   :  { %v6364_v51 = vsel %vm751_vm0, %v12984_v26, 0.0  ;;  %v12993_v27 = vadd.f32 %v6335_v46, %v12122_v0  ;;  %v9845_v46 = vld [vmem:[%s14028_s1 + $0x250] ss:$8 sps:$4 sm:$0xff]  }
0x1010   :  { %v6365_v61 = vadd.f32 %v6364_v51, %v12988_v33  ;;  %v9850_v51 = vld [vmem:[%s14028_s1 + $0x264] ss:$8 sps:$4 sm:$0xff]  }
0x1011   :  { %v6368_v55 = vsel %vm751_vm0, %v12993_v27, 0.0  ;;  %v6279_v44 = vpop.f32.mrb[156].mxu0 }
0x1012   :  { %v6336_v4 = vadd.f32 %v6327_v16, %v6279_v44  ;;  %6366 = vadd.xlane.f32.xlu0 %v6365_v61  ;;  %v6281_v60 = vpop.f32.mrb[157].mxu0  ;;  %v6369_v13 = vadd.f32 %v6368_v55, %v12996_v5  ;;  %v9848_v61 = vld [vmem:[%s14028_s1 + $0x260] ss:$8 sps:$4 sm:$0xff]   ;;  %v9853_v55 = vld [vmem:[%s14028_s1 + $0x274] ss:$8 sps:$4 sm:$0xff]  }
0x1013   :  { %v6337_v29 = vadd.f32 %v12980_v28, %v6281_v60  ;;  %v6283_v47 = vpop.f32.mrb[158].mxu0  ;;  %v9851_v44 = vld [vmem:[%s14028_s1 + $0x270] ss:$8 sps:$4 sm:$0xff]   ;;  %v9854_v60 = vld [vmem:[%s14028_s1 + $0x280] ss:$8 sps:$4 sm:$0xff]  }
0x1014   :  { %v6338_v19 = vadd.f32 %v6327_v16, %v6283_v47  ;;  %6370 = vadd.xlane.f32.xlu1 %v6369_v13  ;;  %v6285_v0 = vpop.f32.mrb[159].mxu0  ;;  %v13008_v56 = vadd.f32 %v6336_v4, %v12159_v17  ;;  %v9856_v4 = vld [vmem:[%s14028_s1 + $0x284] ss:$8 sps:$4 sm:$0xff]   ;;  %v9859_v13 = vld [vmem:[%s14028_s1 + $0x294] ss:$8 sps:$4 sm:$0xff]  }
0x1015   :  { %v13004_v1 = vadd.f32 %v6337_v29, %v12153_v58  ;;  %v6339_v34 = vadd.f32 %v12980_v28, %v6285_v0  ;;  %v9857_v29 = vld [vmem:[%s14028_s1 + $0x290] ss:$8 sps:$4 sm:$0xff]  }
0x1016   :  { %v13016_v2 = vadd.f32 %v6338_v19, %v12162_v12 }
0x1017   :  { %v6372_v43 = vsel %vm751_vm0, %v13004_v1, 0.0  ;;  %v13013_v15 = vadd.f32 %v6339_v34, %v12156_v31 }
0x1018   :  { %v6373_v39 = vadd.f32 %v6372_v43, %v13008_v56 }
0x1019   :  { %v6376_v58 = vsel %vm751_vm0, %v13013_v15, 0.0 }
0x101a   :  { %6374 = vadd.xlane.f32.xlu0 %v6373_v39  ;;  %v6377_v62 = vadd.f32 %v6376_v58, %v13016_v2 }
0x101c   :  { %6378 = vadd.xlane.f32.xlu1 %v6377_v62 }
0x1057   :  { %v6289_v17 = vpop.f32.mrb[160].mxu0 }
0x1058   :  { %v6340_v8 = vadd.f32 %v6327_v16, %v6289_v17  ;;  %v6291_v57 = vpop.f32.mrb[161].mxu0 }
0x1059   :  { %v6341_v6 = vadd.f32 %v12980_v28, %v6291_v57  ;;  %v6293_v40 = vpop.f32.mrb[162].mxu0 }
0x105a   :  { %v6342_v31 = vadd.f32 %v6327_v16, %v6293_v40  ;;  %v6295_v10 = vpop.f32.mrb[163].mxu0  ;;  %v13028_v14 = vadd.f32 %v6340_v8, %v12194_v63 }
0x105b   :  { %v13024_v12 = vadd.f32 %v6341_v6, %v12188_v50  ;;  %v6343_v52 = vadd.f32 %v12980_v28, %v6295_v10 }
0x105c   :  { %v13036_v35 = vadd.f32 %v6342_v31, %v12197_v32 }
0x105d   :  { %v6380_v25 = vsel %vm751_vm0, %v13024_v12, 0.0  ;;  %v13033_v36 = vadd.f32 %v6343_v52, %v12191_v23 }
0x105e   :  { %v6381_v49 = vadd.f32 %v6380_v25, %v13028_v14 }
0x105f   :  { %v6384_v50 = vsel %vm751_vm0, %v13033_v36, 0.0  ;;  %v6299_v30 = vpop.f32.mrb[164].mxu0 }
0x1060   :  { %v6344_v53 = vadd.f32 %v6327_v16, %v6299_v30  ;;  %6382 = vadd.xlane.f32.xlu0 %v6381_v49  ;;  %v6301_v20 = vpop.f32.mrb[165].mxu0  ;;  %v6385_v63 = vadd.f32 %v6384_v50, %v13036_v35 }
0x1061   :  { %v6345_v59 = vadd.f32 %v12980_v28, %v6301_v20  ;;  %v6303_v45 = vpop.f32.mrb[166].mxu0 }
0x1062   :  { %v6346_v24 = vadd.f32 %v6327_v16, %v6303_v45  ;;  %6386 = vadd.xlane.f32.xlu1 %v6385_v63  ;;  %v6305_v23 = vpop.f32.mrb[167].mxu0  ;;  %v13048_v11 = vadd.f32 %v6344_v53, %v12228_v18  ;;  %v9842_v18 = vld [vmem:[%s14028_s1 + $0x240] ss:$8 sps:$4 sm:$0xff]  }
0x1063   :  { %v13044_v32 = vadd.f32 %v6345_v59, %v12222_v54  ;;  %v6347_v9 = vadd.f32 %v12980_v28, %v6305_v23  ;;  %v9865_v23 = vld [vmem:[%s14028_s1 + $0x2b4] ss:$8 sps:$4 sm:$0xff]  }
0x1064   :  { %v13056_v48 = vadd.f32 %v6346_v24, %v12231_v3  ;;  %v9847_v3 = vld [vmem:[%s14028_s1 + $0x254] ss:$8 sps:$4 sm:$0xff]  }
0x1065   :  { %v6388_v41 = vsel %vm751_vm0, %v13044_v32, 0.0  ;;  %v13053_v37 = vadd.f32 %v6347_v9, %v12225_v22  ;;  %v9844_v22 = vld [vmem:[%s14028_s1 + $0x244] ss:$8 sps:$4 sm:$0xff]   ;;  %v9863_v9 = vld [vmem:[%s14028_s1 + $0x2b0] ss:$8 sps:$4 sm:$0xff]  }
0x1066   :  { %v6389_v16 = vadd.f32 %v6388_v41, %v13048_v11  ;;  %6704 = vmatprep.subr.bf16.mxu1 %v9844_v22  ;;  %v9868_v41 = vld [vmem:[%s14028_s1 + $0x2c4] ss:$8 sps:$4 sm:$0xff]   ;;  %v9872_v22 = vld [vmem:[%s14028_s1 + $0x2e0] ss:$8 sps:$4 sm:$0xff]  }
0x1067   :  { %v6392_v54 = vsel %vm751_vm0, %v13053_v37, 0.0  ;;  %6705 = vmatpush1.bf16.msra.mxu1 %v9842_v18  ;;  %v9874_v18 = vld [vmem:[%s14028_s1 + $0x2e4] ss:$8 sps:$4 sm:$0xff]  }
0x1068   :  { %6390 = vadd.xlane.f32.xlu0 %v6389_v16  ;;  %v6393_v28 = vadd.f32 %v6392_v54, %v13056_v48  ;;  %6706 = vmatprep.subr.bf16.mxu1 %v9847_v3  ;;  %v9866_v16 = vld [vmem:[%s14028_s1 + $0x2c0] ss:$8 sps:$4 sm:$0xff]   ;;  %v9871_v54 = vld [vmem:[%s14028_s1 + $0x2d4] ss:$8 sps:$4 sm:$0xff]  }
0x1069   :  { %v9877_v3 = vld [vmem:[%s14028_s1 + $0x2f4] ss:$8 sps:$4 sm:$0xff]  }
0x106a   :  { %6394 = vadd.xlane.f32.xlu1 %v6393_v28  ;;  %v9869_v28 = vld [vmem:[%s14028_s1 + $0x2d0] ss:$8 sps:$4 sm:$0xff]  }
0x106b   :  { %6707 = vmatpush1.bf16.msra.mxu1 %v9845_v46  ;;  %v9875_v46 = vld [vmem:[%s14028_s1 + $0x2f0] ss:$8 sps:$4 sm:$0xff]  }
0x106c   :  { %6708 = vmatprep.subr.bf16.mxu1 %v9850_v51 }
0x106f   :  { %6709 = vmatpush1.bf16.msra.mxu1 %v9848_v61 }
0x1070   :  { %6710 = vmatprep.subr.bf16.mxu1 %v9853_v55 }
0x1073   :  { %6711 = vmatpush1.bf16.msra.mxu1 %v9851_v44 }
0x1074   :  { %6712 = vmatprep.subr.bf16.mxu1 %v9856_v4 }
0x1077   :  { %6713 = vmatpush1.bf16.msra.mxu1 %v9854_v60 }
0x1078   :  { %6714 = vmatprep.subr.bf16.mxu1 %v9859_v13 }
0x107b   :  { %6715 = vmatpush1.bf16.msra.mxu1 %v9857_v29 }
0x109f   :  { %v6367_v47 = vpop.xlane.xlu0 %6366 }
0x10a0   :  { %v6396_v19 = vmul.f32 0.0052083335, %v6367_v47 }
0x10a1   :  { %v6371_v0 = vpop.xlane.xlu1 %6370 }
0x10a2   :  { %v13099_v34 = vsub.f32 %v12988_v33, %v6396_v19  ;;  %v13102_v43 = vsub.f32 %v12984_v26, %v6396_v19  ;;  %v6397_v39 = vmul.f32 0.0052083335, %v6371_v0 }
0x10a4   :  { %v6420_v58 = vmul.f32 %v13099_v34, %v13099_v34  ;;  %v6421_v62 = vmul.f32 %v13102_v43, %v13102_v43  ;;  %v13109_v17 = vsub.f32 %v12996_v5, %v6397_v39  ;;  %v13112_v8 = vsub.f32 %v12993_v27, %v6397_v39 }
0x10a6   :  { %v6422_v33 = vmul.f32 %v13109_v17, %v13109_v17  ;;  %v6423_v26 = vmul.f32 %v13112_v8, %v13112_v8  ;;  %v6436_v57 = vsel %vm751_vm0, %v6421_v62, 0.0 }
0x10a7   :  { %v6375_v6 = vpop.xlane.xlu0 %6374  ;;  %v6437_v40 = vadd.f32 %v6436_v57, %v6420_v58 }
0x10a8   :  { %v6398_v31 = vmul.f32 0.0052083335, %v6375_v6  ;;  %v6440_v10 = vsel %vm751_vm0, %v6423_v26, 0.0 }
0x10a9   :  { %v6379_v52 = vpop.xlane.xlu1 %6378  ;;  %6438 = vadd.xlane.f32.xlu0 %v6437_v40  ;;  %v6441_v5 = vadd.f32 %v6440_v10, %v6422_v33 }
0x10aa   :  { %v13121_v25 = vsub.f32 %v13008_v56, %v6398_v31  ;;  %v13124_v27 = vsub.f32 %v13004_v1, %v6398_v31  ;;  %v6399_v49 = vmul.f32 0.0052083335, %v6379_v52 }
0x10ab   :  { %6442 = vadd.xlane.f32.xlu1 %v6441_v5 }
0x10ac   :  { %v6424_v50 = vmul.f32 %v13121_v25, %v13121_v25  ;;  %v6425_v30 = vmul.f32 %v13124_v27, %v13124_v27  ;;  %v13131_v53 = vsub.f32 %v13016_v2, %v6399_v49  ;;  %v13134_v20 = vsub.f32 %v13013_v15, %v6399_v49  ;;  %v9862_v2 = vld [vmem:[%s14028_s1 + $0x2a4] ss:$8 sps:$4 sm:$0xff]   ;;  %v9860_v15 = vld [vmem:[%s14028_s1 + $0x2a0] ss:$8 sps:$4 sm:$0xff]  }
0x10ad   :  { %6716 = vmatprep.subr.bf16.mxu1 %v9862_v2  ;;  %v9892_v2 = vld [vmem:[%s14028_s1 + $0x344] ss:$8 sps:$4 sm:$0xff]  }
0x10ae   :  { %v6426_v56 = vmul.f32 %v13131_v53, %v13131_v53  ;;  %v6427_v1 = vmul.f32 %v13134_v20, %v13134_v20  ;;  %v6444_v63 = vsel %vm751_vm0, %v6425_v30, 0.0  ;;  %6717 = vmatpush1.bf16.msra.mxu1 %v9860_v15 }
0x10af   :  { %v6445_v59 = vadd.f32 %v6444_v63, %v6424_v50  ;;  %6718 = vmatprep.subr.bf16.mxu1 %v9865_v23  ;;  %v9886_v63 = vld [vmem:[%s14028_s1 + $0x324] ss:$8 sps:$4 sm:$0xff]   ;;  %v9890_v23 = vld [vmem:[%s14028_s1 + $0x340] ss:$8 sps:$4 sm:$0xff]  }
0x10b0   :  { %v6448_v45 = vsel %vm751_vm0, %v6427_v1, 0.0  ;;  %v9881_v1 = vld [vmem:[%s14028_s1 + $0x310] ss:$8 sps:$4 sm:$0xff]  }
0x10b1   :  { %6446 = vadd.xlane.f32.xlu0 %v6445_v59  ;;  %v6449_v24 = vadd.f32 %v6448_v45, %v6426_v56  ;;  %v9883_v56 = vld [vmem:[%s14028_s1 + $0x314] ss:$8 sps:$4 sm:$0xff]   ;;  %v9884_v59 = vld [vmem:[%s14028_s1 + $0x320] ss:$8 sps:$4 sm:$0xff]  }
0x10b2   :  { %6719 = vmatpush1.bf16.msra.mxu1 %v9863_v9  ;;  %v9889_v45 = vld [vmem:[%s14028_s1 + $0x334] ss:$8 sps:$4 sm:$0xff]  }
0x10b3   :  { %6450 = vadd.xlane.f32.xlu1 %v6449_v24  ;;  %6720 = vmatprep.subr.bf16.mxu1 %v9868_v41  ;;  %v9887_v24 = vld [vmem:[%s14028_s1 + $0x330] ss:$8 sps:$4 sm:$0xff]   ;;  %v9895_v41 = vld [vmem:[%s14028_s1 + $0x354] ss:$8 sps:$4 sm:$0xff]  }
0x10b6   :  { %6721 = vmatpush1.bf16.msra.mxu1 %v9866_v16 }
0x10b7   :  { %6722 = vmatprep.subr.bf16.mxu1 %v9871_v54 }
0x10ba   :  { %6723 = vmatpush1.bf16.msra.mxu1 %v9869_v28 }
0x10bb   :  { %6724 = vmatprep.subr.bf16.mxu1 %v9874_v18  ;;  %v9893_v18 = vld [vmem:[%s14028_s1 + $0x350] ss:$8 sps:$4 sm:$0xff]  }
0x10be   :  { %6725 = vmatpush1.bf16.msra.mxu1 %v9872_v22 }
0x10bf   :  { %6726 = vmatprep.subr.bf16.mxu1 %v9877_v3  ;;  %v9898_v3 = vld [vmem:[%s14028_s1 + $0x364] ss:$8 sps:$4 sm:$0xff]  }
0x10c2   :  { %6727 = vmatpush1.bf16.msra.mxu1 %v9875_v46 }
0x10ed   :  { %v6383_v51 = vpop.xlane.xlu0 %6382 }
0x10ee   :  { %v6400_v61 = vmul.f32 0.0052083335, %v6383_v51  ;;  %v9896_v51 = vld [vmem:[%s14028_s1 + $0x360] ss:$8 sps:$4 sm:$0xff]  }
0x10ef   :  { %v6387_v55 = vpop.xlane.xlu1 %6386 }
0x10f0   :  { %v13179_v44 = vsub.f32 %v13028_v14, %v6400_v61  ;;  %v13182_v4 = vsub.f32 %v13024_v12, %v6400_v61  ;;  %v6401_v60 = vmul.f32 0.0052083335, %v6387_v55  ;;  %v9901_v55 = vld [vmem:[%s14028_s1 + $0x374] ss:$8 sps:$4 sm:$0xff]  }
0x10f2   :  { %v6428_v13 = vmul.f32 %v13179_v44, %v13179_v44  ;;  %v6429_v29 = vmul.f32 %v13182_v4, %v13182_v4  ;;  %v13189_v47 = vsub.f32 %v13036_v35, %v6401_v60  ;;  %v13192_v19 = vsub.f32 %v13033_v36, %v6401_v60 }
0x10f4   :  { %v6430_v14 = vmul.f32 %v13189_v47, %v13189_v47  ;;  %v6431_v12 = vmul.f32 %v13192_v19, %v13192_v19  ;;  %v6452_v0 = vsel %vm751_vm0, %v6429_v29, 0.0 }
0x10f5   :  { %v6391_v39 = vpop.xlane.xlu0 %6390  ;;  %v6453_v58 = vadd.f32 %v6452_v0, %v6428_v13  ;;  %v9904_v0 = vld [vmem:[%s14028_s1 + $0x384] ss:$8 sps:$4 sm:$0xff]  }
0x10f6   :  { %v6402_v62 = vmul.f32 0.0052083335, %v6391_v39  ;;  %v6456_v33 = vsel %vm751_vm0, %v6431_v12, 0.0  ;;  %v14104_v39 = vld [vmem:[#allocation8_spill] sm:$0xff] }
0x10f7   :  { %6454 = vadd.xlane.f32.xlu0 %v6453_v58  ;;  %v6395_v26 = vpop.xlane.xlu1 %6394  ;;  %v6457_v35 = vadd.f32 %v6456_v33, %v6430_v14  ;;  %v9899_v14 = vld [vmem:[%s14028_s1 + $0x370] ss:$8 sps:$4 sm:$0xff]   ;;  %v13275_v58 = vrot.slane %v12969_v7, %v14104_v39 }
0x10f8   :  { %v13201_v57 = vsub.f32 %v13048_v11, %v6402_v62  ;;  %v13204_v36 = vsub.f32 %v13044_v32, %v6402_v62  ;;  %v6403_v6 = vmul.f32 0.0052083335, %v6395_v26  ;;  %v13279_v62 = vrot.slane %v12974_v42, %v14104_v39 }
0x10f9   :  { %6458 = vadd.xlane.f32.xlu1 %v6457_v35 }
0x10fa   :  { %v6432_v40 = vmul.f32 %v13201_v57, %v13201_v57  ;;  %v6433_v31 = vmul.f32 %v13204_v36, %v13204_v36  ;;  %v13211_v10 = vsub.f32 %v13056_v48, %v6403_v6  ;;  %v13214_v52 = vsub.f32 %v13053_v37, %v6403_v6  ;;  %v9878_v48 = vld [vmem:[%s14028_s1 + $0x300] ss:$8 sps:$4 sm:$0xff]   ;;  %v9880_v37 = vld [vmem:[%s14028_s1 + $0x304] ss:$8 sps:$4 sm:$0xff]  }
0x10fb   :  { %6941 = vmatprep.subr.bf16.mxu0 %v9880_v37  ;;  %v9902_v6 = vld [vmem:[%s14028_s1 + $0x380] ss:$8 sps:$4 sm:$0xff]  }
0x10fc   :  { %v6434_v11 = vmul.f32 %v13211_v10, %v13211_v10  ;;  %v6435_v32 = vmul.f32 %v13214_v52, %v13214_v52  ;;  %v6460_v5 = vsel %vm751_vm0, %v6433_v31, 0.0  ;;  %6942 = vmatpush1.bf16.msra.mxu0 %v9878_v48  ;;  %v13288_v31 = vrot.slane %v12974_v42, %v10789_v38 }
0x10fd   :  { %v6461_v49 = vadd.f32 %v6460_v5, %v6432_v40  ;;  %6943 = vmatprep.subr.bf16.mxu0 %v9883_v56 }
0x10fe   :  { %v6464_v50 = vsel %vm751_vm0, %v6435_v32, 0.0 }
0x10ff   :  { %6462 = vadd.xlane.f32.xlu0 %v6461_v49  ;;  %v6465_v30 = vadd.f32 %v6464_v50, %v6434_v11  ;;  %v13292_v11 = vrot.slane %v12969_v7, %v10789_v38  ;;  %v9905_v38 = vld [vmem:[%s14028_s1 + $0x390] ss:$8 sps:$4 sm:$0xff]  }
0x1100   :  { %6944 = vmatpush1.bf16.msra.mxu0 %v9881_v1 }
0x1101   :  { %6466 = vadd.xlane.f32.xlu1 %v6465_v30  ;;  %6945 = vmatprep.subr.bf16.mxu0 %v9886_v63 }
0x1104   :  { %6946 = vmatpush1.bf16.msra.mxu0 %v9884_v59 }
0x1105   :  { %6947 = vmatprep.subr.bf16.mxu0 %v9889_v45 }
0x1108   :  { %6948 = vmatpush1.bf16.msra.mxu0 %v9887_v24 }
0x1109   :  { %6949 = vmatprep.subr.bf16.mxu0 %v9892_v2 }
0x110c   :  { %6950 = vmatpush1.bf16.msra.mxu0 %v9890_v23 }
0x110d   :  { %6951 = vmatprep.subr.bf16.mxu0 %v9895_v41 }
0x1110   :  { %6952 = vmatpush1.bf16.msra.mxu0 %v9893_v18 }
0x1111   :  { %6953 = vmatprep.subr.bf16.mxu0 %v9898_v3 }
0x1114   :  { %6954 = vmatpush1.bf16.msra.mxu0 %v9896_v51 }
0x1115   :  { %6955 = vmatprep.subr.bf16.mxu0 %v9901_v55 }
0x1118   :  { %6956 = vmatpush1.bf16.msra.mxu0 %v9899_v14 }
0x1119   :  { %6957 = vmatprep.subr.bf16.mxu0 %v9904_v0 }
0x111c   :  { %6958 = vmatpush1.bf16.msra.mxu0 %v9902_v6 }
0x1136   :  { %v6439_v15 = vpop.xlane.xlu0 %6438 }
0x1137   :  { %v6468_v9 = vmul.f32 0.0052083335, %v6439_v15 }
0x1138   :  { %v6443_v16 = vpop.xlane.xlu1 %6442 }
0x1139   :  { %v6476_v54 = vadd.f32 1e-05, %v6468_v9  ;;  %v6469_v28 = vmul.f32 0.0052083335, %v6443_v16 }
0x113b   :  { %10246 = vrsqrt.f32 %v6476_v54  ;;  %v6477_v22 = vadd.f32 1e-05, %v6469_v28 }
0x113d   :  { %10248 = vrsqrt.f32 %v6477_v22 }
0x113e   :  { %v6447_v46 = vpop.xlane.xlu0 %6446 }
0x113f   :  { %v6470_v61 = vmul.f32 0.0052083335, %v6447_v46 }
0x1140   :  { %v6451_v60 = vpop.xlane.xlu1 %6450 }
0x1141   :  { %v6478_v13 = vadd.f32 1e-05, %v6470_v61  ;;  %v6471_v29 = vmul.f32 0.0052083335, %v6451_v60 }
0x1143   :  { %10250 = vrsqrt.f32 %v6478_v13  ;;  %v6479_v12 = vadd.f32 1e-05, %v6471_v29 }
0x1145   :  { %v10247_v33 = vpop.eup %10246  ;;  %10252 = vrsqrt.f32 %v6479_v12 }
0x1146   :  { %v6492_v26 = vmul.f32 %v10247_v33, %v13099_v34  ;;  %v6493_v35 = vmul.f32 %v10247_v33, %v13102_v43  ;;  %v9907_v34 = vld [vmem:[%s14028_s1 + $0x394] ss:$8 sps:$4 sm:$0xff]  }
0x1147   :  { %v10249_v40 = vpop.eup %10248  ;;  %6959 = vmatprep.subr.bf16.mxu0 %v9907_v34 }
0x1148   :  { %v6516_v43 = vmul.f32 %v13275_v58, %v6492_v26  ;;  %v6494_v32 = vmul.f32 %v10249_v40, %v13109_v17  ;;  %v6495_v5 = vmul.f32 %v10249_v40, %v13112_v8  ;;  %v6517_v49 = vmul.f32 %v13279_v62, %v6493_v35  ;;  %6960 = vmatpush1.bf16.msra.mxu0 %v9905_v38 }
0x114a   :  { %v6518_v50 = vmul.f32 %v13275_v58, %v6494_v32  ;;  %v6519_v30 = vmul.f32 %v13279_v62, %v6495_v5  ;;  %v13307_v48 = vadd.f32 %v13288_v31, %v6517_v49  ;;  %v13313_v17 = vadd.f32 %v13292_v11, %v6516_v43 }
0x114c   :  { %v13310_v37 = vadd.f32 %v13288_v31, %v6519_v30  ;;  %v13316_v8 = vadd.f32 %v13292_v11, %v6518_v50 }
0x114d   :  { %v10251_v56 = vpop.eup %10250 }
0x114e   :  { %v6497_v1 = vmul.f32 %v10251_v56, %v13124_v27  ;;  %v6557_v63 = vpack.c.bf16 %v13310_v37, %v13307_v48  ;;  %v6556_v59 = vpack.c.bf16 %v13316_v8, %v13313_v17  ;;  %v6496_v45 = vmul.f32 %v10251_v56, %v13121_v25 }
0x114f   :  { %v10253_v24 = vpop.eup %10252 }
0x1150   :  { %v6499_v2 = vmul.f32 %v10253_v24, %v13134_v20  ;;  %8729 = vmatprep.mubr.msk.bf16.mxu1 %vm751_vm0, %v6557_v63  ;;  %v6521_v15 = vmul.f32 %v13279_v62, %v6497_v1  ;;  %v6498_v23 = vmul.f32 %v10253_v24, %v13131_v53  ;;  %v6520_v27 = vmul.f32 %v13275_v58, %v6496_v45 }
0x1151   :  { %6737 = vmatmul.mubr.bf16.vlgmr.msra.gmra.mrb[168].mxu1 %v6556_v59 }
0x1152   :  { %v6523_v9 = vmul.f32 %v13279_v62, %v6499_v2  ;;  %v6522_v41 = vmul.f32 %v13275_v58, %v6498_v23  ;;  %v13332_v16 = vadd.f32 %v13288_v31, %v6521_v15  ;;  %v13338_v20 = vadd.f32 %v13292_v11, %v6520_v27  ;;  %v9911_v23 = vld [vmem:[%s14028_s1 + $0x3b0] ss:$8 sps:$4 sm:$0xff]  }
0x1153   :  { %v14105_v27 = vld [vmem:[#allocation9_spill] sm:$0xff] }
0x1154   :  { %v13335_v25 = vadd.f32 %v13288_v31, %v6523_v9  ;;  %v13341_v54 = vadd.f32 %v13292_v11, %v6522_v41  ;;  %v6567_v9 = vrot.slane %v12969_v7, %v14105_v27  ;;  %v6571_v41 = vrot.slane %v12974_v42, %v14105_v27 }
0x1156   :  { %v6559_v53 = vpack.c.bf16 %v13335_v25, %v13332_v16  ;;  %v6558_v28 = vpack.c.bf16 %v13341_v54, %v13338_v20 }
0x1158   :  { %8730 = vmatprep.mubr.msk.bf16.mxu1 %vm751_vm0, %v6559_v53 }
0x1159   :  { %6747 = vmatmul.mubr.bf16.gmra.mrb[172].mxu1 %v6558_v28 }
0x1184   :  { %v6455_v18 = vpop.xlane.xlu0 %6454 }
0x1185   :  { %v6472_v22 = vmul.f32 0.0052083335, %v6455_v18 }
0x1186   :  { %v6459_v3 = vpop.xlane.xlu1 %6458 }
0x1187   :  { %v6480_v46 = vadd.f32 1e-05, %v6472_v22  ;;  %v6473_v51 = vmul.f32 0.0052083335, %v6459_v3 }
0x1189   :  { %10254 = vrsqrt.f32 %v6480_v46  ;;  %v6481_v61 = vadd.f32 1e-05, %v6473_v51 }
0x118b   :  { %10256 = vrsqrt.f32 %v6481_v61 }
0x118c   :  { %v6463_v55 = vpop.xlane.xlu0 %6462 }
0x118d   :  { %v6474_v60 = vmul.f32 0.0052083335, %v6463_v55 }
0x118e   :  { %v6467_v13 = vpop.xlane.xlu1 %6466 }
0x118f   :  { %v6482_v29 = vadd.f32 1e-05, %v6474_v60  ;;  %v6475_v14 = vmul.f32 0.0052083335, %v6467_v13 }
0x1191   :  { %10258 = vrsqrt.f32 %v6482_v29  ;;  %v6483_v12 = vadd.f32 1e-05, %v6475_v14 }
0x1193   :  { %v10255_v0 = vpop.eup %10254  ;;  %10260 = vrsqrt.f32 %v6483_v12 }
0x1194   :  { %v6501_v39 = vmul.f32 %v10255_v0, %v13182_v4  ;;  %v6500_v33 = vmul.f32 %v10255_v0, %v13179_v44 }
0x1195   :  { %v10257_v26 = vpop.eup %10256 }
0x1196   :  { %v6503_v35 = vmul.f32 %v10257_v26, %v13192_v19  ;;  %v6525_v6 = vmul.f32 %v13279_v62, %v6501_v39  ;;  %v6502_v40 = vmul.f32 %v10257_v26, %v13189_v47  ;;  %v6524_v34 = vmul.f32 %v13275_v58, %v6500_v33 }
0x1198   :  { %v6527_v43 = vmul.f32 %v13279_v62, %v6503_v35  ;;  %v6526_v32 = vmul.f32 %v13275_v58, %v6502_v40  ;;  %v13357_v5 = vadd.f32 %v13288_v31, %v6525_v6  ;;  %v13363_v44 = vadd.f32 %v13292_v11, %v6524_v34 }
0x119a   :  { %v13360_v4 = vadd.f32 %v13288_v31, %v6527_v43  ;;  %v13366_v19 = vadd.f32 %v13292_v11, %v6526_v32 }
0x119b   :  { %v10259_v49 = vpop.eup %10258 }
0x119c   :  { %v6505_v47 = vmul.f32 %v10259_v49, %v13204_v36  ;;  %v6561_v50 = vpack.c.bf16 %v13360_v4, %v13357_v5  ;;  %v6560_v30 = vpack.c.bf16 %v13366_v19, %v13363_v44  ;;  %v6504_v38 = vmul.f32 %v10259_v49, %v13201_v57 }
0x119d   :  { %v10261_v56 = vpop.eup %10260 }
0x119e   :  { %v6507_v1 = vmul.f32 %v10261_v56, %v13214_v52  ;;  %8731 = vmatprep.mubr.msk.bf16.mxu1 %vm751_vm0, %v6561_v50  ;;  %v6529_v63 = vmul.f32 %v13279_v62, %v6505_v47  ;;  %v6506_v59 = vmul.f32 %v10261_v56, %v13211_v10  ;;  %v6528_v45 = vmul.f32 %v13275_v58, %v6504_v38 }
0x119f   :  { %6757 = vmatmul.mubr.bf16.gmra.mrb[176].mxu1 %v6560_v30 }
0x11a0   :  { %v6531_v36 = vmul.f32 %v13279_v62, %v6507_v1  ;;  %v6530_v24 = vmul.f32 %v13275_v58, %v6506_v59  ;;  %v13382_v2 = vadd.f32 %v13288_v31, %v6529_v63  ;;  %v13388_v52 = vadd.f32 %v13292_v11, %v6528_v45  ;;  %v9910_v58 = vld [vmem:[%s14028_s1 + $0x3a4] ss:$8 sps:$4 sm:$0xff]  }
0x11a1   :  { %6961 = vmatprep.subr.bf16.mxu0 %v9910_v58 }
0x11a2   :  { %v13385_v57 = vadd.f32 %v13288_v31, %v6531_v36  ;;  %v13391_v15 = vadd.f32 %v13292_v11, %v6530_v24  ;;  %v9908_v31 = vld [vmem:[%s14028_s1 + $0x3a0] ss:$8 sps:$4 sm:$0xff]   ;;  %v9913_v11 = vld [vmem:[%s14028_s1 + $0x3b4] ss:$8 sps:$4 sm:$0xff]  }
0x11a3   :  { %6962 = vmatpush1.bf16.msra.mxu0 %v9908_v31 }
0x11a4   :  { %v6563_v10 = vpack.c.bf16 %v13385_v57, %v13382_v2  ;;  %v6562_v62 = vpack.c.bf16 %v13391_v15, %v13388_v52  ;;  %6963 = vmatprep.subr.bf16.mxu0 %v9913_v11 }
0x11a6   :  { %8732 = vmatprep.mubr.msk.bf16.mxu1 %vm751_vm0, %v6563_v10 }
0x11a7   :  { %6767 = vmatmul.mubr.bf16.gmra.mrb[180].mxu1 %v6562_v62  ;;  %6964 = vmatpush1.bf16.msra.mxu0 %v9911_v23 }
0x1224   :  { %v6738_v53 = vpop.f32.mrb[168].mxu1 }
0x1225   :  { %v6739_v28 = vadd.f32 %v6738_v53, %v6567_v9  ;;  %v6740_v18 = vpop.f32.mrb[169].mxu1 }
0x1226   :  { %v6741_v22 = vadd.f32 %v6740_v18, %v6571_v41  ;;  %v6742_v3 = vpop.f32.mrb[170].mxu1 }
0x1227   :  { %v6743_v46 = vadd.f32 %v6742_v3, %v6567_v9  ;;  %v6744_v51 = vpop.f32.mrb[171].mxu1  ;;  %v6777_v55 = vmax.f32 %v6739_v28, 0.0 }
0x1228   :  { %v6745_v61 = vadd.f32 %v6744_v51, %v6571_v41  ;;  %v6778_v13 = vmax.f32 %v6741_v22, 0.0 }
0x1229   :  { %v6779_v60 = vmax.f32 %v6743_v46, 0.0 }
0x122a   :  { %v6780_v29 = vmax.f32 %v6745_v61, 0.0 }
0x122b   :  { %v6793_v14 = vpack.c.bf16 %v6779_v60, %v6777_v55 }
0x122c   :  { %v6794_v12 = vpack.c.bf16 %v6780_v29, %v6778_v13  ;;  %v6748_v0 = vpop.f32.mrb[172].mxu1 }
0x122d   :  { %v6749_v39 = vadd.f32 %v6748_v0, %v6567_v9  ;;  %v6750_v33 = vpop.f32.mrb[173].mxu1 }
0x122e   :  { %v6751_v26 = vadd.f32 %v6750_v33, %v6571_v41  ;;  %v6752_v35 = vpop.f32.mrb[174].mxu1  ;;  %8757 = vmatprep.mubr.msk.bf16.mxu0 %vm751_vm0, %v6794_v12  ;;  %v14106_v12 = vld [vmem:[#allocation10_spill] sm:$0xff] }
0x122f   :  { %v6753_v6 = vadd.f32 %v6752_v35, %v6567_v9  ;;  %v6754_v40 = vpop.f32.mrb[175].mxu1  ;;  %6974 = vmatmul.mubr.bf16.vlgmr.msra.gmra.mrb[168].mxu0 %v6793_v14  ;;  %v6781_v43 = vmax.f32 %v6749_v39, 0.0  ;;  %v6804_v0 = vrot.slane %v12969_v7, %v14106_v12  ;;  %v13422_v39 = vrot.slane %v12974_v42, %v14106_v12 }
0x1230   :  { %v6755_v34 = vadd.f32 %v6754_v40, %v6571_v41  ;;  %v6782_v49 = vmax.f32 %v6751_v26, 0.0 }
0x1231   :  { %v6783_v32 = vmax.f32 %v6753_v6, 0.0 }
0x1232   :  { %v6784_v47 = vmax.f32 %v6755_v34, 0.0 }
0x1233   :  { %v6795_v50 = vpack.c.bf16 %v6783_v32, %v6781_v43 }
0x1234   :  { %v6796_v30 = vpack.c.bf16 %v6784_v47, %v6782_v49 }
0x1236   :  { %8758 = vmatprep.mubr.msk.bf16.mxu0 %vm751_vm0, %v6796_v30 }
0x1237   :  { %6984 = vmatmul.mubr.bf16.gmra.mrb[172].mxu0 %v6795_v50 }
0x1272   :  { %v6758_v38 = vpop.f32.mrb[176].mxu1 }
0x1273   :  { %v6759_v56 = vadd.f32 %v6758_v38, %v6567_v9  ;;  %v6760_v1 = vpop.f32.mrb[177].mxu1 }
0x1274   :  { %v6761_v63 = vadd.f32 %v6760_v1, %v6571_v41  ;;  %v6762_v59 = vpop.f32.mrb[178].mxu1 }
0x1275   :  { %v6763_v45 = vadd.f32 %v6762_v59, %v6567_v9  ;;  %v6764_v36 = vpop.f32.mrb[179].mxu1  ;;  %v6785_v10 = vmax.f32 %v6759_v56, 0.0 }
0x1276   :  { %v6765_v24 = vadd.f32 %v6764_v36, %v6571_v41  ;;  %v6786_v58 = vmax.f32 %v6761_v63, 0.0 }
0x1277   :  { %v6787_v62 = vmax.f32 %v6763_v45, 0.0 }
0x1278   :  { %v6788_v31 = vmax.f32 %v6765_v24, 0.0 }
0x1279   :  { %v6797_v11 = vpack.c.bf16 %v6787_v62, %v6785_v10 }
0x127a   :  { %v6798_v23 = vpack.c.bf16 %v6788_v31, %v6786_v58  ;;  %v6768_v27 = vpop.f32.mrb[180].mxu1 }
0x127b   :  { %v6769_v53 = vadd.f32 %v6768_v27, %v6567_v9  ;;  %v6770_v28 = vpop.f32.mrb[181].mxu1 }
0x127c   :  { %v6771_v18 = vadd.f32 %v6770_v28, %v6571_v41  ;;  %v6772_v22 = vpop.f32.mrb[182].mxu1  ;;  %8759 = vmatprep.mubr.msk.bf16.mxu0 %vm751_vm0, %v6798_v23 }
0x127d   :  { %v6773_v3 = vadd.f32 %v6772_v22, %v6567_v9  ;;  %v6774_v46 = vpop.f32.mrb[183].mxu1  ;;  %6994 = vmatmul.mubr.bf16.gmra.mrb[176].mxu0 %v6797_v11  ;;  %v6789_v61 = vmax.f32 %v6769_v53, 0.0 }
0x127e   :  { %v6775_v51 = vadd.f32 %v6774_v46, %v6571_v41  ;;  %v6790_v60 = vmax.f32 %v6771_v18, 0.0 }
0x127f   :  { %v6791_v55 = vmax.f32 %v6773_v3, 0.0 }
0x1280   :  { %v6792_v13 = vmax.f32 %v6775_v51, 0.0 }
0x1281   :  { %v6799_v29 = vpack.c.bf16 %v6791_v55, %v6789_v61 }
0x1282   :  { %v6800_v14 = vpack.c.bf16 %v6792_v13, %v6790_v60 }
0x1284   :  { %8760 = vmatprep.mubr.msk.bf16.mxu0 %vm751_vm0, %v6800_v14 }
0x1285   :  { %7004 = vmatmul.mubr.bf16.gmra.mrb[180].mxu0 %v6799_v29 }
0x1302   :  { %v6975_v9 = vpop.f32.mrb[168].mxu0 }
0x1303   :  { %v6976_v33 = vadd.f32 %v6975_v9, %v6804_v0  ;;  %v6977_v26 = vpop.f32.mrb[169].mxu0 }
0x1304   :  { %v6978_v41 = vadd.f32 %v6977_v26, %v13422_v39  ;;  %v6979_v35 = vpop.f32.mrb[170].mxu0 }
0x1305   :  { %v6980_v6 = vadd.f32 %v6979_v35, %v6804_v0  ;;  %v6981_v40 = vpop.f32.mrb[171].mxu0  ;;  %v13430_v32 = vadd.f32 %v6976_v33, %v13313_v17  ;;  %v9919_v35 = vld [vmem:[%s14028_s1 + $0x544] ss:$8 sps:$4 sm:$0xff]  }
0x1306   :  { %v13426_v34 = vadd.f32 %v6978_v41, %v13307_v48  ;;  %v6982_v43 = vadd.f32 %v6981_v40, %v13422_v39  ;;  %v9925_v40 = vld [vmem:[%s14028_s1 + $0x554] ss:$8 sps:$4 sm:$0xff]   ;;  %7587 = vmatprep.subr.bf16.mxu0 %v9919_v35  ;;  %v9950_v35 = vld [vmem:[%s14028_s1 + $0x4e0] ss:$8 sps:$4 sm:$0xff]  }
0x1307   :  { %v13438_v49 = vadd.f32 %v6980_v6, %v13316_v8  ;;  %v9922_v6 = vld [vmem:[%s14028_s1 + $0x494] ss:$8 sps:$4 sm:$0xff]  }
0x1308   :  { %v7030_v7 = vsel %vm751_vm0, %v13426_v34, 0.0  ;;  %v13435_v42 = vadd.f32 %v6982_v43, %v13310_v37  ;;  %v9920_v43 = vld [vmem:[%s14028_s1 + $0x490] ss:$8 sps:$4 sm:$0xff]  }
0x1309   :  { %v7031_v47 = vadd.f32 %v7030_v7, %v13430_v32  ;;  %v9923_v7 = vld [vmem:[%s14028_s1 + $0x550] ss:$8 sps:$4 sm:$0xff]  }
0x130a   :  { %v7034_v48 = vsel %vm751_vm0, %v13435_v42, 0.0  ;;  %v6985_v50 = vpop.f32.mrb[172].mxu0 }
0x130b   :  { %v6986_v30 = vadd.f32 %v6985_v50, %v6804_v0  ;;  %7032 = vadd.xlane.f32.xlu0 %v7031_v47  ;;  %v6987_v38 = vpop.f32.mrb[173].mxu0  ;;  %v7035_v17 = vadd.f32 %v7034_v48, %v13438_v49  ;;  %v9928_v47 = vld [vmem:[%s14028_s1 + $0x4a4] ss:$8 sps:$4 sm:$0xff]   ;;  %v9926_v50 = vld [vmem:[%s14028_s1 + $0x4a0] ss:$8 sps:$4 sm:$0xff]  }
0x130c   :  { %v6988_v56 = vadd.f32 %v6987_v38, %v13422_v39  ;;  %v6989_v1 = vpop.f32.mrb[174].mxu0  ;;  %v9931_v48 = vld [vmem:[%s14028_s1 + $0x564] ss:$8 sps:$4 sm:$0xff]   ;;  %v9934_v38 = vld [vmem:[%s14028_s1 + $0x4b4] ss:$8 sps:$4 sm:$0xff]  }
0x130d   :  { %v6990_v63 = vadd.f32 %v6989_v1, %v6804_v0  ;;  %7036 = vadd.xlane.f32.xlu1 %v7035_v17  ;;  %v6991_v37 = vpop.f32.mrb[175].mxu0  ;;  %v13450_v45 = vadd.f32 %v6986_v30, %v13338_v20  ;;  %v9929_v30 = vld [vmem:[%s14028_s1 + $0x560] ss:$8 sps:$4 sm:$0xff]   ;;  %v9937_v17 = vld [vmem:[%s14028_s1 + $0x574] ss:$8 sps:$4 sm:$0xff]  }
0x130e   :  { %v13446_v8 = vadd.f32 %v6988_v56, %v13332_v16  ;;  %v6992_v59 = vadd.f32 %v6991_v37, %v13422_v39  ;;  %v9932_v56 = vld [vmem:[%s14028_s1 + $0x4b0] ss:$8 sps:$4 sm:$0xff]   ;;  %v9943_v37 = vld [vmem:[%s14028_s1 + $0x584] ss:$8 sps:$4 sm:$0xff]  }
0x130f   :  { %v13458_v10 = vadd.f32 %v6990_v63, %v13341_v54  ;;  %v9935_v1 = vld [vmem:[%s14028_s1 + $0x570] ss:$8 sps:$4 sm:$0xff]   ;;  %v9940_v63 = vld [vmem:[%s14028_s1 + $0x4c4] ss:$8 sps:$4 sm:$0xff]  }
0x1310   :  { %v7038_v36 = vsel %vm751_vm0, %v13446_v8, 0.0  ;;  %v13455_v24 = vadd.f32 %v6992_v59, %v13335_v25  ;;  %v9938_v59 = vld [vmem:[%s14028_s1 + $0x4c0] ss:$8 sps:$4 sm:$0xff]  }
0x1311   :  { %v7039_v62 = vadd.f32 %v7038_v36, %v13450_v45  ;;  %v9941_v36 = vld [vmem:[%s14028_s1 + $0x580] ss:$8 sps:$4 sm:$0xff]  }
0x1312   :  { %v7042_v16 = vsel %vm751_vm0, %v13455_v24, 0.0 }
0x1313   :  { %7040 = vadd.xlane.f32.xlu0 %v7039_v62  ;;  %v7043_v58 = vadd.f32 %v7042_v16, %v13458_v10  ;;  %v9946_v62 = vld [vmem:[%s14028_s1 + $0x4d4] ss:$8 sps:$4 sm:$0xff]  }
0x1314   :  { %v9949_v16 = vld [vmem:[%s14028_s1 + $0x594] ss:$8 sps:$4 sm:$0xff]  }
0x1315   :  { %7044 = vadd.xlane.f32.xlu1 %v7043_v58  ;;  %v9944_v58 = vld [vmem:[%s14028_s1 + $0x4d0] ss:$8 sps:$4 sm:$0xff]  }
0x1350   :  { %v6995_v20 = vpop.f32.mrb[176].mxu0 }
0x1351   :  { %v6996_v31 = vadd.f32 %v6995_v20, %v6804_v0  ;;  %v6997_v11 = vpop.f32.mrb[177].mxu0  ;;  %v9947_v20 = vld [vmem:[%s14028_s1 + $0x590] ss:$8 sps:$4 sm:$0xff]  }
0x1352   :  { %v6998_v23 = vadd.f32 %v6997_v11, %v13422_v39  ;;  %v6999_v27 = vpop.f32.mrb[178].mxu0 }
0x1353   :  { %v7000_v25 = vadd.f32 %v6999_v27, %v6804_v0  ;;  %v7001_v53 = vpop.f32.mrb[179].mxu0  ;;  %v13470_v18 = vadd.f32 %v6996_v31, %v13363_v44 }
0x1354   :  { %v13466_v54 = vadd.f32 %v6998_v23, %v13357_v5  ;;  %v7002_v28 = vadd.f32 %v7001_v53, %v13422_v39 }
0x1355   :  { %v13478_v46 = vadd.f32 %v7000_v25, %v13366_v19 }
0x1356   :  { %v7046_v22 = vsel %vm751_vm0, %v13466_v54, 0.0  ;;  %v13475_v3 = vadd.f32 %v7002_v28, %v13360_v4 }
0x1357   :  { %v7047_v51 = vadd.f32 %v7046_v22, %v13470_v18 }
0x1358   :  { %v7050_v5 = vsel %vm751_vm0, %v13475_v3, 0.0  ;;  %v7005_v61 = vpop.f32.mrb[180].mxu0 }
0x1359   :  { %v7006_v55 = vadd.f32 %v7005_v61, %v6804_v0  ;;  %7048 = vadd.xlane.f32.xlu0 %v7047_v51  ;;  %v7007_v60 = vpop.f32.mrb[181].mxu0  ;;  %v7051_v44 = vadd.f32 %v7050_v5, %v13478_v46 }
0x135a   :  { %v7008_v13 = vadd.f32 %v7007_v60, %v13422_v39  ;;  %v7009_v29 = vpop.f32.mrb[182].mxu0 }
0x135b   :  { %v7010_v14 = vadd.f32 %v7009_v29, %v6804_v0  ;;  %7052 = vadd.xlane.f32.xlu1 %v7051_v44  ;;  %v7011_v4 = vpop.f32.mrb[183].mxu0  ;;  %v13490_v9 = vadd.f32 %v7006_v55, %v13388_v52  ;;  %v9914_v52 = vld [vmem:[%s14028_s1 + $0x480] ss:$8 sps:$4 sm:$0xff]  }
0x135c   :  { %v13486_v19 = vadd.f32 %v7008_v13, %v13382_v2  ;;  %v7012_v12 = vadd.f32 %v7011_v4, %v13422_v39 }
0x135d   :  { %v13498_v41 = vadd.f32 %v7010_v14, %v13391_v15  ;;  %v9917_v15 = vld [vmem:[%s14028_s1 + $0x540] ss:$8 sps:$4 sm:$0xff]  }
0x135e   :  { %v7054_v33 = vsel %vm751_vm0, %v13486_v19, 0.0  ;;  %v13495_v26 = vadd.f32 %v7012_v12, %v13385_v57  ;;  %v9916_v57 = vld [vmem:[%s14028_s1 + $0x484] ss:$8 sps:$4 sm:$0xff]   ;;  %7588 = vmatpush1.bf16.msra.mxu0 %v9917_v15 }
0x135f   :  { %v7055_v0 = vadd.f32 %v7054_v33, %v13490_v9  ;;  %7370 = vmatprep.subr.bf16.mxu1 %v9916_v57  ;;  %7589 = vmatprep.subr.bf16.mxu0 %v9925_v40  ;;  %v9958_v40 = vld [vmem:[%s14028_s1 + $0x4f4] ss:$8 sps:$4 sm:$0xff]  }
0x1360   :  { %v7058_v2 = vsel %vm751_vm0, %v13495_v26, 0.0  ;;  %7371 = vmatpush1.bf16.msra.mxu1 %v9914_v52 }
0x1361   :  { %7056 = vadd.xlane.f32.xlu0 %v7055_v0  ;;  %v7059_v39 = vadd.f32 %v7058_v2, %v13498_v41  ;;  %7372 = vmatprep.subr.bf16.mxu1 %v9922_v6  ;;  %v9953_v6 = vld [vmem:[%s14028_s1 + $0x5a0] ss:$8 sps:$4 sm:$0xff]  }
0x1362   :  { %7590 = vmatpush1.bf16.msra.mxu0 %v9923_v7  ;;  %v9956_v7 = vld [vmem:[%s14028_s1 + $0x4f0] ss:$8 sps:$4 sm:$0xff]  }
0x1363   :  { %7060 = vadd.xlane.f32.xlu1 %v7059_v39  ;;  %7591 = vmatprep.subr.bf16.mxu0 %v9931_v48  ;;  %v9964_v48 = vld [vmem:[%s14028_s1 + $0x504] ss:$8 sps:$4 sm:$0xff]  }
0x1364   :  { %7373 = vmatpush1.bf16.msra.mxu1 %v9920_v43  ;;  %v9961_v43 = vld [vmem:[%s14028_s1 + $0x5b4] ss:$8 sps:$4 sm:$0xff]  }
0x1365   :  { %7374 = vmatprep.subr.bf16.mxu1 %v9928_v47  ;;  %v9959_v47 = vld [vmem:[%s14028_s1 + $0x5b0] ss:$8 sps:$4 sm:$0xff]  }
0x1366   :  { %7592 = vmatpush1.bf16.msra.mxu0 %v9929_v30  ;;  %v9962_v30 = vld [vmem:[%s14028_s1 + $0x500] ss:$8 sps:$4 sm:$0xff]  }
0x1367   :  { %7593 = vmatprep.subr.bf16.mxu0 %v9937_v17  ;;  %v9970_v17 = vld [vmem:[%s14028_s1 + $0x514] ss:$8 sps:$4 sm:$0xff]  }
0x1368   :  { %7375 = vmatpush1.bf16.msra.mxu1 %v9926_v50  ;;  %v9967_v50 = vld [vmem:[%s14028_s1 + $0x5c4] ss:$8 sps:$4 sm:$0xff]  }
0x1369   :  { %7376 = vmatprep.subr.bf16.mxu1 %v9934_v38  ;;  %v9965_v38 = vld [vmem:[%s14028_s1 + $0x5c0] ss:$8 sps:$4 sm:$0xff]  }
0x136a   :  { %7594 = vmatpush1.bf16.msra.mxu0 %v9935_v1  ;;  %v9968_v1 = vld [vmem:[%s14028_s1 + $0x510] ss:$8 sps:$4 sm:$0xff]  }
0x136b   :  { %7595 = vmatprep.subr.bf16.mxu0 %v9943_v37  ;;  %v9976_v37 = vld [vmem:[%s14028_s1 + $0x524] ss:$8 sps:$4 sm:$0xff]  }
0x136c   :  { %7377 = vmatpush1.bf16.msra.mxu1 %v9932_v56  ;;  %v9973_v56 = vld [vmem:[%s14028_s1 + $0x5d4] ss:$8 sps:$4 sm:$0xff]  }
0x136d   :  { %7378 = vmatprep.subr.bf16.mxu1 %v9940_v63  ;;  %v9971_v63 = vld [vmem:[%s14028_s1 + $0x5d0] ss:$8 sps:$4 sm:$0xff]  }
0x136e   :  { %7596 = vmatpush1.bf16.msra.mxu0 %v9941_v36  ;;  %v9974_v36 = vld [vmem:[%s14028_s1 + $0x520] ss:$8 sps:$4 sm:$0xff]  }
0x136f   :  { %7597 = vmatprep.subr.bf16.mxu0 %v9949_v16  ;;  %v9982_v16 = vld [vmem:[%s14028_s1 + $0x534] ss:$8 sps:$4 sm:$0xff]  }
0x1370   :  { %7379 = vmatpush1.bf16.msra.mxu1 %v9938_v59  ;;  %v9979_v59 = vld [vmem:[%s14028_s1 + $0x5e4] ss:$8 sps:$4 sm:$0xff]  }
0x1371   :  { %7380 = vmatprep.subr.bf16.mxu1 %v9946_v62  ;;  %v9977_v62 = vld [vmem:[%s14028_s1 + $0x5e0] ss:$8 sps:$4 sm:$0xff]  }
0x1372   :  { %7598 = vmatpush1.bf16.msra.mxu0 %v9947_v20  ;;  %v9980_v20 = vld [vmem:[%s14028_s1 + $0x530] ss:$8 sps:$4 sm:$0xff]  }
0x1374   :  { %7381 = vmatpush1.bf16.msra.mxu1 %v9944_v58  ;;  %v9985_v58 = vld [vmem:[%s14028_s1 + $0x5f4] ss:$8 sps:$4 sm:$0xff]  }
0x1398   :  { %v7033_v31 = vpop.xlane.xlu0 %7032 }
0x1399   :  { %v7062_v11 = vmul.f32 0.0052083335, %v7033_v31  ;;  %v9983_v31 = vld [vmem:[%s14028_s1 + $0x5f0] ss:$8 sps:$4 sm:$0xff]  }
0x139a   :  { %v7037_v23 = vpop.xlane.xlu1 %7036 }
0x139b   :  { %v13577_v27 = vsub.f32 %v13430_v32, %v7062_v11  ;;  %v13580_v25 = vsub.f32 %v13426_v34, %v7062_v11  ;;  %v7063_v53 = vmul.f32 0.0052083335, %v7037_v23 }
0x139d   :  { %v7086_v28 = vmul.f32 %v13577_v27, %v13577_v27  ;;  %v7087_v22 = vmul.f32 %v13580_v25, %v13580_v25  ;;  %v13587_v51 = vsub.f32 %v13438_v49, %v7063_v53  ;;  %v13590_v5 = vsub.f32 %v13435_v42, %v7063_v53 }
0x139f   :  { %v7088_v32 = vmul.f32 %v13587_v51, %v13587_v51  ;;  %v7089_v34 = vmul.f32 %v13590_v5, %v13590_v5  ;;  %v7102_v61 = vsel %vm751_vm0, %v7087_v22, 0.0 }
0x13a0   :  { %v7041_v55 = vpop.xlane.xlu0 %7040  ;;  %v7103_v60 = vadd.f32 %v7102_v61, %v7086_v28 }
0x13a1   :  { %v7064_v44 = vmul.f32 0.0052083335, %v7041_v55  ;;  %v7106_v13 = vsel %vm751_vm0, %v7089_v34, 0.0 }
0x13a2   :  { %7104 = vadd.xlane.f32.xlu0 %v7103_v60  ;;  %v7045_v29 = vpop.xlane.xlu1 %7044  ;;  %v7107_v49 = vadd.f32 %v7106_v13, %v7088_v32 }
0x13a3   :  { %v13599_v14 = vsub.f32 %v13450_v45, %v7064_v44  ;;  %v13602_v42 = vsub.f32 %v13446_v8, %v7064_v44  ;;  %v7065_v4 = vmul.f32 0.0052083335, %v7045_v29 }
0x13a4   :  { %7108 = vadd.xlane.f32.xlu1 %v7107_v49 }
0x13a5   :  { %v7090_v12 = vmul.f32 %v13599_v14, %v13599_v14  ;;  %v7091_v33 = vmul.f32 %v13602_v42, %v13602_v42  ;;  %v13609_v0 = vsub.f32 %v13458_v10, %v7065_v4  ;;  %v13612_v2 = vsub.f32 %v13455_v24, %v7065_v4  ;;  %v9952_v10 = vld [vmem:[%s14028_s1 + $0x4e4] ss:$8 sps:$4 sm:$0xff]  }
0x13a6   :  { %v9955_v24 = vld [vmem:[%s14028_s1 + $0x5a4] ss:$8 sps:$4 sm:$0xff]   ;;  %7382 = vmatprep.subr.bf16.mxu1 %v9952_v10 }
0x13a7   :  { %v7092_v45 = vmul.f32 %v13609_v0, %v13609_v0  ;;  %v7093_v8 = vmul.f32 %v13612_v2, %v13612_v2  ;;  %v7110_v39 = vsel %vm751_vm0, %v7091_v33, 0.0  ;;  %7599 = vmatprep.subr.bf16.mxu0 %v9955_v24  ;;  %7383 = vmatpush1.bf16.msra.mxu1 %v9950_v35 }
0x13a8   :  { %v7111_v52 = vadd.f32 %v7110_v39, %v7090_v12  ;;  %7600 = vmatpush1.bf16.msra.mxu0 %v9953_v6  ;;  %7384 = vmatprep.subr.bf16.mxu1 %v9958_v40 }
0x13a9   :  { %v7114_v57 = vsel %vm751_vm0, %v7093_v8, 0.0  ;;  %7601 = vmatprep.subr.bf16.mxu0 %v9961_v43 }
0x13aa   :  { %7112 = vadd.xlane.f32.xlu0 %v7111_v52  ;;  %v7115_v15 = vadd.f32 %v7114_v57, %v7092_v45 }
0x13ab   :  { %7385 = vmatpush1.bf16.msra.mxu1 %v9956_v7 }
0x13ac   :  { %7116 = vadd.xlane.f32.xlu1 %v7115_v15  ;;  %7602 = vmatpush1.bf16.msra.mxu0 %v9959_v47 }
0x13ad   :  { %7386 = vmatprep.subr.bf16.mxu1 %v9964_v48  ;;  %7603 = vmatprep.subr.bf16.mxu0 %v9967_v50 }
0x13af   :  { %7387 = vmatpush1.bf16.msra.mxu1 %v9962_v30 }
0x13b0   :  { %7604 = vmatpush1.bf16.msra.mxu0 %v9965_v38  ;;  %7388 = vmatprep.subr.bf16.mxu1 %v9970_v17 }
0x13b1   :  { %7605 = vmatprep.subr.bf16.mxu0 %v9973_v56  ;;  %v13739_v56 = vld [vmem:[%s14032_s5 + $0x10] sm:$0xff] }
0x13b3   :  { %7389 = vmatpush1.bf16.msra.mxu1 %v9968_v1  ;;  %v14107_v1 = vld [vmem:[#allocation11_spill] sm:$0xff] }
0x13b4   :  { %7606 = vmatpush1.bf16.msra.mxu0 %v9971_v63  ;;  %7390 = vmatprep.subr.bf16.mxu1 %v9976_v37  ;;  %v13743_v63 = vrot.slane %v13739_v56, %v14107_v1  ;;  %v13748_v37 = vld [vmem:[%s14032_s5 + $0x18] sm:$0xff] }
0x13b5   :  { %7607 = vmatprep.subr.bf16.mxu0 %v9979_v59  ;;  %v13752_v59 = vrot.slane %v13748_v37, %v14107_v1 }
0x13b7   :  { %7391 = vmatpush1.bf16.msra.mxu1 %v9974_v36 }
0x13b8   :  { %7608 = vmatpush1.bf16.msra.mxu0 %v9977_v62  ;;  %7392 = vmatprep.subr.bf16.mxu1 %v9982_v16 }
0x13b9   :  { %7609 = vmatprep.subr.bf16.mxu0 %v9985_v58 }
0x13bb   :  { %7393 = vmatpush1.bf16.msra.mxu1 %v9980_v20  ;;  %v14108_v20 = vld [vmem:[#allocation12_spill] sm:$0xff] }
0x13bc   :  { %7610 = vmatpush1.bf16.msra.mxu0 %v9983_v31  ;;  %v13758_v31 = vrot.slane %v13748_v37, %v14108_v20 }
0x13e6   :  { %v7049_v11 = vpop.xlane.xlu0 %7048 }
0x13e7   :  { %v7066_v23 = vmul.f32 0.0052083335, %v7049_v11  ;;  %v13762_v11 = vrot.slane %v13739_v56, %v14108_v20 }
0x13e8   :  { %v7053_v53 = vpop.xlane.xlu1 %7052 }
0x13e9   :  { %v13693_v28 = vsub.f32 %v13470_v18, %v7066_v23  ;;  %v13696_v22 = vsub.f32 %v13466_v54, %v7066_v23  ;;  %v7067_v32 = vmul.f32 0.0052083335, %v7053_v53 }
0x13eb   :  { %v7094_v34 = vmul.f32 %v13693_v28, %v13693_v28  ;;  %v7095_v61 = vmul.f32 %v13696_v22, %v13696_v22  ;;  %v13703_v55 = vsub.f32 %v13478_v46, %v7067_v32  ;;  %v13706_v60 = vsub.f32 %v13475_v3, %v7067_v32 }
0x13ed   :  { %v7096_v18 = vmul.f32 %v13703_v55, %v13703_v55  ;;  %v7097_v54 = vmul.f32 %v13706_v60, %v13706_v60  ;;  %v7118_v44 = vsel %vm751_vm0, %v7095_v61, 0.0 }
0x13ee   :  { %v7057_v13 = vpop.xlane.xlu0 %7056  ;;  %v7119_v29 = vadd.f32 %v7118_v44, %v7094_v34 }
0x13ef   :  { %v7068_v49 = vmul.f32 0.0052083335, %v7057_v13  ;;  %v7122_v4 = vsel %vm751_vm0, %v7097_v54, 0.0 }
0x13f0   :  { %7120 = vadd.xlane.f32.xlu0 %v7119_v29  ;;  %v7061_v12 = vpop.xlane.xlu1 %7060  ;;  %v7123_v46 = vadd.f32 %v7122_v4, %v7096_v18 }
0x13f1   :  { %v13715_v33 = vsub.f32 %v13490_v9, %v7068_v49  ;;  %v13718_v3 = vsub.f32 %v13486_v19, %v7068_v49  ;;  %v7069_v45 = vmul.f32 0.0052083335, %v7061_v12 }
0x13f2   :  { %7124 = vadd.xlane.f32.xlu1 %v7123_v46 }
0x13f3   :  { %v7098_v8 = vmul.f32 %v13715_v33, %v13715_v33  ;;  %v7099_v39 = vmul.f32 %v13718_v3, %v13718_v3  ;;  %v13725_v52 = vsub.f32 %v13498_v41, %v7069_v45  ;;  %v13728_v57 = vsub.f32 %v13495_v26, %v7069_v45 }
0x13f5   :  { %v7100_v9 = vmul.f32 %v13725_v52, %v13725_v52  ;;  %v7101_v19 = vmul.f32 %v13728_v57, %v13728_v57  ;;  %v7126_v15 = vsel %vm751_vm0, %v7099_v39, 0.0 }
0x13f6   :  { %v7127_v10 = vadd.f32 %v7126_v15, %v7098_v8 }
0x13f7   :  { %v7130_v24 = vsel %vm751_vm0, %v7101_v19, 0.0 }
0x13f8   :  { %7128 = vadd.xlane.f32.xlu0 %v7127_v10  ;;  %v7131_v35 = vadd.f32 %v7130_v24, %v7100_v9 }
0x13fa   :  { %7132 = vadd.xlane.f32.xlu1 %v7131_v35 }
0x142f   :  { %v7105_v6 = vpop.xlane.xlu0 %7104 }
0x1430   :  { %v7134_v41 = vmul.f32 0.0052083335, %v7105_v6 }
0x1431   :  { %v7109_v40 = vpop.xlane.xlu1 %7108 }
0x1432   :  { %v7142_v43 = vadd.f32 1e-05, %v7134_v41  ;;  %v7135_v26 = vmul.f32 0.0052083335, %v7109_v40 }
0x1434   :  { %10262 = vrsqrt.f32 %v7142_v43  ;;  %v7143_v7 = vadd.f32 1e-05, %v7135_v26 }
0x1436   :  { %10264 = vrsqrt.f32 %v7143_v7 }
0x1437   :  { %v7113_v47 = vpop.xlane.xlu0 %7112 }
0x1438   :  { %v7136_v48 = vmul.f32 0.0052083335, %v7113_v47 }
0x1439   :  { %v7117_v50 = vpop.xlane.xlu1 %7116 }
0x143a   :  { %v7144_v30 = vadd.f32 1e-05, %v7136_v48  ;;  %v7137_v38 = vmul.f32 0.0052083335, %v7117_v50 }
0x143c   :  { %10266 = vrsqrt.f32 %v7144_v30  ;;  %v7145_v17 = vadd.f32 1e-05, %v7137_v38 }
0x143e   :  { %v10263_v36 = vpop.eup %10262  ;;  %10268 = vrsqrt.f32 %v7145_v17 }
0x143f   :  { %v7158_v62 = vmul.f32 %v10263_v36, %v13577_v27  ;;  %v7159_v16 = vmul.f32 %v10263_v36, %v13580_v25 }
0x1440   :  { %v10265_v58 = vpop.eup %10264 }
0x1441   :  { %v7182_v23 = vmul.f32 %v13743_v63, %v7158_v62  ;;  %v7160_v53 = vmul.f32 %v10265_v58, %v13587_v51  ;;  %v7161_v32 = vmul.f32 %v10265_v58, %v13590_v5  ;;  %v7183_v34 = vmul.f32 %v13752_v59, %v7159_v16 }
0x1443   :  { %v7184_v27 = vmul.f32 %v13743_v63, %v7160_v53  ;;  %v7185_v25 = vmul.f32 %v13752_v59, %v7161_v32  ;;  %v7207_v61 = vadd.f32 %v13758_v31, %v7183_v34  ;;  %v7206_v54 = vadd.f32 %v13762_v11, %v7182_v23 }
0x1445   :  { %v7209_v18 = vadd.f32 %v13758_v31, %v7185_v25  ;;  %v7208_v44 = vadd.f32 %v13762_v11, %v7184_v27 }
0x1446   :  { %v10267_v13 = vpop.eup %10266 }
0x1447   :  { %v7163_v29 = vmul.f32 %v10267_v13, %v13602_v42  ;;  %v13775_v51 = vpack.c.bf16 %v7209_v18, %v7207_v61  ;;  %v13777_v5 = vpack.c.bf16 %v7208_v44, %v7206_v54  ;;  %v7162_v49 = vmul.f32 %v10267_v13, %v13599_v14 }
0x1448   :  { %v10269_v4 = vpop.eup %10268 }
0x1449   :  { %v7165_v12 = vmul.f32 %v10269_v4, %v13612_v2  ;;  %8785 = vmatprep.mubr.msk.bf16.mxu1 %vm751_vm0, %v13775_v51  ;;  %8813 = vmatprep.mubr.msk.bf16.mxu0 %vm751_vm0, %v13775_v51  ;;  %v7187_v46 = vmul.f32 %v13752_v59, %v7163_v29  ;;  %v7164_v45 = vmul.f32 %v10269_v4, %v13609_v0 }
0x144a   :  { %7403 = vmatmul.mubr.bf16.vlgmr.msra.gmra.mrb[184].mxu1 %v13777_v5  ;;  %7620 = vmatmul.mubr.bf16.vlgmr.msra.gmra.mrb[184].mxu0 %v13777_v5  ;;  %v7186_v42 = vmul.f32 %v13743_v63, %v7162_v49 }
0x144b   :  { %v7189_v14 = vmul.f32 %v13752_v59, %v7165_v12  ;;  %v7188_v2 = vmul.f32 %v13743_v63, %v7164_v45  ;;  %v7211_v8 = vadd.f32 %v13758_v31, %v7187_v46 }
0x144c   :  { %v7210_v9 = vadd.f32 %v13762_v11, %v7186_v42 }
0x144d   :  { %v7213_v39 = vadd.f32 %v13758_v31, %v7189_v14  ;;  %v7212_v19 = vadd.f32 %v13762_v11, %v7188_v2 }
0x144f   :  { %v13796_v15 = vpack.c.bf16 %v7213_v39, %v7211_v8  ;;  %v13798_v0 = vpack.c.bf16 %v7212_v19, %v7210_v9 }
0x1451   :  { %8786 = vmatprep.mubr.msk.bf16.mxu1 %vm751_vm0, %v13796_v15  ;;  %8814 = vmatprep.mubr.msk.bf16.mxu0 %vm751_vm0, %v13796_v15 }
0x1452   :  { %7413 = vmatmul.mubr.bf16.gmra.mrb[188].mxu1 %v13798_v0  ;;  %7630 = vmatmul.mubr.bf16.gmra.mrb[188].mxu0 %v13798_v0 }
0x147d   :  { %v7121_v10 = vpop.xlane.xlu0 %7120 }
0x147e   :  { %v7138_v24 = vmul.f32 0.0052083335, %v7121_v10 }
0x147f   :  { %v7125_v35 = vpop.xlane.xlu1 %7124 }
0x1480   :  { %v7146_v6 = vadd.f32 1e-05, %v7138_v24  ;;  %v7139_v41 = vmul.f32 0.0052083335, %v7125_v35 }
0x1482   :  { %10270 = vrsqrt.f32 %v7146_v6  ;;  %v7147_v40 = vadd.f32 1e-05, %v7139_v41  ;;  %v14109_v6 = vld [vmem:[#allocation13_spill] sm:$0xff] }
0x1483   :  { %v13876_v41 = vrot.slane %v13739_v56, %v14109_v6 }
0x1484   :  { %10272 = vrsqrt.f32 %v7147_v40 }
0x1485   :  { %v7129_v43 = vpop.xlane.xlu0 %7128 }
0x1486   :  { %v7140_v26 = vmul.f32 0.0052083335, %v7129_v43 }
0x1487   :  { %v7133_v7 = vpop.xlane.xlu1 %7132 }
0x1488   :  { %v7148_v47 = vadd.f32 1e-05, %v7140_v26  ;;  %v7141_v48 = vmul.f32 0.0052083335, %v7133_v7 }
0x148a   :  { %10274 = vrsqrt.f32 %v7148_v47  ;;  %v7149_v50 = vadd.f32 1e-05, %v7141_v48  ;;  %v13881_v47 = vrot.slane %v13748_v37, %v14109_v6 }
0x148c   :  { %v10271_v30 = vpop.eup %10270  ;;  %10276 = vrsqrt.f32 %v7149_v50 }
0x148d   :  { %v7167_v38 = vmul.f32 %v10271_v30, %v13696_v22  ;;  %v7166_v17 = vmul.f32 %v10271_v30, %v13693_v28 }
0x148e   :  { %v10273_v1 = vpop.eup %10272 }
0x148f   :  { %v7169_v36 = vmul.f32 %v10273_v1, %v13706_v60  ;;  %v7191_v62 = vmul.f32 %v13752_v59, %v7167_v38  ;;  %v7168_v16 = vmul.f32 %v10273_v1, %v13703_v55  ;;  %v7190_v58 = vmul.f32 %v13743_v63, %v7166_v17 }
0x1491   :  { %v7193_v20 = vmul.f32 %v13752_v59, %v7169_v36  ;;  %v7192_v23 = vmul.f32 %v13743_v63, %v7168_v16  ;;  %v7215_v53 = vadd.f32 %v13758_v31, %v7191_v62  ;;  %v7214_v22 = vadd.f32 %v13762_v11, %v7190_v58 }
0x1493   :  { %v7217_v32 = vadd.f32 %v13758_v31, %v7193_v20  ;;  %v7216_v28 = vadd.f32 %v13762_v11, %v7192_v23 }
0x1494   :  { %v10275_v34 = vpop.eup %10274 }
0x1495   :  { %v7171_v60 = vmul.f32 %v10275_v34, %v13718_v3  ;;  %v13819_v27 = vpack.c.bf16 %v7217_v32, %v7215_v53  ;;  %v13821_v55 = vpack.c.bf16 %v7216_v28, %v7214_v22  ;;  %v7170_v25 = vmul.f32 %v10275_v34, %v13715_v33 }
0x1496   :  { %v10277_v61 = vpop.eup %10276 }
0x1497   :  { %v7173_v18 = vmul.f32 %v10277_v61, %v13728_v57  ;;  %8787 = vmatprep.mubr.msk.bf16.mxu1 %vm751_vm0, %v13819_v27  ;;  %8815 = vmatprep.mubr.msk.bf16.mxu0 %vm751_vm0, %v13819_v27  ;;  %v7195_v54 = vmul.f32 %v13752_v59, %v7171_v60  ;;  %v7172_v44 = vmul.f32 %v10277_v61, %v13725_v52  ;;  %v13843_v52 = vld [vmem:[%s14032_s5 + $0x20] sm:$0x3f] }
0x1498   :  { %7423 = vmatmul.mubr.bf16.gmra.mrb[192].mxu1 %v13821_v55  ;;  %7640 = vmatmul.mubr.bf16.gmra.mrb[192].mxu0 %v13821_v55  ;;  %v7194_v3 = vmul.f32 %v13743_v63, %v7170_v25 }
0x1499   :  { %v7197_v33 = vmul.f32 %v13752_v59, %v7173_v18  ;;  %v7196_v57 = vmul.f32 %v13743_v63, %v7172_v44  ;;  %v7219_v13 = vadd.f32 %v13758_v31, %v7195_v54  ;;  %7774 = vperm.xlu0 %9265, %v13843_v52   ;;  %v13859_v63 = vld [vmem:[%s14032_s5 + $0x28] sm:$0x3f]  ;;  %v13863_v59 = vrot.slane %v13843_v52, %v10590_v21 }
0x149a   :  { %v7218_v49 = vadd.f32 %v13762_v11, %v7194_v3  ;;  %v7778_v42 = vrot.slane %v13859_v63, 1 }
0x149b   :  { %v7221_v29 = vadd.f32 %v13758_v31, %v7197_v33  ;;  %v7220_v4 = vadd.f32 %v13762_v11, %v7196_v57  ;;  %v13867_v31 = vrot.slane %v13859_v63, %v10590_v21 }
0x149d   :  { %v13845_v12 = vpack.c.bf16 %v7221_v29, %v7219_v13  ;;  %v13847_v46 = vpack.c.bf16 %v7220_v4, %v7218_v49 }
0x149f   :  { %8788 = vmatprep.mubr.msk.bf16.mxu1 %vm751_vm0, %v13845_v12  ;;  %8816 = vmatprep.mubr.msk.bf16.mxu0 %vm751_vm0, %v13845_v12 }
0x14a0   :  { %7433 = vmatmul.mubr.bf16.gmra.mrb[196].mxu1 %v13847_v46  ;;  %7650 = vmatmul.mubr.bf16.gmra.mrb[196].mxu0 %v13847_v46 }
0x14a1   :  { %8841 = vmatprep.mubr.msk.f32.mxu1 %vm751_vm0, %v7778_v42 }
0x151d   :  { %v7404_v11 = vpop.f32.mrb[184].mxu1  ;;  %v7621_v45 = vpop.f32.mrb[184].mxu0 }
0x151e   :  { %v7622_v14 = vadd.f32 %v7621_v45, %v13863_v59  ;;  %v7406_v2 = vpop.f32.mrb[185].mxu1  ;;  %v7623_v8 = vpop.f32.mrb[185].mxu0  ;;  %v7405_v48 = vadd.f32 %v7404_v11, %v13876_v41 }
0x151f   :  { %v7624_v39 = vadd.f32 %v7623_v8, %v13867_v31  ;;  %v7408_v9 = vpop.f32.mrb[186].mxu1  ;;  %v7625_v19 = vpop.f32.mrb[186].mxu0  ;;  %v7407_v16 = vadd.f32 %v7406_v2, %v13881_v47 }
0x1520   :  { %v8817_v10 = vmul.f32 -1.442695, %v7622_v14  ;;  %v7626_v24 = vadd.f32 %v7625_v19, %v13863_v59  ;;  %v7410_v35 = vpop.f32.mrb[187].mxu1  ;;  %v7627_v21 = vpop.f32.mrb[187].mxu0  ;;  %v7409_v22 = vadd.f32 %v7408_v9, %v13876_v41 }
0x1521   :  { %v8818_v40 = vmul.f32 -1.442695, %v7624_v39  ;;  %v7628_v43 = vadd.f32 %v7627_v21, %v13867_v31  ;;  %v7411_v44 = vadd.f32 %v7410_v35, %v13881_v47 }
0x1522   :  { %10278 = vpow2.f32 %v8817_v10  ;;  %v8819_v26 = vmul.f32 -1.442695, %v7626_v24 }
0x1523   :  { %10280 = vpow2.f32 %v8818_v40  ;;  %v8820_v7 = vmul.f32 -1.442695, %v7628_v43 }
0x1524   :  { %10282 = vpow2.f32 %v8819_v26 }
0x1525   :  { %v7414_v50 = vpop.f32.mrb[188].mxu1  ;;  %v7631_v30 = vpop.f32.mrb[188].mxu0  ;;  %10284 = vpow2.f32 %v8820_v7 }
0x1526   :  { %v7632_v38 = vadd.f32 %v7631_v30, %v13863_v59  ;;  %v7416_v56 = vpop.f32.mrb[189].mxu1  ;;  %v7633_v17 = vpop.f32.mrb[189].mxu0  ;;  %10286 = vtanh.f32 %v7405_v48  ;;  %v7415_v57 = vadd.f32 %v7414_v50, %v13876_v41 }
0x1527   :  { %v7634_v1 = vadd.f32 %v7633_v17, %v13867_v31  ;;  %v7418_v36 = vpop.f32.mrb[190].mxu1  ;;  %v7635_v62 = vpop.f32.mrb[190].mxu0  ;;  %v7417_v29 = vadd.f32 %v7416_v56, %v13881_v47 }
0x1528   :  { %v8821_v58 = vmul.f32 -1.442695, %v7632_v38  ;;  %v7636_v37 = vadd.f32 %v7635_v62, %v13863_v59  ;;  %v7420_v20 = vpop.f32.mrb[191].mxu1  ;;  %v7637_v23 = vpop.f32.mrb[191].mxu0  ;;  %v7419_v42 = vadd.f32 %v7418_v36, %v13876_v41 }
0x1529   :  { %v8822_v53 = vmul.f32 -1.442695, %v7634_v1  ;;  %v7638_v32 = vadd.f32 %v7637_v23, %v13867_v31  ;;  %v7421_v10 = vadd.f32 %v7420_v20, %v13881_v47  ;;  %v7775_v17 = vpop.permute.xlu0 %7774 }
0x152a   :  { %10288 = vpow2.f32 %v8821_v58  ;;  %v8823_v28 = vmul.f32 -1.442695, %v7636_v37 }
0x152b   :  { %10290 = vpow2.f32 %v8822_v53  ;;  %v8824_v61 = vmul.f32 -1.442695, %v7638_v32 }
0x152c   :  { %v10279_v34 = vpop.eup %10278  ;;  %10292 = vtanh.f32 %v7407_v16 }
0x152d   :  { %v10281_v60 = vpop.eup %10280  ;;  %v7708_v25 = vadd.f32 1.0, %v10279_v34  ;;  %10294 = vpow2.f32 %v8823_v28 }
0x152e   :  { %v7709_v18 = vadd.f32 1.0, %v10281_v60  ;;  %10296 = vtanh.f32 %v7409_v22  ;;  %v10283_v54 = vpop.eup %10282 }
0x152f   :  { %10298 = vrcp.f32 %v7708_v25  ;;  %v7710_v3 = vadd.f32 1.0, %v10283_v54  ;;  %v10285_v33 = vpop.eup %10284 }
0x1530   :  { %10300 = vrcp.f32 %v7709_v18  ;;  %v7711_v13 = vadd.f32 1.0, %v10285_v33  ;;  %v10287_v49 = vpop.eup %10286 }
0x1531   :  { %10302 = vpow2.f32 %v8824_v61 }
0x1532   :  { %10304 = vrcp.f32 %v7710_v3 }
0x1533   :  { %10306 = vtanh.f32 %v7411_v44 }
0x1534   :  { %v10289_v4 = vpop.eup %10288  ;;  %10308 = vrcp.f32 %v7711_v13 }
0x1535   :  { %v10291_v11 = vpop.eup %10290  ;;  %10310 = vtanh.f32 %v7415_v57  ;;  %v7712_v45 = vadd.f32 1.0, %v10289_v4 }
0x1536   :  { %v10293_v14 = vpop.eup %10292  ;;  %10312 = vtanh.f32 %v7417_v29  ;;  %v7713_v2 = vadd.f32 1.0, %v10291_v11 }
0x1537   :  { %v10295_v8 = vpop.eup %10294  ;;  %10314 = vrcp.f32 %v7712_v45 }
0x1538   :  { %v10297_v39 = vpop.eup %10296  ;;  %10316 = vrcp.f32 %v7713_v2  ;;  %v7714_v9 = vadd.f32 1.0, %v10295_v8 }
0x1539   :  { %v10299_v19 = vpop.eup %10298  ;;  %10318 = vtanh.f32 %v7419_v42 }
0x153a   :  { %v10301_v24 = vpop.eup %10300  ;;  %10320 = vrcp.f32 %v7714_v9  ;;  %v7756_v35 = vmul.f32 %v10299_v19, %v10287_v49 }
0x153b   :  { %v10303_v21 = vpop.eup %10302  ;;  %v7757_v6 = vmul.f32 %v10301_v24, %v10293_v14  ;;  %10322 = vtanh.f32 %v7421_v10 }
0x153c   :  { %v10305_v40 = vpop.eup %10304  ;;  %v7715_v43 = vadd.f32 1.0, %v10303_v21 }
0x153d   :  { %v10307_v26 = vpop.eup %10306  ;;  %v7758_v7 = vmul.f32 %v10305_v40, %v10297_v39 }
0x153e   :  { %v10309_v48 = vpop.eup %10308  ;;  %10324 = vrcp.f32 %v7715_v43 }
0x153f   :  { %v10311_v50 = vpop.eup %10310  ;;  %v7759_v30 = vmul.f32 %v10309_v48, %v10307_v26  ;;  %v9161_v38 = vpack.c.bf16 %v7758_v7, %v7756_v35 }
0x1540   :  { %v10313_v56 = vpop.eup %10312 }
0x1541   :  { %v10315_v1 = vpop.eup %10314  ;;  %v9158_v36 = vpack.c.bf16 %v7759_v30, %v7757_v6 }
0x1542   :  { %v10317_v62 = vpop.eup %10316  ;;  %v7760_v16 = vmul.f32 %v10315_v1, %v10311_v50 }
0x1543   :  { %v10319_v58 = vpop.eup %10318  ;;  %9160 = vmatprep.subr.msk.bf16.mxu1 %vm13897_vm1, %v9158_v36  ;;  %v7761_v37 = vmul.f32 %v10317_v62, %v10313_v56 }
0x1544   :  { %v10321_v20 = vpop.eup %10320  ;;  %9162 = vmatpush1.bf16.xpose.msra.mxu1 %v9161_v38 }
0x1545   :  { %v7762_v23 = vmul.f32 %v10321_v20, %v10319_v58  ;;  %v10323_v53 = vpop.eup %10322 }
0x1547   :  { %v9166_v32 = vpack.c.bf16 %v7762_v23, %v7760_v16 }
0x1548   :  { %v10325_v22 = vpop.eup %10324 }
0x1549   :  { %v7763_v28 = vmul.f32 %v10325_v22, %v10323_v53 }
0x154b   :  { %v9163_v34 = vpack.c.bf16 %v7763_v28, %v7761_v37 }
0x154d   :  { %9165 = vmatprep.subr.msk.bf16.mxu1 %vm13897_vm1, %v9163_v34 }
0x154e   :  { %9167 = vmatpush1.bf16.xpose.msra.mxu1 %v9166_v32 }
0x156b   :  { %v7424_v60 = vpop.f32.mrb[192].mxu1  ;;  %v7641_v25 = vpop.f32.mrb[192].mxu0 }
0x156c   :  { %v7642_v61 = vadd.f32 %v7641_v25, %v13863_v59  ;;  %v7426_v18 = vpop.f32.mrb[193].mxu1  ;;  %v7643_v54 = vpop.f32.mrb[193].mxu0  ;;  %v7425_v14 = vadd.f32 %v7424_v60, %v13876_v41 }
0x156d   :  { %v7644_v44 = vadd.f32 %v7643_v54, %v13867_v31  ;;  %v7428_v3 = vpop.f32.mrb[194].mxu1  ;;  %v7645_v33 = vpop.f32.mrb[194].mxu0  ;;  %v7427_v21 = vadd.f32 %v7426_v18, %v13881_v47 }
0x156e   :  { %v8825_v57 = vmul.f32 -1.442695, %v7642_v61  ;;  %v7646_v13 = vadd.f32 %v7645_v33, %v13863_v59  ;;  %v7430_v29 = vpop.f32.mrb[195].mxu1  ;;  %v7647_v49 = vpop.f32.mrb[195].mxu0  ;;  %v7429_v50 = vadd.f32 %v7428_v3, %v13876_v41 }
0x156f   :  { %v8826_v4 = vmul.f32 -1.442695, %v7644_v44  ;;  %v7648_v11 = vadd.f32 %v7647_v49, %v13867_v31  ;;  %v7431_v16 = vadd.f32 %v7430_v29, %v13881_v47 }
0x1570   :  { %10326 = vpow2.f32 %v8825_v57  ;;  %v8827_v45 = vmul.f32 -1.442695, %v7646_v13 }
0x1571   :  { %10328 = vpow2.f32 %v8826_v4  ;;  %v8828_v42 = vmul.f32 -1.442695, %v7648_v11 }
0x1572   :  { %10330 = vpow2.f32 %v8827_v45 }
0x1573   :  { %v7434_v2 = vpop.f32.mrb[196].mxu1  ;;  %v7651_v8 = vpop.f32.mrb[196].mxu0  ;;  %10332 = vpow2.f32 %v8828_v42 }
0x1574   :  { %v7652_v39 = vadd.f32 %v7651_v8, %v13863_v59  ;;  %v7436_v9 = vpop.f32.mrb[197].mxu1  ;;  %v7653_v19 = vpop.f32.mrb[197].mxu0  ;;  %10334 = vtanh.f32 %v7425_v14  ;;  %v7435_v37 = vadd.f32 %v7434_v2, %v13876_v41 }
0x1575   :  { %v7654_v10 = vadd.f32 %v7653_v19, %v13867_v31  ;;  %v7438_v24 = vpop.f32.mrb[198].mxu1  ;;  %v7655_v35 = vpop.f32.mrb[198].mxu0  ;;  %v7437_v23 = vadd.f32 %v7436_v9, %v13881_v47 }
0x1576   :  { %v8829_v6 = vmul.f32 -1.442695, %v7652_v39  ;;  %v7656_v40 = vadd.f32 %v7655_v35, %v13863_v59  ;;  %v7440_v43 = vpop.f32.mrb[199].mxu1  ;;  %v7657_v26 = vpop.f32.mrb[199].mxu0  ;;  %v7439_v34 = vadd.f32 %v7438_v24, %v13876_v41 }
0x1577   :  { %v8830_v7 = vmul.f32 -1.442695, %v7654_v10  ;;  %v7658_v48 = vadd.f32 %v7657_v26, %v13867_v31  ;;  %v7441_v3 = vadd.f32 %v7440_v43, %v13881_v47 }
0x1578   :  { %10336 = vpow2.f32 %v8829_v6  ;;  %v8831_v30 = vmul.f32 -1.442695, %v7656_v40 }
0x1579   :  { %10338 = vpow2.f32 %v8830_v7  ;;  %v8832_v36 = vmul.f32 -1.442695, %v7658_v48  ;;  %v7777_v48 = vrot.slane %v13843_v52, 1 }
0x157a   :  { %v10327_v38 = vpop.eup %10326  ;;  %10340 = vtanh.f32 %v7427_v21 }
0x157b   :  { %v10329_v56 = vpop.eup %10328  ;;  %v7716_v1 = vadd.f32 1.0, %v10327_v38  ;;  %10342 = vpow2.f32 %v8831_v30 }
0x157c   :  { %v7717_v62 = vadd.f32 1.0, %v10329_v56  ;;  %10344 = vtanh.f32 %v7429_v50  ;;  %v10331_v59 = vpop.eup %10330  ;;  %v7780_v50 = vrot.slane %v7775_v17, 2 }
0x157d   :  { %10346 = vrcp.f32 %v7716_v1  ;;  %v7718_v58 = vadd.f32 1.0, %v10331_v59  ;;  %v10333_v31 = vpop.eup %10332  ;;  %v9994_v59 = vld [vmem:[%s14028_s1 + $0x3e4] ss:$8 sps:$4 sm:$0xff]  }
0x157e   :  { %10348 = vrcp.f32 %v7717_v62  ;;  %v7719_v20 = vadd.f32 1.0, %v10333_v31  ;;  %v10335_v53 = vpop.eup %10334  ;;  %v9989_v62 = vld [vmem:[%s14028_s1 + $0x3d0] ss:$8 sps:$4 sm:$0xff]  }
0x157f   :  { %10350 = vpow2.f32 %v8832_v36  ;;  %v9991_v36 = vld [vmem:[%s14028_s1 + $0x3d4] ss:$8 sps:$4 sm:$0xff]   ;;  %v9995_v31 = vld [vmem:[%s14028_s1 + $0x3f0] ss:$8 sps:$4 sm:$0xff]  }
0x1580   :  { %10352 = vrcp.f32 %v7718_v58  ;;  %v9997_v58 = vld [vmem:[%s14028_s1 + $0x3f4] ss:$8 sps:$4 sm:$0xff]  }
0x1581   :  { %10354 = vtanh.f32 %v7431_v16  ;;  %v9992_v16 = vld [vmem:[%s14028_s1 + $0x3e0] ss:$8 sps:$4 sm:$0xff]  }
0x1582   :  { %v10337_v32 = vpop.eup %10336  ;;  %10356 = vrcp.f32 %v7719_v20  ;;  %v9998_v20 = vld [vmem:[%s14028_s1 + $0x400] ss:$8 sps:$4 sm:$0xff]  }
0x1583   :  { %v10339_v22 = vpop.eup %10338  ;;  %10358 = vtanh.f32 %v7435_v37  ;;  %v7720_v28 = vadd.f32 1.0, %v10337_v32  ;;  %v10000_v37 = vld [vmem:[%s14028_s1 + $0x404] ss:$8 sps:$4 sm:$0xff]  }
0x1584   :  { %v10341_v60 = vpop.eup %10340  ;;  %10360 = vtanh.f32 %v7437_v23  ;;  %v7721_v25 = vadd.f32 1.0, %v10339_v22  ;;  %v10003_v23 = vld [vmem:[%s14028_s1 + $0x414] ss:$8 sps:$4 sm:$0xff]   ;;  %v10006_v32 = vld [vmem:[%s14028_s1 + $0x424] ss:$8 sps:$4 sm:$0xff]  }
0x1585   :  { %v10343_v61 = vpop.eup %10342  ;;  %10362 = vrcp.f32 %v7720_v28  ;;  %v10004_v22 = vld [vmem:[%s14028_s1 + $0x420] ss:$8 sps:$4 sm:$0xff]   ;;  %v10009_v28 = vld [vmem:[%s14028_s1 + $0x434] ss:$8 sps:$4 sm:$0xff]  }
0x1586   :  { %v10345_v18 = vpop.eup %10344  ;;  %10364 = vrcp.f32 %v7721_v25  ;;  %v7722_v54 = vadd.f32 1.0, %v10343_v61  ;;  %v10010_v25 = vld [vmem:[%s14028_s1 + $0x440] ss:$8 sps:$4 sm:$0xff]   ;;  %v10015_v61 = vld [vmem:[%s14028_s1 + $0x454] ss:$8 sps:$4 sm:$0xff]  }
0x1587   :  { %v10347_v44 = vpop.eup %10346  ;;  %10366 = vtanh.f32 %v7439_v34  ;;  %v10007_v34 = vld [vmem:[%s14028_s1 + $0x430] ss:$8 sps:$4 sm:$0xff]  }
0x1588   :  { %v10349_v33 = vpop.eup %10348  ;;  %10368 = vrcp.f32 %v7722_v54  ;;  %v7764_v57 = vmul.f32 %v10347_v44, %v10335_v53  ;;  %v10001_v53 = vld [vmem:[%s14028_s1 + $0x410] ss:$8 sps:$4 sm:$0xff]   ;;  %v10018_v54 = vld [vmem:[%s14028_s1 + $0x464] ss:$8 sps:$4 sm:$0xff]   ;;  %v10016_v44 = vld [vmem:[%s14028_s1 + $0x460] ss:$8 sps:$4 sm:$0xff]  }
0x1589   :  { %v10351_v13 = vpop.eup %10350  ;;  %v7765_v29 = vmul.f32 %v10349_v33, %v10341_v60  ;;  %10370 = vtanh.f32 %v7441_v3  ;;  %v10012_v60 = vld [vmem:[%s14028_s1 + $0x444] ss:$8 sps:$4 sm:$0xff]   ;;  %v10021_v3 = vld [vmem:[%s14028_s1 + $0x474] ss:$8 sps:$4 sm:$0xff]   ;;  %v10019_v33 = vld [vmem:[%s14028_s1 + $0x470] ss:$8 sps:$4 sm:$0xff]  }
0x158a   :  { %v10353_v49 = vpop.eup %10352  ;;  %v7723_v4 = vadd.f32 1.0, %v10351_v13 }
0x158b   :  { %v10355_v41 = vpop.eup %10354  ;;  %v7766_v11 = vmul.f32 %v10353_v49, %v10345_v18  ;;  %v10013_v18 = vld [vmem:[%s14028_s1 + $0x450] ss:$8 sps:$4 sm:$0xff]  }
0x158c   :  { %v10357_v45 = vpop.eup %10356  ;;  %10372 = vrcp.f32 %v7723_v4 }
0x158d   :  { %v10359_v42 = vpop.eup %10358  ;;  %v7767_v14 = vmul.f32 %v10357_v45, %v10355_v41  ;;  %v9171_v2 = vpack.c.bf16 %v7766_v11, %v7764_v57 }
0x158e   :  { %v10361_v8 = vpop.eup %10360 }
0x158f   :  { %v10363_v39 = vpop.eup %10362  ;;  %v9168_v9 = vpack.c.bf16 %v7767_v14, %v7765_v29  ;;  %v8138_v14 = vrot.slane %v13843_v52, 3 }
0x1590   :  { %v10365_v19 = vpop.eup %10364  ;;  %v7768_v47 = vmul.f32 %v10363_v39, %v10359_v42  ;;  %v8139_v42 = vrot.slane %v13859_v63, 3  ;;  %v8089_v39 = vrot.slane %v13859_v63, 5 }
0x1591   :  { %v10367_v10 = vpop.eup %10366  ;;  %9170 = vmatprep.subr.msk.bf16.mxu1 %vm13897_vm1, %v9168_v9  ;;  %v7769_v24 = vmul.f32 %v10365_v19, %v10361_v8  ;;  %v8088_v8 = vrot.slane %v13843_v52, 5 }
0x1592   :  { %v10369_v35 = vpop.eup %10368  ;;  %9172 = vmatpush1.bf16.xpose.msra.mxu1 %v9171_v2  ;;  %v8141_v2 = vrot.slane %v13843_v52, 2 }
0x1593   :  { %v7770_v21 = vmul.f32 %v10369_v35, %v10367_v10  ;;  %v10371_v6 = vpop.eup %10370 }
0x1595   :  { %v9176_v40 = vpack.c.bf16 %v7770_v21, %v7768_v47 }
0x1596   :  { %v10373_v43 = vpop.eup %10372 }
0x1597   :  { %v7771_v26 = vmul.f32 %v10373_v43, %v10371_v6 }
0x1599   :  { %v9173_v7 = vpack.c.bf16 %v7771_v26, %v7769_v24 }
0x159b   :  { %9175 = vmatprep.subr.msk.bf16.mxu1 %vm13897_vm1, %v9173_v7 }
0x159c   :  { %9177 = vmatpush1.bf16.xpose.msra.mxu1 %v9176_v40 }
0x159d   :  { %9179 = vmatprep.subr.bf16.mxu1 %v13775_v51 }
0x15a3   :  { %7873 = vmatmul.mubr.f32.vlgmr.msra.gmra.mrb[200].mxu1 %v7777_v48 }
0x15a4   :  { %9181 = vmatpush1.bf16.msra.mxu1 %v13777_v5  ;;  %v10436_v5 = vmov 0.0  }
0x15a5   :  { %9183 = vmatprep.subr.bf16.mxu1 %v13796_v15  ;;  %7955 = vmatprep.mubr.f32.mxu1 %v10436_v5 }
0x15a8   :  { %9185 = vmatpush1.bf16.msra.mxu1 %v13798_v0 }
0x15a9   :  { %9187 = vmatprep.subr.bf16.mxu1 %v13819_v27 }
0x15ac   :  { %9189 = vmatpush1.bf16.msra.mxu1 %v13821_v55 }
0x15ad   :  { %9191 = vmatprep.subr.bf16.mxu1 %v13845_v12  ;;  %v9986_v12 = vld [vmem:[%s14028_s1 + $0x3c0] ss:$8 sps:$4 sm:$0xff]  }
0x15b0   :  { %9193 = vmatpush1.bf16.msra.mxu1 %v13847_v46  ;;  %v9988_v46 = vld [vmem:[%s14028_s1 + $0x3c4] ss:$8 sps:$4 sm:$0xff]   ;;  %s10437_s1 = smov 127  }
0x15b1   :  { %8095 = vmatprep.subr.bf16.mxu0 %v9988_v46  ;;  %8868 = vmatprep.subr.msk.mxu1 %vm751_vm0, %v8139_v42 }
0x15b2   :  { %8096 = vmatpush1.bf16.msra.mxu0 %v9986_v12 }
0x15b3   :  { %8097 = vmatprep.subr.bf16.mxu0 %v9991_v36 }
0x15b6   :  { %8098 = vmatpush1.bf16.msra.mxu0 %v9989_v62 }
0x15b7   :  { %8099 = vmatprep.subr.bf16.mxu0 %v9994_v59 }
0x15ba   :  { %8100 = vmatpush1.bf16.msra.mxu0 %v9992_v16 }
0x15bb   :  { %8101 = vmatprep.subr.bf16.mxu0 %v9997_v58 }
0x15be   :  { %8102 = vmatpush1.bf16.msra.mxu0 %v9995_v31 }
0x15bf   :  { %8103 = vmatprep.subr.bf16.mxu0 %v10000_v37 }
0x15c2   :  { %8104 = vmatpush1.bf16.msra.mxu0 %v9998_v20 }
0x15c3   :  { %8105 = vmatprep.subr.bf16.mxu0 %v10003_v23 }
0x15c6   :  { %8106 = vmatpush1.bf16.msra.mxu0 %v10001_v53 }
0x15c7   :  { %8107 = vmatprep.subr.bf16.mxu0 %v10006_v32 }
0x15ca   :  { %8108 = vmatpush1.bf16.msra.mxu0 %v10004_v22 }
0x15cb   :  { %8109 = vmatprep.subr.bf16.mxu0 %v10009_v28 }
0x15ce   :  { %8110 = vmatpush1.bf16.msra.mxu0 %v10007_v34 }
0x15cf   :  { %8111 = vmatprep.subr.bf16.mxu0 %v10012_v60 }
0x15d2   :  { %8112 = vmatpush1.bf16.msra.mxu0 %v10010_v25 }
0x15d3   :  { %8113 = vmatprep.subr.bf16.mxu0 %v10015_v61 }
0x15d6   :  { %8114 = vmatpush1.bf16.msra.mxu0 %v10013_v18 }
0x15d7   :  { %8115 = vmatprep.subr.bf16.mxu0 %v10018_v54 }
0x15da   :  { %8116 = vmatpush1.bf16.msra.mxu0 %v10016_v44 }
0x15db   :  { %8117 = vmatprep.subr.bf16.mxu0 %v10021_v3 }
0x15de   :  { %8118 = vmatpush1.bf16.msra.mxu0 %v10019_v33 }
0x1676   :  { %v7874_v51 = vpop.f32.mrb[200].mxu1 }
0x1677   :  { %v7875_v30 = vadd.f32 %v7874_v51, %v7780_v50  ;;  %v7876_v38 = vpop.f32.mrb[201].mxu1 }
0x1679   :  { %v7879_v56 = vsel %vm7878_vm2, %v7875_v30, -inf }
0x167a   :  { %7880 = vmax.xlane.f32.xlu1 %v7879_v56 }
0x1707   :  { %v7881_v15 = vpop.xlane.xlu1 %7880 }
0x1708   :  { %v7882_v0 = vsub.f32 %v7875_v30, %v7881_v15 }
0x170a   :  { %v7883_v1 = vmul.f32 1.442695, %v7882_v0 }
0x170c   :  { %10374 = vpow2.f32 %v7883_v1 }
0x1716   :  { %v10375_v27 = vpop.eup %10374 }
0x1717   :  { %8842 = vmatmul.mubr.msk.f32.vlgmr.msra.gmra.mrb[202].mxu1 %vm751_vm0, %v10375_v27  ;;  %v7885_v55 = vsel %vm7878_vm2, %v10375_v27, 0.0 }
0x1718   :  { %7886 = vadd.xlane.f32.xlu1 %v7885_v55  ;;  %8151 = vmatpush1.xpose.msra.mxu1 %v8138_v14 }
0x1729   :  { %8142 = vrot.lane.b32.xlu1 %v8141_v2, %s10437_s1 }
0x17a5   :  { %v7887_v57 = vpop.xlane.xlu1 %7886 }
0x17a6   :  { %10376 = vrcp.f32 %v7887_v57 }
0x17a9   :  { %v8143_v40 = vpop.permute.xlu1 %8142 }
0x17b0   :  { %v10377_v13 = vpop.eup %10376 }
0x17ea   :  { %v7957_v29 = vpop.f32.mrb[202].mxu1 }
0x17eb   :  { %v7964_v49 = vmul.f32 %v10377_v13, %v7957_v29  ;;  %v7959_v4 = vpop.f32.mrb[203].mxu1 }
0x17ec   :  { %v7965_v41 = vmul.f32 %v10377_v13, %v7959_v4 }
0x17ed   :  { %v7966_v45 = vpack.c.bf16 %v7964_v49, %v7964_v49 }
0x17ee   :  { %v7967_v11 = vpack.c.bf16 %v7965_v41, %v7965_v41 }
0x17f0   :  { %8867 = vmatprep.mubr.msk.bf16.mxu0 %vm751_vm0, %v7967_v11 }
0x17f1   :  { %8128 = vmatmul.mubr.bf16.vlgmr.msra.gmra.mrb[200].mxu0 %v7966_v45 }
0x18c4   :  { %v8129_v9 = vpop.f32.mrb[200].mxu0 }
0x18c5   :  { %v8130_v19 = vadd.f32 %v8129_v9, %v8088_v8  ;;  %v8131_v47 = vpop.f32.mrb[201].mxu0 }
0x18c6   :  { %v8132_v10 = vadd.f32 %v8131_v47, %v8089_v39  ;;  %v8133_v24 = vpop.f32.mrb[202].mxu0 }
0x18c7   :  { %v8134_v35 = vpop.f32.mrb[203].mxu0  ;;  %v8136_v6 = vmax.f32 %v8130_v19, 0.0 }
0x18c8   :  { %v8137_v21 = vmax.f32 %v8132_v10, 0.0 }
0x18ca   :  { %8869 = vmatprep.mubr.msk.f32.mxu1 %vm751_vm0, %v8137_v21 }
0x18cb   :  { %8215 = vmatmul.mubr.f32.vlgmr.msra.gmra.mrb[204].mxu1 %v8136_v6 }
0x199e   :  { %v8216_v43 = vpop.f32.mrb[204].mxu1 }
0x199f   :  { %v8217_v26 = vadd.f32 %v8216_v43, %v8143_v40  ;;  %v8218_v52 = vpop.f32.mrb[205].mxu1 }
0x19a1   :  { %8221 = vst.msk [vmem:[#allocation5] sm:$0x1] %vm8220_vm3, %v8217_v26 }
0x19a2   :  { %10417 = shalt.err (!%p10414_p12)
}
0x19a3   :  { %s10418_s23 = scalar_lea.hbm %s14033_s6, 16 }
0x19a4   :  { %p10419_p13 = scmp.ne.s32.totalorder %s14033_s6, %s10418_s23  ;;  %p10422_p0 = scmp.lt.u32.totalorder %s10418_s23, %s14033_s6 }
0x19a6   :  { %p10424_p1 = pnand %p10422_p0, %p10419_p13 }
0x19a8   :  { %10427 = shalt.err (!%p10424_p1)
}
0x19a9   :  { %8231 = dma.vmem_to_hbm [thread:$0]  %s8229_s19, 16, %s14033_s6, [#allocation4]  }
0x19aa   :  { %10430 = dma.done.wait [#allocation4], 16  }
0x19ab   :  { %10431 = vsyncadd [#allocation4], 4294967280 }
0x19ac   :  { %8235 = vsyncpa [#allocation3], 1 }
0x19ad   :  { %8236 = vsyncpa [#allocation4], 1 }

</bundles_post_ra>
